<compile_context>
chip_gen: v5e
topology: v5e:2x2
jax: 0.10.0
libtpu: 0.0.40
codegen_flags: <defaults>
</compile_context>

<pallas_src>
import functools

import jax
import jax.numpy as jnp
from jax import lax
from jax.experimental import pallas as pl
from jax.experimental.pallas import tpu as pltpu  # noqa: F401  (TPU backend)


# ----------------------------- Pallas kernels -----------------------------

def _convt_bn_relu_kernel(p_ref, w_ref, g_ref, b_ref, o_ref, *, eps, inv_m):
    """out = relu(batchnorm(patches @ w)); stats per output column (= channel)."""
    y = jnp.dot(p_ref[...], w_ref[...],
                preferred_element_type=jnp.float32)            # (M, Cout) f32
    mean = jnp.sum(y, axis=0, keepdims=True) * inv_m           # (1, Cout)
    d = y - mean
    var = jnp.sum(d * d, axis=0, keepdims=True) * inv_m        # two-pass variance
    yhat = d * lax.rsqrt(var + eps)
    z = yhat * g_ref[...] + b_ref[...]
    o_ref[...] = jnp.maximum(z, 0.0).astype(o_ref.dtype)


def _convt_tanh_kernel(p_ref, w_ref, o_ref):
    """Final Cout=1 layer, computed transposed so N*OH*OW is lane-dense."""
    # w_ref: (8, K*K*Cin) bf16, real weights in row 0, rows 1..7 zero.
    # p_ref: (M, K*K*Cin) bf16.  Contract the shared last dims (a @ b^T form).
    y = lax.dot_general(w_ref[...], p_ref[...],
                        dimension_numbers=(((1,), (1,)), ((), ())),
                        preferred_element_type=jnp.float32)    # (8, M) f32
    o_ref[...] = jnp.tanh(y[0:1, :])                           # (1, M)


# ------------------------------ XLA glue -----------------------------------

def _dilate_pad_nhwc(x, stride, pad):
    """Zero-dilate spatially by `stride` and edge-pad by `pad` (one lax.pad)."""
    cfg = ((0, 0, 0),
           (pad, pad, stride - 1),
           (pad, pad, stride - 1),
           (0, 0, 0))
    return lax.pad(x, jnp.zeros((), x.dtype), cfg)


def _im2col(xp, K):
    """(N, Hp, Wp, C) -> (N*OH*OW, K*K*C); column order (kh, kw, c)."""
    N, Hp, Wp, C = xp.shape
    OH, OW = Hp - K + 1, Wp - K + 1
    cols = jnp.stack([xp[:, kh:kh + OH, kw:kw + OW, :]
                      for kh in range(K) for kw in range(K)], axis=3)
    return cols.reshape(N * OH * OW, K * K * C), OH, OW


def _convt_weight_mat(w_t):
    """PyTorch ConvTranspose2d weight (Cin, Cout, K, K) -> (K*K*Cin, Cout)
    matrix of the equivalent stride-1 conv (spatial flip + channel transpose);
    row order (kh, kw, cin) matches _im2col columns."""
    Cin, Cout, K, _ = w_t.shape
    w_flip = w_t[:, :, ::-1, ::-1]
    return w_flip.transpose(2, 3, 0, 1).reshape(K * K * Cin, Cout)


# -------------------------- Fused layer wrappers ----------------------------

def convt_bn_relu(x_nhwc, w_t, gamma, beta, *, stride, padding, eps=1e-5):
    """ConvTranspose2d(bias=False) + BatchNorm2d(batch stats) + ReLU, fused.

    x_nhwc: (N, H, W, Cin) -> (N, OH, OW, Cout) float32.
    """
    N = x_nhwc.shape[0]
    Cin, Cout, K, _ = w_t.shape
    pad = K - 1 - padding
    xp = _dilate_pad_nhwc(x_nhwc.astype(jnp.bfloat16), stride, pad)
    patches, OH, OW = _im2col(xp, K)                         # (M, K*K*Cin) bf16
    w_mat = _convt_weight_mat(w_t).astype(jnp.bfloat16)      # (K*K*Cin, Cout)
    M, Kd = patches.shape
    out = pl.pallas_call(
        functools.partial(_convt_bn_relu_kernel, eps=eps, inv_m=1.0 / M),
        out_shape=jax.ShapeDtypeStruct((M, Cout), jnp.float32),
        grid=(1,),
        in_specs=[pl.BlockSpec((M, Kd), lambda i: (0, 0)),
                  pl.BlockSpec((Kd, Cout), lambda i: (0, 0)),
                  pl.BlockSpec((1, Cout), lambda i: (0, 0)),
                  pl.BlockSpec((1, Cout), lambda i: (0, 0))],
        out_specs=pl.BlockSpec((M, Cout), lambda i: (0, 0)),
    )(patches, w_mat, gamma.reshape(1, Cout), beta.reshape(1, Cout))
    return out.reshape(N, OH, OW, Cout)


def convt_tanh(x_nhwc, w_t, *, stride, padding):
    """Final ConvTranspose2d (Cout=1, bias=False) + tanh; lane-dense output."""
    N = x_nhwc.shape[0]
    Cin, Cout, K, _ = w_t.shape
    assert Cout == 1
    pad = K - 1 - padding
    xp = _dilate_pad_nhwc(x_nhwc.astype(jnp.bfloat16), stride, pad)
    patches, OH, OW = _im2col(xp, K)                         # (M, K*K*Cin) bf16
    M, Kd = patches.shape
    # Pad the single output-channel weight row to 8 sublanes (rows 1..7 zero).
    w_row = jnp.zeros((8, Kd), jnp.bfloat16).at[0].set(
        _convt_weight_mat(w_t)[:, 0].astype(jnp.bfloat16))
    out = pl.pallas_call(
        _convt_tanh_kernel,
        out_shape=jax.ShapeDtypeStruct((1, M), jnp.float32),
        grid=(1,),
        in_specs=[pl.BlockSpec((M, Kd), lambda i: (0, 0)),
                  pl.BlockSpec((8, Kd), lambda i: (0, 0))],
        out_specs=pl.BlockSpec((1, M), lambda i: (0, 0)),
    )(patches, w_row)
    return out.reshape(N, OH, OW)[:, None, :, :]             # NCHW (N,1,OH,OW)


# ------------------------------- Generator ---------------------------------

def init_params(key, z_dim):
    ks = jax.random.split(key, 4)
    std = 0.02
    return {
        "w1": std * jax.random.normal(ks[0], (z_dim, 128, 4, 4), jnp.float32),
        "w2": std * jax.random.normal(ks[1], (128, 64, 3, 3), jnp.float32),
        "w3": std * jax.random.normal(ks[2], (64, 32, 4, 4), jnp.float32),
        "w4": std * jax.random.normal(ks[3], (32, 1, 4, 4), jnp.float32),
        # PyTorch BatchNorm2d default init: weight=1, bias=0
        "g1": jnp.ones((128,), jnp.float32), "b1": jnp.zeros((128,), jnp.float32),
        "g2": jnp.ones((64,), jnp.float32), "b2": jnp.zeros((64,), jnp.float32),
        "g3": jnp.ones((32,), jnp.float32), "b3": jnp.zeros((32,), jnp.float32),
    }


def cnn_generator_forward(x, p):
    # Module boundary is NCHW (like PyTorch); internal layout is NHWC-flat.
    h = jnp.transpose(x, (0, 2, 3, 1))                                    # (N,1,1,z)
    h = convt_bn_relu(h, p["w1"], p["g1"], p["b1"], stride=1, padding=0)  # (N,4,4,128)
    h = convt_bn_relu(h, p["w2"], p["g2"], p["b2"], stride=2, padding=1)  # (N,7,7,64)
    h = convt_bn_relu(h, p["w3"], p["g3"], p["b3"], stride=2, padding=1)  # (N,14,14,32)
    return convt_tanh(h, p["w4"], stride=2, padding=1)                    # (N,1,28,28)


# ------------------------------ Pure-JAX ref --------------------------------

def _ref_convt(x, w_t, stride, padding):
    K = w_t.shape[-1]
    w_conv = jnp.transpose(w_t[:, :, ::-1, ::-1], (1, 0, 2, 3))  # (Cout,Cin,K,K)
    pad = K - 1 - padding
    return lax.conv_general_dilated(
        x, w_conv, window_strides=(1, 1),
        padding=((pad, pad), (pad, pad)),
        lhs_dilation=(stride, stride),
        dimension_numbers=("NCHW", "OIHW", "NCHW"))


def _ref_bn_relu(x, g, b, eps=1e-5):
    mean = x.mean(axis=(0, 2, 3), keepdims=True)
    var = x.var(axis=(0, 2, 3), keepdims=True)
    y = (x - mean) / jnp.sqrt(var + eps)
    y = y * g.reshape(1, -1, 1, 1) + b.reshape(1, -1, 1, 1)
    return jnp.maximum(y, 0.0)


def ref_forward(x, p):
    out = _ref_bn_relu(_ref_convt(x, p["w1"], 1, 0), p["g1"], p["b1"])
    out = _ref_bn_relu(_ref_convt(out, p["w2"], 2, 1), p["g2"], p["b2"])
    out = _ref_bn_relu(_ref_convt(out, p["w3"], 2, 1), p["g3"], p["b3"])
    return jnp.tanh(_ref_convt(out, p["w4"], 2, 1))


# ---------------------------------- main ------------------------------------

if __name__ == "__main__":
    z_dim = 16
    batch = 2
    key = jax.random.PRNGKey(0)
    k_x, k_p = jax.random.split(key)
    x = jax.random.normal(k_x, (batch, z_dim, 1, 1), jnp.float32)
    params = init_params(k_p, z_dim)

    out = jax.block_until_ready(jax.jit(cnn_generator_forward)(x, params))
    assert out.shape == (batch, 1, 28, 28), out.shape

    ref = jax.block_until_ready(ref_forward(x, params))
    # bf16 MXU operands (f32 accumulation / f32 BN epilogue) vs a pure-f32 ref.
    assert jnp.allclose(out, ref, rtol=2e-2, atol=2e-2), \
        float(jnp.max(jnp.abs(out - ref)))

    print("KERNEL_OK")
</pallas_src>

<mosaic_0001>
module attributes {stable_mosaic.version = 11 : i64} {
  func.func @_convt_bn_relu_kernel(%arg0: i32, %arg1: memref<32x256xbf16, #tpu.memory_space<vmem>>, %arg2: memref<256x128xbf16, #tpu.memory_space<vmem>>, %arg3: memref<1x128xf32, #tpu.memory_space<vmem>>, %arg4: memref<1x128xf32, #tpu.memory_space<vmem>>, %arg5: memref<32x128xf32, #tpu.memory_space<vmem>>) attributes {dimension_semantics = [#tpu.dimension_semantics<arbitrary>], iteration_bounds = array<i64: 1>, scalar_prefetch = 0 : i64, scratch_operands = 0 : i64, tpu.core_type = #tpu.core_type<tc>, window_params = [{pipeline_mode = #tpu.pipeline_mode<synchronous>, transform_indices = @transform_0, window_bounds = array<i64: 32, 256>}, {pipeline_mode = #tpu.pipeline_mode<synchronous>, transform_indices = @transform_1, window_bounds = array<i64: 256, 128>}, {pipeline_mode = #tpu.pipeline_mode<synchronous>, transform_indices = @transform_2, window_bounds = array<i64: 1, 128>}, {pipeline_mode = #tpu.pipeline_mode<synchronous>, transform_indices = @transform_3, window_bounds = array<i64: 1, 128>}, {pipeline_mode = #tpu.pipeline_mode<synchronous>, transform_indices = @transform_4, window_bounds = array<i64: 32, 128>}]} {
    %c0 = arith.constant 0 : index
    %c0_0 = arith.constant 0 : index
    %0 = vector.load %arg1[%c0, %c0_0] : memref<32x256xbf16, #tpu.memory_space<vmem>>, vector<32x256xbf16>
    %c0_1 = arith.constant 0 : index
    %c0_2 = arith.constant 0 : index
    %1 = vector.load %arg2[%c0_1, %c0_2] : memref<256x128xbf16, #tpu.memory_space<vmem>>, vector<256x128xbf16>
    %cst = arith.constant dense<0.000000e+00> : vector<32x128xf32>
    %2 = tpu.matmul %0, %1, %cst {dimension_numbers = #tpu.dot_dimension_numbers<[1], [0], [0], [1], [0, 0, 1, 1], [], []>} : vector<32x256xbf16>, vector<256x128xbf16>, vector<32x128xf32> -> vector<32x128xf32>
    %cst_3 = arith.constant dense<0.000000e+00> : vector<128xf32>
    %3 = vector.multi_reduction <add>, %2, %cst_3 [0] : vector<32x128xf32> to vector<128xf32>
    %4 = vector.shape_cast %3 : vector<128xf32> to vector<1x128xf32>
    %cst_4 = arith.constant 3.125000e-02 : f32
    %5 = vector.broadcast %cst_4 : f32 to vector<1x128xf32>
    %6 = arith.mulf %4, %5 : vector<1x128xf32>
    %7 = vector.broadcast %6 : vector<1x128xf32> to vector<32x128xf32>
    %8 = arith.subf %2, %7 : vector<32x128xf32>
    %9 = arith.mulf %8, %8 : vector<32x128xf32>
    %cst_5 = arith.constant dense<0.000000e+00> : vector<128xf32>
    %10 = vector.multi_reduction <add>, %9, %cst_5 [0] : vector<32x128xf32> to vector<128xf32>
    %11 = vector.shape_cast %10 : vector<128xf32> to vector<1x128xf32>
    %cst_6 = arith.constant 3.125000e-02 : f32
    %12 = vector.broadcast %cst_6 : f32 to vector<1x128xf32>
    %13 = arith.mulf %11, %12 : vector<1x128xf32>
    %cst_7 = arith.constant 9.99999974E-6 : f32
    %14 = vector.broadcast %cst_7 : f32 to vector<1x128xf32>
    %15 = arith.addf %13, %14 : vector<1x128xf32>
    %16 = math.rsqrt %15 : vector<1x128xf32>
    %17 = vector.broadcast %16 : vector<1x128xf32> to vector<32x128xf32>
    %18 = arith.mulf %8, %17 : vector<32x128xf32>
    %c0_8 = arith.constant 0 : index
    %c0_9 = arith.constant 0 : index
    %19 = vector.load %arg3[%c0_8, %c0_9] : memref<1x128xf32, #tpu.memory_space<vmem>>, vector<1x128xf32>
    %20 = vector.broadcast %19 : vector<1x128xf32> to vector<32x128xf32>
    %21 = arith.mulf %18, %20 : vector<32x128xf32>
    %c0_10 = arith.constant 0 : index
    %c0_11 = arith.constant 0 : index
    %22 = vector.load %arg4[%c0_10, %c0_11] : memref<1x128xf32, #tpu.memory_space<vmem>>, vector<1x128xf32>
    %23 = vector.broadcast %22 : vector<1x128xf32> to vector<32x128xf32>
    %24 = arith.addf %21, %23 : vector<32x128xf32>
    %cst_12 = arith.constant 0.000000e+00 : f32
    %25 = vector.broadcast %cst_12 : f32 to vector<32x128xf32>
    %26 = arith.maximumf %24, %25 : vector<32x128xf32>
    %c0_13 = arith.constant 0 : index
    %c0_14 = arith.constant 0 : index
    %27 = vector.load %arg5[%c0_13, %c0_14] : memref<32x128xf32, #tpu.memory_space<vmem>>, vector<32x128xf32>
    tpu.vector_store %arg5[%c0_13, %c0_14], %26 {strides = array<i32>} : memref<32x128xf32, #tpu.memory_space<vmem>>, vector<32x128xf32>,
    return
  }
  func.func @transform_0(%arg0: i32) -> (i32, i32) {
    %c0_i32 = arith.constant 0 : i32
    %c0_i32_0 = arith.constant 0 : i32
    %c0_i32_1 = arith.constant 0 : i32
    return %c0_i32, %c0_i32_0 : i32, i32
  }
  func.func @transform_1(%arg0: i32) -> (i32, i32) {
    %c0_i32 = arith.constant 0 : i32
    %c0_i32_0 = arith.constant 0 : i32
    %c0_i32_1 = arith.constant 0 : i32
    return %c0_i32, %c0_i32_0 : i32, i32
  }
  func.func @transform_2(%arg0: i32) -> (i32, i32) {
    %c0_i32 = arith.constant 0 : i32
    %c0_i32_0 = arith.constant 0 : i32
    %c0_i32_1 = arith.constant 0 : i32
    return %c0_i32, %c0_i32_0 : i32, i32
  }
  func.func @transform_3(%arg0: i32) -> (i32, i32) {
    %c0_i32 = arith.constant 0 : i32
    %c0_i32_0 = arith.constant 0 : i32
    %c0_i32_1 = arith.constant 0 : i32
    return %c0_i32, %c0_i32_0 : i32, i32
  }
  func.func @transform_4(%arg0: i32) -> (i32, i32) {
    %c0_i32 = arith.constant 0 : i32
    %c0_i32_0 = arith.constant 0 : i32
    %c0_i32_1 = arith.constant 0 : i32
    return %c0_i32, %c0_i32_0 : i32, i32
  }
}

module attributes {stable_mosaic.version = 11 : i64} {
  func.func @_convt_bn_relu_kernel(%arg0: i32, %arg1: memref<98x1152xbf16, #tpu.memory_space<vmem>>, %arg2: memref<1152x64xbf16, #tpu.memory_space<vmem>>, %arg3: memref<1x64xf32, #tpu.memory_space<vmem>>, %arg4: memref<1x64xf32, #tpu.memory_space<vmem>>, %arg5: memref<98x64xf32, #tpu.memory_space<vmem>>) attributes {dimension_semantics = [#tpu.dimension_semantics<arbitrary>], iteration_bounds = array<i64: 1>, scalar_prefetch = 0 : i64, scratch_operands = 0 : i64, tpu.core_type = #tpu.core_type<tc>, window_params = [{pipeline_mode = #tpu.pipeline_mode<synchronous>, transform_indices = @transform_0, window_bounds = array<i64: 98, 1152>}, {pipeline_mode = #tpu.pipeline_mode<synchronous>, transform_indices = @transform_1, window_bounds = array<i64: 1152, 64>}, {pipeline_mode = #tpu.pipeline_mode<synchronous>, transform_indices = @transform_2, window_bounds = array<i64: 1, 64>}, {pipeline_mode = #tpu.pipeline_mode<synchronous>, transform_indices = @transform_3, window_bounds = array<i64: 1, 64>}, {pipeline_mode = #tpu.pipeline_mode<synchronous>, transform_indices = @transform_4, window_bounds = array<i64: 98, 64>}]} {
    %c0 = arith.constant 0 : index
    %c0_0 = arith.constant 0 : index
    %0 = vector.load %arg1[%c0, %c0_0] : memref<98x1152xbf16, #tpu.memory_space<vmem>>, vector<98x1152xbf16>
    %c0_1 = arith.constant 0 : index
    %c0_2 = arith.constant 0 : index
    %1 = vector.load %arg2[%c0_1, %c0_2] : memref<1152x64xbf16, #tpu.memory_space<vmem>>, vector<1152x64xbf16>
    %cst = arith.constant dense<0.000000e+00> : vector<98x64xf32>
    %2 = tpu.matmul %0, %1, %cst {dimension_numbers = #tpu.dot_dimension_numbers<[1], [0], [0], [1], [0, 0, 1, 1], [], []>} : vector<98x1152xbf16>, vector<1152x64xbf16>, vector<98x64xf32> -> vector<98x64xf32>
    %cst_3 = arith.constant dense<0.000000e+00> : vector<64xf32>
    %3 = vector.multi_reduction <add>, %2, %cst_3 [0] : vector<98x64xf32> to vector<64xf32>
    %4 = vector.shape_cast %3 : vector<64xf32> to vector<1x64xf32>
    %cst_4 = arith.constant 0.0102040814 : f32
    %5 = vector.broadcast %cst_4 : f32 to vector<1x64xf32>
    %6 = arith.mulf %4, %5 : vector<1x64xf32>
    %7 = vector.broadcast %6 : vector<1x64xf32> to vector<98x64xf32>
    %8 = arith.subf %2, %7 : vector<98x64xf32>
    %9 = arith.mulf %8, %8 : vector<98x64xf32>
    %cst_5 = arith.constant dense<0.000000e+00> : vector<64xf32>
    %10 = vector.multi_reduction <add>, %9, %cst_5 [0] : vector<98x64xf32> to vector<64xf32>
    %11 = vector.shape_cast %10 : vector<64xf32> to vector<1x64xf32>
    %cst_6 = arith.constant 0.0102040814 : f32
    %12 = vector.broadcast %cst_6 : f32 to vector<1x64xf32>
    %13 = arith.mulf %11, %12 : vector<1x64xf32>
    %cst_7 = arith.constant 9.99999974E-6 : f32
    %14 = vector.broadcast %cst_7 : f32 to vector<1x64xf32>
    %15 = arith.addf %13, %14 : vector<1x64xf32>
    %16 = math.rsqrt %15 : vector<1x64xf32>
    %17 = vector.broadcast %16 : vector<1x64xf32> to vector<98x64xf32>
    %18 = arith.mulf %8, %17 : vector<98x64xf32>
    %c0_8 = arith.constant 0 : index
    %c0_9 = arith.constant 0 : index
    %19 = vector.load %arg3[%c0_8, %c0_9] : memref<1x64xf32, #tpu.memory_space<vmem>>, vector<1x64xf32>
    %20 = vector.broadcast %19 : vector<1x64xf32> to vector<98x64xf32>
    %21 = arith.mulf %18, %20 : vector<98x64xf32>
    %c0_10 = arith.constant 0 : index
    %c0_11 = arith.constant 0 : index
    %22 = vector.load %arg4[%c0_10, %c0_11] : memref<1x64xf32, #tpu.memory_space<vmem>>, vector<1x64xf32>
    %23 = vector.broadcast %22 : vector<1x64xf32> to vector<98x64xf32>
    %24 = arith.addf %21, %23 : vector<98x64xf32>
    %cst_12 = arith.constant 0.000000e+00 : f32
    %25 = vector.broadcast %cst_12 : f32 to vector<98x64xf32>
    %26 = arith.maximumf %24, %25 : vector<98x64xf32>
    %c0_13 = arith.constant 0 : index
    %c0_14 = arith.constant 0 : index
    %27 = vector.load %arg5[%c0_13, %c0_14] : memref<98x64xf32, #tpu.memory_space<vmem>>, vector<98x64xf32>
    tpu.vector_store %arg5[%c0_13, %c0_14], %26 {strides = array<i32>} : memref<98x64xf32, #tpu.memory_space<vmem>>, vector<98x64xf32>,
    return
  }
  func.func @transform_0(%arg0: i32) -> (i32, i32) {
    %c0_i32 = arith.constant 0 : i32
    %c0_i32_0 = arith.constant 0 : i32
    %c0_i32_1 = arith.constant 0 : i32
    return %c0_i32, %c0_i32_0 : i32, i32
  }
  func.func @transform_1(%arg0: i32) -> (i32, i32) {
    %c0_i32 = arith.constant 0 : i32
    %c0_i32_0 = arith.constant 0 : i32
    %c0_i32_1 = arith.constant 0 : i32
    return %c0_i32, %c0_i32_0 : i32, i32
  }
  func.func @transform_2(%arg0: i32) -> (i32, i32) {
    %c0_i32 = arith.constant 0 : i32
    %c0_i32_0 = arith.constant 0 : i32
    %c0_i32_1 = arith.constant 0 : i32
    return %c0_i32, %c0_i32_0 : i32, i32
  }
  func.func @transform_3(%arg0: i32) -> (i32, i32) {
    %c0_i32 = arith.constant 0 : i32
    %c0_i32_0 = arith.constant 0 : i32
    %c0_i32_1 = arith.constant 0 : i32
    return %c0_i32, %c0_i32_0 : i32, i32
  }
  func.func @transform_4(%arg0: i32) -> (i32, i32) {
    %c0_i32 = arith.constant 0 : i32
    %c0_i32_0 = arith.constant 0 : i32
    %c0_i32_1 = arith.constant 0 : i32
    return %c0_i32, %c0_i32_0 : i32, i32
  }
}

module attributes {stable_mosaic.version = 11 : i64} {
  func.func @_convt_bn_relu_kernel(%arg0: i32, %arg1: memref<392x1024xbf16, #tpu.memory_space<vmem>>, %arg2: memref<1024x32xbf16, #tpu.memory_space<vmem>>, %arg3: memref<1x32xf32, #tpu.memory_space<vmem>>, %arg4: memref<1x32xf32, #tpu.memory_space<vmem>>, %arg5: memref<392x32xf32, #tpu.memory_space<vmem>>) attributes {dimension_semantics = [#tpu.dimension_semantics<arbitrary>], iteration_bounds = array<i64: 1>, scalar_prefetch = 0 : i64, scratch_operands = 0 : i64, tpu.core_type = #tpu.core_type<tc>, window_params = [{pipeline_mode = #tpu.pipeline_mode<synchronous>, transform_indices = @transform_0, window_bounds = array<i64: 392, 1024>}, {pipeline_mode = #tpu.pipeline_mode<synchronous>, transform_indices = @transform_1, window_bounds = array<i64: 1024, 32>}, {pipeline_mode = #tpu.pipeline_mode<synchronous>, transform_indices = @transform_2, window_bounds = array<i64: 1, 32>}, {pipeline_mode = #tpu.pipeline_mode<synchronous>, transform_indices = @transform_3, window_bounds = array<i64: 1, 32>}, {pipeline_mode = #tpu.pipeline_mode<synchronous>, transform_indices = @transform_4, window_bounds = array<i64: 392, 32>}]} {
    %c0 = arith.constant 0 : index
    %c0_0 = arith.constant 0 : index
    %0 = vector.load %arg1[%c0, %c0_0] : memref<392x1024xbf16, #tpu.memory_space<vmem>>, vector<392x1024xbf16>
    %c0_1 = arith.constant 0 : index
    %c0_2 = arith.constant 0 : index
    %1 = vector.load %arg2[%c0_1, %c0_2] : memref<1024x32xbf16, #tpu.memory_space<vmem>>, vector<1024x32xbf16>
    %cst = arith.constant dense<0.000000e+00> : vector<392x32xf32>
    %2 = tpu.matmul %0, %1, %cst {dimension_numbers = #tpu.dot_dimension_numbers<[1], [0], [0], [1], [0, 0, 1, 1], [], []>} : vector<392x1024xbf16>, vector<1024x32xbf16>, vector<392x32xf32> -> vector<392x32xf32>
    %cst_3 = arith.constant dense<0.000000e+00> : vector<32xf32>
    %3 = vector.multi_reduction <add>, %2, %cst_3 [0] : vector<392x32xf32> to vector<32xf32>
    %4 = vector.shape_cast %3 : vector<32xf32> to vector<1x32xf32>
    %cst_4 = arith.constant 0.00255102036 : f32
    %5 = vector.broadcast %cst_4 : f32 to vector<1x32xf32>
    %6 = arith.mulf %4, %5 : vector<1x32xf32>
    %7 = vector.broadcast %6 : vector<1x32xf32> to vector<392x32xf32>
    %8 = arith.subf %2, %7 : vector<392x32xf32>
    %9 = arith.mulf %8, %8 : vector<392x32xf32>
    %cst_5 = arith.constant dense<0.000000e+00> : vector<32xf32>
    %10 = vector.multi_reduction <add>, %9, %cst_5 [0] : vector<392x32xf32> to vector<32xf32>
    %11 = vector.shape_cast %10 : vector<32xf32> to vector<1x32xf32>
    %cst_6 = arith.constant 0.00255102036 : f32
    %12 = vector.broadcast %cst_6 : f32 to vector<1x32xf32>
    %13 = arith.mulf %11, %12 : vector<1x32xf32>
    %cst_7 = arith.constant 9.99999974E-6 : f32
    %14 = vector.broadcast %cst_7 : f32 to vector<1x32xf32>
    %15 = arith.addf %13, %14 : vector<1x32xf32>
    %16 = math.rsqrt %15 : vector<1x32xf32>
    %17 = vector.broadcast %16 : vector<1x32xf32> to vector<392x32xf32>
    %18 = arith.mulf %8, %17 : vector<392x32xf32>
    %c0_8 = arith.constant 0 : index
    %c0_9 = arith.constant 0 : index
    %19 = vector.load %arg3[%c0_8, %c0_9] : memref<1x32xf32, #tpu.memory_space<vmem>>, vector<1x32xf32>
    %20 = vector.broadcast %19 : vector<1x32xf32> to vector<392x32xf32>
    %21 = arith.mulf %18, %20 : vector<392x32xf32>
    %c0_10 = arith.constant 0 : index
    %c0_11 = arith.constant 0 : index
    %22 = vector.load %arg4[%c0_10, %c0_11] : memref<1x32xf32, #tpu.memory_space<vmem>>, vector<1x32xf32>
    %23 = vector.broadcast %22 : vector<1x32xf32> to vector<392x32xf32>
    %24 = arith.addf %21, %23 : vector<392x32xf32>
    %cst_12 = arith.constant 0.000000e+00 : f32
    %25 = vector.broadcast %cst_12 : f32 to vector<392x32xf32>
    %26 = arith.maximumf %24, %25 : vector<392x32xf32>
    %c0_13 = arith.constant 0 : index
    %c0_14 = arith.constant 0 : index
    %27 = vector.load %arg5[%c0_13, %c0_14] : memref<392x32xf32, #tpu.memory_space<vmem>>, vector<392x32xf32>
    tpu.vector_store %arg5[%c0_13, %c0_14], %26 {strides = array<i32>} : memref<392x32xf32, #tpu.memory_space<vmem>>, vector<392x32xf32>,
    return
  }
  func.func @transform_0(%arg0: i32) -> (i32, i32) {
    %c0_i32 = arith.constant 0 : i32
    %c0_i32_0 = arith.constant 0 : i32
    %c0_i32_1 = arith.constant 0 : i32
    return %c0_i32, %c0_i32_0 : i32, i32
  }
  func.func @transform_1(%arg0: i32) -> (i32, i32) {
    %c0_i32 = arith.constant 0 : i32
    %c0_i32_0 = arith.constant 0 : i32
    %c0_i32_1 = arith.constant 0 : i32
    return %c0_i32, %c0_i32_0 : i32, i32
  }
  func.func @transform_2(%arg0: i32) -> (i32, i32) {
    %c0_i32 = arith.constant 0 : i32
    %c0_i32_0 = arith.constant 0 : i32
    %c0_i32_1 = arith.constant 0 : i32
    return %c0_i32, %c0_i32_0 : i32, i32
  }
  func.func @transform_3(%arg0: i32) -> (i32, i32) {
    %c0_i32 = arith.constant 0 : i32
    %c0_i32_0 = arith.constant 0 : i32
    %c0_i32_1 = arith.constant 0 : i32
    return %c0_i32, %c0_i32_0 : i32, i32
  }
  func.func @transform_4(%arg0: i32) -> (i32, i32) {
    %c0_i32 = arith.constant 0 : i32
    %c0_i32_0 = arith.constant 0 : i32
    %c0_i32_1 = arith.constant 0 : i32
    return %c0_i32, %c0_i32_0 : i32, i32
  }
}

module attributes {stable_mosaic.version = 11 : i64} {
  func.func @_convt_tanh_kernel(%arg0: i32, %arg1: memref<1568x512xbf16, #tpu.memory_space<vmem>>, %arg2: memref<8x512xbf16, #tpu.memory_space<vmem>>, %arg3: memref<1x1568xf32, #tpu.memory_space<vmem>>) attributes {dimension_semantics = [#tpu.dimension_semantics<arbitrary>], iteration_bounds = array<i64: 1>, scalar_prefetch = 0 : i64, scratch_operands = 0 : i64, tpu.core_type = #tpu.core_type<tc>, window_params = [{pipeline_mode = #tpu.pipeline_mode<synchronous>, transform_indices = @transform_0, window_bounds = array<i64: 1568, 512>}, {pipeline_mode = #tpu.pipeline_mode<synchronous>, transform_indices = @transform_1, window_bounds = array<i64: 8, 512>}, {pipeline_mode = #tpu.pipeline_mode<synchronous>, transform_indices = @transform_2, window_bounds = array<i64: 1, 1568>}]} {
    %c0 = arith.constant 0 : index
    %c0_0 = arith.constant 0 : index
    %0 = vector.load %arg2[%c0, %c0_0] : memref<8x512xbf16, #tpu.memory_space<vmem>>, vector<8x512xbf16>
    %c0_1 = arith.constant 0 : index
    %c0_2 = arith.constant 0 : index
    %1 = vector.load %arg1[%c0_1, %c0_2] : memref<1568x512xbf16, #tpu.memory_space<vmem>>, vector<1568x512xbf16>
    %cst = arith.constant dense<0.000000e+00> : vector<8x1568xf32>
    %2 = tpu.matmul %0, %1, %cst {dimension_numbers = #tpu.dot_dimension_numbers<[1], [1], [0], [0], [0, 0, 1, 0], [], []>} : vector<8x512xbf16>, vector<1568x512xbf16>, vector<8x1568xf32> -> vector<8x1568xf32>
    %3 = vector.extract_strided_slice %2 {offsets = [0, 0], sizes = [1, 1568], strides = [1, 1]} : vector<8x1568xf32> to vector<1x1568xf32>
    %4 = math.tanh %3 : vector<1x1568xf32>
    %c0_3 = arith.constant 0 : index
    %c0_4 = arith.constant 0 : index
    %5 = vector.load %arg3[%c0_3, %c0_4] : memref<1x1568xf32, #tpu.memory_space<vmem>>, vector<1x1568xf32>
    tpu.vector_store %arg3[%c0_3, %c0_4], %4 {strides = array<i32>} : memref<1x1568xf32, #tpu.memory_space<vmem>>, vector<1x1568xf32>,
    return
  }
  func.func @transform_0(%arg0: i32) -> (i32, i32) {
    %c0_i32 = arith.constant 0 : i32
    %c0_i32_0 = arith.constant 0 : i32
    %c0_i32_1 = arith.constant 0 : i32
    return %c0_i32, %c0_i32_0 : i32, i32
  }
  func.func @transform_1(%arg0: i32) -> (i32, i32) {
    %c0_i32 = arith.constant 0 : i32
    %c0_i32_0 = arith.constant 0 : i32
    %c0_i32_1 = arith.constant 0 : i32
    return %c0_i32, %c0_i32_0 : i32, i32
  }
  func.func @transform_2(%arg0: i32) -> (i32, i32) {
    %c0_i32 = arith.constant 0 : i32
    %c0_i32_0 = arith.constant 0 : i32
    %c0_i32_1 = arith.constant 0 : i32
    return %c0_i32, %c0_i32_0 : i32, i32
  }
}

</mosaic_0001>

<bundles_post_ra>
// kernel: cnn_generator_forward.4
= control target key start
LH: loop header
LB: loop body
LE: loop exit
PB: predicated region body
PF: predicated region fallthrough
CT: control target
= control target key end

     0   :  { %9 = vsyncpa [#allocation3], 0  ;;  %s599_s0 = inlined_call_operand.vmem [shape: bf16[32,256], index: 0, kind: input, shape index: {}]   ;;  %s600_s1 = inlined_call_operand.vmem [shape: bf16[256,128], index: 1, kind: input, shape index: {}]   ;;  %s601_s2 = inlined_call_operand.hbm [shape: f32[1,128], index: 2, kind: input, shape index: {}]   ;;  %s602_s3 = inlined_call_operand.hbm [shape: f32[1,128], index: 3, kind: input, shape index: {}]   ;;  %s603_s4 = inlined_call_operand.vmem [shape: f32[32,128], index: 4, kind: output, shape index: {}]  }
   0x1   :  { %s20_s17 = sshll.u32 %s601_s2, 4  ;;  %s21_s17 = int_to_ptr.hbm [resolvable:$true] %s20_s17 }
   0x2   :  { %10 = vsyncpa [#allocation5], 0  ;;  %s482_s18 = smov [#allocation2]   ;;  %s31_s22 = sshll.u32 %s602_s3, 4  ;;  %s32_s22 = int_to_ptr.hbm [resolvable:$true] %s31_s22 }
   0x3   :  { %s22_s19 = sshll.u32 %s482_s18, 4  ;;  %s483_s23 = smov [#allocation4]   ;;  %s23_s19 = int_to_ptr.vmem [resolvable:$true] %s22_s19 }
   0x4   :  { %25 = dma.hbm_to_vmem [thread:$0]  %s21_s17, 16, %s23_s19, [#allocation3]  }
   0x5   :  { %s33_s24 = sshll.u32 %s483_s23, 4  ;;  %s34_s24 = int_to_ptr.vmem [resolvable:$true] %s33_s24 }
   0x6   :  { %36 = dma.hbm_to_vmem [thread:$0]  %s32_s22, 16, %s34_s24, [#allocation5]  }
   0x7   :  { %478 = dma.done.wait [#allocation3], 16  }
   0x8   :  { %479 = vsyncadd [#allocation3], 4294967280 }
   0x9   :  { %480 = dma.done.wait [#allocation5], 16  }
   0xa   :  { %481 = vsyncadd [#allocation5], 4294967280  ;;  %v399_v0 = vld [vmem:[%s600_s1 + $0x38] sm:$0xff]  ;;  %v398_v2 = vld [vmem:[%s600_s1 + $0x30] sm:$0xff] }
   0xb   :  { %v407_v1 = vld [vmem:[%s600_s1 + $0x78] sm:$0xff]  ;;  %197 = vmatpush.bf16.msra.mxu0 %v399_v0  ;;  %408 = vmatpush.bf16.msra.mxu2 %v399_v0  ;;  %v406_v3 = vld [vmem:[%s600_s1 + $0x70] sm:$0xff]  ;;  %v397_v4 = vld [vmem:[%s600_s1 + $0x28] sm:$0xff] }
   0xc   :  { %216 = vmatpush.bf16.msra.mxu1 %v407_v1  ;;  %416 = vmatpush.bf16.msra.mxu3 %v407_v1  ;;  %v405_v5 = vld [vmem:[%s600_s1 + $0x68] sm:$0xff]  ;;  %v396_v6 = vld [vmem:[%s600_s1 + $0x20] sm:$0xff]  ;;  %v395_v8 = vld [vmem:[%s600_s1 + $0x18] sm:$0xff] }
   0xd   :  { %v404_v7 = vld [vmem:[%s600_s1 + $0x60] sm:$0xff]  ;;  %v403_v9 = vld [vmem:[%s600_s1 + $0x58] sm:$0xff]  ;;  %v394_v10 = vld [vmem:[%s600_s1 + $0x10] sm:$0xff] }
   0xe   :  { %v402_v11 = vld [vmem:[%s600_s1 + $0x50] sm:$0xff]  ;;  %v393_v12 = vld [vmem:[%s600_s1 + $0x8] sm:$0xff]  ;;  %v392_v14 = vld [vmem:[%s600_s1] sm:$0xff] }
   0xf   :  { %198 = vmatpush.bf16.msra.mxu0 %v398_v2  ;;  %409 = vmatpush.bf16.msra.mxu2 %v398_v2  ;;  %v401_v13 = vld [vmem:[%s600_s1 + $0x48] sm:$0xff]  ;;  %v400_v15 = vld [vmem:[%s600_s1 + $0x40] sm:$0xff]  ;;  %v318_v18 = vld [vmem:[%s599_s0 + $0x10] sm:$0xf] }
  0x10   :  { %217 = vmatpush.bf16.msra.mxu1 %v406_v3  ;;  %417 = vmatpush.bf16.msra.mxu3 %v406_v3  ;;  %v310_v16 = vld [vmem:[%s599_s0] sm:$0xf]  ;;  %v389_v17 = vld [vmem:[%s599_s0 + $0x4] sm:$0xf0]  ;;  %v391_v19 = vld [vmem:[%s599_s0 + $0x14] sm:$0xf0] }
  0x11   :  { %v388_v20 = vld [vmem:[%s599_s0 + $0x4] sm:$0xf]  ;;  %v312_v21 = vld [vmem:[%s599_s0 + $0x8] sm:$0xf0]  ;;  %v390_v22 = vld [vmem:[%s599_s0 + $0x14] sm:$0xf]  ;;  %v311_v24 = vor.u32 %v389_v17, %v310_v16  ;;  %v319_v25 = vor.u32 %v391_v19, %v318_v18 }
  0x12   :  { %v320_v23 = vld [vmem:[%s599_s0 + $0x18] sm:$0xf0]  ;;  %v315_v26 = vor.u32 %v388_v20, %v312_v21  ;;  %v427_v17 = vld [vmem:[#allocation4] ss:$0 sm:$0xff] }
  0x13   :  { %199 = vmatpush.bf16.msra.mxu0 %v397_v4  ;;  %410 = vmatpush.bf16.msra.mxu2 %v397_v4  ;;  %v323_v27 = vor.u32 %v390_v22, %v320_v23 }
  0x14   :  { %218 = vmatpush.bf16.msra.mxu1 %v405_v5  ;;  %418 = vmatpush.bf16.msra.mxu3 %v405_v5 }
  0x17   :  { %200 = vmatpush.bf16.msra.mxu0 %v396_v6  ;;  %411 = vmatpush.bf16.msra.mxu2 %v396_v6 }
  0x18   :  { %219 = vmatpush.bf16.msra.mxu1 %v404_v7  ;;  %419 = vmatpush.bf16.msra.mxu3 %v404_v7 }
  0x1b   :  { %201 = vmatpush.bf16.msra.mxu0 %v395_v8  ;;  %412 = vmatpush.bf16.msra.mxu2 %v395_v8 }
  0x1c   :  { %220 = vmatpush.bf16.msra.mxu1 %v403_v9  ;;  %420 = vmatpush.bf16.msra.mxu3 %v403_v9 }
  0x1f   :  { %202 = vmatpush.bf16.msra.mxu0 %v394_v10  ;;  %413 = vmatpush.bf16.msra.mxu2 %v394_v10 }
  0x20   :  { %221 = vmatpush.bf16.msra.mxu1 %v402_v11  ;;  %421 = vmatpush.bf16.msra.mxu3 %v402_v11  ;;  %v426_v11 = vld [vmem:[#allocation2] ss:$0 sm:$0xff] }
  0x23   :  { %203 = vmatpush.bf16.msra.mxu0 %v393_v12  ;;  %414 = vmatpush.bf16.msra.mxu2 %v393_v12 }
  0x24   :  { %222 = vmatpush.bf16.msra.mxu1 %v401_v13  ;;  %422 = vmatpush.bf16.msra.mxu3 %v401_v13 }
  0x27   :  { %204 = vmatpush.bf16.msra.mxu0 %v392_v14  ;;  %415 = vmatpush.bf16.msra.mxu2 %v392_v14 }
  0x28   :  { %223 = vmatpush.bf16.msra.mxu1 %v400_v15  ;;  %423 = vmatpush.bf16.msra.mxu3 %v400_v15 }
  0x2a   :  { %205 = vmatmul.bf16.vlgmr.msra.gmra.mxu0 %v311_v24  ;;  %210 = vmatmul.bf16.vlgmr.msra.gmra.mxu2 %v319_v25 }
  0x2b   :  { %224 = vmatmul.bf16.vlgmr.msra.gmra.mxu1 %v315_v26  ;;  %229 = vmatmul.bf16.vlgmr.msra.gmra.mxu3 %v323_v27 }
  0xa7   :  { %v206_v28 = vpop.f32.mrf.mxu0 }
  0xa8   :  { %v225_v29 = vpop.f32.mrf.mxu1 }
  0xa9   :  { %v226_v34 = vadd.f32 %v225_v29, %v206_v28 }
  0xad   :  { %v211_v30 = vpop.f32.mrf.mxu2 }
  0xae   :  { %v230_v31 = vpop.f32.mrf.mxu3 }
  0xaf   :  { %v208_v32 = vpop.f32.mrf.mxu0  ;;  %v231_v37 = vadd.f32 %v230_v31, %v211_v30 }
  0xb0   :  { %v227_v33 = vpop.f32.mrf.mxu1 }
  0xb1   :  { %v228_v35 = vadd.f32 %v227_v33, %v208_v32 }
  0xb3   :  { %v235_v36 = vadd.f32 %v228_v35, %v226_v34 }
  0xb5   :  { %v213_v38 = vpop.f32.mrf.mxu2  ;;  %v236_v41 = vadd.f32 %v235_v36, %v231_v37 }
  0xb6   :  { %v232_v39 = vpop.f32.mrf.mxu3 }
  0xb7   :  { %v233_v40 = vadd.f32 %v232_v39, %v213_v38 }
  0xb9   :  { %v237_v42 = vadd.f32 %v236_v41, %v233_v40 }
  0xbb   :  { %v238_v43 = vrot.slane %v237_v42, 4 }
  0xbd   :  { %v239_v44 = vadd.f32 %v238_v43, %v237_v42 }
  0xbf   :  { %v240_v45 = vrot.slane %v239_v44, 2 }
  0xc1   :  { %v241_v46 = vadd.f32 %v240_v45, %v239_v44 }
  0xc3   :  { %v242_v47 = vrot.slane %v241_v46, 1 }
  0xc5   :  { %v243_v48 = vadd.f32 %v242_v47, %v241_v46 }
  0xc7   :  { %v244_v49 = vmul.f32 0.03125, %v243_v48 }
  0xc9   :  { %v245_v50 = vsub.f32 %v226_v34, %v244_v49  ;;  %v246_v51 = vsub.f32 %v228_v35, %v244_v49  ;;  %v247_v52 = vsub.f32 %v231_v37, %v244_v49  ;;  %v248_v53 = vsub.f32 %v233_v40, %v244_v49 }
  0xcb   :  { %v249_v54 = vmul.f32 %v245_v50, %v245_v50  ;;  %v250_v55 = vmul.f32 %v246_v51, %v246_v51  ;;  %v251_v56 = vmul.f32 %v247_v52, %v247_v52  ;;  %v252_v58 = vmul.f32 %v248_v53, %v248_v53 }
  0xcd   :  { %v253_v57 = vadd.f32 %v250_v55, %v249_v54 }
  0xcf   :  { %v254_v59 = vadd.f32 %v253_v57, %v251_v56 }
  0xd1   :  { %v255_v60 = vadd.f32 %v254_v59, %v252_v58 }
  0xd3   :  { %v256_v61 = vrot.slane %v255_v60, 4 }
  0xd5   :  { %v257_v62 = vadd.f32 %v256_v61, %v255_v60 }
  0xd7   :  { %v258_v63 = vrot.slane %v257_v62, 2 }
  0xd9   :  { %v259_v0 = vadd.f32 %v258_v63, %v257_v62 }
  0xdb   :  { %v260_v1 = vrot.slane %v259_v0, 1 }
  0xdd   :  { %v261_v2 = vadd.f32 %v260_v1, %v259_v0 }
  0xdf   :  { %v262_v3 = vmul.f32 0.03125, %v261_v2 }
  0xe1   :  { %v263_v4 = vadd.f32 1e-05, %v262_v3 }
  0xe3   :  { %428 = vrsqrt.f32 %v263_v4  ;;  %vm270_vm1 = vweird.f32 %v263_v4 }
  0xe9   :  { %v429_v5 = vpop.eup %428 }
  0xea   :  { %v265_v6 = vmul.f32 %v429_v5, %v263_v4  ;;  %vm271_vm0 = vweird.f32 %v429_v5 }
  0xeb   :  { %vm272_vm2 = vmor %vm270_vm1, %vm271_vm0 }
  0xec   :  { %v266_v7 = vmul.f32 %v429_v5, %v265_v6 }
  0xee   :  { %v267_v8 = vmul.f32 0.5, %v266_v7 }
  0xf0   :  { %v268_v9 = vsub.f32 1.5, %v267_v8 }
  0xf2   :  { %v269_v10 = vmul.f32 %v429_v5, %v268_v9 }
  0xf4   :  { %v273_v12 = vsel %vm272_vm2, %v429_v5, %v269_v10 }
  0xf5   :  { %v274_v13 = vmul.f32 %v273_v12, %v245_v50  ;;  %v275_v14 = vmul.f32 %v273_v12, %v246_v51  ;;  %v276_v15 = vmul.f32 %v273_v12, %v247_v52  ;;  %v277_v16 = vmul.f32 %v273_v12, %v248_v53 }
  0xf7   :  { %v282_v18 = vmul.f32 %v426_v11, %v274_v13  ;;  %v283_v19 = vmul.f32 %v426_v11, %v275_v14  ;;  %v284_v20 = vmul.f32 %v426_v11, %v276_v15  ;;  %v285_v21 = vmul.f32 %v426_v11, %v277_v16 }
  0xf9   :  { %v290_v22 = vadd.f32 %v427_v17, %v282_v18  ;;  %v291_v23 = vadd.f32 %v427_v17, %v283_v19  ;;  %v292_v24 = vadd.f32 %v427_v17, %v284_v20  ;;  %v293_v25 = vadd.f32 %v427_v17, %v285_v21 }
  0xfb   :  { %v294_v26 = vmax.f32 %v290_v22, 0.0  ;;  %v295_v27 = vmax.f32 %v291_v23, 0.0  ;;  %v296_v28 = vmax.f32 %v292_v24, 0.0  ;;  %v297_v29 = vmax.f32 %v293_v25, 0.0 }
  0xfd   :  { %298 = vst [vmem:[%s603_s4] sm:$0xff] %v294_v26 }
  0xfe   :  { %299 = vst [vmem:[%s603_s4 + $0x8] sm:$0xff] %v295_v27 }
  0xff   :  { %300 = vst [vmem:[%s603_s4 + $0x10] sm:$0xff] %v296_v28 }
 0x100   :  { %301 = vst [vmem:[%s603_s4 + $0x18] sm:$0xff] %v297_v29 }
 0x101   :  { %306 = vsyncpa [#allocation3], 1 }
 0x102   :  { %307 = vsyncpa [#allocation5], 1 }

// kernel: cnn_generator_forward.5
= control target key start
LH: loop header
LB: loop body
LE: loop exit
PB: predicated region body
PF: predicated region fallthrough
CT: control target
= control target key end

     0   :  { %vm1353_vm0 = vcmask 523264   ;;  %vm1377_vm1 = vcmask 517120   ;;  %s3026_s1 = inlined_call_operand.vmem [shape: bf16[1152,64], index: 1, kind: input, shape index: {}]   ;;  %s3027_s0 = inlined_call_operand.vmem [shape: bf16[98,1152], index: 0, kind: input, shape index: {}]   ;;  %s3028_s2 = inlined_call_operand.vmem [shape: f32[1,64], index: 2, kind: input, shape index: {}]   ;;  %s3029_s3 = inlined_call_operand.vmem [shape: f32[1,64], index: 3, kind: input, shape index: {}]   ;;  %s3030_s4 = inlined_call_operand.vmem [shape: f32[98,64], index: 4, kind: output, shape index: {}]  }
   0x1   :  { %v2098_v0 = vld [vmem:[%s3026_s1 + $0x38] sm:$0xff]  ;;  %v2097_v1 = vld [vmem:[%s3026_s1 + $0x30] sm:$0xff]  ;;  %v2096_v2 = vld [vmem:[%s3026_s1 + $0x28] sm:$0xff] }
   0x2   :  { %2163 = vmatpush.bf16.msra.mxu1 %v2098_v0  ;;  %2164 = vmatpush.bf16.msra.mxu2 %v2098_v0  ;;  %v2095_v3 = vld [vmem:[%s3026_s1 + $0x20] sm:$0xff]  ;;  %v2094_v4 = vld [vmem:[%s3026_s1 + $0x18] sm:$0xff]  ;;  %v2093_v5 = vld [vmem:[%s3026_s1 + $0x10] sm:$0xff] }
   0x3   :  { %2165 = vmatpush.bf16.msra.mxu3 %v2098_v0  ;;  %966 = vmatpush.bf16.msra.mxu0 %v2098_v0  ;;  %v2092_v6 = vld [vmem:[%s3026_s1 + $0x8] sm:$0xff]  ;;  %v2240_v7 = vld [vmem:[%s3027_s0 + $0x1b0] sm:$0x11]  ;;  %v2091_v8 = vld [vmem:[%s3026_s1] sm:$0xff] }
   0x4   :  { %v1607_v9 = vld [vmem:[%s3027_s0 + $0x90] sm:$0xf]  ;;  %v2059_v10 = vld [vmem:[%s3027_s0 + $0xb0] sm:$0xf0]  ;;  %v1679_v11 = vld [vmem:[%s3027_s0 + $0x120] sm:$0xf]  ;;  %v399_v15 = vunpack.c.l.b16 %v2240_v7 }
   0x5   :  { %v2077_v12 = vld [vmem:[%s3027_s0 + $0x140] sm:$0xf0]  ;;  %v1535_v13 = vld [vmem:[%s3027_s0] sm:$0xf]  ;;  %v2122_v16 = vld [vmem:[%s3026_s1 + $0xf8] sm:$0xff]  ;;  %v1608_v18 = vor.u32 %v2059_v10, %v1607_v9 }
   0x6   :  { %2166 = vmatpush.bf16.msra.mxu1 %v2097_v1  ;;  %2167 = vmatpush.bf16.msra.mxu2 %v2097_v1  ;;  %v2041_v14 = vld [vmem:[%s3027_s0 + $0x20] sm:$0xf0]  ;;  %v2114_v17 = vld [vmem:[%s3026_s1 + $0xb8] sm:$0xff]  ;;  %v1680_v19 = vor.u32 %v2077_v12, %v1679_v11  ;;  %v462_v23 = vpack.c.b16 %v399_v15, %v399_v15  ;;  %v2121_v24 = vld [vmem:[%s3026_s1 + $0xf0] sm:$0xff] }
   0x7   :  { %2168 = vmatpush.bf16.msra.mxu3 %v2097_v1  ;;  %967 = vmatpush.bf16.msra.mxu0 %v2097_v1  ;;  %v2106_v20 = vld [vmem:[%s3026_s1 + $0x78] sm:$0xff]  ;;  %v1536_v21 = vor.u32 %v2041_v14, %v1535_v13  ;;  %v2113_v25 = vld [vmem:[%s3026_s1 + $0xb0] sm:$0xff]  ;;  %v2120_v28 = vld [vmem:[%s3026_s1 + $0xe8] sm:$0xff] }
   0x8   :  { %v2130_v22 = vld [vmem:[%s3026_s1 + $0x138] sm:$0xff]  ;;  %v2105_v26 = vld [vmem:[%s3026_s1 + $0x70] sm:$0xff]  ;;  %v2112_v29 = vld [vmem:[%s3026_s1 + $0xa8] sm:$0xff] }
   0x9   :  { %v2129_v27 = vld [vmem:[%s3026_s1 + $0x130] sm:$0xff]  ;;  %v2104_v30 = vld [vmem:[%s3026_s1 + $0x68] sm:$0xff]  ;;  %v2119_v32 = vld [vmem:[%s3026_s1 + $0xe0] sm:$0xff] }
   0xa   :  { %2169 = vmatpush.bf16.msra.mxu1 %v2096_v2  ;;  %2170 = vmatpush.bf16.msra.mxu2 %v2096_v2  ;;  %v2128_v31 = vld [vmem:[%s3026_s1 + $0x128] sm:$0xff]  ;;  %v2111_v33 = vld [vmem:[%s3026_s1 + $0xa0] sm:$0xff]  ;;  %v1643_v35 = vld [vmem:[%s3027_s0 + $0xd8] sm:$0xf] }
   0xb   :  { %2171 = vmatpush.bf16.msra.mxu3 %v2096_v2  ;;  %968 = vmatpush.bf16.msra.mxu0 %v2096_v2  ;;  %v2103_v34 = vld [vmem:[%s3026_s1 + $0x60] sm:$0xff]  ;;  %v2068_v36 = vld [vmem:[%s3027_s0 + $0xf8] sm:$0xf0]  ;;  %v1715_v37 = vld [vmem:[%s3027_s0 + $0x168] sm:$0xf] }
   0xc   :  { %v2086_v38 = vld [vmem:[%s3027_s0 + $0x188] sm:$0xf0]  ;;  %v2127_v39 = vld [vmem:[%s3026_s1 + $0x120] sm:$0xff]  ;;  %v1571_v40 = vld [vmem:[%s3027_s0 + $0x48] sm:$0xf]  ;;  %v1644_v44 = vor.u32 %v2068_v36, %v1643_v35 }
   0xd   :  { %v2050_v41 = vld [vmem:[%s3027_s0 + $0x68] sm:$0xf0]  ;;  %v2118_v42 = vld [vmem:[%s3026_s1 + $0xd8] sm:$0xff]  ;;  %v1716_v45 = vor.u32 %v2086_v38, %v1715_v37  ;;  %v2117_v49 = vld [vmem:[%s3026_s1 + $0xd0] sm:$0xff] }
   0xe   :  { %2172 = vmatpush.bf16.msra.mxu1 %v2095_v3  ;;  %2173 = vmatpush.bf16.msra.mxu2 %v2095_v3  ;;  %v2110_v43 = vld [vmem:[%s3026_s1 + $0x98] sm:$0xff]  ;;  %v1572_v47 = vor.u32 %v2050_v41, %v1571_v40  ;;  %v2109_v50 = vld [vmem:[%s3026_s1 + $0x90] sm:$0xff]  ;;  %v2116_v53 = vld [vmem:[%s3026_s1 + $0xc8] sm:$0xff] }
   0xf   :  { %2174 = vmatpush.bf16.msra.mxu3 %v2095_v3  ;;  %969 = vmatpush.bf16.msra.mxu0 %v2095_v3  ;;  %v2102_v46 = vld [vmem:[%s3026_s1 + $0x58] sm:$0xff]  ;;  %v2101_v51 = vld [vmem:[%s3026_s1 + $0x50] sm:$0xff]  ;;  %v2108_v54 = vld [vmem:[%s3026_s1 + $0x88] sm:$0xff] }
  0x10   :  { %v2126_v48 = vld [vmem:[%s3026_s1 + $0x118] sm:$0xff]  ;;  %v2125_v52 = vld [vmem:[%s3026_s1 + $0x110] sm:$0xff]  ;;  %v2100_v55 = vld [vmem:[%s3026_s1 + $0x48] sm:$0xff] }
  0x11   :  { %v2115_v56 = vld [vmem:[%s3026_s1 + $0xc0] sm:$0xff]  ;;  %v2124_v57 = vld [vmem:[%s3026_s1 + $0x108] sm:$0xff]  ;;  %v1545_v61 = vld [vmem:[%s3027_s0 + $0x2c] sm:$0xf0] }
  0x12   :  { %2175 = vmatpush.bf16.msra.mxu1 %v2094_v4  ;;  %2176 = vmatpush.bf16.msra.mxu2 %v2094_v4  ;;  %v2107_v58 = vld [vmem:[%s3026_s1 + $0x80] sm:$0xff]  ;;  %v2038_v60 = vld [vmem:[%s3027_s0 + $0xc] sm:$0xf]  ;;  %v2146_v63 = vld [vmem:[%s3026_s1 + $0x1b8] sm:$0xff] }
  0x13   :  { %2177 = vmatpush.bf16.msra.mxu3 %v2094_v4  ;;  %970 = vmatpush.bf16.msra.mxu0 %v2094_v4  ;;  %v2099_v59 = vld [vmem:[%s3026_s1 + $0x40] sm:$0xff]  ;;  %v2154_v0 = vld [vmem:[%s3026_s1 + $0x1f8] sm:$0xff]  ;;  %v1537_v1 = vld [vmem:[%s3027_s0 + $0x24] sm:$0xf0]  ;;  %v1548_v4 = vor.u32 %v2038_v60, %v1545_v61 }
  0x14   :  { %v2037_v62 = vld [vmem:[%s3027_s0 + $0x4] sm:$0xf]  ;;  %v1543_v2 = vld [vmem:[%s3027_s0 + $0x8] sm:$0xf]  ;;  %v2042_v3 = vld [vmem:[%s3027_s0 + $0x28] sm:$0xf0] }
  0x15   :  { %v2138_v9 = vld [vmem:[%s3026_s1 + $0x178] sm:$0xff]  ;;  %v1540_v11 = vor.u32 %v2037_v62, %v1537_v1  ;;  %v1544_v12 = vor.u32 %v2042_v3, %v1543_v2  ;;  %v2145_v14 = vld [vmem:[%s3026_s1 + $0x1b0] sm:$0xff]  ;;  %v2135_v36 = vld [vmem:[%s3026_s1 + $0x160] sm:$0xff] }
  0x16   :  { %2178 = vmatpush.bf16.msra.mxu1 %v2093_v5  ;;  %2179 = vmatpush.bf16.msra.mxu2 %v2093_v5  ;;  %v2162_v10 = vld [vmem:[%s3026_s1 + $0x238] sm:$0xff]  ;;  %v2153_v15 = vld [vmem:[%s3026_s1 + $0x1f0] sm:$0xff]  ;;  %v2159_v37 = vld [vmem:[%s3026_s1 + $0x220] sm:$0xff] }
  0x17   :  { %2180 = vmatpush.bf16.msra.mxu3 %v2093_v5  ;;  %971 = vmatpush.bf16.msra.mxu0 %v2093_v5  ;;  %v2123_v5 = vld [vmem:[%s3026_s1 + $0x100] sm:$0xff]  ;;  %v2142_v38 = vld [vmem:[%s3026_s1 + $0x198] sm:$0xff]  ;;  %v2070_v1 = vld [vmem:[%s3027_s0 + $0x108] sm:$0xf0] }
  0x18   :  { %v2134_v40 = vld [vmem:[%s3026_s1 + $0x158] sm:$0xff]  ;;  %v1645_v60 = vld [vmem:[%s3027_s0 + $0xfc] sm:$0xf0]  ;;  %v2069_v62 = vld [vmem:[%s3027_s0 + $0x100] sm:$0xf0] }
  0x19   :  { %v2056_v41 = vld [vmem:[%s3027_s0 + $0x9c] sm:$0xf]  ;;  %v1651_v61 = vld [vmem:[%s3027_s0 + $0xe0] sm:$0xf] }
  0x1a   :  { %2181 = vmatpush.bf16.msra.mxu1 %v2092_v6  ;;  %2182 = vmatpush.bf16.msra.mxu2 %v2092_v6  ;;  %v1652_v3 = vor.u32 %v2069_v62, %v1651_v61  ;;  %v1567_v61 = vld [vmem:[%s3027_s0 + $0x20] sm:$0xf]  ;;  %v2045_v62 = vld [vmem:[%s3027_s0 + $0x40] sm:$0xf0] }
  0x1b   :  { %2183 = vmatpush.bf16.msra.mxu3 %v2092_v6  ;;  %972 = vmatpush.bf16.msra.mxu0 %v2092_v6  ;;  %v1551_v6 = vld [vmem:[%s3027_s0 + $0x10] sm:$0xf] }
  0x1e   :  { %2184 = vmatpush.bf16.msra.mxu1 %v2091_v8  ;;  %2185 = vmatpush.bf16.msra.mxu2 %v2091_v8 }
  0x1f   :  { %2186 = vmatpush.bf16.msra.mxu3 %v2091_v8  ;;  %973 = vmatpush.bf16.msra.mxu0 %v2091_v8  ;;  %v2043_v8 = vld [vmem:[%s3027_s0 + $0x30] sm:$0xf0] }
  0x20   :  { %v1552_v13 = vor.u32 %v2043_v8, %v1551_v6  ;;  %v2140_v6 = vld [vmem:[%s3026_s1 + $0x188] sm:$0xff] }
  0x21   :  { %984 = vmatmul.bf16.vlgmr.msra.gmra.mxu1 %v1608_v18  ;;  %994 = vmatmul.bf16.vlgmr.msra.gmra.mxu2 %v1680_v19  ;;  %v2144_v18 = vld [vmem:[%s3026_s1 + $0x1a8] sm:$0xff] }
  0x22   :  { %1052 = vmatpush.bf16.msrb.mxu2 %v2114_v17  ;;  %1009 = vmatpush.bf16.msrb.mxu1 %v2106_v20  ;;  %v2161_v17 = vld [vmem:[%s3026_s1 + $0x230] sm:$0xff]  ;;  %v2152_v19 = vld [vmem:[%s3026_s1 + $0x1e8] sm:$0xff] }
  0x23   :  { %1095 = vmatpush.bf16.msrb.mxu3 %v2122_v16  ;;  %974 = vmatmul.bf16.vlgmr.msra.gmra.mxu0 %v1536_v21  ;;  %v2137_v16 = vld [vmem:[%s3026_s1 + $0x170] sm:$0xff]  ;;  %v2136_v20 = vld [vmem:[%s3026_s1 + $0x168] sm:$0xff] }
  0x24   :  { %1138 = vmatpush.bf16.msrb.mxu0 %v2130_v22  ;;  %1004 = vmatmul.bf16.vlgmr.msra.gmra.mxu3 %v462_v23  ;;  %v2160_v21 = vld [vmem:[%s3026_s1 + $0x228] sm:$0xff]  ;;  %v2143_v22 = vld [vmem:[%s3026_s1 + $0x1a0] sm:$0xff] }
  0x25   :  { %v2151_v23 = vld [vmem:[%s3026_s1 + $0x1e0] sm:$0xff]  ;;  %v2148_v8 = vld [vmem:[%s3026_s1 + $0x1c8] sm:$0xff] }
  0x26   :  { %1053 = vmatpush.bf16.msrb.mxu2 %v2113_v25  ;;  %1010 = vmatpush.bf16.msrb.mxu1 %v2105_v26  ;;  %v1581_v25 = vld [vmem:[%s3027_s0 + $0x74] sm:$0xf0]  ;;  %v2046_v26 = vld [vmem:[%s3027_s0 + $0x4c] sm:$0xf] }
  0x27   :  { %1096 = vmatpush.bf16.msrb.mxu3 %v2121_v24  ;;  %v2047_v24 = vld [vmem:[%s3027_s0 + $0x54] sm:$0xf] }
  0x28   :  { %1139 = vmatpush.bf16.msrb.mxu0 %v2129_v27  ;;  %v1573_v27 = vld [vmem:[%s3027_s0 + $0x6c] sm:$0xf0] }
  0x2a   :  { %1054 = vmatpush.bf16.msrb.mxu2 %v2112_v29  ;;  %1011 = vmatpush.bf16.msrb.mxu1 %v2104_v30  ;;  %v2051_v29 = vld [vmem:[%s3027_s0 + $0x70] sm:$0xf0]  ;;  %v1584_v30 = vor.u32 %v2047_v24, %v1581_v25  ;;  %v2147_v24 = vld [vmem:[%s3026_s1 + $0x1c0] sm:$0xff] }
  0x2b   :  { %1097 = vmatpush.bf16.msrb.mxu3 %v2120_v28  ;;  %v1579_v28 = vld [vmem:[%s3027_s0 + $0x50] sm:$0xf]  ;;  %v2131_v25 = vld [vmem:[%s3026_s1 + $0x140] sm:$0xff] }
  0x2c   :  { %1140 = vmatpush.bf16.msrb.mxu0 %v2128_v31  ;;  %v1587_v31 = vld [vmem:[%s3027_s0 + $0x58] sm:$0xf] }
  0x2e   :  { %1055 = vmatpush.bf16.msrb.mxu2 %v2111_v33  ;;  %1012 = vmatpush.bf16.msrb.mxu1 %v2103_v34  ;;  %v1576_v33 = vor.u32 %v2046_v26, %v1573_v27  ;;  %v1580_v34 = vor.u32 %v2051_v29, %v1579_v28  ;;  %v2083_v26 = vld [vmem:[%s3027_s0 + $0x174] sm:$0xf]  ;;  %v1725_v27 = vld [vmem:[%s3027_s0 + $0x194] sm:$0xf0]  ;;  %v2082_v28 = vld [vmem:[%s3027_s0 + $0x16c] sm:$0xf] }
  0x2f   :  { %1098 = vmatpush.bf16.msrb.mxu3 %v2119_v32  ;;  %v2052_v32 = vld [vmem:[%s3027_s0 + $0x78] sm:$0xf0]  ;;  %v1717_v29 = vld [vmem:[%s3027_s0 + $0x18c] sm:$0xf0] }
  0x30   :  { %1141 = vmatpush.bf16.msrb.mxu0 %v2127_v39  ;;  %v1588_v35 = vor.u32 %v2052_v32, %v1587_v31  ;;  %v2150_v39 = vld [vmem:[%s3026_s1 + $0x1d8] sm:$0xff]  ;;  %v2087_v31 = vld [vmem:[%s3027_s0 + $0x190] sm:$0xf0]  ;;  %v1728_v32 = vor.u32 %v2083_v26, %v1725_v27 }
  0x31   :  { %989 = vmatmul.bf16.gmra.mxu1 %v1644_v44  ;;  %999 = vmatmul.bf16.gmra.mxu2 %v1716_v45  ;;  %v1609_v44 = vld [vmem:[%s3027_s0 + $0xb4] sm:$0xf0] }
  0x32   :  { %1056 = vmatpush.bf16.msrb.mxu2 %v2110_v43  ;;  %1013 = vmatpush.bf16.msrb.mxu1 %v2102_v46  ;;  %v2055_v43 = vld [vmem:[%s3027_s0 + $0x94] sm:$0xf]  ;;  %v1615_v45 = vld [vmem:[%s3027_s0 + $0x98] sm:$0xf]  ;;  %v2060_v46 = vld [vmem:[%s3027_s0 + $0xb8] sm:$0xf0] }
  0x33   :  { %1099 = vmatpush.bf16.msrb.mxu3 %v2118_v42  ;;  %979 = vmatmul.bf16.gmra.mxu0 %v1572_v47  ;;  %v1617_v42 = vld [vmem:[%s3027_s0 + $0xbc] sm:$0xf0] }
  0x34   :  { %1142 = vmatpush.bf16.msrb.mxu0 %v2126_v48  ;;  %v1620_v47 = vor.u32 %v2056_v41, %v1617_v42  ;;  %v1623_v48 = vld [vmem:[%s3027_s0 + $0xa0] sm:$0xf]  ;;  %v400_v42 = vunpack.c.h.b16 %v2240_v7 }
  0x35   :  { %v2624_v41 = vld [vmem:[%s3027_s0 + $0x1c0] sm:$0x11] }
  0x36   :  { %1057 = vmatpush.bf16.msrb.mxu2 %v2109_v50  ;;  %1014 = vmatpush.bf16.msrb.mxu1 %v2101_v51  ;;  %v1612_v50 = vor.u32 %v2055_v43, %v1609_v44  ;;  %v1616_v51 = vor.u32 %v2060_v46, %v1615_v45  ;;  %v403_v44 = vunpack.c.l.b16 %v2624_v41  ;;  %v463_v46 = vpack.c.b16 %v400_v42, %v400_v42 }
  0x37   :  { %1100 = vmatpush.bf16.msrb.mxu3 %v2117_v49  ;;  %v2061_v49 = vld [vmem:[%s3027_s0 + $0xc0] sm:$0xf0] }
  0x38   :  { %1143 = vmatpush.bf16.msrb.mxu0 %v2125_v52  ;;  %v1624_v52 = vor.u32 %v2061_v49, %v1623_v48  ;;  %v466_v49 = vpack.c.b16 %v403_v44, %v403_v44  ;;  %v2063_v44 = vld [vmem:[%s3027_s0 + $0xd0] sm:$0xf0] }
  0x3a   :  { %1058 = vmatpush.bf16.msrb.mxu2 %v2108_v54  ;;  %1015 = vmatpush.bf16.msrb.mxu1 %v2100_v55  ;;  %v2141_v54 = vld [vmem:[%s3026_s1 + $0x190] sm:$0xff] }
  0x3b   :  { %1101 = vmatpush.bf16.msrb.mxu3 %v2116_v53  ;;  %v2158_v53 = vld [vmem:[%s3026_s1 + $0x218] sm:$0xff]  ;;  %v2149_v55 = vld [vmem:[%s3026_s1 + $0x1d0] sm:$0xff] }
  0x3c   :  { %1144 = vmatpush.bf16.msrb.mxu0 %v2124_v57  ;;  %v2065_v57 = vld [vmem:[%s3027_s0 + $0xe4] sm:$0xf] }
  0x3e   :  { %1059 = vmatpush.bf16.msrb.mxu2 %v2107_v58  ;;  %1016 = vmatpush.bf16.msrb.mxu1 %v2099_v59  ;;  %v1653_v58 = vld [vmem:[%s3027_s0 + $0x104] sm:$0xf0]  ;;  %v2064_v59 = vld [vmem:[%s3027_s0 + $0xdc] sm:$0xf] }
  0x3f   :  { %1102 = vmatpush.bf16.msrb.mxu3 %v2115_v56  ;;  %v2133_v56 = vld [vmem:[%s3026_s1 + $0x150] sm:$0xff]  ;;  %v1648_v2 = vor.u32 %v2064_v59, %v1645_v60  ;;  %v2044_v59 = vld [vmem:[%s3027_s0 + $0x38] sm:$0xf0] }
  0x40   :  { %1145 = vmatpush.bf16.msrb.mxu0 %v2123_v5  ;;  %v2157_v5 = vld [vmem:[%s3026_s1 + $0x210] sm:$0xff] }
  0x41   :  { %1017 = vmatmul.bf16.vlgmr.msrb.gmra.mxu1 %v1540_v11  ;;  %1060 = vmatmul.bf16.vlgmr.msrb.gmra.mxu2 %v1544_v12  ;;  %v1689_v11 = vld [vmem:[%s3027_s0 + $0x14c] sm:$0xf0]  ;;  %v2073_v12 = vld [vmem:[%s3027_s0 + $0x124] sm:$0xf] }
  0x42   :  { %1224 = vmatpush.bf16.msra.mxu2 %v2146_v63  ;;  %1103 = vmatmul.bf16.vlgmr.msrb.gmra.mxu3 %v1548_v4  ;;  %v1656_v63 = vor.u32 %v2065_v57, %v1653_v58  ;;  %v1553_v57 = vld [vmem:[%s3027_s0 + $0x34] sm:$0xf0] }
  0x43   :  { %1267 = vmatpush.bf16.msra.mxu3 %v2154_v0  ;;  %1181 = vmatpush.bf16.msra.mxu1 %v2138_v9  ;;  %v1659_v0 = vld [vmem:[%s3027_s0 + $0xe8] sm:$0xf]  ;;  %v1559_v58 = vld [vmem:[%s3027_s0 + $0x18] sm:$0xf] }
  0x44   :  { %1310 = vmatpush.bf16.msra.mxu0 %v2162_v10  ;;  %v1660_v4 = vor.u32 %v2070_v1, %v1659_v0  ;;  %v2132_v9 = vld [vmem:[%s3026_s1 + $0x148] sm:$0xff]  ;;  %v1560_v1 = vor.u32 %v2044_v59, %v1559_v58 }
  0x45   :  { %1146 = vmatmul.bf16.vlgmr.msrb.gmra.mxu0 %v1552_v13  ;;  %v2074_v10 = vld [vmem:[%s3027_s0 + $0x12c] sm:$0xf]  ;;  %v1681_v13 = vld [vmem:[%s3027_s0 + $0x144] sm:$0xf0] }
  0x46   :  { %1225 = vmatpush.bf16.msra.mxu2 %v2145_v14  ;;  %v1687_v14 = vld [vmem:[%s3027_s0 + $0x128] sm:$0xf] }
  0x47   :  { %1268 = vmatpush.bf16.msra.mxu3 %v2153_v15  ;;  %1182 = vmatpush.bf16.msra.mxu1 %v2137_v16  ;;  %v2078_v15 = vld [vmem:[%s3027_s0 + $0x148] sm:$0xf0]  ;;  %v1692_v16 = vor.u32 %v2074_v10, %v1689_v11  ;;  %v2049_v10 = vld [vmem:[%s3027_s0 + $0x64] sm:$0xf]  ;;  %v1597_v11 = vld [vmem:[%s3027_s0 + $0x84] sm:$0xf0] }
  0x48   :  { %1311 = vmatpush.bf16.msra.mxu0 %v2161_v17  ;;  %v1695_v17 = vld [vmem:[%s3027_s0 + $0x130] sm:$0xf] }
  0x4a   :  { %1226 = vmatpush.bf16.msra.mxu2 %v2144_v18  ;;  %v2079_v18 = vld [vmem:[%s3027_s0 + $0x150] sm:$0xf0] }
  0x4b   :  { %1269 = vmatpush.bf16.msra.mxu3 %v2152_v19  ;;  %1183 = vmatpush.bf16.msra.mxu1 %v2136_v20  ;;  %v1684_v19 = vor.u32 %v2073_v12, %v1681_v13  ;;  %v1688_v20 = vor.u32 %v2078_v15, %v1687_v14  ;;  %v2048_v12 = vld [vmem:[%s3027_s0 + $0x5c] sm:$0xf]  ;;  %v1589_v13 = vld [vmem:[%s3027_s0 + $0x7c] sm:$0xf0]  ;;  %v2053_v15 = vld [vmem:[%s3027_s0 + $0x80] sm:$0xf0] }
  0x4c   :  { %1312 = vmatpush.bf16.msra.mxu0 %v2160_v21  ;;  %v1696_v21 = vor.u32 %v2079_v18, %v1695_v17  ;;  %v1595_v14 = vld [vmem:[%s3027_s0 + $0x60] sm:$0xf]  ;;  %v1603_v17 = vld [vmem:[%s3027_s0 + $0x68] sm:$0xf]  ;;  %v2054_v18 = vld [vmem:[%s3027_s0 + $0x88] sm:$0xf0] }
  0x4e   :  { %1227 = vmatpush.bf16.msra.mxu2 %v2143_v22  ;;  %v2156_v22 = vld [vmem:[%s3026_s1 + $0x208] sm:$0xff] }
  0x4f   :  { %1270 = vmatpush.bf16.msra.mxu3 %v2151_v23  ;;  %1184 = vmatpush.bf16.msra.mxu1 %v2135_v36  ;;  %v2139_v23 = vld [vmem:[%s3026_s1 + $0x180] sm:$0xff]  ;;  %v1720_v36 = vor.u32 %v2082_v28, %v1717_v29 }
  0x50   :  { %1313 = vmatpush.bf16.msra.mxu0 %v2159_v37 }
  0x51   :  { %1022 = vmatmul.bf16.gmra.mxu1 %v1576_v33  ;;  %1065 = vmatmul.bf16.gmra.mxu2 %v1580_v34  ;;  %v1731_v33 = vld [vmem:[%s3027_s0 + $0x178] sm:$0xf]  ;;  %v2088_v34 = vld [vmem:[%s3027_s0 + $0x198] sm:$0xf0] }
  0x52   :  { %1108 = vmatmul.bf16.gmra.mxu3 %v1584_v30  ;;  %1228 = vmatpush.bf16.msra.mxu2 %v2142_v38  ;;  %v1723_v30 = vld [vmem:[%s3027_s0 + $0x170] sm:$0xf]  ;;  %v1732_v38 = vor.u32 %v2088_v34, %v1731_v33  ;;  %v2058_v33 = vld [vmem:[%s3027_s0 + $0xac] sm:$0xf] }
  0x53   :  { %1271 = vmatpush.bf16.msra.mxu3 %v2150_v39  ;;  %1185 = vmatpush.bf16.msra.mxu1 %v2134_v40  ;;  %v1724_v37 = vor.u32 %v2087_v31, %v1723_v30  ;;  %v78_v39 = vld [vmem:[%s3027_s0 + $0x1b8] sm:$0x11]  ;;  %v1633_v34 = vld [vmem:[%s3027_s0 + $0xcc] sm:$0xf0] }
  0x54   :  { %1314 = vmatpush.bf16.msra.mxu0 %v2158_v53  ;;  %v402_v40 = vunpack.c.h.b16 %v78_v39  ;;  %v401_v43 = vunpack.c.l.b16 %v78_v39  ;;  %v1631_v39 = vld [vmem:[%s3027_s0 + $0xa8] sm:$0xf]  ;;  %v1636_v42 = vor.u32 %v2058_v33, %v1633_v34 }
  0x55   :  { %1151 = vmatmul.bf16.gmra.mxu0 %v1588_v35  ;;  %v2155_v35 = vld [vmem:[%s3026_s1 + $0x200] sm:$0xff] }
  0x56   :  { %1229 = vmatpush.bf16.msra.mxu2 %v2141_v54  ;;  %v465_v45 = vpack.c.b16 %v402_v40, %v402_v40  ;;  %v2040_v54 = vld [vmem:[%s3027_s0 + $0x1c] sm:$0xf]  ;;  %v2062_v40 = vld [vmem:[%s3027_s0 + $0xc8] sm:$0xf0] }
  0x57   :  { %1272 = vmatpush.bf16.msra.mxu3 %v2149_v55  ;;  %1186 = vmatpush.bf16.msra.mxu1 %v2133_v56  ;;  %v1561_v55 = vld [vmem:[%s3027_s0 + $0x3c] sm:$0xf0]  ;;  %v2039_v56 = vld [vmem:[%s3027_s0 + $0x14] sm:$0xf] }
  0x58   :  { %1315 = vmatpush.bf16.msra.mxu0 %v2157_v5  ;;  %v1564_v60 = vor.u32 %v2040_v54, %v1561_v55  ;;  %v1556_v0 = vor.u32 %v2039_v56, %v1553_v57 }
  0x5a   :  { %1230 = vmatpush.bf16.msra.mxu2 %v2140_v6 }
  0x5b   :  { %1273 = vmatpush.bf16.msra.mxu3 %v2148_v8  ;;  %1187 = vmatpush.bf16.msra.mxu1 %v2132_v9 }
  0x5c   :  { %1316 = vmatpush.bf16.msra.mxu0 %v2156_v22 }
  0x5e   :  { %1231 = vmatpush.bf16.msra.mxu2 %v2139_v23  ;;  %v1604_v23 = vor.u32 %v2054_v18, %v1603_v17 }
  0x5f   :  { %1274 = vmatpush.bf16.msra.mxu3 %v2147_v24  ;;  %1188 = vmatpush.bf16.msra.mxu1 %v2131_v25 }
  0x60   :  { %1317 = vmatpush.bf16.msra.mxu0 %v2155_v35  ;;  %v2057_v35 = vld [vmem:[%s3027_s0 + $0xa4] sm:$0xf] }
  0x61   :  { %1027 = vmatmul.bf16.gmra.mxu1 %v1612_v50  ;;  %1070 = vmatmul.bf16.gmra.mxu2 %v1616_v51 }
  0x62   :  { %1113 = vmatmul.bf16.gmra.mxu3 %v1620_v47  ;;  %v464_v47 = vpack.c.b16 %v401_v43, %v401_v43  ;;  %v1639_v43 = vld [vmem:[%s3027_s0 + $0xb0] sm:$0xf] }
  0x65   :  { %1156 = vmatmul.bf16.gmra.mxu0 %v1624_v52 }
  0x71   :  { %1032 = vmatmul.bf16.gmra.mxu1 %v1648_v2  ;;  %1075 = vmatmul.bf16.gmra.mxu2 %v1652_v3  ;;  %v1568_v3 = vor.u32 %v2045_v62, %v1567_v61 }
  0x72   :  { %1118 = vmatmul.bf16.gmra.mxu3 %v1656_v63 }
  0x75   :  { %1161 = vmatmul.bf16.gmra.mxu0 %v1660_v4 }
  0x81   :  { %1037 = vmatmul.bf16.gmra.mxu1 %v1684_v19  ;;  %1080 = vmatmul.bf16.gmra.mxu2 %v1688_v20  ;;  %v1592_v20 = vor.u32 %v2048_v12, %v1589_v13  ;;  %v1667_v12 = vld [vmem:[%s3027_s0 + $0xf0] sm:$0xf]  ;;  %v2071_v13 = vld [vmem:[%s3027_s0 + $0x110] sm:$0xf0] }
  0x82   :  { %1123 = vmatmul.bf16.gmra.mxu3 %v1692_v16  ;;  %v1600_v16 = vor.u32 %v2049_v10, %v1597_v11 }
  0x85   :  { %1166 = vmatmul.bf16.gmra.mxu0 %v1696_v21  ;;  %v1596_v21 = vor.u32 %v2053_v15, %v1595_v14  ;;  %v1675_v15 = vld [vmem:[%s3027_s0 + $0xf8] sm:$0xf] }
  0x91   :  { %1042 = vmatmul.bf16.gmra.mxu1 %v1720_v36  ;;  %1085 = vmatmul.bf16.gmra.mxu2 %v1724_v37 }
  0x92   :  { %1128 = vmatmul.bf16.gmra.mxu3 %v1728_v32 }
  0x95   :  { %1171 = vmatmul.bf16.gmra.mxu0 %v1732_v38  ;;  %v1625_v38 = vld [vmem:[%s3027_s0 + $0xc4] sm:$0xf0] }
  0x9e   :  { %v2628_v48 = vpop.f32.mrf.mxu1 }
  0xa0   :  { %v975_v50 = vpop.f32.mrf.mxu0 }
  0xa1   :  { %1047 = vmatmul.bf16.gmra.mxu1 %v463_v46  ;;  %1090 = vmatmul.bf16.gmra.mxu2 %v464_v47  ;;  %v1628_v47 = vor.u32 %v2057_v35, %v1625_v38  ;;  %v2076_v35 = vld [vmem:[%s3027_s0 + $0x13c] sm:$0xf] }
  0xa2   :  { %1133 = vmatmul.bf16.gmra.mxu3 %v465_v45 }
  0xa4   :  { %v2630_v51 = vpop.f32.mrf.mxu2 }
  0xa5   :  { %1176 = vmatmul.bf16.gmra.mxu0 %v466_v49  ;;  %v1632_v49 = vor.u32 %v2062_v40, %v1631_v39  ;;  %v1703_v40 = vld [vmem:[%s3027_s0 + $0x138] sm:$0xf] }
  0xa6   :  { %v2632_v52 = vpop.f32.mrf.mxu1 }
  0xa7   :  { %v2634_v53 = vpop.f32.mrf.mxu3 }
  0xa8   :  { %v977_v7 = vpop.f32.mrf.mxu0 }
  0xac   :  { %v2660_v63 = vpop.f32.mrf.mxu2 }
  0xae   :  { %v2662_v2 = vpop.f32.mrf.mxu1 }
  0xaf   :  { %v1007_v4 = vpop.f32.mrf.mxu3 }
  0xb0   :  { %v980_v5 = vpop.f32.mrf.mxu0  ;;  %v1669_v4 = vld [vmem:[%s3027_s0 + $0x114] sm:$0xf0] }
  0xb1   :  { %1189 = vmatmul.bf16.vlgmr.msra.gmra.mxu1 %v1556_v0  ;;  %1232 = vmatmul.bf16.vlgmr.msra.gmra.mxu2 %v1560_v1 }
  0xb2   :  { %1275 = vmatmul.bf16.vlgmr.msra.gmra.mxu3 %v1564_v60 }
  0xb4   :  { %v2664_v6 = vpop.f32.mrf.mxu2 }
  0xb5   :  { %1318 = vmatmul.bf16.vlgmr.msra.gmra.mxu0 %v1568_v3  ;;  %v2067_v3 = vld [vmem:[%s3027_s0 + $0xf4] sm:$0xf] }
  0xb6   :  { %v2666_v8 = vpop.f32.mrf.mxu1  ;;  %v1672_v14 = vor.u32 %v2067_v3, %v1669_v4 }
  0xb8   :  { %v982_v9 = vpop.f32.mrf.mxu0 }
  0xbc   :  { %v2692_v19 = vpop.f32.mrf.mxu2 }
  0xbe   :  { %v1018_v22 = vpop.f32.mrf.mxu1 }
  0xbf   :  { %v1019_v24 = vadd.f32 %v1018_v22, %v975_v50 }
  0xc1   :  { %1194 = vmatmul.bf16.gmra.mxu1 %v1592_v20  ;;  %1237 = vmatmul.bf16.gmra.mxu2 %v1596_v21  ;;  %v1668_v21 = vor.u32 %v2071_v13, %v1667_v12  ;;  %v1739_v13 = vld [vmem:[%s3027_s0 + $0x180] sm:$0xf] }
  0xc2   :  { %1280 = vmatmul.bf16.gmra.mxu3 %v1600_v16  ;;  %v1147_v25 = vpop.f32.mrf.mxu0  ;;  %v2072_v16 = vld [vmem:[%s3027_s0 + $0x118] sm:$0xf0] }
  0xc4   :  { %v1061_v27 = vpop.f32.mrf.mxu2 }
  0xc5   :  { %v1104_v26 = vpop.f32.mrf.mxu3  ;;  %1323 = vmatmul.bf16.gmra.mxu0 %v1604_v23  ;;  %v1062_v28 = vadd.f32 %v1061_v27, %v1019_v24  ;;  %v1676_v23 = vor.u32 %v2072_v16, %v1675_v15  ;;  %v1747_v16 = vld [vmem:[%s3027_s0 + $0x188] sm:$0xf] }
  0xc6   :  { %v1020_v29 = vpop.f32.mrf.mxu1 }
  0xc7   :  { %v1105_v30 = vadd.f32 %v1104_v26, %v1062_v28  ;;  %v1021_v31 = vadd.f32 %v1020_v29, %v977_v7  ;;  %v1640_v7 = vor.u32 %v2063_v44, %v1639_v43  ;;  %v1711_v44 = vld [vmem:[%s3027_s0 + $0x140] sm:$0xf] }
  0xc9   :  { %v2703_v36 = vadd.f32 %v1147_v25, %v1105_v30 }
  0xca   :  { %v1149_v32 = vpop.f32.mrf.mxu0 }
  0xcc   :  { %v1063_v45 = vpop.f32.mrf.mxu2 }
  0xcd   :  { %v1106_v37 = vpop.f32.mrf.mxu3  ;;  %v1064_v46 = vadd.f32 %v1063_v45, %v1021_v31  ;;  %v2081_v45 = vld [vmem:[%s3027_s0 + $0x160] sm:$0xf0] }
  0xce   :  { %v1023_v50 = vpop.f32.mrf.mxu1 }
  0xcf   :  { %v1107_v54 = vadd.f32 %v1106_v37, %v1064_v46  ;;  %v1024_v55 = vadd.f32 %v1023_v50, %v980_v5  ;;  %v2066_v5 = vld [vmem:[%s3027_s0 + $0xec] sm:$0xf]  ;;  %v2075_v37 = vld [vmem:[%s3027_s0 + $0x134] sm:$0xf] }
  0xd1   :  { %1199 = vmatmul.bf16.gmra.mxu1 %v1628_v47  ;;  %1242 = vmatmul.bf16.gmra.mxu2 %v1632_v49  ;;  %v2720_v57 = vadd.f32 %v1149_v32, %v1107_v54  ;;  %v1712_v54 = vor.u32 %v2081_v45, %v1711_v44 }
  0xd2   :  { %1285 = vmatmul.bf16.gmra.mxu3 %v1636_v42  ;;  %v1152_v56 = vpop.f32.mrf.mxu0  ;;  %v2080_v42 = vld [vmem:[%s3027_s0 + $0x158] sm:$0xf0] }
  0xd3   :  { %v1704_v50 = vor.u32 %v2080_v42, %v1703_v40 }
  0xd4   :  { %v1066_v59 = vpop.f32.mrf.mxu2 }
  0xd5   :  { %v1109_v58 = vpop.f32.mrf.mxu3  ;;  %1328 = vmatmul.bf16.gmra.mxu0 %v1640_v7  ;;  %v1067_v60 = vadd.f32 %v1066_v59, %v1024_v55 }
  0xd6   :  { %v1025_v61 = vpop.f32.mrf.mxu1 }
  0xd7   :  { %v1110_v62 = vadd.f32 %v1109_v58, %v1067_v60  ;;  %v1026_v0 = vadd.f32 %v1025_v61, %v982_v9  ;;  %v1661_v9 = vld [vmem:[%s3027_s0 + $0x10c] sm:$0xf0] }
  0xd8   :  { %v1664_v20 = vor.u32 %v2066_v5, %v1661_v9  ;;  %v2085_v5 = vld [vmem:[%s3027_s0 + $0x184] sm:$0xf] }
  0xd9   :  { %v2731_v10 = vadd.f32 %v1152_v56, %v1110_v62 }
  0xda   :  { %v1154_v1 = vpop.f32.mrf.mxu0 }
  0xdc   :  { %v1068_v17 = vpop.f32.mrf.mxu2 }
  0xdd   :  { %v1111_v11 = vpop.f32.mrf.mxu3  ;;  %v1069_v18 = vadd.f32 %v1068_v17, %v1026_v0  ;;  %v2090_v17 = vld [vmem:[%s3027_s0 + $0x1a8] sm:$0xf0] }
  0xde   :  { %v1028_v22 = vpop.f32.mrf.mxu1 }
  0xdf   :  { %v1112_v24 = vadd.f32 %v1111_v11, %v1069_v18  ;;  %v1029_v25 = vadd.f32 %v1028_v22, %v2628_v48  ;;  %v1705_v48 = vld [vmem:[%s3027_s0 + $0x15c] sm:$0xf0]  ;;  %v2084_v11 = vld [vmem:[%s3027_s0 + $0x17c] sm:$0xf] }
  0xe0   :  { %v1708_v43 = vor.u32 %v2076_v35, %v1705_v48 }
  0xe1   :  { %1204 = vmatmul.bf16.gmra.mxu1 %v1664_v20  ;;  %1247 = vmatmul.bf16.gmra.mxu2 %v1668_v21  ;;  %v2749_v27 = vadd.f32 %v1154_v1, %v1112_v24  ;;  %v1748_v24 = vor.u32 %v2090_v17, %v1747_v16 }
  0xe2   :  { %1290 = vmatmul.bf16.gmra.mxu3 %v1672_v14  ;;  %v1157_v26 = vpop.f32.mrf.mxu0  ;;  %v2089_v14 = vld [vmem:[%s3027_s0 + $0x1a0] sm:$0xf0] }
  0xe3   :  { %v1740_v22 = vor.u32 %v2089_v14, %v1739_v13 }
  0xe4   :  { %v1071_v29 = vpop.f32.mrf.mxu2 }
  0xe5   :  { %v1114_v28 = vpop.f32.mrf.mxu3  ;;  %1333 = vmatmul.bf16.gmra.mxu0 %v1676_v23  ;;  %v1072_v30 = vadd.f32 %v1071_v29, %v1029_v25 }
  0xe6   :  { %v1030_v31 = vpop.f32.mrf.mxu1 }
  0xe7   :  { %v1115_v32 = vadd.f32 %v1114_v28, %v1072_v30  ;;  %v1031_v33 = vadd.f32 %v1030_v31, %v2632_v52  ;;  %v1697_v52 = vld [vmem:[%s3027_s0 + $0x154] sm:$0xf0] }
  0xe8   :  { %v1700_v49 = vor.u32 %v2075_v37, %v1697_v52  ;;  %v404_v52 = vunpack.c.h.b16 %v2624_v41 }
  0xe9   :  { %v2761_v38 = vadd.f32 %v1157_v26, %v1115_v32  ;;  %v80_v32 = vld [vmem:[%s3027_s0 + $0x1c8] sm:$0x11] }
  0xea   :  { %v1159_v34 = vpop.f32.mrf.mxu0  ;;  %v406_v37 = vunpack.c.h.b16 %v80_v32  ;;  %v405_v40 = vunpack.c.l.b16 %v80_v32 }
  0xec   :  { %v1073_v46 = vpop.f32.mrf.mxu2  ;;  %v469_v45 = vpack.c.b16 %v406_v37, %v406_v37 }
  0xed   :  { %v1116_v39 = vpop.f32.mrf.mxu3  ;;  %v1074_v47 = vadd.f32 %v1073_v46, %v1031_v33 }
  0xee   :  { %v1033_v7 = vpop.f32.mrf.mxu1 }
  0xef   :  { %v1117_v55 = vadd.f32 %v1116_v39, %v1074_v47  ;;  %v1034_v56 = vadd.f32 %v1033_v7, %v2662_v2  ;;  %v1741_v2 = vld [vmem:[%s3027_s0 + $0x1a4] sm:$0xf0]  ;;  %v81_v39 = vld [vmem:[%s3027_s0 + $0x1d0] sm:$0x1] }
  0xf0   :  { %v1744_v15 = vor.u32 %v2085_v5, %v1741_v2 }
  0xf1   :  { %1209 = vmatmul.bf16.gmra.mxu1 %v1700_v49  ;;  %1252 = vmatmul.bf16.gmra.mxu2 %v1704_v50  ;;  %v2779_v59 = vadd.f32 %v1159_v34, %v1117_v55  ;;  %v467_v49 = vpack.c.b16 %v404_v52, %v404_v52  ;;  %v468_v50 = vpack.c.b16 %v405_v40, %v405_v40 }
  0xf2   :  { %1295 = vmatmul.bf16.gmra.mxu3 %v1708_v43  ;;  %v1162_v58 = vpop.f32.mrf.mxu0  ;;  %v407_v43 = vunpack.c.l.b16 %v81_v39 }
  0xf4   :  { %v1076_v61 = vpop.f32.mrf.mxu2 }
  0xf5   :  { %v1119_v60 = vpop.f32.mrf.mxu3  ;;  %1338 = vmatmul.bf16.gmra.mxu0 %v1712_v54  ;;  %v1077_v62 = vadd.f32 %v1076_v61, %v1034_v56  ;;  %v470_v54 = vpack.c.b16 %v407_v43, %v407_v43 }
  0xf6   :  { %v1035_v0 = vpop.f32.mrf.mxu1 }
  0xf7   :  { %v1120_v1 = vadd.f32 %v1119_v60, %v1077_v62  ;;  %v1036_v3 = vadd.f32 %v1035_v0, %v2666_v8  ;;  %v1733_v8 = vld [vmem:[%s3027_s0 + $0x19c] sm:$0xf0] }
  0xf8   :  { %v1736_v21 = vor.u32 %v2084_v11, %v1733_v8 }
  0xf9   :  { %v2791_v9 = vadd.f32 %v1162_v58, %v1120_v1 }
  0xfa   :  { %v1164_v4 = vpop.f32.mrf.mxu0 }
  0xfc   :  { %v1078_v18 = vpop.f32.mrf.mxu2 }
  0xfd   :  { %v1121_v12 = vpop.f32.mrf.mxu3  ;;  %v1079_v20 = vadd.f32 %v1078_v18, %v1036_v3 }
  0xfe   :  { %v1038_v23 = vpop.f32.mrf.mxu1 }
  0xff   :  { %v1122_v25 = vadd.f32 %v1121_v12, %v1079_v20  ;;  %v1039_v30 = vadd.f32 %v1038_v23, %v2630_v51 }
 0x101   :  { %1214 = vmatmul.bf16.gmra.mxu1 %v1736_v21  ;;  %1257 = vmatmul.bf16.gmra.mxu2 %v1740_v22  ;;  %v2808_v28 = vadd.f32 %v1164_v4, %v1122_v25 }
 0x102   :  { %1300 = vmatmul.bf16.gmra.mxu3 %v1744_v15  ;;  %v1167_v26 = vpop.f32.mrf.mxu0 }
 0x104   :  { %v1081_v31 = vpop.f32.mrf.mxu2 }
 0x105   :  { %v1124_v29 = vpop.f32.mrf.mxu3  ;;  %1343 = vmatmul.bf16.gmra.mxu0 %v1748_v24  ;;  %v1082_v33 = vadd.f32 %v1081_v31, %v1039_v30 }
 0x106   :  { %v1040_v34 = vpop.f32.mrf.mxu1 }
 0x107   :  { %v1125_v35 = vadd.f32 %v1124_v29, %v1082_v33  ;;  %v1041_v44 = vadd.f32 %v1040_v34, %v2660_v63 }
 0x109   :  { %v2818_v42 = vadd.f32 %v1167_v26, %v1125_v35 }
 0x10a   :  { %v1169_v48 = vpop.f32.mrf.mxu0 }
 0x10c   :  { %v1083_v46 = vpop.f32.mrf.mxu2 }
 0x10d   :  { %v1126_v51 = vpop.f32.mrf.mxu3  ;;  %v1084_v47 = vadd.f32 %v1083_v46, %v1041_v44 }
 0x10e   :  { %v1043_v7 = vpop.f32.mrf.mxu1 }
 0x10f   :  { %v1127_v55 = vadd.f32 %v1126_v51, %v1084_v47  ;;  %v1044_v60 = vadd.f32 %v1043_v7, %v2664_v6 }
 0x111   :  { %1219 = vmatmul.bf16.gmra.mxu1 %v467_v49  ;;  %1262 = vmatmul.bf16.gmra.mxu2 %v468_v50  ;;  %v2821_v41 = vadd.f32 %v1169_v48, %v1127_v55 }
 0x112   :  { %1305 = vmatmul.bf16.gmra.mxu3 %v469_v45  ;;  %v1172_v56 = vpop.f32.mrf.mxu0 }
 0x114   :  { %v1086_v61 = vpop.f32.mrf.mxu2 }
 0x115   :  { %v1129_v58 = vpop.f32.mrf.mxu3  ;;  %1348 = vmatmul.bf16.gmra.mxu0 %v470_v54  ;;  %v1087_v63 = vadd.f32 %v1086_v61, %v1044_v60 }
 0x116   :  { %v1045_v62 = vpop.f32.mrf.mxu1 }
 0x117   :  { %v1130_v0 = vadd.f32 %v1129_v58, %v1087_v63  ;;  %v1046_v5 = vadd.f32 %v1045_v62, %v2692_v19 }
 0x119   :  { %v2824_v3 = vadd.f32 %v1172_v56, %v1130_v0 }
 0x11a   :  { %v1174_v1 = vpop.f32.mrf.mxu0 }
 0x11c   :  { %v1088_v2 = vpop.f32.mrf.mxu2 }
 0x11d   :  { %v1131_v4 = vpop.f32.mrf.mxu3  ;;  %v1089_v11 = vadd.f32 %v1088_v2, %v1046_v5 }
 0x11e   :  { %v1048_v12 = vpop.f32.mrf.mxu1 }
 0x11f   :  { %v1132_v8 = vadd.f32 %v1131_v4, %v1089_v11  ;;  %v1049_v6 = vadd.f32 %v1048_v12, %v2634_v53 }
 0x121   :  { %v2827_v14 = vadd.f32 %v1174_v1, %v1132_v8 }
 0x122   :  { %v1177_v13 = vpop.f32.mrf.mxu0 }
 0x124   :  { %v1091_v16 = vpop.f32.mrf.mxu2 }
 0x125   :  { %v1134_v15 = vpop.f32.mrf.mxu3  ;;  %v1092_v17 = vadd.f32 %v1091_v16, %v1049_v6 }
 0x126   :  { %v1050_v18 = vpop.f32.mrf.mxu1 }
 0x127   :  { %v1135_v20 = vadd.f32 %v1134_v15, %v1092_v17 }
 0x129   :  { %v2830_v22 = vadd.f32 %v1177_v13, %v1135_v20 }
 0x12a   :  { %v1179_v21 = vpop.f32.mrf.mxu0 }
 0x12c   :  { %v1093_v24 = vpop.f32.mrf.mxu2 }
 0x12d   :  { %v1136_v23 = vpop.f32.mrf.mxu3 }
 0x12e   :  { %v1190_v19 = vpop.f32.mrf.mxu1 }
 0x12f   :  { %v1191_v25 = vadd.f32 %v1190_v19, %v2703_v36 }
 0x132   :  { %v1319_v26 = vpop.f32.mrf.mxu0 }
 0x134   :  { %v1233_v30 = vpop.f32.mrf.mxu2 }
 0x135   :  { %v1276_v29 = vpop.f32.mrf.mxu3  ;;  %v1234_v31 = vadd.f32 %v1233_v30, %v1191_v25 }
 0x136   :  { %v1192_v32 = vpop.f32.mrf.mxu1 }
 0x137   :  { %v1277_v33 = vadd.f32 %v1276_v29, %v1234_v31  ;;  %v1193_v53 = vadd.f32 %v1192_v32, %v2720_v57 }
 0x139   :  { %v2834_v35 = vadd.f32 %v1319_v26, %v1277_v33 }
 0x13a   :  { %v1321_v34 = vpop.f32.mrf.mxu0 }
 0x13b   :  { %v1354_v45 = vsel %vm1353_vm0, %v2834_v35, 0.0 }
 0x13c   :  { %v1235_v37 = vpop.f32.mrf.mxu2 }
 0x13d   :  { %v1278_v48 = vpop.f32.mrf.mxu3  ;;  %v1236_v39 = vadd.f32 %v1235_v37, %v1193_v53 }
 0x13e   :  { %v1195_v52 = vpop.f32.mrf.mxu1 }
 0x13f   :  { %v1279_v40 = vadd.f32 %v1278_v48, %v1236_v39  ;;  %v1196_v51 = vadd.f32 %v1195_v52, %v2731_v10 }
 0x141   :  { %v2837_v36 = vadd.f32 %v1321_v34, %v1279_v40 }
 0x142   :  { %v1324_v43 = vpop.f32.mrf.mxu0 }
 0x143   :  { %v1355_v57 = vsel %vm1353_vm0, %v2837_v36, 0.0 }
 0x144   :  { %v1356_v46 = vadd.f32 %v1355_v57, %v1354_v45  ;;  %v1238_v47 = vpop.f32.mrf.mxu2 }
 0x145   :  { %v1281_v44 = vpop.f32.mrf.mxu3  ;;  %v1239_v49 = vadd.f32 %v1238_v47, %v1196_v51 }
 0x146   :  { %v1197_v50 = vpop.f32.mrf.mxu1 }
 0x147   :  { %v1282_v7 = vadd.f32 %v1281_v44, %v1239_v49  ;;  %v1198_v58 = vadd.f32 %v1197_v50, %v2749_v27 }
 0x149   :  { %v2843_v55 = vadd.f32 %v1324_v43, %v1282_v7 }
 0x14a   :  { %v1326_v54 = vpop.f32.mrf.mxu0 }
 0x14b   :  { %v1357_v56 = vsel %vm1353_vm0, %v2843_v55, 0.0 }
 0x14c   :  { %v1358_v60 = vadd.f32 %v1357_v56, %v1356_v46  ;;  %v1240_v61 = vpop.f32.mrf.mxu2 }
 0x14d   :  { %v1283_v10 = vpop.f32.mrf.mxu3  ;;  %v1241_v63 = vadd.f32 %v1240_v61, %v1198_v58 }
 0x14e   :  { %v1200_v62 = vpop.f32.mrf.mxu1 }
 0x14f   :  { %v1284_v0 = vadd.f32 %v1283_v10, %v1241_v63  ;;  %v1201_v11 = vadd.f32 %v1200_v62, %v2761_v38 }
 0x151   :  { %v2848_v4 = vadd.f32 %v1326_v54, %v1284_v0 }
 0x152   :  { %v1329_v1 = vpop.f32.mrf.mxu0 }
 0x153   :  { %v1359_v2 = vsel %vm1353_vm0, %v2848_v4, 0.0 }
 0x154   :  { %v1360_v12 = vadd.f32 %v1359_v2, %v1358_v60  ;;  %v1243_v8 = vpop.f32.mrf.mxu2 }
 0x155   :  { %v1286_v5 = vpop.f32.mrf.mxu3  ;;  %v1244_v13 = vadd.f32 %v1243_v8, %v1201_v11 }
 0x156   :  { %v1202_v15 = vpop.f32.mrf.mxu1 }
 0x157   :  { %v1287_v6 = vadd.f32 %v1286_v5, %v1244_v13  ;;  %v1203_v20 = vadd.f32 %v1202_v15, %v2779_v59 }
 0x159   :  { %v2853_v16 = vadd.f32 %v1329_v1, %v1287_v6 }
 0x15a   :  { %v1331_v27 = vpop.f32.mrf.mxu0 }
 0x15b   :  { %v1361_v18 = vsel %vm1353_vm0, %v2853_v16, 0.0 }
 0x15c   :  { %v1362_v21 = vadd.f32 %v1361_v18, %v1360_v12  ;;  %v1245_v23 = vpop.f32.mrf.mxu2 }
 0x15d   :  { %v1288_v17 = vpop.f32.mrf.mxu3  ;;  %v1246_v24 = vadd.f32 %v1245_v23, %v1203_v20 }
 0x15e   :  { %v1205_v19 = vpop.f32.mrf.mxu1 }
 0x15f   :  { %v1289_v25 = vadd.f32 %v1288_v17, %v1246_v24  ;;  %v1206_v31 = vadd.f32 %v1205_v19, %v2791_v9 }
 0x161   :  { %v2858_v26 = vadd.f32 %v1331_v27, %v1289_v25 }
 0x162   :  { %v1334_v38 = vpop.f32.mrf.mxu0 }
 0x163   :  { %v1363_v30 = vsel %vm1353_vm0, %v2858_v26, 0.0 }
 0x164   :  { %v1364_v32 = vadd.f32 %v1363_v30, %v1362_v21  ;;  %v1248_v33 = vpop.f32.mrf.mxu2 }
 0x165   :  { %v1291_v29 = vpop.f32.mrf.mxu3  ;;  %v1249_v53 = vadd.f32 %v1248_v33, %v1206_v31 }
 0x166   :  { %v1207_v34 = vpop.f32.mrf.mxu1 }
 0x167   :  { %v1292_v48 = vadd.f32 %v1291_v29, %v1249_v53  ;;  %v1208_v40 = vadd.f32 %v1207_v34, %v2808_v28 }
 0x169   :  { %v2863_v37 = vadd.f32 %v1334_v38, %v1292_v48 }
 0x16a   :  { %v1336_v59 = vpop.f32.mrf.mxu0 }
 0x16b   :  { %v1365_v52 = vsel %vm1353_vm0, %v2863_v37, 0.0 }
 0x16c   :  { %v1366_v51 = vadd.f32 %v1365_v52, %v1364_v32  ;;  %v1250_v43 = vpop.f32.mrf.mxu2 }
 0x16d   :  { %v1293_v39 = vpop.f32.mrf.mxu3  ;;  %v1251_v44 = vadd.f32 %v1250_v43, %v1208_v40 }
 0x16e   :  { %v1210_v45 = vpop.f32.mrf.mxu1 }
 0x16f   :  { %v1294_v57 = vadd.f32 %v1293_v39, %v1251_v44  ;;  %v1211_v50 = vadd.f32 %v1210_v45, %v2818_v42 }
 0x171   :  { %v2868_v46 = vadd.f32 %v1336_v59, %v1294_v57 }
 0x172   :  { %v1339_v9 = vpop.f32.mrf.mxu0 }
 0x173   :  { %v1367_v49 = vsel %vm1353_vm0, %v2868_v46, 0.0 }
 0x174   :  { %v1368_v7 = vadd.f32 %v1367_v49, %v1366_v51  ;;  %v1253_v54 = vpop.f32.mrf.mxu2 }
 0x175   :  { %v1296_v47 = vpop.f32.mrf.mxu3  ;;  %v1254_v10 = vadd.f32 %v1253_v54, %v1211_v50 }
 0x176   :  { %v1212_v56 = vpop.f32.mrf.mxu1 }
 0x177   :  { %v1297_v58 = vadd.f32 %v1296_v47, %v1254_v10  ;;  %v1213_v62 = vadd.f32 %v1212_v56, %v2821_v41 }
 0x179   :  { %v1340_v60 = vadd.f32 %v1339_v9, %v1297_v58 }
 0x17a   :  { %v1341_v28 = vpop.f32.mrf.mxu0 }
 0x17b   :  { %v1369_v63 = vsel %vm1353_vm0, %v1340_v60, 0.0 }
 0x17c   :  { %v1370_v0 = vadd.f32 %v1369_v63, %v1368_v7  ;;  %v1255_v1 = vpop.f32.mrf.mxu2 }
 0x17d   :  { %v1298_v61 = vpop.f32.mrf.mxu3  ;;  %v1256_v5 = vadd.f32 %v1255_v1, %v1213_v62 }
 0x17e   :  { %v1215_v2 = vpop.f32.mrf.mxu1 }
 0x17f   :  { %v1299_v11 = vadd.f32 %v1298_v61, %v1256_v5  ;;  %v1216_v15 = vadd.f32 %v1215_v2, %v2824_v3 }
 0x181   :  { %v1342_v8 = vadd.f32 %v1341_v28, %v1299_v11 }
 0x182   :  { %v1344_v12 = vpop.f32.mrf.mxu0 }
 0x183   :  { %v1371_v13 = vsel %vm1353_vm0, %v1342_v8, 0.0 }
 0x184   :  { %v1372_v6 = vadd.f32 %v1371_v13, %v1370_v0  ;;  %v1258_v27 = vpop.f32.mrf.mxu2 }
 0x185   :  { %v1301_v42 = vpop.f32.mrf.mxu3  ;;  %v1259_v17 = vadd.f32 %v1258_v27, %v1216_v15 }
 0x186   :  { %v1217_v18 = vpop.f32.mrf.mxu1 }
 0x187   :  { %v1302_v20 = vadd.f32 %v1301_v42, %v1259_v17  ;;  %v1218_v19 = vadd.f32 %v1217_v18, %v2827_v14 }
 0x189   :  { %v1345_v23 = vadd.f32 %v1344_v12, %v1302_v20 }
 0x18a   :  { %v1346_v21 = vpop.f32.mrf.mxu0 }
 0x18b   :  { %v1373_v24 = vsel %vm1353_vm0, %v1345_v23, 0.0 }
 0x18c   :  { %v1374_v25 = vadd.f32 %v1373_v24, %v1372_v6  ;;  %v1260_v38 = vpop.f32.mrf.mxu2 }
 0x18d   :  { %v1303_v41 = vpop.f32.mrf.mxu3  ;;  %v1261_v29 = vadd.f32 %v1260_v38, %v1218_v19 }
 0x18e   :  { %v1220_v30 = vpop.f32.mrf.mxu1 }
 0x18f   :  { %v1304_v31 = vadd.f32 %v1303_v41, %v1261_v29  ;;  %v1221_v34 = vadd.f32 %v1220_v30, %v2830_v22 }
 0x191   :  { %v1347_v33 = vadd.f32 %v1346_v21, %v1304_v31 }
 0x192   :  { %v1349_v32 = vpop.f32.mrf.mxu0 }
 0x193   :  { %v1375_v53 = vsel %vm1353_vm0, %v1347_v33, 0.0 }
 0x194   :  { %v1376_v48 = vadd.f32 %v1375_v53, %v1374_v25  ;;  %v1263_v59 = vpop.f32.mrf.mxu2 }
 0x195   :  { %v1306_v3 = vpop.f32.mrf.mxu3  ;;  %v1264_v39 = vadd.f32 %v1263_v59, %v1221_v34 }
 0x196   :  { %v1222_v52 = vpop.f32.mrf.mxu1 }
 0x197   :  { %v1307_v40 = vadd.f32 %v1306_v3, %v1264_v39 }
 0x199   :  { %v1350_v14 = vadd.f32 %v1349_v32, %v1307_v40 }
 0x19a   :  { %v1351_v51 = vpop.f32.mrf.mxu0 }
 0x19b   :  { %v1378_v44 = vsel %vm1377_vm1, %v1350_v14, 0.0 }
 0x19c   :  { %v1379_v45 = vadd.f32 %v1378_v44, %v1376_v48  ;;  %v1265_v57 = vpop.f32.mrf.mxu2 }
 0x19d   :  { %v1308_v43 = vpop.f32.mrf.mxu3 }
 0x19e   :  { %v1380_v9 = vrot.slane %v1379_v45, 4 }
 0x1a0   :  { %v1381_v47 = vadd.f32 %v1380_v9, %v1379_v45 }
 0x1a2   :  { %v1382_v49 = vrot.slane %v1381_v47, 2 }
 0x1a4   :  { %v1383_v50 = vadd.f32 %v1382_v49, %v1381_v47 }
 0x1a6   :  { %v1384_v7 = vrot.slane %v1383_v50, 1 }
 0x1a8   :  { %v1385_v54 = vadd.f32 %v1384_v7, %v1383_v50 }
 0x1aa   :  { %v1386_v22 = vmul.f32 0.010204081, %v1385_v54 }
 0x1ac   :  { %v2883_v10 = vsub.f32 %v2834_v35, %v1386_v22  ;;  %v2886_v56 = vsub.f32 %v2837_v36, %v1386_v22  ;;  %v2889_v58 = vsub.f32 %v2843_v55, %v1386_v22  ;;  %v2892_v28 = vsub.f32 %v2848_v4, %v1386_v22 }
 0x1ad   :  { %v2895_v61 = vsub.f32 %v2853_v16, %v1386_v22  ;;  %v2898_v63 = vsub.f32 %v2858_v26, %v1386_v22  ;;  %v2901_v62 = vsub.f32 %v2863_v37, %v1386_v22  ;;  %v2904_v35 = vsub.f32 %v2868_v46, %v1386_v22 }
 0x1ae   :  { %v2906_v36 = vsub.f32 %v1340_v60, %v1386_v22  ;;  %v2908_v0 = vsub.f32 %v1342_v8, %v1386_v22  ;;  %v2910_v55 = vsub.f32 %v1345_v23, %v1386_v22  ;;  %v2912_v4 = vsub.f32 %v1347_v33, %v1386_v22 }
 0x1af   :  { %v2914_v1 = vsub.f32 %v1350_v14, %v1386_v22  ;;  %v1400_v16 = vmul.f32 %v2883_v10, %v2883_v10  ;;  %v1401_v26 = vmul.f32 %v2886_v56, %v2886_v56  ;;  %v1402_v37 = vmul.f32 %v2889_v58, %v2889_v58 }
 0x1b0   :  { %v1403_v46 = vmul.f32 %v2892_v28, %v2892_v28  ;;  %v1404_v11 = vmul.f32 %v2895_v61, %v2895_v61  ;;  %v1405_v42 = vmul.f32 %v2898_v63, %v2898_v63  ;;  %v1406_v6 = vmul.f32 %v2901_v62, %v2901_v62 }
 0x1b1   :  { %v1413_v60 = vsel %vm1353_vm0, %v1400_v16, 0.0  ;;  %v1414_v5 = vsel %vm1353_vm0, %v1401_v26, 0.0  ;;  %v1416_v12 = vsel %vm1353_vm0, %v1402_v37, 0.0  ;;  %v1407_v18 = vmul.f32 %v2904_v35, %v2904_v35  ;;  %v2187_v37 = vld [vmem:[%s3028_s2] ss:$0 sm:$0xff] }
 0x1b2   :  { %v1415_v2 = vadd.f32 %v1414_v5, %v1413_v60  ;;  %v1418_v13 = vsel %vm1353_vm0, %v1403_v46, 0.0  ;;  %v1420_v27 = vsel %vm1353_vm0, %v1404_v11, 0.0  ;;  %v1422_v20 = vsel %vm1353_vm0, %v1405_v42, 0.0 }
 0x1b3   :  { %v1408_v23 = vmul.f32 %v2906_v36, %v2906_v36  ;;  %v1424_v41 = vsel %vm1353_vm0, %v1406_v6, 0.0  ;;  %v1409_v19 = vmul.f32 %v2908_v0, %v2908_v0  ;;  %v1426_v25 = vsel %vm1353_vm0, %v1407_v18, 0.0 }
 0x1b4   :  { %v1417_v8 = vadd.f32 %v1416_v12, %v1415_v2  ;;  %v1410_v29 = vmul.f32 %v2910_v55, %v2910_v55  ;;  %v1411_v32 = vmul.f32 %v2912_v4, %v2912_v4  ;;  %v1412_v53 = vmul.f32 %v2914_v1, %v2914_v1 }
 0x1b5   :  { %v1428_v30 = vsel %vm1353_vm0, %v1408_v23, 0.0  ;;  %v1430_v33 = vsel %vm1353_vm0, %v1409_v19, 0.0 }
 0x1b6   :  { %v1419_v15 = vadd.f32 %v1418_v13, %v1417_v8  ;;  %v1432_v34 = vsel %vm1353_vm0, %v1410_v29, 0.0  ;;  %v1434_v59 = vsel %vm1353_vm0, %v1411_v32, 0.0  ;;  %v1436_v52 = vsel %vm1377_vm1, %v1412_v53, 0.0 }
 0x1b8   :  { %v1421_v17 = vadd.f32 %v1420_v27, %v1419_v15 }
 0x1ba   :  { %v1423_v21 = vadd.f32 %v1422_v20, %v1421_v17 }
 0x1bc   :  { %v1425_v24 = vadd.f32 %v1424_v41, %v1423_v21 }
 0x1be   :  { %v1427_v38 = vadd.f32 %v1426_v25, %v1425_v24 }
 0x1c0   :  { %v1429_v31 = vadd.f32 %v1428_v30, %v1427_v38 }
 0x1c2   :  { %v1431_v3 = vadd.f32 %v1430_v33, %v1429_v31 }
 0x1c4   :  { %v1433_v48 = vadd.f32 %v1432_v34, %v1431_v3 }
 0x1c6   :  { %v1435_v39 = vadd.f32 %v1434_v59, %v1433_v48 }
 0x1c8   :  { %v1437_v40 = vadd.f32 %v1436_v52, %v1435_v39 }
 0x1ca   :  { %v1438_v51 = vrot.slane %v1437_v40, 4 }
 0x1cc   :  { %v1439_v14 = vadd.f32 %v1438_v51, %v1437_v40 }
 0x1ce   :  { %v1440_v43 = vrot.slane %v1439_v14, 2 }
 0x1d0   :  { %v1441_v44 = vadd.f32 %v1440_v43, %v1439_v14 }
 0x1d2   :  { %v1442_v45 = vrot.slane %v1441_v44, 1 }
 0x1d4   :  { %v1443_v57 = vadd.f32 %v1442_v45, %v1441_v44 }
 0x1d6   :  { %v1444_v9 = vmul.f32 0.010204081, %v1443_v57 }
 0x1d8   :  { %v1445_v47 = vadd.f32 1e-05, %v1444_v9 }
 0x1da   :  { %2189 = vrsqrt.f32 %v1445_v47  ;;  %vm1452_vm3 = vweird.f32 %v1445_v47 }
 0x1e0   :  { %v2190_v49 = vpop.eup %2189 }
 0x1e1   :  { %v1447_v50 = vmul.f32 %v2190_v49, %v1445_v47  ;;  %vm1453_vm2 = vweird.f32 %v2190_v49 }
 0x1e2   :  { %vm1454_vm4 = vmor %vm1452_vm3, %vm1453_vm2 }
 0x1e3   :  { %v1448_v7 = vmul.f32 %v2190_v49, %v1447_v50 }
 0x1e5   :  { %v1449_v54 = vmul.f32 0.5, %v1448_v7 }
 0x1e7   :  { %v1450_v22 = vsub.f32 1.5, %v1449_v54 }
 0x1e9   :  { %v1451_v16 = vmul.f32 %v2190_v49, %v1450_v22 }
 0x1eb   :  { %v1455_v26 = vsel %vm1454_vm4, %v2190_v49, %v1451_v16 }
 0x1ec   :  { %v1456_v46 = vmul.f32 %v1455_v26, %v2883_v10  ;;  %v1457_v60 = vmul.f32 %v1455_v26, %v2886_v56  ;;  %v1458_v5 = vmul.f32 %v1455_v26, %v2889_v58  ;;  %v1459_v2 = vmul.f32 %v1455_v26, %v2892_v28  ;;  %v2188_v58 = vld [vmem:[%s3029_s3] ss:$0 sm:$0xff] }
 0x1ed   :  { %v1460_v11 = vmul.f32 %v1455_v26, %v2895_v61  ;;  %v1461_v12 = vmul.f32 %v1455_v26, %v2898_v63  ;;  %v1462_v8 = vmul.f32 %v1455_v26, %v2901_v62  ;;  %v1463_v42 = vmul.f32 %v1455_v26, %v2904_v35 }
 0x1ee   :  { %v1464_v13 = vmul.f32 %v1455_v26, %v2906_v36  ;;  %v1465_v15 = vmul.f32 %v1455_v26, %v2908_v0  ;;  %v1466_v10 = vmul.f32 %v1455_v26, %v2910_v55  ;;  %v1467_v56 = vmul.f32 %v1455_v26, %v2912_v4 }
 0x1ef   :  { %v1468_v28 = vmul.f32 %v1455_v26, %v2914_v1  ;;  %v1473_v61 = vmul.f32 %v2187_v37, %v1456_v46  ;;  %v1474_v63 = vmul.f32 %v2187_v37, %v1457_v60  ;;  %v1475_v6 = vmul.f32 %v2187_v37, %v1458_v5 }
 0x1f0   :  { %v1476_v62 = vmul.f32 %v2187_v37, %v1459_v2  ;;  %v1477_v27 = vmul.f32 %v2187_v37, %v1460_v11  ;;  %v1478_v35 = vmul.f32 %v2187_v37, %v1461_v12  ;;  %v1479_v17 = vmul.f32 %v2187_v37, %v1462_v8 }
 0x1f1   :  { %v1480_v36 = vmul.f32 %v2187_v37, %v1463_v42  ;;  %v1490_v18 = vadd.f32 %v2188_v58, %v1473_v61  ;;  %v1491_v0 = vadd.f32 %v2188_v58, %v1474_v63  ;;  %v1481_v20 = vmul.f32 %v2187_v37, %v1464_v13 }
 0x1f2   :  { %v1492_v55 = vadd.f32 %v2188_v58, %v1475_v6  ;;  %v1493_v21 = vadd.f32 %v2188_v58, %v1476_v62  ;;  %v1494_v4 = vadd.f32 %v2188_v58, %v1477_v27  ;;  %v1482_v23 = vmul.f32 %v2187_v37, %v1465_v15 }
 0x1f3   :  { %v1495_v41 = vadd.f32 %v2188_v58, %v1478_v35  ;;  %v1483_v24 = vmul.f32 %v2187_v37, %v1466_v10  ;;  %v1484_v19 = vmul.f32 %v2187_v37, %v1467_v56  ;;  %v1496_v25 = vadd.f32 %v2188_v58, %v1479_v17 }
 0x1f4   :  { %v1503_v1 = vmax.f32 %v1490_v18, 0.0  ;;  %v1497_v38 = vadd.f32 %v2188_v58, %v1480_v36  ;;  %v1504_v29 = vmax.f32 %v1491_v0, 0.0  ;;  %v1505_v30 = vmax.f32 %v1492_v55, 0.0 }
 0x1f5   :  { %v1506_v31 = vmax.f32 %v1493_v21, 0.0  ;;  %v1485_v32 = vmul.f32 %v2187_v37, %v1468_v28  ;;  %v1498_v33 = vadd.f32 %v2188_v58, %v1481_v20  ;;  %v1507_v3 = vmax.f32 %v1494_v4, 0.0 }
 0x1f6   :  { %1516 = vst.msk [vmem:[%s3030_s4] sm:$0xff] %vm1353_vm0, %v1503_v1  ;;  %v1499_v53 = vadd.f32 %v2188_v58, %v1482_v23  ;;  %v1508_v34 = vmax.f32 %v1495_v41, 0.0  ;;  %v1500_v48 = vadd.f32 %v2188_v58, %v1483_v24  ;;  %v1509_v59 = vmax.f32 %v1496_v25, 0.0 }
 0x1f7   :  { %1517 = vst.msk [vmem:[%s3030_s4 + $0x8] sm:$0xff] %vm1353_vm0, %v1504_v29  ;;  %v1501_v39 = vadd.f32 %v2188_v58, %v1484_v19  ;;  %v1510_v52 = vmax.f32 %v1497_v38, 0.0  ;;  %v1502_v40 = vadd.f32 %v2188_v58, %v1485_v32  ;;  %v1511_v51 = vmax.f32 %v1498_v33, 0.0 }
 0x1f8   :  { %1518 = vst.msk [vmem:[%s3030_s4 + $0x10] sm:$0xff] %vm1353_vm0, %v1505_v30  ;;  %v1512_v14 = vmax.f32 %v1499_v53, 0.0  ;;  %v1513_v43 = vmax.f32 %v1500_v48, 0.0 }
 0x1f9   :  { %1519 = vst.msk [vmem:[%s3030_s4 + $0x18] sm:$0xff] %vm1353_vm0, %v1506_v31  ;;  %v1514_v44 = vmax.f32 %v1501_v39, 0.0  ;;  %v1515_v45 = vmax.f32 %v1502_v40, 0.0 }
 0x1fa   :  { %1520 = vst.msk [vmem:[%s3030_s4 + $0x20] sm:$0xff] %vm1353_vm0, %v1507_v3 }
 0x1fb   :  { %1521 = vst.msk [vmem:[%s3030_s4 + $0x28] sm:$0xff] %vm1353_vm0, %v1508_v34 }
 0x1fc   :  { %1522 = vst.msk [vmem:[%s3030_s4 + $0x30] sm:$0xff] %vm1353_vm0, %v1509_v59 }
 0x1fd   :  { %1523 = vst.msk [vmem:[%s3030_s4 + $0x38] sm:$0xff] %vm1353_vm0, %v1510_v52 }
 0x1fe   :  { %1524 = vst.msk [vmem:[%s3030_s4 + $0x40] sm:$0xff] %vm1353_vm0, %v1511_v51 }
 0x1ff   :  { %1525 = vst.msk [vmem:[%s3030_s4 + $0x48] sm:$0xff] %vm1353_vm0, %v1512_v14 }
 0x200   :  { %1526 = vst.msk [vmem:[%s3030_s4 + $0x50] sm:$0xff] %vm1353_vm0, %v1513_v43 }
 0x201   :  { %1527 = vst.msk [vmem:[%s3030_s4 + $0x58] sm:$0xff] %vm1353_vm0, %v1514_v44 }
 0x202   :  { %1528 = vst.msk [vmem:[%s3030_s4 + $0x60] sm:$0x3] %vm1377_vm1, %v1515_v45 }

// kernel: cnn_generator_forward.6
= control target key start
LH: loop header
LB: loop body
LE: loop exit
PB: predicated region body
PF: predicated region fallthrough
CT: control target
= control target key end

     0   :  { %vm2777_vm0 = vcmask 261120   ;;  %s7089_s1 = inlined_call_operand.vmem [shape: bf16[1024,32], index: 1, kind: input, shape index: {}]   ;;  %s7090_s0 = inlined_call_operand.vmem [shape: bf16[392,1024], index: 0, kind: input, shape index: {}]   ;;  %s7091_s2 = inlined_call_operand.vmem [shape: f32[1,32], index: 2, kind: input, shape index: {}]   ;;  %s7092_s3 = inlined_call_operand.vmem [shape: f32[1,32], index: 3, kind: input, shape index: {}]   ;;  %s7093_s4 = inlined_call_operand.vmem [shape: f32[392,32], index: 4, kind: output, shape index: {}]  }
   0x1   :  { %v4575_v0 = vld [vmem:[%s7089_s1 + $0x38] sm:$0xff]  ;;  %v4574_v4 = vld [vmem:[%s7089_s1 + $0x30] sm:$0xff]  ;;  %v4573_v8 = vld [vmem:[%s7089_s1 + $0x28] sm:$0xff] }
   0x2   :  { %v4583_v1 = vld [vmem:[%s7089_s1 + $0x78] sm:$0xff]  ;;  %1713 = vmatpush.bf16.msra.mxu0 %v4575_v0  ;;  %v4582_v5 = vld [vmem:[%s7089_s1 + $0x70] sm:$0xff]  ;;  %v4581_v9 = vld [vmem:[%s7089_s1 + $0x68] sm:$0xff] }
   0x3   :  { %v4591_v2 = vld [vmem:[%s7089_s1 + $0xb8] sm:$0xff]  ;;  %1846 = vmatpush.bf16.msra.mxu1 %v4583_v1  ;;  %v4590_v6 = vld [vmem:[%s7089_s1 + $0xb0] sm:$0xff]  ;;  %v4589_v10 = vld [vmem:[%s7089_s1 + $0xa8] sm:$0xff] }
   0x4   :  { %v4599_v3 = vld [vmem:[%s7089_s1 + $0xf8] sm:$0xff]  ;;  %1979 = vmatpush.bf16.msra.mxu2 %v4591_v2  ;;  %v4598_v7 = vld [vmem:[%s7089_s1 + $0xf0] sm:$0xff]  ;;  %v4597_v11 = vld [vmem:[%s7089_s1 + $0xe8] sm:$0xff] }
   0x5   :  { %2112 = vmatpush.bf16.msra.mxu3 %v4599_v3  ;;  %v4572_v12 = vld [vmem:[%s7089_s1 + $0x20] sm:$0xff]  ;;  %v4571_v16 = vld [vmem:[%s7089_s1 + $0x18] sm:$0xff]  ;;  %v4570_v20 = vld [vmem:[%s7089_s1 + $0x10] sm:$0xff] }
   0x6   :  { %1714 = vmatpush.bf16.msra.mxu0 %v4574_v4  ;;  %v4580_v13 = vld [vmem:[%s7089_s1 + $0x60] sm:$0xff]  ;;  %v4579_v17 = vld [vmem:[%s7089_s1 + $0x58] sm:$0xff]  ;;  %v4578_v21 = vld [vmem:[%s7089_s1 + $0x50] sm:$0xff] }
   0x7   :  { %1847 = vmatpush.bf16.msra.mxu1 %v4582_v5  ;;  %v4588_v14 = vld [vmem:[%s7089_s1 + $0xa0] sm:$0xff]  ;;  %v4587_v18 = vld [vmem:[%s7089_s1 + $0x98] sm:$0xff]  ;;  %v4586_v22 = vld [vmem:[%s7089_s1 + $0x90] sm:$0xff] }
   0x8   :  { %1980 = vmatpush.bf16.msra.mxu2 %v4590_v6  ;;  %v4596_v15 = vld [vmem:[%s7089_s1 + $0xe0] sm:$0xff]  ;;  %v4595_v19 = vld [vmem:[%s7089_s1 + $0xd8] sm:$0xff]  ;;  %v4594_v23 = vld [vmem:[%s7089_s1 + $0xd0] sm:$0xff] }
   0x9   :  { %2113 = vmatpush.bf16.msra.mxu3 %v4598_v7  ;;  %v4569_v24 = vld [vmem:[%s7089_s1 + $0x8] sm:$0xff]  ;;  %v4568_v28 = vld [vmem:[%s7089_s1] sm:$0xff]  ;;  %v4623_v40 = vld [vmem:[%s7089_s1 + $0x1b8] sm:$0xff] }
   0xa   :  { %1715 = vmatpush.bf16.msra.mxu0 %v4573_v8  ;;  %v4577_v25 = vld [vmem:[%s7089_s1 + $0x48] sm:$0xff]  ;;  %v4576_v29 = vld [vmem:[%s7089_s1 + $0x40] sm:$0xff]  ;;  %v4607_v41 = vld [vmem:[%s7089_s1 + $0x138] sm:$0xff] }
   0xb   :  { %1848 = vmatpush.bf16.msra.mxu1 %v4581_v9  ;;  %v4585_v26 = vld [vmem:[%s7089_s1 + $0x88] sm:$0xff]  ;;  %v4584_v30 = vld [vmem:[%s7089_s1 + $0x80] sm:$0xff]  ;;  %v4631_v46 = vld [vmem:[%s7089_s1 + $0x1f8] sm:$0xff] }
   0xc   :  { %1981 = vmatpush.bf16.msra.mxu2 %v4589_v10  ;;  %v4593_v27 = vld [vmem:[%s7089_s1 + $0xc8] sm:$0xff]  ;;  %v4592_v31 = vld [vmem:[%s7089_s1 + $0xc0] sm:$0xff]  ;;  %v4615_v47 = vld [vmem:[%s7089_s1 + $0x178] sm:$0xff] }
   0xd   :  { %2114 = vmatpush.bf16.msra.mxu3 %v4597_v11  ;;  %v3354_v32 = vld [vmem:[%s7090_s0] sm:$0xf]  ;;  %v4376_v34 = vld [vmem:[%s7090_s0 + $0x4] sm:$0xf]  ;;  %v3362_v36 = vld [vmem:[%s7090_s0 + $0x8] sm:$0xf] }
   0xe   :  { %1716 = vmatpush.bf16.msra.mxu0 %v4572_v12  ;;  %v4380_v33 = vld [vmem:[%s7090_s0 + $0x1c] sm:$0xf0]  ;;  %v3356_v35 = vld [vmem:[%s7090_s0 + $0x20] sm:$0xf0]  ;;  %v4381_v37 = vld [vmem:[%s7090_s0 + $0x24] sm:$0xf0] }
   0xf   :  { %1849 = vmatpush.bf16.msra.mxu1 %v4580_v13  ;;  %v4377_v38 = vld [vmem:[%s7090_s0 + $0xc] sm:$0xf]  ;;  %v3355_v42 = vor.u32 %v4380_v33, %v3354_v32  ;;  %v3359_v43 = vor.u32 %v4376_v34, %v3356_v35  ;;  %v3363_v44 = vor.u32 %v4381_v37, %v3362_v36  ;;  %v3386_v48 = vld [vmem:[%s7090_s0 + $0x40] sm:$0xf]  ;;  %v4384_v50 = vld [vmem:[%s7090_s0 + $0x44] sm:$0xf] }
  0x10   :  { %1982 = vmatpush.bf16.msra.mxu2 %v4588_v14  ;;  %v3364_v39 = vld [vmem:[%s7090_s0 + $0x28] sm:$0xf0]  ;;  %v4388_v49 = vld [vmem:[%s7090_s0 + $0x5c] sm:$0xf0]  ;;  %v3388_v51 = vld [vmem:[%s7090_s0 + $0x60] sm:$0xf0] }
  0x11   :  { %2115 = vmatpush.bf16.msra.mxu3 %v4596_v15  ;;  %v3367_v45 = vor.u32 %v4377_v38, %v3364_v39  ;;  %v3394_v52 = vld [vmem:[%s7090_s0 + $0x48] sm:$0xf]  ;;  %v4385_v54 = vld [vmem:[%s7090_s0 + $0x4c] sm:$0xf]  ;;  %v3387_v56 = vor.u32 %v4388_v49, %v3386_v48  ;;  %v3391_v57 = vor.u32 %v4384_v50, %v3388_v51  ;;  %v4622_v60 = vld [vmem:[%s7089_s1 + $0x1b0] sm:$0xff] }
  0x12   :  { %1717 = vmatpush.bf16.msra.mxu0 %v4571_v16  ;;  %v4389_v53 = vld [vmem:[%s7090_s0 + $0x64] sm:$0xf0]  ;;  %v3396_v55 = vld [vmem:[%s7090_s0 + $0x68] sm:$0xf0]  ;;  %v4606_v61 = vld [vmem:[%s7089_s1 + $0x130] sm:$0xff] }
  0x13   :  { %1850 = vmatpush.bf16.msra.mxu1 %v4579_v17  ;;  %v3395_v58 = vor.u32 %v4389_v53, %v3394_v52  ;;  %v3399_v59 = vor.u32 %v4385_v54, %v3396_v55  ;;  %v4630_v62 = vld [vmem:[%s7089_s1 + $0x1f0] sm:$0xff]  ;;  %v3418_v0 = vld [vmem:[%s7090_s0 + $0x80] sm:$0xf]  ;;  %v4392_v2 = vld [vmem:[%s7090_s0 + $0x84] sm:$0xf] }
  0x14   :  { %1983 = vmatpush.bf16.msra.mxu2 %v4587_v18  ;;  %v4614_v63 = vld [vmem:[%s7089_s1 + $0x170] sm:$0xff]  ;;  %v4396_v1 = vld [vmem:[%s7090_s0 + $0x9c] sm:$0xf0]  ;;  %v3420_v3 = vld [vmem:[%s7090_s0 + $0xa0] sm:$0xf0] }
  0x15   :  { %2116 = vmatpush.bf16.msra.mxu3 %v4595_v19  ;;  %v3426_v4 = vld [vmem:[%s7090_s0 + $0x88] sm:$0xf]  ;;  %v4393_v6 = vld [vmem:[%s7090_s0 + $0x8c] sm:$0xf]  ;;  %v3419_v8 = vor.u32 %v4396_v1, %v3418_v0  ;;  %v3423_v9 = vor.u32 %v4392_v2, %v3420_v3  ;;  %v3450_v12 = vld [vmem:[%s7090_s0 + $0xc0] sm:$0xf] }
  0x16   :  { %1718 = vmatpush.bf16.msra.mxu0 %v4570_v20  ;;  %v4397_v5 = vld [vmem:[%s7090_s0 + $0xa4] sm:$0xf0]  ;;  %v3428_v7 = vld [vmem:[%s7090_s0 + $0xa8] sm:$0xf0]  ;;  %v4404_v13 = vld [vmem:[%s7090_s0 + $0xdc] sm:$0xf0] }
  0x17   :  { %1851 = vmatpush.bf16.msra.mxu1 %v4578_v21  ;;  %v3427_v10 = vor.u32 %v4397_v5, %v3426_v4  ;;  %v3431_v11 = vor.u32 %v4393_v6, %v3428_v7  ;;  %v4400_v14 = vld [vmem:[%s7090_s0 + $0xc4] sm:$0xf]  ;;  %v3458_v16 = vld [vmem:[%s7090_s0 + $0xc8] sm:$0xf]  ;;  %v4401_v18 = vld [vmem:[%s7090_s0 + $0xcc] sm:$0xf]  ;;  %v3451_v20 = vor.u32 %v4404_v13, %v3450_v12 }
  0x18   :  { %1984 = vmatpush.bf16.msra.mxu2 %v4586_v22  ;;  %v3452_v15 = vld [vmem:[%s7090_s0 + $0xe0] sm:$0xf0]  ;;  %v4405_v17 = vld [vmem:[%s7090_s0 + $0xe4] sm:$0xf0]  ;;  %v3460_v19 = vld [vmem:[%s7090_s0 + $0xe8] sm:$0xf0] }
  0x19   :  { %2117 = vmatpush.bf16.msra.mxu3 %v4594_v23  ;;  %v3455_v21 = vor.u32 %v4400_v14, %v3452_v15  ;;  %v3459_v22 = vor.u32 %v4405_v17, %v3458_v16  ;;  %v3463_v23 = vor.u32 %v4401_v18, %v3460_v19  ;;  %v4621_v36 = vld [vmem:[%s7089_s1 + $0x1a8] sm:$0xff]  ;;  %v3546_v52 = vld [vmem:[%s7090_s0 + $0x180] sm:$0xf]  ;;  %v4424_v54 = vld [vmem:[%s7090_s0 + $0x184] sm:$0xf] }
  0x1a   :  { %1719 = vmatpush.bf16.msra.mxu0 %v4569_v24  ;;  %v3482_v24 = vld [vmem:[%s7090_s0 + $0x100] sm:$0xf]  ;;  %v4605_v37 = vld [vmem:[%s7089_s1 + $0x128] sm:$0xff]  ;;  %v3548_v55 = vld [vmem:[%s7090_s0 + $0x1a0] sm:$0xf0] }
  0x1b   :  { %1852 = vmatpush.bf16.msra.mxu1 %v4577_v25  ;;  %v4412_v25 = vld [vmem:[%s7090_s0 + $0x11c] sm:$0xf0]  ;;  %v4629_v38 = vld [vmem:[%s7089_s1 + $0x1e8] sm:$0xff]  ;;  %v4432_v2 = vld [vmem:[%s7090_s0 + $0x1c4] sm:$0xf] }
  0x1c   :  { %1985 = vmatpush.bf16.msra.mxu2 %v4585_v26  ;;  %v4408_v26 = vld [vmem:[%s7090_s0 + $0x104] sm:$0xf]  ;;  %v3483_v32 = vor.u32 %v4412_v25, %v3482_v24  ;;  %v4613_v39 = vld [vmem:[%s7089_s1 + $0x168] sm:$0xff]  ;;  %v4428_v53 = vld [vmem:[%s7090_s0 + $0x19c] sm:$0xf0] }
  0x1d   :  { %2118 = vmatpush.bf16.msra.mxu3 %v4593_v27  ;;  %v3484_v27 = vld [vmem:[%s7090_s0 + $0x120] sm:$0xf0]  ;;  %v3578_v0 = vld [vmem:[%s7090_s0 + $0x1c0] sm:$0xf]  ;;  %v3586_v4 = vld [vmem:[%s7090_s0 + $0x1c8] sm:$0xf] }
  0x1e   :  { %1720 = vmatpush.bf16.msra.mxu0 %v4568_v28  ;;  %v3490_v28 = vld [vmem:[%s7090_s0 + $0x108] sm:$0xf]  ;;  %v3487_v33 = vor.u32 %v4408_v26, %v3484_v27  ;;  %v4436_v1 = vld [vmem:[%s7090_s0 + $0x1dc] sm:$0xf0]  ;;  %v3580_v3 = vld [vmem:[%s7090_s0 + $0x1e0] sm:$0xf0] }
  0x1f   :  { %1853 = vmatpush.bf16.msra.mxu1 %v4576_v29  ;;  %v4413_v29 = vld [vmem:[%s7090_s0 + $0x124] sm:$0xf0]  ;;  %v4433_v6 = vld [vmem:[%s7090_s0 + $0x1cc] sm:$0xf]  ;;  %v4620_v12 = vld [vmem:[%s7089_s1 + $0x1a0] sm:$0xff] }
  0x20   :  { %1986 = vmatpush.bf16.msra.mxu2 %v4584_v30  ;;  %v4409_v30 = vld [vmem:[%s7090_s0 + $0x10c] sm:$0xf]  ;;  %v3491_v34 = vor.u32 %v4413_v29, %v3490_v28  ;;  %v4437_v5 = vld [vmem:[%s7090_s0 + $0x1e4] sm:$0xf0]  ;;  %v4604_v13 = vld [vmem:[%s7089_s1 + $0x120] sm:$0xff] }
  0x21   :  { %2119 = vmatpush.bf16.msra.mxu3 %v4592_v31  ;;  %1721 = vmatmul.bf16.vlgmr.msra.gmra.mxu0 %v3355_v42  ;;  %v3492_v31 = vld [vmem:[%s7090_s0 + $0x128] sm:$0xf0]  ;;  %v4416_v42 = vld [vmem:[%s7090_s0 + $0x144] sm:$0xf]  ;;  %v3610_v15 = vld [vmem:[%s7090_s0 + $0x200] sm:$0xf] }
  0x22   :  { %2245 = vmatpush.bf16.msrb.mxu0 %v4607_v41  ;;  %1854 = vmatmul.bf16.vlgmr.msra.gmra.mxu1 %v3359_v43  ;;  %v3495_v35 = vor.u32 %v4409_v30, %v3492_v31  ;;  %v4420_v41 = vld [vmem:[%s7090_s0 + $0x15c] sm:$0xf0]  ;;  %v3516_v43 = vld [vmem:[%s7090_s0 + $0x160] sm:$0xf0]  ;;  %v3588_v7 = vld [vmem:[%s7090_s0 + $0x1e8] sm:$0xf0] }
  0x23   :  { %1987 = vmatmul.bf16.vlgmr.msra.gmra.mxu2 %v3363_v44  ;;  %2378 = vmatpush.bf16.msrb.mxu1 %v4615_v47  ;;  %v3522_v44 = vld [vmem:[%s7090_s0 + $0x148] sm:$0xf]  ;;  %v3524_v47 = vld [vmem:[%s7090_s0 + $0x168] sm:$0xf0]  ;;  %v3519_v49 = vor.u32 %v4416_v42, %v3516_v43  ;;  %v4628_v14 = vld [vmem:[%s7089_s1 + $0x1e0] sm:$0xff] }
  0x24   :  { %2511 = vmatpush.bf16.msrb.mxu2 %v4623_v40  ;;  %2120 = vmatmul.bf16.vlgmr.msra.gmra.mxu3 %v3367_v45  ;;  %v3514_v40 = vld [vmem:[%s7090_s0 + $0x140] sm:$0xf]  ;;  %v4421_v45 = vld [vmem:[%s7090_s0 + $0x164] sm:$0xf0]  ;;  %v4440_v18 = vld [vmem:[%s7090_s0 + $0x204] sm:$0xf] }
  0x25   :  { %2644 = vmatpush.bf16.msrb.mxu3 %v4631_v46  ;;  %v4417_v46 = vld [vmem:[%s7090_s0 + $0x14c] sm:$0xf]  ;;  %v3515_v48 = vor.u32 %v4420_v41, %v3514_v40  ;;  %v3523_v50 = vor.u32 %v4421_v45, %v3522_v44  ;;  %v4444_v16 = vld [vmem:[%s7090_s0 + $0x21c] sm:$0xf0]  ;;  %v3612_v19 = vld [vmem:[%s7090_s0 + $0x220] sm:$0xf0] }
  0x26   :  { %2246 = vmatpush.bf16.msrb.mxu0 %v4606_v61  ;;  %v3527_v51 = vor.u32 %v4417_v46, %v3524_v47  ;;  %v3551_v61 = vor.u32 %v4424_v54, %v3548_v55  ;;  %v4612_v17 = vld [vmem:[%s7089_s1 + $0x160] sm:$0xff]  ;;  %v3611_v24 = vor.u32 %v4444_v16, %v3610_v15  ;;  %v3615_v25 = vor.u32 %v4440_v18, %v3612_v19  ;;  %v3650_v42 = vld [vmem:[%s7090_s0 + $0x248] sm:$0xf]  ;;  %v4449_v44 = vld [vmem:[%s7090_s0 + $0x24c] sm:$0xf] }
  0x27   :  { %2379 = vmatpush.bf16.msrb.mxu1 %v4614_v63  ;;  %v4448_v40 = vld [vmem:[%s7090_s0 + $0x244] sm:$0xf]  ;;  %v4453_v43 = vld [vmem:[%s7090_s0 + $0x264] sm:$0xf0]  ;;  %v3652_v45 = vld [vmem:[%s7090_s0 + $0x268] sm:$0xf0] }
  0x28   :  { %2512 = vmatpush.bf16.msrb.mxu2 %v4622_v60  ;;  %v3547_v60 = vor.u32 %v4428_v53, %v3546_v52  ;;  %v3644_v41 = vld [vmem:[%s7090_s0 + $0x260] sm:$0xf0]  ;;  %v3651_v53 = vor.u32 %v4453_v43, %v3650_v42  ;;  %v3655_v54 = vor.u32 %v4449_v44, %v3652_v45 }
  0x29   :  { %2645 = vmatpush.bf16.msrb.mxu3 %v4630_v62 }
  0x2a   :  { %2247 = vmatpush.bf16.msrb.mxu0 %v4605_v37 }
  0x2b   :  { %2380 = vmatpush.bf16.msrb.mxu1 %v4613_v39  ;;  %v4452_v39 = vld [vmem:[%s7090_s0 + $0x25c] sm:$0xf0] }
  0x2c   :  { %2513 = vmatpush.bf16.msrb.mxu2 %v4621_v36 }
  0x2d   :  { %2646 = vmatpush.bf16.msrb.mxu3 %v4629_v38  ;;  %v3642_v38 = vld [vmem:[%s7090_s0 + $0x240] sm:$0xf] }
  0x2e   :  { %2248 = vmatpush.bf16.msrb.mxu0 %v4604_v13 }
  0x2f   :  { %2381 = vmatpush.bf16.msrb.mxu1 %v4612_v17 }
  0x30   :  { %2514 = vmatpush.bf16.msrb.mxu2 %v4620_v12 }
  0x31   :  { %1726 = vmatmul.bf16.gmra.mxu0 %v3387_v56  ;;  %v3554_v56 = vld [vmem:[%s7090_s0 + $0x188] sm:$0xf]  ;;  %2647 = vmatpush.bf16.msrb.mxu3 %v4628_v14 }
  0x32   :  { %1859 = vmatmul.bf16.gmra.mxu1 %v3391_v57  ;;  %v4429_v57 = vld [vmem:[%s7090_s0 + $0x1a4] sm:$0xf0] }
  0x33   :  { %1992 = vmatmul.bf16.gmra.mxu2 %v3395_v58  ;;  %v4425_v58 = vld [vmem:[%s7090_s0 + $0x18c] sm:$0xf]  ;;  %v3555_v62 = vor.u32 %v4429_v57, %v3554_v56 }
  0x34   :  { %2125 = vmatmul.bf16.gmra.mxu3 %v3399_v59  ;;  %v3556_v59 = vld [vmem:[%s7090_s0 + $0x1a8] sm:$0xf0] }
  0x35   :  { %v3559_v63 = vor.u32 %v4425_v58, %v3556_v59 }
  0x41   :  { %1731 = vmatmul.bf16.gmra.mxu0 %v3419_v8  ;;  %v3579_v8 = vor.u32 %v4436_v1, %v3578_v0  ;;  %v3674_v0 = vld [vmem:[%s7090_s0 + $0x280] sm:$0xf] }
  0x42   :  { %1864 = vmatmul.bf16.gmra.mxu1 %v3423_v9  ;;  %v3583_v9 = vor.u32 %v4432_v2, %v3580_v3  ;;  %v4460_v1 = vld [vmem:[%s7090_s0 + $0x29c] sm:$0xf0]  ;;  %v4456_v2 = vld [vmem:[%s7090_s0 + $0x284] sm:$0xf] }
  0x43   :  { %1997 = vmatmul.bf16.gmra.mxu2 %v3427_v10  ;;  %v3587_v10 = vor.u32 %v4437_v5, %v3586_v4  ;;  %v3676_v3 = vld [vmem:[%s7090_s0 + $0x2a0] sm:$0xf0]  ;;  %v3682_v4 = vld [vmem:[%s7090_s0 + $0x288] sm:$0xf] }
  0x44   :  { %2130 = vmatmul.bf16.gmra.mxu3 %v3431_v11  ;;  %v3591_v11 = vor.u32 %v4433_v6, %v3588_v7  ;;  %v4461_v5 = vld [vmem:[%s7090_s0 + $0x2a4] sm:$0xf0]  ;;  %v4457_v6 = vld [vmem:[%s7090_s0 + $0x28c] sm:$0xf] }
  0x45   :  { %v3684_v7 = vld [vmem:[%s7090_s0 + $0x2a8] sm:$0xf0]  ;;  %v3683_v15 = vor.u32 %v4461_v5, %v3682_v4 }
  0x46   :  { %v3687_v16 = vor.u32 %v4457_v6, %v3684_v7 }
  0x51   :  { %1736 = vmatmul.bf16.gmra.mxu0 %v3451_v20  ;;  %v3618_v20 = vld [vmem:[%s7090_s0 + $0x208] sm:$0xf] }
  0x52   :  { %1869 = vmatmul.bf16.gmra.mxu1 %v3455_v21  ;;  %v4445_v21 = vld [vmem:[%s7090_s0 + $0x224] sm:$0xf0] }
  0x53   :  { %2002 = vmatmul.bf16.gmra.mxu2 %v3459_v22  ;;  %v4441_v22 = vld [vmem:[%s7090_s0 + $0x20c] sm:$0xf]  ;;  %v3619_v28 = vor.u32 %v4445_v21, %v3618_v20 }
  0x54   :  { %2135 = vmatmul.bf16.gmra.mxu3 %v3463_v23  ;;  %v3620_v23 = vld [vmem:[%s7090_s0 + $0x228] sm:$0xf0] }
  0x55   :  { %v3623_v29 = vor.u32 %v4441_v22, %v3620_v23 }
  0x61   :  { %1741 = vmatmul.bf16.gmra.mxu0 %v3483_v32 }
  0x62   :  { %1874 = vmatmul.bf16.gmra.mxu1 %v3487_v33 }
  0x63   :  { %2007 = vmatmul.bf16.gmra.mxu2 %v3491_v34 }
  0x64   :  { %2140 = vmatmul.bf16.gmra.mxu3 %v3495_v35 }
  0x71   :  { %1746 = vmatmul.bf16.gmra.mxu0 %v3515_v48  ;;  %v3643_v48 = vor.u32 %v4452_v39, %v3642_v38 }
  0x72   :  { %1879 = vmatmul.bf16.gmra.mxu1 %v3519_v49  ;;  %v3647_v49 = vor.u32 %v4448_v40, %v3644_v41 }
  0x73   :  { %2012 = vmatmul.bf16.gmra.mxu2 %v3523_v50 }
  0x74   :  { %2145 = vmatmul.bf16.gmra.mxu3 %v3527_v51 }
  0x81   :  { %1751 = vmatmul.bf16.gmra.mxu0 %v3547_v60 }
  0x82   :  { %1884 = vmatmul.bf16.gmra.mxu1 %v3551_v61 }
  0x83   :  { %2017 = vmatmul.bf16.gmra.mxu2 %v3555_v62 }
  0x84   :  { %2150 = vmatmul.bf16.gmra.mxu3 %v3559_v63 }
  0x91   :  { %1756 = vmatmul.bf16.gmra.mxu0 %v3579_v8 }
  0x92   :  { %1889 = vmatmul.bf16.gmra.mxu1 %v3583_v9 }
  0x93   :  { %2022 = vmatmul.bf16.gmra.mxu2 %v3587_v10  ;;  %v3675_v10 = vor.u32 %v4460_v1, %v3674_v0  ;;  %v4477_v0 = vld [vmem:[%s7090_s0 + $0x324] sm:$0xf0]  ;;  %v4473_v1 = vld [vmem:[%s7090_s0 + $0x30c] sm:$0xf] }
  0x94   :  { %2155 = vmatmul.bf16.gmra.mxu3 %v3591_v11  ;;  %v3679_v11 = vor.u32 %v4456_v2, %v3676_v3  ;;  %v3748_v2 = vld [vmem:[%s7090_s0 + $0x328] sm:$0xf0] }
  0x9e   :  { %v1722_v26 = vpop.f32.mrf.mxu0 }
  0x9f   :  { %v1855_v27 = vpop.f32.mrf.mxu1 }
  0xa0   :  { %v1856_v30 = vadd.f32 %v1855_v27, %v1722_v26  ;;  %v4619_v26 = vld [vmem:[%s7089_s1 + $0x198] sm:$0xff] }
  0xa1   :  { %1761 = vmatmul.bf16.gmra.mxu0 %v3611_v24  ;;  %v4603_v27 = vld [vmem:[%s7089_s1 + $0x118] sm:$0xff]  ;;  %2515 = vmatpush.bf16.msrb.mxu2 %v4619_v26  ;;  %v3772_v26 = vld [vmem:[%s7090_s0 + $0x360] sm:$0xf0] }
  0xa2   :  { %1894 = vmatmul.bf16.gmra.mxu1 %v3615_v25  ;;  %2249 = vmatpush.bf16.msrb.mxu0 %v4603_v27  ;;  %v3778_v27 = vld [vmem:[%s7090_s0 + $0x348] sm:$0xf] }
  0xa3   :  { %2027 = vmatmul.bf16.gmra.mxu2 %v3619_v28  ;;  %v4627_v28 = vld [vmem:[%s7089_s1 + $0x1d8] sm:$0xff] }
  0xa4   :  { %2160 = vmatmul.bf16.gmra.mxu3 %v3623_v29  ;;  %v3706_v29 = vld [vmem:[%s7090_s0 + $0x2c0] sm:$0xf] }
  0xa5   :  { %2648 = vmatpush.bf16.msrb.mxu3 %v4627_v28  ;;  %v4485_v28 = vld [vmem:[%s7090_s0 + $0x364] sm:$0xf0] }
  0xa6   :  { %v1988_v31 = vpop.f32.mrf.mxu2  ;;  %v1724_v34 = vpop.f32.mrf.mxu0 }
  0xa7   :  { %v2121_v32 = vpop.f32.mrf.mxu3  ;;  %v1989_v33 = vadd.f32 %v1988_v31, %v1856_v30  ;;  %v1857_v35 = vpop.f32.mrf.mxu1  ;;  %v4468_v30 = vld [vmem:[%s7090_s0 + $0x2dc] sm:$0xf0]  ;;  %v4464_v31 = vld [vmem:[%s7090_s0 + $0x2c4] sm:$0xf] }
  0xa8   :  { %v1858_v36 = vadd.f32 %v1857_v35, %v1724_v34  ;;  %v4469_v34 = vld [vmem:[%s7090_s0 + $0x2e4] sm:$0xf0]  ;;  %v4465_v35 = vld [vmem:[%s7090_s0 + $0x2cc] sm:$0xf]  ;;  %v3707_v40 = vor.u32 %v4468_v30, %v3706_v29 }
  0xa9   :  { %v5021_v37 = vadd.f32 %v2121_v32, %v1989_v33  ;;  %v3708_v32 = vld [vmem:[%s7090_s0 + $0x2e0] sm:$0xf0]  ;;  %v3714_v33 = vld [vmem:[%s7090_s0 + $0x2c8] sm:$0xf]  ;;  %v4481_v29 = vld [vmem:[%s7090_s0 + $0x34c] sm:$0xf] }
  0xaa   :  { %v3711_v41 = vor.u32 %v4464_v31, %v3708_v32  ;;  %v3715_v45 = vor.u32 %v4469_v34, %v3714_v33  ;;  %v3780_v30 = vld [vmem:[%s7090_s0 + $0x368] sm:$0xf0] }
  0xae   :  { %v1990_v46 = vpop.f32.mrf.mxu2  ;;  %v1727_v51 = vpop.f32.mrf.mxu0 }
  0xaf   :  { %v2123_v47 = vpop.f32.mrf.mxu3  ;;  %v1991_v50 = vadd.f32 %v1990_v46, %v1858_v36  ;;  %v1860_v52 = vpop.f32.mrf.mxu1  ;;  %v3716_v36 = vld [vmem:[%s7090_s0 + $0x2e8] sm:$0xf0] }
  0xb0   :  { %v1861_v55 = vadd.f32 %v1860_v52, %v1727_v51  ;;  %v3719_v46 = vor.u32 %v4465_v35, %v3716_v36 }
  0xb1   :  { %v5047_v56 = vadd.f32 %v2123_v47, %v1991_v50  ;;  %1766 = vmatmul.bf16.gmra.mxu0 %v3643_v48 }
  0xb2   :  { %1899 = vmatmul.bf16.gmra.mxu1 %v3647_v49  ;;  %v4611_v49 = vld [vmem:[%s7089_s1 + $0x158] sm:$0xff] }
  0xb3   :  { %2032 = vmatmul.bf16.gmra.mxu2 %v3651_v53  ;;  %2382 = vmatpush.bf16.msrb.mxu1 %v4611_v49 }
  0xb4   :  { %2165 = vmatmul.bf16.gmra.mxu3 %v3655_v54 }
  0xb6   :  { %v1993_v57 = vpop.f32.mrf.mxu2  ;;  %v1729_v60 = vpop.f32.mrf.mxu0 }
  0xb7   :  { %v2126_v58 = vpop.f32.mrf.mxu3  ;;  %v1994_v59 = vadd.f32 %v1993_v57, %v1861_v55  ;;  %v1862_v61 = vpop.f32.mrf.mxu1 }
  0xb8   :  { %v1863_v62 = vadd.f32 %v1862_v61, %v1729_v60  ;;  %v4472_v60 = vld [vmem:[%s7090_s0 + $0x304] sm:$0xf] }
  0xb9   :  { %v5049_v63 = vadd.f32 %v2126_v58, %v1994_v59  ;;  %v3738_v58 = vld [vmem:[%s7090_s0 + $0x300] sm:$0xf]  ;;  %v3740_v61 = vld [vmem:[%s7090_s0 + $0x320] sm:$0xf0] }
  0xba   :  { %v4476_v59 = vld [vmem:[%s7090_s0 + $0x31c] sm:$0xf0]  ;;  %v3743_v6 = vor.u32 %v4472_v60, %v3740_v61  ;;  %v4489_v60 = vld [vmem:[%s7090_s0 + $0x38c] sm:$0xf] }
  0xbb   :  { %v3739_v5 = vor.u32 %v4476_v59, %v3738_v58  ;;  %v3810_v58 = vld [vmem:[%s7090_s0 + $0x388] sm:$0xf]  ;;  %v3812_v61 = vld [vmem:[%s7090_s0 + $0x3a8] sm:$0xf0] }
  0xbc   :  { %v4493_v59 = vld [vmem:[%s7090_s0 + $0x3a4] sm:$0xf0] }
  0xbe   :  { %v1995_v8 = vpop.f32.mrf.mxu2  ;;  %v1732_v13 = vpop.f32.mrf.mxu0 }
  0xbf   :  { %v2128_v9 = vpop.f32.mrf.mxu3  ;;  %v1996_v12 = vadd.f32 %v1995_v8, %v1863_v62  ;;  %v1865_v14 = vpop.f32.mrf.mxu1  ;;  %v3746_v62 = vld [vmem:[%s7090_s0 + $0x308] sm:$0xf] }
  0xc0   :  { %v1866_v17 = vadd.f32 %v1865_v14, %v1732_v13 }
  0xc1   :  { %v5075_v18 = vadd.f32 %v2128_v9, %v1996_v12  ;;  %1771 = vmatmul.bf16.gmra.mxu0 %v3675_v10  ;;  %v3747_v10 = vor.u32 %v4477_v0, %v3746_v62 }
  0xc2   :  { %1904 = vmatmul.bf16.gmra.mxu1 %v3679_v11  ;;  %v3751_v11 = vor.u32 %v4473_v1, %v3748_v2 }
  0xc3   :  { %2037 = vmatmul.bf16.gmra.mxu2 %v3683_v15 }
  0xc4   :  { %2170 = vmatmul.bf16.gmra.mxu3 %v3687_v16 }
  0xc6   :  { %v1998_v19 = vpop.f32.mrf.mxu2  ;;  %v1734_v22 = vpop.f32.mrf.mxu0 }
  0xc7   :  { %v2131_v20 = vpop.f32.mrf.mxu3  ;;  %v1999_v21 = vadd.f32 %v1998_v19, %v1866_v17  ;;  %v1867_v23 = vpop.f32.mrf.mxu1 }
  0xc8   :  { %v1868_v24 = vadd.f32 %v1867_v23, %v1734_v22  ;;  %v3770_v22 = vld [vmem:[%s7090_s0 + $0x340] sm:$0xf] }
  0xc9   :  { %v5077_v25 = vadd.f32 %v2131_v20, %v1999_v21  ;;  %v4484_v23 = vld [vmem:[%s7090_s0 + $0x35c] sm:$0xf0] }
  0xca   :  { %v3771_v33 = vor.u32 %v4484_v23, %v3770_v22  ;;  %v3834_v23 = vld [vmem:[%s7090_s0 + $0x3c0] sm:$0xf] }
  0xce   :  { %v2000_v38 = vpop.f32.mrf.mxu2  ;;  %v1737_v43 = vpop.f32.mrf.mxu0 }
  0xcf   :  { %v2133_v39 = vpop.f32.mrf.mxu3  ;;  %v2001_v42 = vadd.f32 %v2000_v38, %v1868_v24  ;;  %v1870_v44 = vpop.f32.mrf.mxu1  ;;  %v4480_v24 = vld [vmem:[%s7090_s0 + $0x344] sm:$0xf] }
  0xd0   :  { %v1871_v47 = vadd.f32 %v1870_v44, %v1737_v43  ;;  %v3775_v34 = vor.u32 %v4480_v24, %v3772_v26  ;;  %v4500_v24 = vld [vmem:[%s7090_s0 + $0x3dc] sm:$0xf0]  ;;  %v4496_v26 = vld [vmem:[%s7090_s0 + $0x3c4] sm:$0xf] }
  0xd1   :  { %v5112_v48 = vadd.f32 %v2133_v39, %v2001_v42  ;;  %1776 = vmatmul.bf16.gmra.mxu0 %v3707_v40  ;;  %v3779_v39 = vor.u32 %v4485_v28, %v3778_v27  ;;  %v3783_v40 = vor.u32 %v4481_v29, %v3780_v30  ;;  %v3836_v27 = vld [vmem:[%s7090_s0 + $0x3e0] sm:$0xf0]  ;;  %v3842_v28 = vld [vmem:[%s7090_s0 + $0x3c8] sm:$0xf]  ;;  %v4497_v30 = vld [vmem:[%s7090_s0 + $0x3cc] sm:$0xf] }
  0xd2   :  { %1909 = vmatmul.bf16.gmra.mxu1 %v3711_v41  ;;  %v4501_v29 = vld [vmem:[%s7090_s0 + $0x3e4] sm:$0xf0] }
  0xd3   :  { %2042 = vmatmul.bf16.gmra.mxu2 %v3715_v45 }
  0xd4   :  { %2175 = vmatmul.bf16.gmra.mxu3 %v3719_v46 }
  0xd6   :  { %v2003_v50 = vpop.f32.mrf.mxu2  ;;  %v1739_v53 = vpop.f32.mrf.mxu0 }
  0xd7   :  { %v2136_v51 = vpop.f32.mrf.mxu3  ;;  %v2004_v52 = vadd.f32 %v2003_v50, %v1871_v47  ;;  %v1872_v54 = vpop.f32.mrf.mxu1 }
  0xd8   :  { %v1873_v55 = vadd.f32 %v1872_v54, %v1739_v53  ;;  %v4492_v53 = vld [vmem:[%s7090_s0 + $0x39c] sm:$0xf0]  ;;  %v4488_v54 = vld [vmem:[%s7090_s0 + $0x384] sm:$0xf] }
  0xd9   :  { %v5117_v57 = vadd.f32 %v2136_v51, %v2004_v52  ;;  %v4618_v51 = vld [vmem:[%s7089_s1 + $0x190] sm:$0xff]  ;;  %v3802_v52 = vld [vmem:[%s7090_s0 + $0x380] sm:$0xf] }
  0xda   :  { %2516 = vmatpush.bf16.msrb.mxu2 %v4618_v51  ;;  %v3803_v1 = vor.u32 %v4492_v53, %v3802_v52 }
  0xde   :  { %v2005_v3 = vpop.f32.mrf.mxu2  ;;  %v1742_v8 = vpop.f32.mrf.mxu0 }
  0xdf   :  { %v2138_v4 = vpop.f32.mrf.mxu3  ;;  %v2006_v7 = vadd.f32 %v2005_v3, %v1873_v55  ;;  %v1875_v9 = vpop.f32.mrf.mxu1  ;;  %v3804_v55 = vld [vmem:[%s7090_s0 + $0x3a0] sm:$0xf0] }
  0xe0   :  { %v1876_v12 = vadd.f32 %v1875_v9, %v1742_v8  ;;  %v3807_v2 = vor.u32 %v4488_v54, %v3804_v55  ;;  %v3866_v54 = vld [vmem:[%s7090_s0 + $0x400] sm:$0xf] }
  0xe1   :  { %v5143_v13 = vadd.f32 %v2138_v4, %v2006_v7  ;;  %1781 = vmatmul.bf16.gmra.mxu0 %v3739_v5  ;;  %v3815_v7 = vor.u32 %v4489_v60, %v3812_v61  ;;  %v4508_v55 = vld [vmem:[%s7090_s0 + $0x41c] sm:$0xf0]  ;;  %v3874_v60 = vld [vmem:[%s7090_s0 + $0x408] sm:$0xf] }
  0xe2   :  { %1914 = vmatmul.bf16.gmra.mxu1 %v3743_v6  ;;  %v3811_v6 = vor.u32 %v4493_v59, %v3810_v58  ;;  %v4504_v58 = vld [vmem:[%s7090_s0 + $0x404] sm:$0xf]  ;;  %v4509_v61 = vld [vmem:[%s7090_s0 + $0x424] sm:$0xf0] }
  0xe3   :  { %2047 = vmatmul.bf16.gmra.mxu2 %v3747_v10  ;;  %v4602_v10 = vld [vmem:[%s7089_s1 + $0x110] sm:$0xff]  ;;  %v3868_v59 = vld [vmem:[%s7090_s0 + $0x420] sm:$0xf0] }
  0xe4   :  { %2180 = vmatmul.bf16.gmra.mxu3 %v3751_v11  ;;  %v4626_v11 = vld [vmem:[%s7089_s1 + $0x1d0] sm:$0xff]  ;;  %2250 = vmatpush.bf16.msrb.mxu0 %v4602_v10 }
  0xe5   :  { %2649 = vmatpush.bf16.msrb.mxu3 %v4626_v11 }
  0xe6   :  { %v2008_v14 = vpop.f32.mrf.mxu2  ;;  %v1744_v17 = vpop.f32.mrf.mxu0 }
  0xe7   :  { %v2141_v15 = vpop.f32.mrf.mxu3  ;;  %v2009_v16 = vadd.f32 %v2008_v14, %v1876_v12  ;;  %v1877_v19 = vpop.f32.mrf.mxu1  ;;  %v4610_v12 = vld [vmem:[%s7089_s1 + $0x150] sm:$0xff] }
  0xe8   :  { %v1878_v20 = vadd.f32 %v1877_v19, %v1744_v17  ;;  %2383 = vmatpush.bf16.msrb.mxu1 %v4610_v12 }
  0xe9   :  { %v5145_v21 = vadd.f32 %v2141_v15, %v2009_v16 }
  0xee   :  { %v2010_v31 = vpop.f32.mrf.mxu2  ;;  %v1747_v36 = vpop.f32.mrf.mxu0 }
  0xef   :  { %v2143_v32 = vpop.f32.mrf.mxu3  ;;  %v2011_v35 = vadd.f32 %v2010_v31, %v1878_v20  ;;  %v1880_v38 = vpop.f32.mrf.mxu1  ;;  %v3844_v31 = vld [vmem:[%s7090_s0 + $0x3e8] sm:$0xf0] }
  0xf0   :  { %v1881_v41 = vadd.f32 %v1880_v38, %v1747_v36 }
  0xf1   :  { %v5171_v42 = vadd.f32 %v2143_v32, %v2011_v35  ;;  %1786 = vmatmul.bf16.gmra.mxu0 %v3771_v33  ;;  %v3839_v35 = vor.u32 %v4496_v26, %v3836_v27  ;;  %v4516_v26 = vld [vmem:[%s7090_s0 + $0x45c] sm:$0xf0]  ;;  %v4512_v27 = vld [vmem:[%s7090_s0 + $0x444] sm:$0xf] }
  0xf2   :  { %1919 = vmatmul.bf16.gmra.mxu1 %v3775_v34  ;;  %v3835_v34 = vor.u32 %v4500_v24, %v3834_v23  ;;  %v3898_v24 = vld [vmem:[%s7090_s0 + $0x440] sm:$0xf] }
  0xf3   :  { %2052 = vmatmul.bf16.gmra.mxu2 %v3779_v39 }
  0xf4   :  { %2185 = vmatmul.bf16.gmra.mxu3 %v3783_v40  ;;  %v3843_v40 = vor.u32 %v4501_v29, %v3842_v28  ;;  %v3900_v28 = vld [vmem:[%s7090_s0 + $0x460] sm:$0xf0]  ;;  %v3906_v29 = vld [vmem:[%s7090_s0 + $0x448] sm:$0xf] }
  0xf6   :  { %v2013_v43 = vpop.f32.mrf.mxu2  ;;  %v1749_v46 = vpop.f32.mrf.mxu0 }
  0xf7   :  { %v2146_v44 = vpop.f32.mrf.mxu3  ;;  %v2014_v45 = vadd.f32 %v2013_v43, %v1881_v41  ;;  %v1882_v47 = vpop.f32.mrf.mxu1  ;;  %v3847_v41 = vor.u32 %v4497_v30, %v3844_v31  ;;  %v4517_v30 = vld [vmem:[%s7090_s0 + $0x464] sm:$0xf0]  ;;  %v4513_v31 = vld [vmem:[%s7090_s0 + $0x44c] sm:$0xf] }
  0xf8   :  { %v1883_v49 = vadd.f32 %v1882_v47, %v1749_v46 }
  0xf9   :  { %v5173_v50 = vadd.f32 %v2146_v44, %v2014_v45 }
  0xfe   :  { %v2015_v62 = vpop.f32.mrf.mxu2  ;;  %v1752_v4 = vpop.f32.mrf.mxu0 }
  0xff   :  { %v2148_v0 = vpop.f32.mrf.mxu3  ;;  %v2016_v3 = vadd.f32 %v2015_v62, %v1883_v49  ;;  %v1885_v5 = vpop.f32.mrf.mxu1  ;;  %v4505_v62 = vld [vmem:[%s7090_s0 + $0x40c] sm:$0xf] }
 0x100   :  { %v1886_v8 = vadd.f32 %v1885_v5, %v1752_v4  ;;  %v3871_v4 = vor.u32 %v4504_v58, %v3868_v59 }
 0x101   :  { %v5202_v9 = vadd.f32 %v2148_v0, %v2016_v3  ;;  %1791 = vmatmul.bf16.gmra.mxu0 %v3803_v1  ;;  %v3876_v0 = vld [vmem:[%s7090_s0 + $0x428] sm:$0xf0]  ;;  %v3867_v3 = vor.u32 %v4508_v55, %v3866_v54 }
 0x102   :  { %1924 = vmatmul.bf16.gmra.mxu1 %v3807_v2  ;;  %v3879_v10 = vor.u32 %v4505_v62, %v3876_v0  ;;  %v3930_v0 = vld [vmem:[%s7090_s0 + $0x480] sm:$0xf] }
 0x103   :  { %2057 = vmatmul.bf16.gmra.mxu2 %v3811_v6 }
 0x104   :  { %2190 = vmatmul.bf16.gmra.mxu3 %v3815_v7 }
 0x106   :  { %v2018_v14 = vpop.f32.mrf.mxu2  ;;  %v1754_v17 = vpop.f32.mrf.mxu0 }
 0x107   :  { %v2151_v15 = vpop.f32.mrf.mxu3  ;;  %v2019_v16 = vadd.f32 %v2018_v14, %v1886_v8  ;;  %v1887_v19 = vpop.f32.mrf.mxu1  ;;  %v3875_v8 = vor.u32 %v4509_v61, %v3874_v60 }
 0x108   :  { %v1888_v20 = vadd.f32 %v1887_v19, %v1754_v17 }
 0x109   :  { %v5213_v22 = vadd.f32 %v2151_v15, %v2019_v16 }
 0x10e   :  { %v2020_v32 = vpop.f32.mrf.mxu2  ;;  %v1757_v38 = vpop.f32.mrf.mxu0 }
 0x10f   :  { %v2153_v33 = vpop.f32.mrf.mxu3  ;;  %v2021_v36 = vadd.f32 %v2020_v32, %v1888_v20  ;;  %v1890_v39 = vpop.f32.mrf.mxu1  ;;  %v3908_v32 = vld [vmem:[%s7090_s0 + $0x468] sm:$0xf0] }
 0x110   :  { %v1891_v43 = vadd.f32 %v1890_v39, %v1757_v38 }
 0x111   :  { %v5239_v44 = vadd.f32 %v2153_v33, %v2021_v36  ;;  %1796 = vmatmul.bf16.gmra.mxu0 %v3835_v34  ;;  %v3903_v36 = vor.u32 %v4512_v27, %v3900_v28 }
 0x112   :  { %1929 = vmatmul.bf16.gmra.mxu1 %v3839_v35  ;;  %v3899_v35 = vor.u32 %v4516_v26, %v3898_v24 }
 0x113   :  { %2062 = vmatmul.bf16.gmra.mxu2 %v3843_v40 }
 0x114   :  { %2195 = vmatmul.bf16.gmra.mxu3 %v3847_v41  ;;  %v3907_v41 = vor.u32 %v4517_v30, %v3906_v29 }
 0x116   :  { %v2023_v45 = vpop.f32.mrf.mxu2  ;;  %v1759_v49 = vpop.f32.mrf.mxu0 }
 0x117   :  { %v2156_v46 = vpop.f32.mrf.mxu3  ;;  %v2024_v47 = vadd.f32 %v2023_v45, %v1891_v43  ;;  %v1892_v51 = vpop.f32.mrf.mxu1  ;;  %v3911_v43 = vor.u32 %v4513_v31, %v3908_v32 }
 0x118   :  { %v1893_v52 = vadd.f32 %v1892_v51, %v1759_v49  ;;  %v4601_v49 = vld [vmem:[%s7089_s1 + $0x108] sm:$0xff] }
 0x119   :  { %v5241_v53 = vadd.f32 %v2156_v46, %v2024_v47  ;;  %v4617_v47 = vld [vmem:[%s7089_s1 + $0x188] sm:$0xff]  ;;  %2251 = vmatpush.bf16.msrb.mxu0 %v4601_v49 }
 0x11a   :  { %v4625_v51 = vld [vmem:[%s7089_s1 + $0x1c8] sm:$0xff]  ;;  %2517 = vmatpush.bf16.msrb.mxu2 %v4617_v47 }
 0x11b   :  { %2650 = vmatpush.bf16.msrb.mxu3 %v4625_v51 }
 0x11e   :  { %v2025_v1 = vpop.f32.mrf.mxu2  ;;  %v1762_v6 = vpop.f32.mrf.mxu0 }
 0x11f   :  { %v2158_v2 = vpop.f32.mrf.mxu3  ;;  %v2026_v5 = vadd.f32 %v2025_v1, %v1893_v52  ;;  %v1895_v7 = vpop.f32.mrf.mxu1  ;;  %v4609_v52 = vld [vmem:[%s7089_s1 + $0x148] sm:$0xff]  ;;  %v4524_v1 = vld [vmem:[%s7090_s0 + $0x49c] sm:$0xf0] }
 0x120   :  { %v1896_v11 = vadd.f32 %v1895_v7, %v1762_v6  ;;  %2384 = vmatpush.bf16.msrb.mxu1 %v4609_v52  ;;  %v4521_v6 = vld [vmem:[%s7090_s0 + $0x48c] sm:$0xf] }
 0x121   :  { %v5267_v12 = vadd.f32 %v2158_v2, %v2026_v5  ;;  %1801 = vmatmul.bf16.gmra.mxu0 %v3867_v3  ;;  %v4520_v2 = vld [vmem:[%s7090_s0 + $0x484] sm:$0xf]  ;;  %v4525_v5 = vld [vmem:[%s7090_s0 + $0x4a4] sm:$0xf0]  ;;  %v3940_v7 = vld [vmem:[%s7090_s0 + $0x4a8] sm:$0xf0] }
 0x122   :  { %1934 = vmatmul.bf16.gmra.mxu1 %v3871_v4  ;;  %v3932_v3 = vld [vmem:[%s7090_s0 + $0x4a0] sm:$0xf0]  ;;  %v3938_v4 = vld [vmem:[%s7090_s0 + $0x488] sm:$0xf] }
 0x123   :  { %2067 = vmatmul.bf16.gmra.mxu2 %v3875_v8 }
 0x124   :  { %2200 = vmatmul.bf16.gmra.mxu3 %v3879_v10 }
 0x126   :  { %v2028_v14 = vpop.f32.mrf.mxu2  ;;  %v1764_v17 = vpop.f32.mrf.mxu0 }
 0x127   :  { %v2161_v15 = vpop.f32.mrf.mxu3  ;;  %v2029_v16 = vadd.f32 %v2028_v14, %v1896_v11  ;;  %v1897_v19 = vpop.f32.mrf.mxu1  ;;  %v3931_v11 = vor.u32 %v4524_v1, %v3930_v0  ;;  %v3935_v14 = vor.u32 %v4520_v2, %v3932_v3 }
 0x128   :  { %v1898_v20 = vadd.f32 %v1897_v19, %v1764_v17  ;;  %v3939_v19 = vor.u32 %v4525_v5, %v3938_v4 }
 0x129   :  { %v5269_v23 = vadd.f32 %v2161_v15, %v2029_v16 }
 0x12e   :  { %v2030_v33 = vpop.f32.mrf.mxu2  ;;  %v1767_v39 = vpop.f32.mrf.mxu0 }
 0x12f   :  { %v2163_v34 = vpop.f32.mrf.mxu3  ;;  %v2031_v38 = vadd.f32 %v2030_v33, %v1898_v20  ;;  %v1900_v40 = vpop.f32.mrf.mxu1  ;;  %v3943_v20 = vor.u32 %v4521_v6, %v3940_v7  ;;  %v3994_v7 = vld [vmem:[%s7090_s0 + $0x500] sm:$0xf] }
 0x130   :  { %v1901_v45 = vadd.f32 %v1900_v40, %v1767_v39  ;;  %v3970_v39 = vld [vmem:[%s7090_s0 + $0x4c8] sm:$0xf] }
 0x131   :  { %v5295_v46 = vadd.f32 %v2163_v34, %v2031_v38  ;;  %1806 = vmatmul.bf16.gmra.mxu0 %v3899_v35  ;;  %v3962_v34 = vld [vmem:[%s7090_s0 + $0x4c0] sm:$0xf]  ;;  %v3964_v38 = vld [vmem:[%s7090_s0 + $0x4e0] sm:$0xf0]  ;;  %v4533_v40 = vld [vmem:[%s7090_s0 + $0x4e4] sm:$0xf0] }
 0x132   :  { %1939 = vmatmul.bf16.gmra.mxu1 %v3903_v36  ;;  %v4532_v35 = vld [vmem:[%s7090_s0 + $0x4dc] sm:$0xf0]  ;;  %v4528_v36 = vld [vmem:[%s7090_s0 + $0x4c4] sm:$0xf] }
 0x133   :  { %2072 = vmatmul.bf16.gmra.mxu2 %v3907_v41  ;;  %v4529_v41 = vld [vmem:[%s7090_s0 + $0x4cc] sm:$0xf]  ;;  %v3963_v49 = vor.u32 %v4532_v35, %v3962_v34  ;;  %v3967_v51 = vor.u32 %v4528_v36, %v3964_v38  ;;  %v4616_v36 = vld [vmem:[%s7089_s1 + $0x180] sm:$0xff] }
 0x134   :  { %2205 = vmatmul.bf16.gmra.mxu3 %v3911_v43  ;;  %v3972_v43 = vld [vmem:[%s7090_s0 + $0x4e8] sm:$0xf0]  ;;  %v4600_v38 = vld [vmem:[%s7089_s1 + $0x100] sm:$0xff]  ;;  %2518 = vmatpush.bf16.msrb.mxu2 %v4616_v36 }
 0x135   :  { %2252 = vmatpush.bf16.msrb.mxu0 %v4600_v38  ;;  %v4060_v36 = vld [vmem:[%s7090_s0 + $0x5a0] sm:$0xf0]  ;;  %v4066_v38 = vld [vmem:[%s7090_s0 + $0x588] sm:$0xf] }
 0x136   :  { %v2033_v54 = vpop.f32.mrf.mxu2  ;;  %v1769_v59 = vpop.f32.mrf.mxu0 }
 0x137   :  { %v2166_v55 = vpop.f32.mrf.mxu3  ;;  %v2034_v58 = vadd.f32 %v2033_v54, %v1901_v45  ;;  %v1902_v60 = vpop.f32.mrf.mxu1 }
 0x138   :  { %v1903_v61 = vadd.f32 %v1902_v60, %v1769_v59  ;;  %v3975_v59 = vor.u32 %v4529_v41, %v3972_v43 }
 0x139   :  { %v5309_v62 = vadd.f32 %v2166_v55, %v2034_v58  ;;  %v3971_v58 = vor.u32 %v4533_v40, %v3970_v39  ;;  %v4624_v39 = vld [vmem:[%s7089_s1 + $0x1c0] sm:$0xff] }
 0x13a   :  { %v4608_v40 = vld [vmem:[%s7089_s1 + $0x140] sm:$0xff]  ;;  %2651 = vmatpush.bf16.msrb.mxu3 %v4624_v39  ;;  %v4557_v39 = vld [vmem:[%s7090_s0 + $0x5a4] sm:$0xf0] }
 0x13b   :  { %2385 = vmatpush.bf16.msrb.mxu1 %v4608_v40  ;;  %v4553_v40 = vld [vmem:[%s7090_s0 + $0x58c] sm:$0xf] }
 0x13e   :  { %v2035_v8 = vpop.f32.mrf.mxu2  ;;  %v1772_v16 = vpop.f32.mrf.mxu0 }
 0x13f   :  { %v2168_v10 = vpop.f32.mrf.mxu3  ;;  %v2036_v15 = vadd.f32 %v2035_v8, %v1903_v61  ;;  %v1905_v17 = vpop.f32.mrf.mxu1  ;;  %v4540_v8 = vld [vmem:[%s7090_s0 + $0x51c] sm:$0xf0] }
 0x140   :  { %v1906_v24 = vadd.f32 %v1905_v17, %v1772_v16  ;;  %v4537_v16 = vld [vmem:[%s7090_s0 + $0x50c] sm:$0xf] }
 0x141   :  { %v5335_v26 = vadd.f32 %v2168_v10, %v2036_v15  ;;  %1811 = vmatmul.bf16.gmra.mxu0 %v3931_v11  ;;  %v4536_v10 = vld [vmem:[%s7090_s0 + $0x504] sm:$0xf]  ;;  %v4541_v15 = vld [vmem:[%s7090_s0 + $0x524] sm:$0xf0]  ;;  %v4004_v17 = vld [vmem:[%s7090_s0 + $0x528] sm:$0xf0] }
 0x142   :  { %1944 = vmatmul.bf16.gmra.mxu1 %v3935_v14  ;;  %v3996_v11 = vld [vmem:[%s7090_s0 + $0x520] sm:$0xf0]  ;;  %v4002_v14 = vld [vmem:[%s7090_s0 + $0x508] sm:$0xf] }
 0x143   :  { %2077 = vmatmul.bf16.gmra.mxu2 %v3939_v19 }
 0x144   :  { %2210 = vmatmul.bf16.gmra.mxu3 %v3943_v20 }
 0x146   :  { %v2038_v27 = vpop.f32.mrf.mxu2  ;;  %v1774_v30 = vpop.f32.mrf.mxu0 }
 0x147   :  { %v2171_v28 = vpop.f32.mrf.mxu3  ;;  %v2039_v29 = vadd.f32 %v2038_v27, %v1906_v24  ;;  %v1907_v31 = vpop.f32.mrf.mxu1  ;;  %v3995_v24 = vor.u32 %v4540_v8, %v3994_v7  ;;  %v3999_v27 = vor.u32 %v4536_v10, %v3996_v11 }
 0x148   :  { %v1908_v32 = vadd.f32 %v1907_v31, %v1774_v30  ;;  %v4003_v31 = vor.u32 %v4541_v15, %v4002_v14 }
 0x149   :  { %v5337_v33 = vadd.f32 %v2171_v28, %v2039_v29 }
 0x14e   :  { %v2040_v45 = vpop.f32.mrf.mxu2  ;;  %v1777_v54 = vpop.f32.mrf.mxu0 }
 0x14f   :  { %v2173_v47 = vpop.f32.mrf.mxu3  ;;  %v2041_v52 = vadd.f32 %v2040_v45, %v1908_v32  ;;  %v1910_v55 = vpop.f32.mrf.mxu1  ;;  %v4007_v32 = vor.u32 %v4537_v16, %v4004_v17 }
 0x150   :  { %v1911_v60 = vadd.f32 %v1910_v55, %v1777_v54  ;;  %v4026_v54 = vld [vmem:[%s7090_s0 + $0x540] sm:$0xf] }
 0x151   :  { %v5363_v61 = vadd.f32 %v2173_v47, %v2041_v52  ;;  %1816 = vmatmul.bf16.gmra.mxu0 %v3963_v49  ;;  %v4548_v55 = vld [vmem:[%s7090_s0 + $0x55c] sm:$0xf0] }
 0x152   :  { %1949 = vmatmul.bf16.gmra.mxu1 %v3967_v51 }
 0x153   :  { %2082 = vmatmul.bf16.gmra.mxu2 %v3971_v58  ;;  %v4544_v58 = vld [vmem:[%s7090_s0 + $0x544] sm:$0xf] }
 0x154   :  { %2215 = vmatmul.bf16.gmra.mxu3 %v3975_v59  ;;  %v4028_v59 = vld [vmem:[%s7090_s0 + $0x560] sm:$0xf0] }
 0x155   :  { %v4031_v7 = vor.u32 %v4544_v58, %v4028_v59  ;;  %v4067_v58 = vor.u32 %v4557_v39, %v4066_v38 }
 0x156   :  { %v2043_v0 = vpop.f32.mrf.mxu2  ;;  %v1779_v3 = vpop.f32.mrf.mxu0 }
 0x157   :  { %v2176_v1 = vpop.f32.mrf.mxu3  ;;  %v2044_v2 = vadd.f32 %v2043_v0, %v1911_v60  ;;  %v1912_v4 = vpop.f32.mrf.mxu1  ;;  %v4034_v60 = vld [vmem:[%s7090_s0 + $0x548] sm:$0xf] }
 0x158   :  { %v1913_v5 = vadd.f32 %v1912_v4, %v1779_v3  ;;  %v4549_v0 = vld [vmem:[%s7090_s0 + $0x564] sm:$0xf0] }
 0x159   :  { %v5365_v6 = vadd.f32 %v2176_v1, %v2044_v2  ;;  %v4545_v1 = vld [vmem:[%s7090_s0 + $0x54c] sm:$0xf]  ;;  %v4035_v14 = vor.u32 %v4549_v0, %v4034_v60 }
 0x15a   :  { %v4036_v2 = vld [vmem:[%s7090_s0 + $0x568] sm:$0xf0] }
 0x15b   :  { %v4039_v15 = vor.u32 %v4545_v1, %v4036_v2 }
 0x15e   :  { %v2045_v19 = vpop.f32.mrf.mxu2  ;;  %v1782_v29 = vpop.f32.mrf.mxu0 }
 0x15f   :  { %v2178_v20 = vpop.f32.mrf.mxu3  ;;  %v2046_v28 = vadd.f32 %v2045_v19, %v1913_v5  ;;  %v1915_v30 = vpop.f32.mrf.mxu1  ;;  %v4027_v5 = vor.u32 %v4548_v55, %v4026_v54 }
 0x160   :  { %v1916_v34 = vadd.f32 %v1915_v30, %v1782_v29 }
 0x161   :  { %v5391_v35 = vadd.f32 %v2178_v20, %v2046_v28  ;;  %1821 = vmatmul.bf16.gmra.mxu0 %v3995_v24 }
 0x162   :  { %1954 = vmatmul.bf16.gmra.mxu1 %v3999_v27 }
 0x163   :  { %2087 = vmatmul.bf16.gmra.mxu2 %v4003_v31  ;;  %v4058_v31 = vld [vmem:[%s7090_s0 + $0x580] sm:$0xf] }
 0x164   :  { %2220 = vmatmul.bf16.gmra.mxu3 %v4007_v32  ;;  %v4556_v32 = vld [vmem:[%s7090_s0 + $0x59c] sm:$0xf0] }
 0x166   :  { %v2048_v41 = vpop.f32.mrf.mxu2  ;;  %v1784_v47 = vpop.f32.mrf.mxu0 }
 0x167   :  { %v2181_v43 = vpop.f32.mrf.mxu3  ;;  %v2049_v45 = vadd.f32 %v2048_v41, %v1916_v34  ;;  %v1917_v49 = vpop.f32.mrf.mxu1  ;;  %v4552_v34 = vld [vmem:[%s7090_s0 + $0x584] sm:$0xf]  ;;  %v4068_v41 = vld [vmem:[%s7090_s0 + $0x5a8] sm:$0xf0] }
 0x168   :  { %v1918_v51 = vadd.f32 %v1917_v49, %v1784_v47  ;;  %v4059_v47 = vor.u32 %v4556_v32, %v4058_v31  ;;  %v4063_v49 = vor.u32 %v4552_v34, %v4060_v36  ;;  %v4071_v59 = vor.u32 %v4553_v40, %v4068_v41 }
 0x169   :  { %v5405_v52 = vadd.f32 %v2181_v43, %v2049_v45 }
 0x16e   :  { %v2050_v3 = vpop.f32.mrf.mxu2  ;;  %v1787_v10 = vpop.f32.mrf.mxu0 }
 0x16f   :  { %v2183_v4 = vpop.f32.mrf.mxu3  ;;  %v2051_v8 = vadd.f32 %v2050_v3, %v1918_v51  ;;  %v1920_v11 = vpop.f32.mrf.mxu1 }
 0x170   :  { %v1921_v16 = vadd.f32 %v1920_v11, %v1787_v10  ;;  %v4090_v10 = vld [vmem:[%s7090_s0 + $0x5c0] sm:$0xf] }
 0x171   :  { %v5431_v17 = vadd.f32 %v2183_v4, %v2051_v8  ;;  %1826 = vmatmul.bf16.gmra.mxu0 %v4027_v5  ;;  %v4564_v11 = vld [vmem:[%s7090_s0 + $0x5dc] sm:$0xf0] }
 0x172   :  { %1959 = vmatmul.bf16.gmra.mxu1 %v4031_v7 }
 0x173   :  { %2092 = vmatmul.bf16.gmra.mxu2 %v4035_v14  ;;  %v4560_v14 = vld [vmem:[%s7090_s0 + $0x5c4] sm:$0xf] }
 0x174   :  { %2225 = vmatmul.bf16.gmra.mxu3 %v4039_v15  ;;  %v4092_v15 = vld [vmem:[%s7090_s0 + $0x5e0] sm:$0xf0] }
 0x175   :  { %v4095_v31 = vor.u32 %v4560_v14, %v4092_v15 }
 0x176   :  { %v2053_v19 = vpop.f32.mrf.mxu2  ;;  %v1789_v27 = vpop.f32.mrf.mxu0 }
 0x177   :  { %v2186_v20 = vpop.f32.mrf.mxu3  ;;  %v2054_v24 = vadd.f32 %v2053_v19, %v1921_v16  ;;  %v1922_v28 = vpop.f32.mrf.mxu1  ;;  %v4098_v16 = vld [vmem:[%s7090_s0 + $0x5c8] sm:$0xf] }
 0x178   :  { %v1923_v29 = vadd.f32 %v1922_v28, %v1789_v27  ;;  %v4565_v19 = vld [vmem:[%s7090_s0 + $0x5e4] sm:$0xf0] }
 0x179   :  { %v5433_v30 = vadd.f32 %v2186_v20, %v2054_v24  ;;  %v4561_v20 = vld [vmem:[%s7090_s0 + $0x5cc] sm:$0xf]  ;;  %v4099_v38 = vor.u32 %v4565_v19, %v4098_v16 }
 0x17a   :  { %v4100_v24 = vld [vmem:[%s7090_s0 + $0x5e8] sm:$0xf0] }
 0x17b   :  { %v4103_v39 = vor.u32 %v4561_v20, %v4100_v24 }
 0x17e   :  { %v2055_v43 = vpop.f32.mrf.mxu2  ;;  %v1792_v54 = vpop.f32.mrf.mxu0 }
 0x17f   :  { %v2188_v45 = vpop.f32.mrf.mxu3  ;;  %v2056_v51 = vadd.f32 %v2055_v43, %v1923_v29  ;;  %v1925_v55 = vpop.f32.mrf.mxu1  ;;  %v4091_v29 = vor.u32 %v4564_v11, %v4090_v10 }
 0x180   :  { %v1926_v60 = vadd.f32 %v1925_v55, %v1792_v54  ;;  %v209_v54 = vld [vmem:[%s7090_s0 + $0x600] sm:$0xff] }
 0x181   :  { %v5459_v0 = vadd.f32 %v2188_v45, %v2056_v51  ;;  %1831 = vmatmul.bf16.gmra.mxu0 %v4059_v47 }
 0x182   :  { %1964 = vmatmul.bf16.gmra.mxu1 %v4063_v49 }
 0x183   :  { %2097 = vmatmul.bf16.gmra.mxu2 %v4067_v58  ;;  %v210_v58 = vld [vmem:[%s7090_s0 + $0x608] sm:$0xff] }
 0x184   :  { %2230 = vmatmul.bf16.gmra.mxu3 %v4071_v59 }
 0x186   :  { %v2058_v1 = vpop.f32.mrf.mxu2  ;;  %v1794_v4 = vpop.f32.mrf.mxu0 }
 0x187   :  { %v2191_v2 = vpop.f32.mrf.mxu3  ;;  %v2059_v3 = vadd.f32 %v2058_v1, %v1926_v60  ;;  %v1927_v5 = vpop.f32.mrf.mxu1  ;;  %v921_v60 = vunpack.c.l.b16 %v209_v54  ;;  %v922_v1 = vunpack.c.h.b16 %v209_v54 }
 0x188   :  { %v1928_v7 = vadd.f32 %v1927_v5, %v1794_v4 }
 0x189   :  { %v5461_v8 = vadd.f32 %v2191_v2, %v2059_v3  ;;  %v923_v2 = vunpack.c.l.b16 %v210_v58  ;;  %v924_v3 = vunpack.c.h.b16 %v210_v58  ;;  %v1122_v10 = vpack.c.b16 %v922_v1, %v922_v1 }
 0x18b   :  { %v1123_v16 = vpack.c.b16 %v923_v2, %v923_v2  ;;  %v1124_v19 = vpack.c.b16 %v924_v3, %v924_v3 }
 0x18e   :  { %v2060_v27 = vpop.f32.mrf.mxu2  ;;  %v1797_v34 = vpop.f32.mrf.mxu0 }
 0x18f   :  { %v2193_v28 = vpop.f32.mrf.mxu3  ;;  %v2061_v32 = vadd.f32 %v2060_v27, %v1928_v7  ;;  %v1930_v36 = vpop.f32.mrf.mxu1  ;;  %v1121_v7 = vpack.c.b16 %v921_v60, %v921_v60 }
 0x190   :  { %v1931_v40 = vadd.f32 %v1930_v36, %v1797_v34 }
 0x191   :  { %v5487_v41 = vadd.f32 %v2193_v28, %v2061_v32  ;;  %1836 = vmatmul.bf16.gmra.mxu0 %v4091_v29 }
 0x192   :  { %1969 = vmatmul.bf16.gmra.mxu1 %v4095_v31 }
 0x193   :  { %2102 = vmatmul.bf16.gmra.mxu2 %v4099_v38  ;;  %v3370_v38 = vld [vmem:[%s7090_s0 + $0x10] sm:$0xf] }
 0x194   :  { %2235 = vmatmul.bf16.gmra.mxu3 %v4103_v39  ;;  %v4382_v39 = vld [vmem:[%s7090_s0 + $0x2c] sm:$0xf0] }
 0x195   :  { %v3371_v58 = vor.u32 %v4382_v39, %v3370_v38  ;;  %v4391_v38 = vld [vmem:[%s7090_s0 + $0x74] sm:$0xf0]  ;;  %v4387_v39 = vld [vmem:[%s7090_s0 + $0x5c] sm:$0xf] }
 0x196   :  { %v2063_v43 = vpop.f32.mrf.mxu2  ;;  %v1799_v49 = vpop.f32.mrf.mxu0 }
 0x197   :  { %v2196_v45 = vpop.f32.mrf.mxu3  ;;  %v2064_v47 = vadd.f32 %v2063_v43, %v1931_v40  ;;  %v1932_v51 = vpop.f32.mrf.mxu1  ;;  %v4378_v40 = vld [vmem:[%s7090_s0 + $0x14] sm:$0xf] }
 0x198   :  { %v1933_v55 = vadd.f32 %v1932_v51, %v1799_v49  ;;  %v3372_v43 = vld [vmem:[%s7090_s0 + $0x30] sm:$0xf0]  ;;  %v4379_v49 = vld [vmem:[%s7090_s0 + $0x1c] sm:$0xf] }
 0x199   :  { %v5495_v59 = vadd.f32 %v2196_v45, %v2064_v47  ;;  %v3378_v45 = vld [vmem:[%s7090_s0 + $0x18] sm:$0xf]  ;;  %v3380_v51 = vld [vmem:[%s7090_s0 + $0x38] sm:$0xf0]  ;;  %v3375_v60 = vor.u32 %v4378_v40, %v3372_v43 }
 0x19a   :  { %v4383_v47 = vld [vmem:[%s7090_s0 + $0x34] sm:$0xf0]  ;;  %v3412_v40 = vld [vmem:[%s7090_s0 + $0x78] sm:$0xf0] }
 0x19e   :  { %v2065_v4 = vpop.f32.mrf.mxu2  ;;  %v1802_v14 = vpop.f32.mrf.mxu0 }
 0x19f   :  { %v2198_v5 = vpop.f32.mrf.mxu3  ;;  %v2066_v11 = vadd.f32 %v2065_v4, %v1933_v55  ;;  %v1935_v15 = vpop.f32.mrf.mxu1  ;;  %v3379_v4 = vor.u32 %v4383_v47, %v3378_v45 }
 0x1a0   :  { %v1936_v20 = vadd.f32 %v1935_v15, %v1802_v14 }
 0x1a1   :  { %v5497_v24 = vadd.f32 %v2198_v5, %v2066_v11  ;;  %1841 = vmatmul.bf16.gmra.mxu0 %v1121_v7  ;;  %v3383_v5 = vor.u32 %v4379_v49, %v3380_v51 }
 0x1a2   :  { %1974 = vmatmul.bf16.gmra.mxu1 %v1122_v10 }
 0x1a3   :  { %2107 = vmatmul.bf16.gmra.mxu2 %v1123_v16 }
 0x1a4   :  { %2240 = vmatmul.bf16.gmra.mxu3 %v1124_v19 }
 0x1a6   :  { %v2068_v27 = vpop.f32.mrf.mxu2  ;;  %v1804_v31 = vpop.f32.mrf.mxu0 }
 0x1a7   :  { %v2201_v28 = vpop.f32.mrf.mxu3  ;;  %v2069_v29 = vadd.f32 %v2068_v27, %v1936_v20  ;;  %v1937_v32 = vpop.f32.mrf.mxu1 }
 0x1a8   :  { %v1938_v34 = vadd.f32 %v1937_v32, %v1804_v31  ;;  %v4386_v31 = vld [vmem:[%s7090_s0 + $0x54] sm:$0xf] }
 0x1a9   :  { %v5499_v36 = vadd.f32 %v2201_v28, %v2069_v29  ;;  %v3402_v28 = vld [vmem:[%s7090_s0 + $0x50] sm:$0xf]  ;;  %v3404_v32 = vld [vmem:[%s7090_s0 + $0x70] sm:$0xf0] }
 0x1aa   :  { %v4390_v29 = vld [vmem:[%s7090_s0 + $0x6c] sm:$0xf0]  ;;  %v3407_v49 = vor.u32 %v4386_v31, %v3404_v32  ;;  %v4399_v31 = vld [vmem:[%s7090_s0 + $0xb4] sm:$0xf0]  ;;  %v4395_v32 = vld [vmem:[%s7090_s0 + $0x9c] sm:$0xf] }
 0x1ab   :  { %v3403_v47 = vor.u32 %v4390_v29, %v3402_v28  ;;  %v3436_v28 = vld [vmem:[%s7090_s0 + $0xb0] sm:$0xf0]  ;;  %v3442_v29 = vld [vmem:[%s7090_s0 + $0x98] sm:$0xf] }
 0x1ae   :  { %v2070_v54 = vpop.f32.mrf.mxu2  ;;  %v1807_v2 = vpop.f32.mrf.mxu0 }
 0x1af   :  { %v2203_v55 = vpop.f32.mrf.mxu3  ;;  %v2071_v1 = vadd.f32 %v2070_v54, %v1938_v34  ;;  %v1940_v3 = vpop.f32.mrf.mxu1  ;;  %v3410_v34 = vld [vmem:[%s7090_s0 + $0x58] sm:$0xf] }
 0x1b0   :  { %v1941_v7 = vadd.f32 %v1940_v3, %v1807_v2 }
 0x1b1   :  { %v5525_v10 = vadd.f32 %v2203_v55, %v2071_v1  ;;  %2253 = vmatmul.bf16.vlgmr.msrb.gmra.mxu0 %v3371_v58  ;;  %v3411_v58 = vor.u32 %v4391_v38, %v3410_v34  ;;  %v3444_v34 = vld [vmem:[%s7090_s0 + $0xb8] sm:$0xf0] }
 0x1b2   :  { %2386 = vmatmul.bf16.vlgmr.msrb.gmra.mxu1 %v3375_v60  ;;  %v3415_v60 = vor.u32 %v4387_v39, %v3412_v40 }
 0x1b3   :  { %2519 = vmatmul.bf16.vlgmr.msrb.gmra.mxu2 %v3379_v4 }
 0x1b4   :  { %2652 = vmatmul.bf16.vlgmr.msrb.gmra.mxu3 %v3383_v5 }
 0x1b6   :  { %v2073_v11 = vpop.f32.mrf.mxu2  ;;  %v1809_v16 = vpop.f32.mrf.mxu0 }
 0x1b7   :  { %v2206_v14 = vpop.f32.mrf.mxu3  ;;  %v2074_v15 = vadd.f32 %v2073_v11, %v1941_v7  ;;  %v1942_v19 = vpop.f32.mrf.mxu1 }
 0x1b8   :  { %v1943_v20 = vadd.f32 %v1942_v19, %v1809_v16  ;;  %v3434_v16 = vld [vmem:[%s7090_s0 + $0x90] sm:$0xf] }
 0x1b9   :  { %v5527_v27 = vadd.f32 %v2206_v14, %v2074_v15  ;;  %v4398_v19 = vld [vmem:[%s7090_s0 + $0xac] sm:$0xf0] }
 0x1ba   :  { %v3435_v40 = vor.u32 %v4398_v19, %v3434_v16  ;;  %v4406_v16 = vld [vmem:[%s7090_s0 + $0xec] sm:$0xf0]  ;;  %v4402_v19 = vld [vmem:[%s7090_s0 + $0xd4] sm:$0xf] }
 0x1be   :  { %v2075_v43 = vpop.f32.mrf.mxu2  ;;  %v1812_v54 = vpop.f32.mrf.mxu0 }
 0x1bf   :  { %v2208_v45 = vpop.f32.mrf.mxu3  ;;  %v2076_v51 = vadd.f32 %v2075_v43, %v1943_v20  ;;  %v1945_v55 = vpop.f32.mrf.mxu1  ;;  %v4394_v20 = vld [vmem:[%s7090_s0 + $0x94] sm:$0xf] }
 0x1c0   :  { %v1946_v1 = vadd.f32 %v1945_v55, %v1812_v54  ;;  %v3439_v43 = vor.u32 %v4394_v20, %v3436_v28  ;;  %v3447_v54 = vor.u32 %v4395_v32, %v3444_v34  ;;  %v3468_v20 = vld [vmem:[%s7090_s0 + $0xf0] sm:$0xf0]  ;;  %v3474_v28 = vld [vmem:[%s7090_s0 + $0xd8] sm:$0xf]  ;;  %v3476_v32 = vld [vmem:[%s7090_s0 + $0xf8] sm:$0xf0] }
 0x1c1   :  { %v5553_v2 = vadd.f32 %v2208_v45, %v2076_v51  ;;  %2258 = vmatmul.bf16.gmra.mxu0 %v3403_v47  ;;  %v3443_v51 = vor.u32 %v4399_v31, %v3442_v29  ;;  %v4407_v29 = vld [vmem:[%s7090_s0 + $0xf4] sm:$0xf0]  ;;  %v4403_v31 = vld [vmem:[%s7090_s0 + $0xdc] sm:$0xf] }
 0x1c2   :  { %2391 = vmatmul.bf16.gmra.mxu1 %v3407_v49 }
 0x1c3   :  { %2524 = vmatmul.bf16.gmra.mxu2 %v3411_v58 }
 0x1c4   :  { %2657 = vmatmul.bf16.gmra.mxu3 %v3415_v60 }
 0x1c6   :  { %v2078_v3 = vpop.f32.mrf.mxu2  ;;  %v1814_v7 = vpop.f32.mrf.mxu0 }
 0x1c7   :  { %v2211_v4 = vpop.f32.mrf.mxu3  ;;  %v2079_v5 = vadd.f32 %v2078_v3, %v1946_v1  ;;  %v1947_v11 = vpop.f32.mrf.mxu1 }
 0x1c8   :  { %v1948_v14 = vadd.f32 %v1947_v11, %v1814_v7 }
 0x1c9   :  { %v5555_v15 = vadd.f32 %v2211_v4, %v2079_v5 }
 0x1ce   :  { %v2080_v38 = vpop.f32.mrf.mxu2  ;;  %v1817_v47 = vpop.f32.mrf.mxu0 }
 0x1cf   :  { %v2213_v39 = vpop.f32.mrf.mxu3  ;;  %v2081_v45 = vadd.f32 %v2080_v38, %v1948_v14  ;;  %v1950_v49 = vpop.f32.mrf.mxu1  ;;  %v3466_v14 = vld [vmem:[%s7090_s0 + $0xd0] sm:$0xf] }
 0x1d0   :  { %v1951_v55 = vadd.f32 %v1950_v49, %v1817_v47  ;;  %v3475_v49 = vor.u32 %v4407_v29, %v3474_v28  ;;  %v3506_v28 = vld [vmem:[%s7090_s0 + $0x118] sm:$0xf] }
 0x1d1   :  { %v5581_v58 = vadd.f32 %v2213_v39, %v2081_v45  ;;  %2263 = vmatmul.bf16.gmra.mxu0 %v3435_v40  ;;  %v3467_v39 = vor.u32 %v4406_v16, %v3466_v14  ;;  %v3471_v40 = vor.u32 %v4402_v19, %v3468_v20  ;;  %v4414_v16 = vld [vmem:[%s7090_s0 + $0x12c] sm:$0xf0]  ;;  %v4410_v19 = vld [vmem:[%s7090_s0 + $0x114] sm:$0xf]  ;;  %v4415_v29 = vld [vmem:[%s7090_s0 + $0x134] sm:$0xf0] }
 0x1d2   :  { %2396 = vmatmul.bf16.gmra.mxu1 %v3439_v43  ;;  %v3500_v20 = vld [vmem:[%s7090_s0 + $0x130] sm:$0xf0] }
 0x1d3   :  { %2529 = vmatmul.bf16.gmra.mxu2 %v3443_v51  ;;  %v3479_v51 = vor.u32 %v4403_v31, %v3476_v32  ;;  %v4411_v31 = vld [vmem:[%s7090_s0 + $0x11c] sm:$0xf] }
 0x1d4   :  { %2662 = vmatmul.bf16.gmra.mxu3 %v3447_v54  ;;  %v3508_v32 = vld [vmem:[%s7090_s0 + $0x138] sm:$0xf0] }
 0x1d6   :  { %v2083_v60 = vpop.f32.mrf.mxu2  ;;  %v1819_v4 = vpop.f32.mrf.mxu0 }
 0x1d7   :  { %v2216_v1 = vpop.f32.mrf.mxu3  ;;  %v2084_v3 = vadd.f32 %v2083_v60, %v1951_v55  ;;  %v1952_v5 = vpop.f32.mrf.mxu1 }
 0x1d8   :  { %v1953_v7 = vadd.f32 %v1952_v5, %v1819_v4 }
 0x1d9   :  { %v5583_v11 = vadd.f32 %v2216_v1, %v2084_v3 }
 0x1db   :  { %7107 = vst [vmem:[#allocation2_spill] sm:$0xff] %v5583_v11 }
 0x1de   :  { %v2085_v34 = vpop.f32.mrf.mxu2  ;;  %v1822_v45 = vpop.f32.mrf.mxu0 }
 0x1df   :  { %v2218_v38 = vpop.f32.mrf.mxu3  ;;  %v2086_v43 = vadd.f32 %v2085_v34, %v1953_v7  ;;  %v1955_v47 = vpop.f32.mrf.mxu1  ;;  %v3498_v7 = vld [vmem:[%s7090_s0 + $0x110] sm:$0xf] }
 0x1e0   :  { %v1956_v54 = vadd.f32 %v1955_v47, %v1822_v45 }
 0x1e1   :  { %v5609_v55 = vadd.f32 %v2218_v38, %v2086_v43  ;;  %2268 = vmatmul.bf16.gmra.mxu0 %v3467_v39  ;;  %v3499_v39 = vor.u32 %v4414_v16, %v3498_v7  ;;  %v4422_v16 = vld [vmem:[%s7090_s0 + $0x16c] sm:$0xf0] }
 0x1e2   :  { %2401 = vmatmul.bf16.gmra.mxu1 %v3471_v40  ;;  %v3503_v40 = vor.u32 %v4410_v19, %v3500_v20  ;;  %v4418_v19 = vld [vmem:[%s7090_s0 + $0x154] sm:$0xf] }
 0x1e3   :  { %7108 = vst [vmem:[#allocation3_spill] sm:$0xff] %v5609_v55  ;;  %2534 = vmatmul.bf16.gmra.mxu2 %v3475_v49  ;;  %v3507_v49 = vor.u32 %v4415_v29, %v3506_v28  ;;  %v3532_v20 = vld [vmem:[%s7090_s0 + $0x170] sm:$0xf0]  ;;  %v4423_v28 = vld [vmem:[%s7090_s0 + $0x174] sm:$0xf0] }
 0x1e4   :  { %2667 = vmatmul.bf16.gmra.mxu3 %v3479_v51  ;;  %v3511_v51 = vor.u32 %v4411_v31, %v3508_v32  ;;  %v4419_v29 = vld [vmem:[%s7090_s0 + $0x15c] sm:$0xf] }
 0x1e5   :  { %v3540_v31 = vld [vmem:[%s7090_s0 + $0x178] sm:$0xf0] }
 0x1e6   :  { %v2088_v60 = vpop.f32.mrf.mxu2  ;;  %v1824_v4 = vpop.f32.mrf.mxu0 }
 0x1e7   :  { %v2221_v1 = vpop.f32.mrf.mxu3  ;;  %v2089_v3 = vadd.f32 %v2088_v60, %v1956_v54  ;;  %v1957_v5 = vpop.f32.mrf.mxu1 }
 0x1e8   :  { %v1958_v11 = vadd.f32 %v1957_v5, %v1824_v4 }
 0x1e9   :  { %v5611_v14 = vadd.f32 %v2221_v1, %v2089_v3 }
 0x1eb   :  { %7109 = vst [vmem:[#allocation4_spill] sm:$0xff] %v5611_v14 }
 0x1ee   :  { %v2090_v34 = vpop.f32.mrf.mxu2  ;;  %v1827_v45 = vpop.f32.mrf.mxu0 }
 0x1ef   :  { %v2223_v38 = vpop.f32.mrf.mxu3  ;;  %v2091_v43 = vadd.f32 %v2090_v34, %v1958_v11  ;;  %v1960_v47 = vpop.f32.mrf.mxu1  ;;  %v3530_v11 = vld [vmem:[%s7090_s0 + $0x150] sm:$0xf] }
 0x1f0   :  { %v1961_v54 = vadd.f32 %v1960_v47, %v1827_v45 }
 0x1f1   :  { %v5637_v60 = vadd.f32 %v2223_v38, %v2091_v43  ;;  %2273 = vmatmul.bf16.gmra.mxu0 %v3499_v39  ;;  %v3531_v38 = vor.u32 %v4422_v16, %v3530_v11  ;;  %v3535_v39 = vor.u32 %v4418_v19, %v3532_v20  ;;  %v4430_v16 = vld [vmem:[%s7090_s0 + $0x1ac] sm:$0xf0]  ;;  %v4426_v19 = vld [vmem:[%s7090_s0 + $0x194] sm:$0xf] }
 0x1f2   :  { %2406 = vmatmul.bf16.gmra.mxu1 %v3503_v40  ;;  %v3564_v20 = vld [vmem:[%s7090_s0 + $0x1b0] sm:$0xf0] }
 0x1f3   :  { %7110 = vst [vmem:[#allocation5_spill] sm:$0xff] %v5637_v60  ;;  %2539 = vmatmul.bf16.gmra.mxu2 %v3507_v49  ;;  %v3543_v49 = vor.u32 %v4419_v29, %v3540_v31  ;;  %v3572_v29 = vld [vmem:[%s7090_s0 + $0x1b8] sm:$0xf0] }
 0x1f4   :  { %2672 = vmatmul.bf16.gmra.mxu3 %v3511_v51 }
 0x1f6   :  { %v2093_v1 = vpop.f32.mrf.mxu2  ;;  %v1829_v5 = vpop.f32.mrf.mxu0 }
 0x1f7   :  { %v2226_v3 = vpop.f32.mrf.mxu3  ;;  %v2094_v4 = vadd.f32 %v2093_v1, %v1961_v54  ;;  %v1962_v14 = vpop.f32.mrf.mxu1 }
 0x1f8   :  { %v1963_v55 = vadd.f32 %v1962_v14, %v1829_v5  ;;  %v3538_v14 = vld [vmem:[%s7090_s0 + $0x158] sm:$0xf] }
 0x1f9   :  { %v5639_v7 = vadd.f32 %v2226_v3, %v2094_v4  ;;  %v3539_v47 = vor.u32 %v4423_v28, %v3538_v14  ;;  %v4431_v14 = vld [vmem:[%s7090_s0 + $0x1b4] sm:$0xf0]  ;;  %v4427_v28 = vld [vmem:[%s7090_s0 + $0x19c] sm:$0xf] }
 0x1fb   :  { %7111 = vst [vmem:[#allocation6_spill] sm:$0xff] %v5639_v7 }
 0x1fe   :  { %v2095_v32 = vpop.f32.mrf.mxu2  ;;  %v1832_v43 = vpop.f32.mrf.mxu0 }
 0x1ff   :  { %v2228_v34 = vpop.f32.mrf.mxu3  ;;  %v2096_v40 = vadd.f32 %v2095_v32, %v1963_v55  ;;  %v1965_v45 = vpop.f32.mrf.mxu1  ;;  %v3562_v55 = vld [vmem:[%s7090_s0 + $0x190] sm:$0xf] }
 0x200   :  { %v1966_v51 = vadd.f32 %v1965_v45, %v1832_v43 }
 0x201   :  { %v5665_v54 = vadd.f32 %v2228_v34, %v2096_v40  ;;  %2278 = vmatmul.bf16.gmra.mxu0 %v3531_v38  ;;  %v3563_v34 = vor.u32 %v4430_v16, %v3562_v55  ;;  %v3567_v38 = vor.u32 %v4426_v19, %v3564_v20  ;;  %v4438_v16 = vld [vmem:[%s7090_s0 + $0x1ec] sm:$0xf0]  ;;  %v4434_v19 = vld [vmem:[%s7090_s0 + $0x1d4] sm:$0xf] }
 0x202   :  { %2411 = vmatmul.bf16.gmra.mxu1 %v3535_v39  ;;  %v3596_v20 = vld [vmem:[%s7090_s0 + $0x1f0] sm:$0xf0] }
 0x203   :  { %7112 = vst [vmem:[#allocation7_spill] sm:$0xff] %v5665_v54  ;;  %2544 = vmatmul.bf16.gmra.mxu2 %v3539_v47  ;;  %v3575_v47 = vor.u32 %v4427_v28, %v3572_v29  ;;  %v3604_v28 = vld [vmem:[%s7090_s0 + $0x1f8] sm:$0xf0] }
 0x204   :  { %2677 = vmatmul.bf16.gmra.mxu3 %v3543_v49 }
 0x206   :  { %v2098_v1 = vpop.f32.mrf.mxu2  ;;  %v1834_v5 = vpop.f32.mrf.mxu0 }
 0x207   :  { %v2231_v3 = vpop.f32.mrf.mxu3  ;;  %v2099_v4 = vadd.f32 %v2098_v1, %v1966_v51  ;;  %v1967_v7 = vpop.f32.mrf.mxu1 }
 0x208   :  { %v1968_v60 = vadd.f32 %v1967_v7, %v1834_v5  ;;  %v3570_v7 = vld [vmem:[%s7090_s0 + $0x198] sm:$0xf] }
 0x209   :  { %v5667_v11 = vadd.f32 %v2231_v3, %v2099_v4  ;;  %v3571_v45 = vor.u32 %v4431_v14, %v3570_v7  ;;  %v4439_v7 = vld [vmem:[%s7090_s0 + $0x1f4] sm:$0xf0]  ;;  %v4435_v14 = vld [vmem:[%s7090_s0 + $0x1dc] sm:$0xf] }
 0x20b   :  { %7113 = vst [vmem:[#allocation8_spill] sm:$0xff] %v5667_v11 }
 0x20e   :  { %v2100_v31 = vpop.f32.mrf.mxu2  ;;  %v1837_v40 = vpop.f32.mrf.mxu0 }
 0x20f   :  { %v2233_v32 = vpop.f32.mrf.mxu3  ;;  %v2101_v39 = vadd.f32 %v2100_v31, %v1968_v60  ;;  %v1970_v43 = vpop.f32.mrf.mxu1  ;;  %v3594_v60 = vld [vmem:[%s7090_s0 + $0x1d0] sm:$0xf] }
 0x210   :  { %v1971_v49 = vadd.f32 %v1970_v43, %v1837_v40 }
 0x211   :  { %v5693_v51 = vadd.f32 %v2233_v32, %v2101_v39  ;;  %2283 = vmatmul.bf16.gmra.mxu0 %v3563_v34  ;;  %v3595_v32 = vor.u32 %v4438_v16, %v3594_v60  ;;  %v3599_v34 = vor.u32 %v4434_v19, %v3596_v20  ;;  %v4446_v60 = vld [vmem:[%s7090_s0 + $0x22c] sm:$0xf0]  ;;  %v4442_v16 = vld [vmem:[%s7090_s0 + $0x214] sm:$0xf]  ;;  %v4447_v20 = vld [vmem:[%s7090_s0 + $0x234] sm:$0xf0] }
 0x212   :  { %2416 = vmatmul.bf16.gmra.mxu1 %v3567_v38  ;;  %v3628_v19 = vld [vmem:[%s7090_s0 + $0x230] sm:$0xf0] }
 0x213   :  { %7114 = vst [vmem:[#allocation9_spill] sm:$0xff] %v5693_v51  ;;  %2549 = vmatmul.bf16.gmra.mxu2 %v3571_v45  ;;  %v3607_v45 = vor.u32 %v4435_v14, %v3604_v28 }
 0x214   :  { %2682 = vmatmul.bf16.gmra.mxu3 %v3575_v47 }
 0x216   :  { %v2103_v1 = vpop.f32.mrf.mxu2  ;;  %v1839_v5 = vpop.f32.mrf.mxu0 }
 0x217   :  { %v2236_v3 = vpop.f32.mrf.mxu3  ;;  %v2104_v4 = vadd.f32 %v2103_v1, %v1971_v49  ;;  %v1972_v11 = vpop.f32.mrf.mxu1 }
 0x218   :  { %v1973_v54 = vadd.f32 %v1972_v11, %v1839_v5  ;;  %v3602_v11 = vld [vmem:[%s7090_s0 + $0x1d8] sm:$0xf] }
 0x219   :  { %v5695_v55 = vadd.f32 %v2236_v3, %v2104_v4  ;;  %v3603_v43 = vor.u32 %v4439_v7, %v3602_v11  ;;  %v4443_v11 = vld [vmem:[%s7090_s0 + $0x21c] sm:$0xf] }
 0x21a   :  { %v3636_v7 = vld [vmem:[%s7090_s0 + $0x238] sm:$0xf0] }
 0x21b   :  { %7115 = vst [vmem:[#allocation10_spill] sm:$0xff] %v5695_v55 }
 0x21e   :  { %v2105_v29 = vpop.f32.mrf.mxu2  ;;  %v1842_v39 = vpop.f32.mrf.mxu0 }
 0x21f   :  { %v2238_v31 = vpop.f32.mrf.mxu3  ;;  %v2106_v38 = vadd.f32 %v2105_v29, %v1973_v54  ;;  %v1975_v40 = vpop.f32.mrf.mxu1  ;;  %v3626_v54 = vld [vmem:[%s7090_s0 + $0x210] sm:$0xf] }
 0x220   :  { %v1976_v47 = vadd.f32 %v1975_v40, %v1842_v39  ;;  %v3627_v29 = vor.u32 %v4446_v60, %v3626_v54  ;;  %v3639_v39 = vor.u32 %v4443_v11, %v3636_v7  ;;  %v4451_v11 = vld [vmem:[%s7090_s0 + $0x25c] sm:$0xf] }
 0x221   :  { %v5721_v49 = vadd.f32 %v2238_v31, %v2106_v38  ;;  %2288 = vmatmul.bf16.gmra.mxu0 %v3595_v32  ;;  %v3631_v31 = vor.u32 %v4442_v16, %v3628_v19  ;;  %v3658_v16 = vld [vmem:[%s7090_s0 + $0x250] sm:$0xf]  ;;  %v4450_v19 = vld [vmem:[%s7090_s0 + $0x254] sm:$0xf]  ;;  %v3668_v7 = vld [vmem:[%s7090_s0 + $0x278] sm:$0xf0] }
 0x222   :  { %2421 = vmatmul.bf16.gmra.mxu1 %v3599_v34 }
 0x223   :  { %2554 = vmatmul.bf16.gmra.mxu2 %v3603_v43 }
 0x224   :  { %2687 = vmatmul.bf16.gmra.mxu3 %v3607_v45 }
 0x226   :  { %v2108_v1 = vpop.f32.mrf.mxu2  ;;  %v1844_v5 = vpop.f32.mrf.mxu0 }
 0x227   :  { %v2241_v3 = vpop.f32.mrf.mxu3  ;;  %v2109_v4 = vadd.f32 %v2108_v1, %v1976_v47  ;;  %v1977_v55 = vpop.f32.mrf.mxu1 }
 0x228   :  { %v3634_v55 = vld [vmem:[%s7090_s0 + $0x218] sm:$0xf] }
 0x229   :  { %v5723_v51 = vadd.f32 %v2241_v3, %v2109_v4  ;;  %v3635_v38 = vor.u32 %v4447_v20, %v3634_v55  ;;  %v3660_v55 = vld [vmem:[%s7090_s0 + $0x270] sm:$0xf0]  ;;  %v4455_v20 = vld [vmem:[%s7090_s0 + $0x274] sm:$0xf0] }
 0x22e   :  { %v2110_v14 = vpop.f32.mrf.mxu2  ;;  %v2254_v32 = vpop.f32.mrf.mxu0 }
 0x22f   :  { %v2243_v28 = vpop.f32.mrf.mxu3  ;;  %v2387_v34 = vpop.f32.mrf.mxu1  ;;  %v2255_v40 = vadd.f32 %v2254_v32, %v5021_v37  ;;  %v4454_v37 = vld [vmem:[%s7090_s0 + $0x26c] sm:$0xf0] }
 0x231   :  { %v2388_v43 = vadd.f32 %v2387_v34, %v2255_v40  ;;  %2293 = vmatmul.bf16.gmra.mxu0 %v3627_v29  ;;  %v3659_v29 = vor.u32 %v4454_v37, %v3658_v16  ;;  %v3671_v40 = vor.u32 %v4451_v11, %v3668_v7  ;;  %v4463_v11 = vld [vmem:[%s7090_s0 + $0x2b4] sm:$0xf0]  ;;  %v4459_v7 = vld [vmem:[%s7090_s0 + $0x29c] sm:$0xf] }
 0x232   :  { %2426 = vmatmul.bf16.gmra.mxu1 %v3631_v31  ;;  %v3663_v31 = vor.u32 %v4450_v19, %v3660_v55  ;;  %v4462_v55 = vld [vmem:[%s7090_s0 + $0x2ac] sm:$0xf0] }
 0x233   :  { %2559 = vmatmul.bf16.gmra.mxu2 %v3635_v38 }
 0x234   :  { %2692 = vmatmul.bf16.gmra.mxu3 %v3639_v39 }
 0x236   :  { %v2520_v45 = vpop.f32.mrf.mxu2  ;;  %v2256_v3 = vpop.f32.mrf.mxu0 }
 0x237   :  { %v2653_v47 = vpop.f32.mrf.mxu3  ;;  %v2521_v1 = vadd.f32 %v2520_v45, %v2388_v43  ;;  %v2389_v4 = vpop.f32.mrf.mxu1  ;;  %v2257_v5 = vadd.f32 %v2256_v3, %v5047_v56  ;;  %v3666_v56 = vld [vmem:[%s7090_s0 + $0x258] sm:$0xf] }
 0x238   :  { %v3667_v39 = vor.u32 %v4455_v20, %v3666_v56  ;;  %v4458_v56 = vld [vmem:[%s7090_s0 + $0x294] sm:$0xf] }
 0x239   :  { %v5751_v54 = vadd.f32 %v2653_v47, %v2521_v1  ;;  %v2390_v60 = vadd.f32 %v2389_v4, %v2257_v5  ;;  %v3692_v20 = vld [vmem:[%s7090_s0 + $0x2b0] sm:$0xf0] }
 0x23e   :  { %v2522_v14 = vpop.f32.mrf.mxu2  ;;  %v2259_v34 = vpop.f32.mrf.mxu0 }
 0x23f   :  { %v2655_v28 = vpop.f32.mrf.mxu3  ;;  %v2523_v32 = vadd.f32 %v2522_v14, %v2390_v60  ;;  %v2392_v38 = vpop.f32.mrf.mxu1  ;;  %v2260_v43 = vadd.f32 %v2259_v34, %v5049_v63  ;;  %v3690_v63 = vld [vmem:[%s7090_s0 + $0x290] sm:$0xf]  ;;  %v3700_v14 = vld [vmem:[%s7090_s0 + $0x2b8] sm:$0xf0] }
 0x241   :  { %v5778_v45 = vadd.f32 %v2655_v28, %v2523_v32  ;;  %v2393_v47 = vadd.f32 %v2392_v38, %v2260_v43  ;;  %2298 = vmatmul.bf16.gmra.mxu0 %v3659_v29  ;;  %v3695_v32 = vor.u32 %v4458_v56, %v3692_v20  ;;  %v3703_v43 = vor.u32 %v4459_v7, %v3700_v14  ;;  %v4470_v20 = vld [vmem:[%s7090_s0 + $0x2ec] sm:$0xf0]  ;;  %v4471_v7 = vld [vmem:[%s7090_s0 + $0x2f4] sm:$0xf0]  ;;  %v4467_v14 = vld [vmem:[%s7090_s0 + $0x2dc] sm:$0xf] }
 0x242   :  { %2431 = vmatmul.bf16.gmra.mxu1 %v3663_v31  ;;  %v3691_v31 = vor.u32 %v4462_v55, %v3690_v63 }
 0x243   :  { %2564 = vmatmul.bf16.gmra.mxu2 %v3667_v39 }
 0x244   :  { %2697 = vmatmul.bf16.gmra.mxu3 %v3671_v40 }
 0x246   :  { %v2525_v1 = vpop.f32.mrf.mxu2  ;;  %v2261_v5 = vpop.f32.mrf.mxu0 }
 0x247   :  { %v2658_v3 = vpop.f32.mrf.mxu3  ;;  %v2526_v4 = vadd.f32 %v2525_v1, %v2393_v47  ;;  %v2394_v16 = vpop.f32.mrf.mxu1  ;;  %v2262_v60 = vadd.f32 %v2261_v5, %v5075_v18  ;;  %v3698_v18 = vld [vmem:[%s7090_s0 + $0x298] sm:$0xf] }
 0x248   :  { %v3699_v40 = vor.u32 %v4463_v11, %v3698_v18  ;;  %v4466_v18 = vld [vmem:[%s7090_s0 + $0x2d4] sm:$0xf] }
 0x249   :  { %v5781_v37 = vadd.f32 %v2658_v3, %v2526_v4  ;;  %v2395_v19 = vadd.f32 %v2394_v16, %v2262_v60  ;;  %v3724_v11 = vld [vmem:[%s7090_s0 + $0x2f0] sm:$0xf0] }
 0x24e   :  { %v2527_v28 = vpop.f32.mrf.mxu2  ;;  %v2264_v38 = vpop.f32.mrf.mxu0 }
 0x24f   :  { %v2660_v29 = vpop.f32.mrf.mxu3  ;;  %v2528_v34 = vadd.f32 %v2527_v28, %v2395_v19  ;;  %v2397_v39 = vpop.f32.mrf.mxu1  ;;  %v2265_v47 = vadd.f32 %v2264_v38, %v5077_v25  ;;  %v3722_v25 = vld [vmem:[%s7090_s0 + $0x2d0] sm:$0xf]  ;;  %v3732_v28 = vld [vmem:[%s7090_s0 + $0x2f8] sm:$0xf0] }
 0x251   :  { %v5808_v1 = vadd.f32 %v2660_v29, %v2528_v34  ;;  %v2398_v3 = vadd.f32 %v2397_v39, %v2265_v47  ;;  %2303 = vmatmul.bf16.gmra.mxu0 %v3691_v31  ;;  %v3727_v34 = vor.u32 %v4466_v18, %v3724_v11  ;;  %v3735_v47 = vor.u32 %v4467_v14, %v3732_v28  ;;  %v4478_v11 = vld [vmem:[%s7090_s0 + $0x32c] sm:$0xf0]  ;;  %v4479_v14 = vld [vmem:[%s7090_s0 + $0x334] sm:$0xf0]  ;;  %v4475_v28 = vld [vmem:[%s7090_s0 + $0x31c] sm:$0xf] }
 0x252   :  { %2436 = vmatmul.bf16.gmra.mxu1 %v3695_v32  ;;  %v3723_v32 = vor.u32 %v4470_v20, %v3722_v25 }
 0x253   :  { %2569 = vmatmul.bf16.gmra.mxu2 %v3699_v40 }
 0x254   :  { %2702 = vmatmul.bf16.gmra.mxu3 %v3703_v43 }
 0x256   :  { %v2530_v4 = vpop.f32.mrf.mxu2  ;;  %v2266_v60 = vpop.f32.mrf.mxu0 }
 0x257   :  { %v2663_v5 = vpop.f32.mrf.mxu3  ;;  %v2531_v16 = vadd.f32 %v2530_v4, %v2398_v3  ;;  %v2399_v63 = vpop.f32.mrf.mxu1  ;;  %v2267_v19 = vadd.f32 %v2266_v60, %v5112_v48  ;;  %v3730_v48 = vld [vmem:[%s7090_s0 + $0x2d8] sm:$0xf] }
 0x258   :  { %v3731_v43 = vor.u32 %v4471_v7, %v3730_v48  ;;  %v4474_v48 = vld [vmem:[%s7090_s0 + $0x314] sm:$0xf] }
 0x259   :  { %v5811_v55 = vadd.f32 %v2663_v5, %v2531_v16  ;;  %v2400_v56 = vadd.f32 %v2399_v63, %v2267_v19  ;;  %v3756_v7 = vld [vmem:[%s7090_s0 + $0x330] sm:$0xf0] }
 0x25e   :  { %v2532_v29 = vpop.f32.mrf.mxu2  ;;  %v2269_v39 = vpop.f32.mrf.mxu0 }
 0x25f   :  { %v2665_v31 = vpop.f32.mrf.mxu3  ;;  %v2533_v38 = vadd.f32 %v2532_v29, %v2400_v56  ;;  %v2402_v40 = vpop.f32.mrf.mxu1  ;;  %v2270_v3 = vadd.f32 %v2269_v39, %v5117_v57  ;;  %v3754_v57 = vld [vmem:[%s7090_s0 + $0x310] sm:$0xf]  ;;  %v3764_v29 = vld [vmem:[%s7090_s0 + $0x338] sm:$0xf0] }
 0x261   :  { %v5838_v4 = vadd.f32 %v2665_v31, %v2533_v38  ;;  %v2403_v5 = vadd.f32 %v2402_v40, %v2270_v3  ;;  %2308 = vmatmul.bf16.gmra.mxu0 %v3723_v32  ;;  %v3759_v38 = vor.u32 %v4474_v48, %v3756_v7  ;;  %v3767_v3 = vor.u32 %v4475_v28, %v3764_v29  ;;  %v4486_v7 = vld [vmem:[%s7090_s0 + $0x36c] sm:$0xf0]  ;;  %v4487_v28 = vld [vmem:[%s7090_s0 + $0x374] sm:$0xf0]  ;;  %v4483_v29 = vld [vmem:[%s7090_s0 + $0x35c] sm:$0xf] }
 0x262   :  { %2441 = vmatmul.bf16.gmra.mxu1 %v3727_v34  ;;  %v3755_v34 = vor.u32 %v4478_v11, %v3754_v57 }
 0x263   :  { %2574 = vmatmul.bf16.gmra.mxu2 %v3731_v43 }
 0x264   :  { %2707 = vmatmul.bf16.gmra.mxu3 %v3735_v47 }
 0x266   :  { %v2535_v16 = vpop.f32.mrf.mxu2  ;;  %v2271_v19 = vpop.f32.mrf.mxu0 }
 0x267   :  { %v2668_v60 = vpop.f32.mrf.mxu3  ;;  %v2536_v63 = vadd.f32 %v2535_v16, %v2403_v5  ;;  %v2404_v25 = vpop.f32.mrf.mxu1  ;;  %v2272_v56 = vadd.f32 %v2271_v19, %v5143_v13  ;;  %v3762_v13 = vld [vmem:[%s7090_s0 + $0x318] sm:$0xf] }
 0x268   :  { %v3763_v47 = vor.u32 %v4479_v14, %v3762_v13  ;;  %v4482_v13 = vld [vmem:[%s7090_s0 + $0x354] sm:$0xf] }
 0x269   :  { %v5841_v20 = vadd.f32 %v2668_v60, %v2536_v63  ;;  %v2405_v18 = vadd.f32 %v2404_v25, %v2272_v56  ;;  %v3788_v14 = vld [vmem:[%s7090_s0 + $0x370] sm:$0xf0] }
 0x26e   :  { %v2537_v31 = vpop.f32.mrf.mxu2  ;;  %v2274_v40 = vpop.f32.mrf.mxu0 }
 0x26f   :  { %v2670_v32 = vpop.f32.mrf.mxu3  ;;  %v2538_v39 = vadd.f32 %v2537_v31, %v2405_v18  ;;  %v2407_v43 = vpop.f32.mrf.mxu1  ;;  %v2275_v5 = vadd.f32 %v2274_v40, %v5145_v21  ;;  %v3786_v21 = vld [vmem:[%s7090_s0 + $0x350] sm:$0xf]  ;;  %v3796_v31 = vld [vmem:[%s7090_s0 + $0x378] sm:$0xf0] }
 0x271   :  { %v5868_v16 = vadd.f32 %v2670_v32, %v2538_v39  ;;  %v2408_v60 = vadd.f32 %v2407_v43, %v2275_v5  ;;  %2313 = vmatmul.bf16.gmra.mxu0 %v3755_v34  ;;  %v3791_v39 = vor.u32 %v4482_v13, %v3788_v14  ;;  %v3799_v5 = vor.u32 %v4483_v29, %v3796_v31  ;;  %v4494_v14 = vld [vmem:[%s7090_s0 + $0x3ac] sm:$0xf0]  ;;  %v4495_v29 = vld [vmem:[%s7090_s0 + $0x3b4] sm:$0xf0]  ;;  %v4491_v31 = vld [vmem:[%s7090_s0 + $0x39c] sm:$0xf] }
 0x272   :  { %2446 = vmatmul.bf16.gmra.mxu1 %v3759_v38  ;;  %v3787_v38 = vor.u32 %v4486_v7, %v3786_v21 }
 0x273   :  { %2579 = vmatmul.bf16.gmra.mxu2 %v3763_v47 }
 0x274   :  { %2712 = vmatmul.bf16.gmra.mxu3 %v3767_v3 }
 0x276   :  { %v2540_v63 = vpop.f32.mrf.mxu2  ;;  %v2276_v56 = vpop.f32.mrf.mxu0 }
 0x277   :  { %v2673_v19 = vpop.f32.mrf.mxu3  ;;  %v2541_v25 = vadd.f32 %v2540_v63, %v2408_v60  ;;  %v2409_v57 = vpop.f32.mrf.mxu1  ;;  %v2277_v18 = vadd.f32 %v2276_v56, %v5171_v42  ;;  %v3794_v42 = vld [vmem:[%s7090_s0 + $0x358] sm:$0xf] }
 0x278   :  { %v3795_v3 = vor.u32 %v4487_v28, %v3794_v42  ;;  %v4490_v42 = vld [vmem:[%s7090_s0 + $0x394] sm:$0xf] }
 0x279   :  { %v5871_v11 = vadd.f32 %v2673_v19, %v2541_v25  ;;  %v2410_v48 = vadd.f32 %v2409_v57, %v2277_v18  ;;  %v3820_v28 = vld [vmem:[%s7090_s0 + $0x3b0] sm:$0xf0] }
 0x27e   :  { %v2542_v32 = vpop.f32.mrf.mxu2  ;;  %v2279_v43 = vpop.f32.mrf.mxu0 }
 0x27f   :  { %v2675_v34 = vpop.f32.mrf.mxu3  ;;  %v2543_v40 = vadd.f32 %v2542_v32, %v2410_v48  ;;  %v2412_v47 = vpop.f32.mrf.mxu1  ;;  %v2280_v60 = vadd.f32 %v2279_v43, %v5173_v50  ;;  %v3818_v50 = vld [vmem:[%s7090_s0 + $0x390] sm:$0xf]  ;;  %v3828_v32 = vld [vmem:[%s7090_s0 + $0x3b8] sm:$0xf0] }
 0x281   :  { %v5898_v63 = vadd.f32 %v2675_v34, %v2543_v40  ;;  %v2413_v19 = vadd.f32 %v2412_v47, %v2280_v60  ;;  %2318 = vmatmul.bf16.gmra.mxu0 %v3787_v38  ;;  %v3823_v40 = vor.u32 %v4490_v42, %v3820_v28  ;;  %v3831_v60 = vor.u32 %v4491_v31, %v3828_v32  ;;  %v4502_v28 = vld [vmem:[%s7090_s0 + $0x3ec] sm:$0xf0]  ;;  %v4503_v31 = vld [vmem:[%s7090_s0 + $0x3f4] sm:$0xf0]  ;;  %v4499_v32 = vld [vmem:[%s7090_s0 + $0x3dc] sm:$0xf] }
 0x282   :  { %2451 = vmatmul.bf16.gmra.mxu1 %v3791_v39  ;;  %v3819_v39 = vor.u32 %v4494_v14, %v3818_v50 }
 0x283   :  { %2584 = vmatmul.bf16.gmra.mxu2 %v3795_v3 }
 0x284   :  { %2717 = vmatmul.bf16.gmra.mxu3 %v3799_v5 }
 0x286   :  { %v2545_v25 = vpop.f32.mrf.mxu2  ;;  %v2281_v18 = vpop.f32.mrf.mxu0 }
 0x287   :  { %v2678_v56 = vpop.f32.mrf.mxu3  ;;  %v2546_v57 = vadd.f32 %v2545_v25, %v2413_v19  ;;  %v2414_v21 = vpop.f32.mrf.mxu1  ;;  %v2282_v48 = vadd.f32 %v2281_v18, %v5202_v9  ;;  %v3826_v9 = vld [vmem:[%s7090_s0 + $0x398] sm:$0xf] }
 0x288   :  { %v3827_v5 = vor.u32 %v4495_v29, %v3826_v9  ;;  %v4498_v9 = vld [vmem:[%s7090_s0 + $0x3d4] sm:$0xf] }
 0x289   :  { %v5901_v7 = vadd.f32 %v2678_v56, %v2546_v57  ;;  %v2415_v13 = vadd.f32 %v2414_v21, %v2282_v48  ;;  %v3852_v29 = vld [vmem:[%s7090_s0 + $0x3f0] sm:$0xf0] }
 0x28e   :  { %v2547_v34 = vpop.f32.mrf.mxu2  ;;  %v2284_v47 = vpop.f32.mrf.mxu0 }
 0x28f   :  { %v2680_v38 = vpop.f32.mrf.mxu3  ;;  %v2548_v43 = vadd.f32 %v2547_v34, %v2415_v13  ;;  %v2417_v3 = vpop.f32.mrf.mxu1  ;;  %v2285_v19 = vadd.f32 %v2284_v47, %v5213_v22  ;;  %v3850_v22 = vld [vmem:[%s7090_s0 + $0x3d0] sm:$0xf]  ;;  %v3860_v34 = vld [vmem:[%s7090_s0 + $0x3f8] sm:$0xf0] }
 0x291   :  { %v5928_v25 = vadd.f32 %v2680_v38, %v2548_v43  ;;  %v2418_v56 = vadd.f32 %v2417_v3, %v2285_v19  ;;  %2323 = vmatmul.bf16.gmra.mxu0 %v3819_v39  ;;  %v3855_v43 = vor.u32 %v4498_v9, %v3852_v29  ;;  %v3863_v19 = vor.u32 %v4499_v32, %v3860_v34  ;;  %v4510_v29 = vld [vmem:[%s7090_s0 + $0x42c] sm:$0xf0]  ;;  %v4511_v32 = vld [vmem:[%s7090_s0 + $0x434] sm:$0xf0]  ;;  %v4507_v34 = vld [vmem:[%s7090_s0 + $0x41c] sm:$0xf] }
 0x292   :  { %2456 = vmatmul.bf16.gmra.mxu1 %v3823_v40  ;;  %v3851_v40 = vor.u32 %v4502_v28, %v3850_v22 }
 0x293   :  { %2589 = vmatmul.bf16.gmra.mxu2 %v3827_v5 }
 0x294   :  { %2722 = vmatmul.bf16.gmra.mxu3 %v3831_v60 }
 0x296   :  { %v2550_v57 = vpop.f32.mrf.mxu2  ;;  %v2286_v48 = vpop.f32.mrf.mxu0 }
 0x297   :  { %v2683_v18 = vpop.f32.mrf.mxu3  ;;  %v2551_v21 = vadd.f32 %v2550_v57, %v2418_v56  ;;  %v2419_v50 = vpop.f32.mrf.mxu1  ;;  %v2287_v13 = vadd.f32 %v2286_v48, %v5239_v44  ;;  %v3858_v44 = vld [vmem:[%s7090_s0 + $0x3d8] sm:$0xf] }
 0x298   :  { %v3859_v60 = vor.u32 %v4503_v31, %v3858_v44  ;;  %v4506_v44 = vld [vmem:[%s7090_s0 + $0x414] sm:$0xf] }
 0x299   :  { %v5931_v14 = vadd.f32 %v2683_v18, %v2551_v21  ;;  %v2420_v42 = vadd.f32 %v2419_v50, %v2287_v13  ;;  %v3884_v31 = vld [vmem:[%s7090_s0 + $0x430] sm:$0xf0] }
 0x29e   :  { %v2552_v38 = vpop.f32.mrf.mxu2  ;;  %v2289_v3 = vpop.f32.mrf.mxu0 }
 0x29f   :  { %v2685_v39 = vpop.f32.mrf.mxu3  ;;  %v2553_v47 = vadd.f32 %v2552_v38, %v2420_v42  ;;  %v2422_v5 = vpop.f32.mrf.mxu1  ;;  %v2290_v56 = vadd.f32 %v2289_v3, %v5241_v53  ;;  %v3882_v53 = vld [vmem:[%s7090_s0 + $0x410] sm:$0xf]  ;;  %v3892_v38 = vld [vmem:[%s7090_s0 + $0x438] sm:$0xf0] }
 0x2a1   :  { %v5958_v57 = vadd.f32 %v2685_v39, %v2553_v47  ;;  %v2423_v18 = vadd.f32 %v2422_v5, %v2290_v56  ;;  %2328 = vmatmul.bf16.gmra.mxu0 %v3851_v40  ;;  %v3887_v47 = vor.u32 %v4506_v44, %v3884_v31  ;;  %v3895_v56 = vor.u32 %v4507_v34, %v3892_v38  ;;  %v4518_v31 = vld [vmem:[%s7090_s0 + $0x46c] sm:$0xf0]  ;;  %v4519_v34 = vld [vmem:[%s7090_s0 + $0x474] sm:$0xf0]  ;;  %v4515_v38 = vld [vmem:[%s7090_s0 + $0x45c] sm:$0xf] }
 0x2a2   :  { %2461 = vmatmul.bf16.gmra.mxu1 %v3855_v43  ;;  %v3883_v43 = vor.u32 %v4510_v29, %v3882_v53 }
 0x2a3   :  { %2594 = vmatmul.bf16.gmra.mxu2 %v3859_v60 }
 0x2a4   :  { %2727 = vmatmul.bf16.gmra.mxu3 %v3863_v19 }
 0x2a6   :  { %v2555_v21 = vpop.f32.mrf.mxu2  ;;  %v2291_v13 = vpop.f32.mrf.mxu0 }
 0x2a7   :  { %v2688_v48 = vpop.f32.mrf.mxu3  ;;  %v2556_v50 = vadd.f32 %v2555_v21, %v2423_v18  ;;  %v2424_v22 = vpop.f32.mrf.mxu1  ;;  %v2292_v42 = vadd.f32 %v2291_v13, %v5267_v12  ;;  %v3890_v12 = vld [vmem:[%s7090_s0 + $0x418] sm:$0xf] }
 0x2a8   :  { %v3891_v19 = vor.u32 %v4511_v32, %v3890_v12  ;;  %v4514_v12 = vld [vmem:[%s7090_s0 + $0x454] sm:$0xf] }
 0x2a9   :  { %v5961_v28 = vadd.f32 %v2688_v48, %v2556_v50  ;;  %v2425_v9 = vadd.f32 %v2424_v22, %v2292_v42  ;;  %v3916_v32 = vld [vmem:[%s7090_s0 + $0x470] sm:$0xf0] }
 0x2ae   :  { %v2557_v39 = vpop.f32.mrf.mxu2  ;;  %v2294_v5 = vpop.f32.mrf.mxu0 }
 0x2af   :  { %v2690_v40 = vpop.f32.mrf.mxu3  ;;  %v2558_v3 = vadd.f32 %v2557_v39, %v2425_v9  ;;  %v2427_v60 = vpop.f32.mrf.mxu1  ;;  %v2295_v18 = vadd.f32 %v2294_v5, %v5269_v23  ;;  %v3914_v23 = vld [vmem:[%s7090_s0 + $0x450] sm:$0xf]  ;;  %v3924_v39 = vld [vmem:[%s7090_s0 + $0x478] sm:$0xf0] }
 0x2b1   :  { %v5988_v21 = vadd.f32 %v2690_v40, %v2558_v3  ;;  %v2428_v48 = vadd.f32 %v2427_v60, %v2295_v18  ;;  %2333 = vmatmul.bf16.gmra.mxu0 %v3883_v43  ;;  %v3919_v3 = vor.u32 %v4514_v12, %v3916_v32  ;;  %v3927_v18 = vor.u32 %v4515_v38, %v3924_v39  ;;  %v4526_v32 = vld [vmem:[%s7090_s0 + $0x4ac] sm:$0xf0]  ;;  %v4527_v38 = vld [vmem:[%s7090_s0 + $0x4b4] sm:$0xf0]  ;;  %v4523_v39 = vld [vmem:[%s7090_s0 + $0x49c] sm:$0xf] }
 0x2b2   :  { %2466 = vmatmul.bf16.gmra.mxu1 %v3887_v47  ;;  %v3915_v47 = vor.u32 %v4518_v31, %v3914_v23 }
 0x2b3   :  { %2599 = vmatmul.bf16.gmra.mxu2 %v3891_v19 }
 0x2b4   :  { %2732 = vmatmul.bf16.gmra.mxu3 %v3895_v56 }
 0x2b6   :  { %v2560_v50 = vpop.f32.mrf.mxu2  ;;  %v2296_v42 = vpop.f32.mrf.mxu0 }
 0x2b7   :  { %v2693_v13 = vpop.f32.mrf.mxu3  ;;  %v2561_v22 = vadd.f32 %v2560_v50, %v2428_v48  ;;  %v2429_v53 = vpop.f32.mrf.mxu1  ;;  %v2297_v9 = vadd.f32 %v2296_v42, %v5295_v46  ;;  %v3922_v46 = vld [vmem:[%s7090_s0 + $0x458] sm:$0xf] }
 0x2b8   :  { %v3923_v56 = vor.u32 %v4519_v34, %v3922_v46  ;;  %v4522_v46 = vld [vmem:[%s7090_s0 + $0x494] sm:$0xf] }
 0x2b9   :  { %v5991_v29 = vadd.f32 %v2693_v13, %v2561_v22  ;;  %v2430_v44 = vadd.f32 %v2429_v53, %v2297_v9  ;;  %v3948_v34 = vld [vmem:[%s7090_s0 + $0x4b0] sm:$0xf0] }
 0x2be   :  { %v2562_v40 = vpop.f32.mrf.mxu2  ;;  %v2299_v60 = vpop.f32.mrf.mxu0 }
 0x2bf   :  { %v2695_v43 = vpop.f32.mrf.mxu3  ;;  %v2563_v5 = vadd.f32 %v2562_v40, %v2430_v44  ;;  %v2432_v19 = vpop.f32.mrf.mxu1  ;;  %v2300_v48 = vadd.f32 %v2299_v60, %v5309_v62  ;;  %v3946_v62 = vld [vmem:[%s7090_s0 + $0x490] sm:$0xf]  ;;  %v3956_v40 = vld [vmem:[%s7090_s0 + $0x4b8] sm:$0xf0] }
 0x2c1   :  { %v6018_v50 = vadd.f32 %v2695_v43, %v2563_v5  ;;  %v2433_v13 = vadd.f32 %v2432_v19, %v2300_v48  ;;  %2338 = vmatmul.bf16.gmra.mxu0 %v3915_v47  ;;  %v3951_v5 = vor.u32 %v4522_v46, %v3948_v34  ;;  %v3959_v48 = vor.u32 %v4523_v39, %v3956_v40  ;;  %v4534_v34 = vld [vmem:[%s7090_s0 + $0x4ec] sm:$0xf0]  ;;  %v4535_v39 = vld [vmem:[%s7090_s0 + $0x4f4] sm:$0xf0]  ;;  %v4531_v40 = vld [vmem:[%s7090_s0 + $0x4dc] sm:$0xf] }
 0x2c2   :  { %2471 = vmatmul.bf16.gmra.mxu1 %v3919_v3  ;;  %v3947_v3 = vor.u32 %v4526_v32, %v3946_v62 }
 0x2c3   :  { %2604 = vmatmul.bf16.gmra.mxu2 %v3923_v56 }
 0x2c4   :  { %2737 = vmatmul.bf16.gmra.mxu3 %v3927_v18 }
 0x2c6   :  { %v2565_v22 = vpop.f32.mrf.mxu2  ;;  %v2301_v9 = vpop.f32.mrf.mxu0 }
 0x2c7   :  { %v2698_v42 = vpop.f32.mrf.mxu3  ;;  %v2566_v53 = vadd.f32 %v2565_v22, %v2433_v13  ;;  %v2434_v23 = vpop.f32.mrf.mxu1  ;;  %v2302_v44 = vadd.f32 %v2301_v9, %v5335_v26  ;;  %v3954_v26 = vld [vmem:[%s7090_s0 + $0x498] sm:$0xf] }
 0x2c8   :  { %v3955_v18 = vor.u32 %v4527_v38, %v3954_v26  ;;  %v4530_v26 = vld [vmem:[%s7090_s0 + $0x4d4] sm:$0xf] }
 0x2c9   :  { %v6021_v31 = vadd.f32 %v2698_v42, %v2566_v53  ;;  %v2435_v12 = vadd.f32 %v2434_v23, %v2302_v44  ;;  %v3980_v38 = vld [vmem:[%s7090_s0 + $0x4f0] sm:$0xf0] }
 0x2ce   :  { %v2567_v43 = vpop.f32.mrf.mxu2  ;;  %v2304_v19 = vpop.f32.mrf.mxu0 }
 0x2cf   :  { %v2700_v47 = vpop.f32.mrf.mxu3  ;;  %v2568_v60 = vadd.f32 %v2567_v43, %v2435_v12  ;;  %v2437_v56 = vpop.f32.mrf.mxu1  ;;  %v2305_v13 = vadd.f32 %v2304_v19, %v5337_v33  ;;  %v3978_v33 = vld [vmem:[%s7090_s0 + $0x4d0] sm:$0xf]  ;;  %v3988_v43 = vld [vmem:[%s7090_s0 + $0x4f8] sm:$0xf0] }
 0x2d1   :  { %v6048_v22 = vadd.f32 %v2700_v47, %v2568_v60  ;;  %v2438_v42 = vadd.f32 %v2437_v56, %v2305_v13  ;;  %2343 = vmatmul.bf16.gmra.mxu0 %v3947_v3  ;;  %v3983_v60 = vor.u32 %v4530_v26, %v3980_v38  ;;  %v3991_v13 = vor.u32 %v4531_v40, %v3988_v43  ;;  %v4542_v38 = vld [vmem:[%s7090_s0 + $0x52c] sm:$0xf0]  ;;  %v4543_v40 = vld [vmem:[%s7090_s0 + $0x534] sm:$0xf0]  ;;  %v4539_v43 = vld [vmem:[%s7090_s0 + $0x51c] sm:$0xf] }
 0x2d2   :  { %2476 = vmatmul.bf16.gmra.mxu1 %v3951_v5  ;;  %v3979_v5 = vor.u32 %v4534_v34, %v3978_v33 }
 0x2d3   :  { %2609 = vmatmul.bf16.gmra.mxu2 %v3955_v18 }
 0x2d4   :  { %2742 = vmatmul.bf16.gmra.mxu3 %v3959_v48 }
 0x2d6   :  { %v2570_v53 = vpop.f32.mrf.mxu2  ;;  %v2306_v44 = vpop.f32.mrf.mxu0 }
 0x2d7   :  { %v2703_v9 = vpop.f32.mrf.mxu3  ;;  %v2571_v23 = vadd.f32 %v2570_v53, %v2438_v42  ;;  %v2439_v62 = vpop.f32.mrf.mxu1  ;;  %v2307_v12 = vadd.f32 %v2306_v44, %v5363_v61  ;;  %v3986_v61 = vld [vmem:[%s7090_s0 + $0x4d8] sm:$0xf] }
 0x2d8   :  { %v3987_v48 = vor.u32 %v4535_v39, %v3986_v61  ;;  %v4538_v61 = vld [vmem:[%s7090_s0 + $0x514] sm:$0xf] }
 0x2d9   :  { %v6051_v32 = vadd.f32 %v2703_v9, %v2571_v23  ;;  %v2440_v46 = vadd.f32 %v2439_v62, %v2307_v12  ;;  %v4012_v39 = vld [vmem:[%s7090_s0 + $0x530] sm:$0xf0] }
 0x2de   :  { %v2572_v47 = vpop.f32.mrf.mxu2  ;;  %v2309_v56 = vpop.f32.mrf.mxu0 }
 0x2df   :  { %v2705_v3 = vpop.f32.mrf.mxu3  ;;  %v2573_v19 = vadd.f32 %v2572_v47, %v2440_v46  ;;  %v2442_v18 = vpop.f32.mrf.mxu1  ;;  %v2310_v42 = vadd.f32 %v2309_v56, %v5365_v6  ;;  %v4010_v6 = vld [vmem:[%s7090_s0 + $0x510] sm:$0xf]  ;;  %v4020_v47 = vld [vmem:[%s7090_s0 + $0x538] sm:$0xf0] }
 0x2e1   :  { %v6078_v53 = vadd.f32 %v2705_v3, %v2573_v19  ;;  %v2443_v9 = vadd.f32 %v2442_v18, %v2310_v42  ;;  %2348 = vmatmul.bf16.gmra.mxu0 %v3979_v5  ;;  %v4015_v19 = vor.u32 %v4538_v61, %v4012_v39  ;;  %v4023_v42 = vor.u32 %v4539_v43, %v4020_v47  ;;  %v4550_v39 = vld [vmem:[%s7090_s0 + $0x56c] sm:$0xf0]  ;;  %v4551_v43 = vld [vmem:[%s7090_s0 + $0x574] sm:$0xf0]  ;;  %v4547_v47 = vld [vmem:[%s7090_s0 + $0x55c] sm:$0xf] }
 0x2e2   :  { %2481 = vmatmul.bf16.gmra.mxu1 %v3983_v60  ;;  %v4011_v60 = vor.u32 %v4542_v38, %v4010_v6 }
 0x2e3   :  { %2614 = vmatmul.bf16.gmra.mxu2 %v3987_v48 }
 0x2e4   :  { %2747 = vmatmul.bf16.gmra.mxu3 %v3991_v13 }
 0x2e6   :  { %v2575_v23 = vpop.f32.mrf.mxu2  ;;  %v2311_v12 = vpop.f32.mrf.mxu0 }
 0x2e7   :  { %v2708_v44 = vpop.f32.mrf.mxu3  ;;  %v2576_v62 = vadd.f32 %v2575_v23, %v2443_v9  ;;  %v2444_v33 = vpop.f32.mrf.mxu1  ;;  %v2312_v46 = vadd.f32 %v2311_v12, %v5391_v35  ;;  %v4018_v35 = vld [vmem:[%s7090_s0 + $0x518] sm:$0xf] }
 0x2e8   :  { %v4019_v13 = vor.u32 %v4543_v40, %v4018_v35  ;;  %v4546_v35 = vld [vmem:[%s7090_s0 + $0x554] sm:$0xf] }
 0x2e9   :  { %v6081_v34 = vadd.f32 %v2708_v44, %v2576_v62  ;;  %v2445_v26 = vadd.f32 %v2444_v33, %v2312_v46  ;;  %v4044_v40 = vld [vmem:[%s7090_s0 + $0x570] sm:$0xf0] }
 0x2ee   :  { %v2577_v3 = vpop.f32.mrf.mxu2  ;;  %v2314_v18 = vpop.f32.mrf.mxu0 }
 0x2ef   :  { %v2710_v5 = vpop.f32.mrf.mxu3  ;;  %v2578_v56 = vadd.f32 %v2577_v3, %v2445_v26  ;;  %v2447_v48 = vpop.f32.mrf.mxu1  ;;  %v2315_v9 = vadd.f32 %v2314_v18, %v5405_v52  ;;  %v4042_v52 = vld [vmem:[%s7090_s0 + $0x550] sm:$0xf]  ;;  %v4052_v3 = vld [vmem:[%s7090_s0 + $0x578] sm:$0xf0] }
 0x2f1   :  { %v6108_v23 = vadd.f32 %v2710_v5, %v2578_v56  ;;  %v2448_v44 = vadd.f32 %v2447_v48, %v2315_v9  ;;  %2353 = vmatmul.bf16.gmra.mxu0 %v4011_v60  ;;  %v4047_v56 = vor.u32 %v4546_v35, %v4044_v40  ;;  %v4055_v9 = vor.u32 %v4547_v47, %v4052_v3  ;;  %v4558_v40 = vld [vmem:[%s7090_s0 + $0x5ac] sm:$0xf0]  ;;  %v4559_v47 = vld [vmem:[%s7090_s0 + $0x5b4] sm:$0xf0]  ;;  %v4555_v3 = vld [vmem:[%s7090_s0 + $0x59c] sm:$0xf] }
 0x2f2   :  { %2486 = vmatmul.bf16.gmra.mxu1 %v4015_v19  ;;  %v4043_v19 = vor.u32 %v4550_v39, %v4042_v52 }
 0x2f3   :  { %2619 = vmatmul.bf16.gmra.mxu2 %v4019_v13 }
 0x2f4   :  { %2752 = vmatmul.bf16.gmra.mxu3 %v4023_v42 }
 0x2f6   :  { %v2580_v62 = vpop.f32.mrf.mxu2  ;;  %v2316_v46 = vpop.f32.mrf.mxu0 }
 0x2f7   :  { %v2713_v12 = vpop.f32.mrf.mxu3  ;;  %v2581_v33 = vadd.f32 %v2580_v62, %v2448_v44  ;;  %v2449_v6 = vpop.f32.mrf.mxu1  ;;  %v2317_v26 = vadd.f32 %v2316_v46, %v5431_v17  ;;  %v4050_v17 = vld [vmem:[%s7090_s0 + $0x558] sm:$0xf] }
 0x2f8   :  { %v4051_v42 = vor.u32 %v4551_v43, %v4050_v17  ;;  %v4554_v17 = vld [vmem:[%s7090_s0 + $0x594] sm:$0xf] }
 0x2f9   :  { %v6111_v38 = vadd.f32 %v2713_v12, %v2581_v33  ;;  %v2450_v61 = vadd.f32 %v2449_v6, %v2317_v26  ;;  %v4076_v43 = vld [vmem:[%s7090_s0 + $0x5b0] sm:$0xf0] }
 0x2fe   :  { %v2582_v5 = vpop.f32.mrf.mxu2  ;;  %v2319_v48 = vpop.f32.mrf.mxu0 }
 0x2ff   :  { %v2715_v60 = vpop.f32.mrf.mxu3  ;;  %v2583_v18 = vadd.f32 %v2582_v5, %v2450_v61  ;;  %v2452_v13 = vpop.f32.mrf.mxu1  ;;  %v2320_v44 = vadd.f32 %v2319_v48, %v5433_v30  ;;  %v4074_v30 = vld [vmem:[%s7090_s0 + $0x590] sm:$0xf]  ;;  %v4084_v5 = vld [vmem:[%s7090_s0 + $0x5b8] sm:$0xf0] }
 0x301   :  { %v6138_v62 = vadd.f32 %v2715_v60, %v2583_v18  ;;  %v2453_v12 = vadd.f32 %v2452_v13, %v2320_v44  ;;  %2358 = vmatmul.bf16.gmra.mxu0 %v4043_v19  ;;  %v4079_v18 = vor.u32 %v4554_v17, %v4076_v43  ;;  %v4087_v44 = vor.u32 %v4555_v3, %v4084_v5  ;;  %v4566_v43 = vld [vmem:[%s7090_s0 + $0x5ec] sm:$0xf0]  ;;  %v4567_v3 = vld [vmem:[%s7090_s0 + $0x5f4] sm:$0xf0]  ;;  %v4563_v5 = vld [vmem:[%s7090_s0 + $0x5dc] sm:$0xf] }
 0x302   :  { %2491 = vmatmul.bf16.gmra.mxu1 %v4047_v56  ;;  %v4075_v56 = vor.u32 %v4558_v40, %v4074_v30 }
 0x303   :  { %2624 = vmatmul.bf16.gmra.mxu2 %v4051_v42 }
 0x304   :  { %2757 = vmatmul.bf16.gmra.mxu3 %v4055_v9 }
 0x306   :  { %v2585_v33 = vpop.f32.mrf.mxu2  ;;  %v2321_v26 = vpop.f32.mrf.mxu0 }
 0x307   :  { %v2718_v46 = vpop.f32.mrf.mxu3  ;;  %v2586_v6 = vadd.f32 %v2585_v33, %v2453_v12  ;;  %v2454_v52 = vpop.f32.mrf.mxu1  ;;  %v2322_v61 = vadd.f32 %v2321_v26, %v5459_v0  ;;  %v4082_v0 = vld [vmem:[%s7090_s0 + $0x598] sm:$0xf] }
 0x308   :  { %v4083_v9 = vor.u32 %v4559_v47, %v4082_v0  ;;  %v4562_v0 = vld [vmem:[%s7090_s0 + $0x5d4] sm:$0xf] }
 0x309   :  { %v6141_v39 = vadd.f32 %v2718_v46, %v2586_v6  ;;  %v2455_v35 = vadd.f32 %v2454_v52, %v2322_v61  ;;  %v4108_v47 = vld [vmem:[%s7090_s0 + $0x5f0] sm:$0xf0] }
 0x30e   :  { %v2587_v60 = vpop.f32.mrf.mxu2  ;;  %v2324_v13 = vpop.f32.mrf.mxu0 }
 0x30f   :  { %v2720_v19 = vpop.f32.mrf.mxu3  ;;  %v2588_v48 = vadd.f32 %v2587_v60, %v2455_v35  ;;  %v2457_v42 = vpop.f32.mrf.mxu1  ;;  %v2325_v12 = vadd.f32 %v2324_v13, %v5461_v8  ;;  %v4106_v8 = vld [vmem:[%s7090_s0 + $0x5d0] sm:$0xf]  ;;  %v4116_v60 = vld [vmem:[%s7090_s0 + $0x5f8] sm:$0xf0] }
 0x311   :  { %v6168_v33 = vadd.f32 %v2720_v19, %v2588_v48  ;;  %v2458_v46 = vadd.f32 %v2457_v42, %v2325_v12  ;;  %2363 = vmatmul.bf16.gmra.mxu0 %v4075_v56  ;;  %v4111_v48 = vor.u32 %v4562_v0, %v4108_v47  ;;  %v4119_v12 = vor.u32 %v4563_v5, %v4116_v60 }
 0x312   :  { %2496 = vmatmul.bf16.gmra.mxu1 %v4079_v18  ;;  %v4107_v18 = vor.u32 %v4566_v43, %v4106_v8 }
 0x313   :  { %2629 = vmatmul.bf16.gmra.mxu2 %v4083_v9 }
 0x314   :  { %2762 = vmatmul.bf16.gmra.mxu3 %v4087_v44 }
 0x316   :  { %v2590_v6 = vpop.f32.mrf.mxu2  ;;  %v2326_v61 = vpop.f32.mrf.mxu0 }
 0x317   :  { %v2723_v26 = vpop.f32.mrf.mxu3  ;;  %v2591_v52 = vadd.f32 %v2590_v6, %v2458_v46  ;;  %v2459_v30 = vpop.f32.mrf.mxu1  ;;  %v2327_v35 = vadd.f32 %v2326_v61, %v5487_v41  ;;  %v4114_v41 = vld [vmem:[%s7090_s0 + $0x5d8] sm:$0xf] }
 0x318   :  { %v4115_v44 = vor.u32 %v4567_v3, %v4114_v41 }
 0x319   :  { %v6171_v40 = vadd.f32 %v2723_v26, %v2591_v52  ;;  %v2460_v17 = vadd.f32 %v2459_v30, %v2327_v35 }
 0x31e   :  { %v2592_v19 = vpop.f32.mrf.mxu2  ;;  %v2329_v42 = vpop.f32.mrf.mxu0 }
 0x31f   :  { %v2725_v56 = vpop.f32.mrf.mxu3  ;;  %v2593_v13 = vadd.f32 %v2592_v19, %v2460_v17  ;;  %v2462_v9 = vpop.f32.mrf.mxu1  ;;  %v2330_v46 = vadd.f32 %v2329_v42, %v5495_v59  ;;  %v211_v17 = vld [vmem:[%s7090_s0 + $0x610] sm:$0xff]  ;;  %v212_v59 = vld [vmem:[%s7090_s0 + $0x618] sm:$0xff] }
 0x320   :  { %v925_v41 = vunpack.c.l.b16 %v211_v17  ;;  %v926_v3 = vunpack.c.h.b16 %v211_v17  ;;  %v927_v5 = vunpack.c.l.b16 %v212_v59  ;;  %v928_v60 = vunpack.c.h.b16 %v212_v59 }
 0x321   :  { %v6198_v6 = vadd.f32 %v2725_v56, %v2593_v13  ;;  %v2463_v26 = vadd.f32 %v2462_v9, %v2330_v46  ;;  %2368 = vmatmul.bf16.gmra.mxu0 %v4107_v18 }
 0x322   :  { %2501 = vmatmul.bf16.gmra.mxu1 %v4111_v48  ;;  %v1125_v18 = vpack.c.b16 %v925_v41, %v925_v41  ;;  %v1126_v48 = vpack.c.b16 %v926_v3, %v926_v3 }
 0x323   :  { %2634 = vmatmul.bf16.gmra.mxu2 %v4115_v44  ;;  %v1127_v44 = vpack.c.b16 %v927_v5, %v927_v5 }
 0x324   :  { %2767 = vmatmul.bf16.gmra.mxu3 %v4119_v12 }
 0x326   :  { %v2595_v52 = vpop.f32.mrf.mxu2  ;;  %v2331_v35 = vpop.f32.mrf.mxu0 }
 0x327   :  { %v2728_v61 = vpop.f32.mrf.mxu3  ;;  %v2596_v30 = vadd.f32 %v2595_v52, %v2463_v26  ;;  %v2464_v8 = vpop.f32.mrf.mxu1  ;;  %v2332_v43 = vadd.f32 %v2331_v35, %v5497_v24  ;;  %v1128_v24 = vpack.c.b16 %v928_v60, %v928_v60 }
 0x329   :  { %v6207_v0 = vadd.f32 %v2728_v61, %v2596_v30  ;;  %v2465_v47 = vadd.f32 %v2464_v8, %v2332_v43 }
 0x32e   :  { %v2597_v19 = vpop.f32.mrf.mxu2  ;;  %v2334_v42 = vpop.f32.mrf.mxu0 }
 0x32f   :  { %v2730_v56 = vpop.f32.mrf.mxu3  ;;  %v2598_v13 = vadd.f32 %v2597_v19, %v2465_v47  ;;  %v2467_v9 = vpop.f32.mrf.mxu1  ;;  %v2335_v12 = vadd.f32 %v2334_v42, %v5499_v36 }
 0x331   :  { %v6210_v46 = vadd.f32 %v2730_v56, %v2598_v13  ;;  %v2468_v26 = vadd.f32 %v2467_v9, %v2335_v12  ;;  %2373 = vmatmul.bf16.gmra.mxu0 %v1125_v18 }
 0x332   :  { %2506 = vmatmul.bf16.gmra.mxu1 %v1126_v48 }
 0x333   :  { %2639 = vmatmul.bf16.gmra.mxu2 %v1127_v44  ;;  %v2779_v44 = vsel %vm2777_vm0, %v5778_v45, 0.0 }
 0x334   :  { %2772 = vmatmul.bf16.gmra.mxu3 %v1128_v24 }
 0x336   :  { %v2600_v52 = vpop.f32.mrf.mxu2  ;;  %v2336_v35 = vpop.f32.mrf.mxu0 }
 0x337   :  { %v2733_v61 = vpop.f32.mrf.mxu3  ;;  %v2601_v30 = vadd.f32 %v2600_v52, %v2468_v26  ;;  %v2469_v8 = vpop.f32.mrf.mxu1  ;;  %v2337_v17 = vadd.f32 %v2336_v35, %v5525_v10  ;;  %v2781_v26 = vsel %vm2777_vm0, %v5781_v37, 0.0 }
 0x339   :  { %v6213_v43 = vadd.f32 %v2733_v61, %v2601_v30  ;;  %v2470_v59 = vadd.f32 %v2469_v8, %v2337_v17  ;;  %v2783_v61 = vsel %vm2777_vm0, %v5808_v1, 0.0 }
 0x33e   :  { %v2602_v47 = vpop.f32.mrf.mxu2  ;;  %v2339_v3 = vpop.f32.mrf.mxu0 }
 0x33f   :  { %v2735_v41 = vpop.f32.mrf.mxu3  ;;  %v2603_v36 = vadd.f32 %v2602_v47, %v2470_v59  ;;  %v2472_v5 = vpop.f32.mrf.mxu1  ;;  %v2340_v60 = vadd.f32 %v2339_v3, %v5527_v27  ;;  %v2778_v27 = vsel %vm2777_vm0, %v5751_v54, 0.0  ;;  %v2787_v3 = vsel %vm2777_vm0, %v5838_v4, 0.0 }
 0x340   :  { %v2780_v52 = vadd.f32 %v2779_v44, %v2778_v27 }
 0x341   :  { %v6216_v19 = vadd.f32 %v2735_v41, %v2603_v36  ;;  %v2473_v56 = vadd.f32 %v2472_v5, %v2340_v60 }
 0x342   :  { %v2782_v30 = vadd.f32 %v2781_v26, %v2780_v52 }
 0x344   :  { %v2784_v41 = vadd.f32 %v2783_v61, %v2782_v30  ;;  %v2795_v61 = vsel %vm2777_vm0, %v5898_v63, 0.0 }
 0x346   :  { %v2605_v18 = vpop.f32.mrf.mxu2  ;;  %v2341_v42 = vpop.f32.mrf.mxu0 }
 0x347   :  { %v2738_v48 = vpop.f32.mrf.mxu3  ;;  %v2606_v13 = vadd.f32 %v2605_v18, %v2473_v56  ;;  %v2474_v9 = vpop.f32.mrf.mxu1  ;;  %v2342_v10 = vadd.f32 %v2341_v42, %v5553_v2  ;;  %v2785_v2 = vsel %vm2777_vm0, %v5811_v55, 0.0  ;;  %v2789_v18 = vsel %vm2777_vm0, %v5841_v20, 0.0 }
 0x348   :  { %v2786_v60 = vadd.f32 %v2785_v2, %v2784_v41  ;;  %v2797_v2 = vsel %vm2777_vm0, %v5901_v7, 0.0 }
 0x349   :  { %v6221_v24 = vadd.f32 %v2738_v48, %v2606_v13  ;;  %v2475_v12 = vadd.f32 %v2474_v9, %v2342_v10  ;;  %v2791_v13 = vsel %vm2777_vm0, %v5868_v16, 0.0 }
 0x34a   :  { %v2788_v48 = vadd.f32 %v2787_v3, %v2786_v60 }
 0x34c   :  { %v2790_v42 = vadd.f32 %v2789_v18, %v2788_v48  ;;  %v7117_v48 = vld [vmem:[#allocation2_spill] sm:$0xff] }
 0x34e   :  { %v2607_v35 = vpop.f32.mrf.mxu2  ;;  %v2344_v59 = vpop.f32.mrf.mxu0  ;;  %v2792_v26 = vadd.f32 %v2791_v13, %v2790_v42  ;;  %v2803_v42 = vsel %vm2777_vm0, %v5958_v57, 0.0 }
 0x34f   :  { %v2740_v8 = vpop.f32.mrf.mxu3  ;;  %v2608_v17 = vadd.f32 %v2607_v35, %v2475_v12  ;;  %v2477_v47 = vpop.f32.mrf.mxu1  ;;  %v2345_v36 = vadd.f32 %v2344_v59, %v5555_v15  ;;  %v2793_v15 = vsel %vm2777_vm0, %v5871_v11, 0.0  ;;  %v2799_v59 = vsel %vm2777_vm0, %v5928_v25, 0.0 }
 0x350   :  { %v2794_v35 = vadd.f32 %v2793_v15, %v2792_v26 }
 0x351   :  { %v6234_v5 = vadd.f32 %v2740_v8, %v2608_v17  ;;  %v2478_v56 = vadd.f32 %v2477_v47, %v2345_v36 }
 0x352   :  { %v2796_v17 = vadd.f32 %v2795_v61, %v2794_v35  ;;  %v2809_v35 = vsel %vm2777_vm0, %v5991_v29, 0.0 }
 0x354   :  { %v2798_v47 = vadd.f32 %v2797_v2, %v2796_v17 }
 0x356   :  { %v2610_v9 = vpop.f32.mrf.mxu2  ;;  %v2346_v12 = vpop.f32.mrf.mxu0  ;;  %v2800_v18 = vadd.f32 %v2799_v59, %v2798_v47  ;;  %v7118_v47 = vld [vmem:[#allocation3_spill] sm:$0xff] }
 0x357   :  { %v2743_v10 = vpop.f32.mrf.mxu3  ;;  %v2611_v44 = vadd.f32 %v2610_v9, %v2478_v56  ;;  %v2479_v27 = vpop.f32.mrf.mxu1  ;;  %v2347_v52 = vadd.f32 %v2346_v12, %v5581_v58  ;;  %v2801_v58 = vsel %vm2777_vm0, %v5931_v14, 0.0 }
 0x359   :  { %v6245_v30 = vadd.f32 %v2743_v10, %v2611_v44  ;;  %v2480_v8 = vadd.f32 %v2479_v27, %v2347_v52  ;;  %v2802_v10 = vadd.f32 %v2801_v58, %v2800_v18  ;;  %v2805_v44 = vsel %vm2777_vm0, %v5961_v28, 0.0 }
 0x35a   :  { %v2807_v27 = vsel %vm2777_vm0, %v5988_v21, 0.0 }
 0x35b   :  { %7116 = vst [vmem:[#allocation11_spill] sm:$0xff] %v6245_v30  ;;  %v2804_v12 = vadd.f32 %v2803_v42, %v2802_v10 }
 0x35d   :  { %v2806_v26 = vadd.f32 %v2805_v44, %v2804_v12 }
 0x35e   :  { %v2612_v41 = vpop.f32.mrf.mxu2  ;;  %v2349_v60 = vpop.f32.mrf.mxu0 }
 0x35f   :  { %v2745_v36 = vpop.f32.mrf.mxu3  ;;  %v2613_v3 = vadd.f32 %v2612_v41, %v2480_v8  ;;  %v2482_v56 = vpop.f32.mrf.mxu1  ;;  %v2350_v13 = vadd.f32 %v2349_v60, %v7117_v48  ;;  %v2808_v59 = vadd.f32 %v2807_v27, %v2806_v26  ;;  %v2815_v48 = vsel %vm2777_vm0, %v6048_v22, 0.0 }
 0x361   :  { %v6256_v9 = vadd.f32 %v2745_v36, %v2613_v3  ;;  %v2483_v15 = vadd.f32 %v2482_v56, %v2350_v13  ;;  %v2811_v36 = vsel %vm2777_vm0, %v6018_v50, 0.0  ;;  %v2810_v3 = vadd.f32 %v2809_v35, %v2808_v59 }
 0x362   :  { %v2813_v56 = vsel %vm2777_vm0, %v6021_v31, 0.0  ;;  %v2819_v35 = vsel %vm2777_vm0, %v6078_v53, 0.0  ;;  %v2821_v59 = vsel %vm2777_vm0, %v6081_v34, 0.0 }
 0x363   :  { %v2812_v18 = vadd.f32 %v2811_v36, %v2810_v3 }
 0x365   :  { %v2814_v13 = vadd.f32 %v2813_v56, %v2812_v18  ;;  %v2825_v56 = vsel %vm2777_vm0, %v6111_v38, 0.0 }
 0x366   :  { %v2615_v52 = vpop.f32.mrf.mxu2  ;;  %v2351_v2 = vpop.f32.mrf.mxu0 }
 0x367   :  { %v2748_v61 = vpop.f32.mrf.mxu3  ;;  %v2616_v8 = vadd.f32 %v2615_v52, %v2483_v15  ;;  %v2484_v17 = vpop.f32.mrf.mxu1  ;;  %v2352_v41 = vadd.f32 %v2351_v2, %v7118_v47  ;;  %v2817_v15 = vsel %vm2777_vm0, %v6051_v32, 0.0  ;;  %v2816_v26 = vadd.f32 %v2815_v48, %v2814_v13  ;;  %v7120_v52 = vld [vmem:[#allocation4_spill] sm:$0xff] }
 0x369   :  { %v6267_v58 = vadd.f32 %v2748_v61, %v2616_v8  ;;  %v2485_v60 = vadd.f32 %v2484_v17, %v2352_v41  ;;  %v2818_v2 = vadd.f32 %v2817_v15, %v2816_v26  ;;  %v2823_v41 = vsel %vm2777_vm0, %v6108_v23, 0.0 }
 0x36b   :  { %7119 = vst [vmem:[#allocation2_spill] sm:$0xff] %v6267_v58  ;;  %v2820_v47 = vadd.f32 %v2819_v35, %v2818_v2  ;;  %v2831_v35 = vsel %vm2777_vm0, %v6168_v33, 0.0 }
 0x36d   :  { %v2822_v36 = vadd.f32 %v2821_v59, %v2820_v47  ;;  %v2833_v47 = vsel %vm2777_vm0, %v6171_v40, 0.0 }
 0x36e   :  { %v2617_v42 = vpop.f32.mrf.mxu2  ;;  %v2354_v12 = vpop.f32.mrf.mxu0 }
 0x36f   :  { %v2750_v10 = vpop.f32.mrf.mxu3  ;;  %v2618_v44 = vadd.f32 %v2617_v42, %v2485_v60  ;;  %v2487_v27 = vpop.f32.mrf.mxu1  ;;  %v2355_v61 = vadd.f32 %v2354_v12, %v7120_v52  ;;  %v2824_v42 = vadd.f32 %v2823_v41, %v2822_v36  ;;  %v2829_v52 = vsel %vm2777_vm0, %v6141_v39, 0.0 }
 0x371   :  { %v6278_v8 = vadd.f32 %v2750_v10, %v2618_v44  ;;  %v2488_v17 = vadd.f32 %v2487_v27, %v2355_v61  ;;  %v7122_v10 = vld [vmem:[#allocation5_spill] sm:$0xff]  ;;  %v2827_v44 = vsel %vm2777_vm0, %v6138_v62, 0.0  ;;  %v2826_v27 = vadd.f32 %v2825_v56, %v2824_v42 }
 0x373   :  { %7121 = vst [vmem:[#allocation3_spill] sm:$0xff] %v6278_v8  ;;  %v2828_v61 = vadd.f32 %v2827_v44, %v2826_v27  ;;  %v2839_v27 = vsel %vm2777_vm0, %v6210_v46, 0.0 }
 0x375   :  { %v2830_v2 = vadd.f32 %v2829_v52, %v2828_v61 }
 0x376   :  { %v2620_v3 = vpop.f32.mrf.mxu2  ;;  %v2356_v48 = vpop.f32.mrf.mxu0 }
 0x377   :  { %v2753_v60 = vpop.f32.mrf.mxu3  ;;  %v2621_v18 = vadd.f32 %v2620_v3, %v2488_v17  ;;  %v2489_v13 = vpop.f32.mrf.mxu1  ;;  %v2357_v15 = vadd.f32 %v2356_v48, %v7122_v10  ;;  %v2835_v48 = vsel %vm2777_vm0, %v6198_v6, 0.0 }
 0x379   :  { %v6289_v12 = vadd.f32 %v2753_v60, %v2621_v18  ;;  %v2490_v26 = vadd.f32 %v2489_v13, %v2357_v15  ;;  %v2832_v60 = vadd.f32 %v2831_v35, %v2830_v2  ;;  %v7124_v18 = vld [vmem:[#allocation6_spill] sm:$0xff]  ;;  %v2837_v15 = vsel %vm2777_vm0, %v6207_v0, 0.0 }
 0x37a   :  { %v2841_v35 = vsel %vm2777_vm0, %v6213_v43, 0.0 }
 0x37b   :  { %7123 = vst [vmem:[#allocation4_spill] sm:$0xff] %v6289_v12  ;;  %v2834_v42 = vadd.f32 %v2833_v47, %v2832_v60 }
 0x37d   :  { %v2836_v44 = vadd.f32 %v2835_v48, %v2834_v42  ;;  %v2845_v48 = vsel %vm2777_vm0, %v6221_v24, 0.0 }
 0x37e   :  { %v2622_v17 = vpop.f32.mrf.mxu2  ;;  %v2359_v36 = vpop.f32.mrf.mxu0 }
 0x37f   :  { %v2755_v59 = vpop.f32.mrf.mxu3  ;;  %v2623_v41 = vadd.f32 %v2622_v17, %v2490_v26  ;;  %v2492_v3 = vpop.f32.mrf.mxu1  ;;  %v2360_v56 = vadd.f32 %v2359_v36, %v7124_v18  ;;  %v2838_v26 = vadd.f32 %v2837_v15, %v2836_v44  ;;  %v2847_v15 = vsel %vm2777_vm0, %v6234_v5, 0.0 }
 0x381   :  { %v6300_v13 = vadd.f32 %v2755_v59, %v2623_v41  ;;  %v2493_v10 = vadd.f32 %v2492_v3, %v2360_v56  ;;  %v2840_v59 = vadd.f32 %v2839_v27, %v2838_v26  ;;  %v7126_v41 = vld [vmem:[#allocation7_spill] sm:$0xff]  ;;  %v2843_v3 = vsel %vm2777_vm0, %v6216_v19, 0.0 }
 0x382   :  { %v2849_v27 = vsel %vm2777_vm0, %v6245_v30, 0.0 }
 0x383   :  { %7125 = vst [vmem:[#allocation5_spill] sm:$0xff] %v6300_v13  ;;  %v2842_v18 = vadd.f32 %v2841_v35, %v2840_v59 }
 0x385   :  { %v2844_v42 = vadd.f32 %v2843_v3, %v2842_v18  ;;  %v2853_v18 = vsel %vm2777_vm0, %v6267_v58, 0.0 }
 0x386   :  { %v2625_v52 = vpop.f32.mrf.mxu2  ;;  %v2361_v17 = vpop.f32.mrf.mxu0 }
 0x387   :  { %v2758_v61 = vpop.f32.mrf.mxu3  ;;  %v2626_v2 = vadd.f32 %v2625_v52, %v2493_v10  ;;  %v2494_v36 = vpop.f32.mrf.mxu1  ;;  %v2362_v47 = vadd.f32 %v2361_v17, %v7126_v41  ;;  %v2846_v10 = vadd.f32 %v2845_v48, %v2844_v42  ;;  %v2855_v42 = vsel %vm2777_vm0, %v6278_v8, 0.0 }
 0x389   :  { %v6311_v60 = vadd.f32 %v2758_v61, %v2626_v2  ;;  %v2495_v56 = vadd.f32 %v2494_v36, %v2362_v47  ;;  %v2848_v61 = vadd.f32 %v2847_v15, %v2846_v10  ;;  %v7128_v2 = vld [vmem:[#allocation8_spill] sm:$0xff]  ;;  %v2851_v36 = vsel %vm2777_vm0, %v6256_v9, 0.0 }
 0x38a   :  { %v2857_v15 = vsel %vm2777_vm0, %v6289_v12, 0.0 }
 0x38b   :  { %7127 = vst [vmem:[#allocation6_spill] sm:$0xff] %v6311_v60  ;;  %v2850_v47 = vadd.f32 %v2849_v27, %v2848_v61 }
 0x38d   :  { %v2852_v48 = vadd.f32 %v2851_v36, %v2850_v47  ;;  %v2861_v47 = vsel %vm2777_vm0, %v6311_v60, 0.0 }
 0x38e   :  { %v2627_v44 = vpop.f32.mrf.mxu2  ;;  %v2364_v17 = vpop.f32.mrf.mxu0 }
 0x38f   :  { %v2760_v52 = vpop.f32.mrf.mxu3  ;;  %v2628_v26 = vadd.f32 %v2627_v44, %v2495_v56  ;;  %v2497_v41 = vpop.f32.mrf.mxu1  ;;  %v2365_v35 = vadd.f32 %v2364_v17, %v7128_v2  ;;  %v2854_v56 = vadd.f32 %v2853_v18, %v2852_v48 }
 0x391   :  { %v6322_v59 = vadd.f32 %v2760_v52, %v2628_v26  ;;  %v2498_v3 = vadd.f32 %v2497_v41, %v2365_v35  ;;  %v2856_v52 = vadd.f32 %v2855_v42, %v2854_v56  ;;  %v7130_v26 = vld [vmem:[#allocation9_spill] sm:$0xff]  ;;  %v2859_v41 = vsel %vm2777_vm0, %v6300_v13, 0.0  ;;  %v7131_v13 = vld [vmem:[#allocation10_spill] sm:$0xff] }
 0x393   :  { %7129 = vst [vmem:[#allocation7_spill] sm:$0xff] %v6322_v59  ;;  %v2858_v35 = vadd.f32 %v2857_v15, %v2856_v52  ;;  %v2863_v48 = vsel %vm2777_vm0, %v6322_v59, 0.0 }
 0x395   :  { %v2860_v18 = vadd.f32 %v2859_v41, %v2858_v35 }
 0x396   :  { %v2630_v44 = vpop.f32.mrf.mxu2  ;;  %v2366_v17 = vpop.f32.mrf.mxu0 }
 0x397   :  { %v2763_v30 = vpop.f32.mrf.mxu3  ;;  %v2631_v10 = vadd.f32 %v2630_v44, %v2498_v3  ;;  %v2499_v2 = vpop.f32.mrf.mxu1  ;;  %v2367_v27 = vadd.f32 %v2366_v17, %v7130_v26  ;;  %v2862_v12 = vadd.f32 %v2861_v47, %v2860_v18 }
 0x399   :  { %v2764_v61 = vadd.f32 %v2763_v30, %v2631_v10  ;;  %v2500_v36 = vadd.f32 %v2499_v2, %v2367_v27  ;;  %v2864_v8 = vadd.f32 %v2863_v48, %v2862_v12 }
 0x39b   :  { %v2865_v42 = vsel %vm2777_vm0, %v2764_v61, 0.0 }
 0x39c   :  { %v2866_v10 = vadd.f32 %v2865_v42, %v2864_v8 }
 0x39e   :  { %v2632_v3 = vpop.f32.mrf.mxu2  ;;  %v2369_v17 = vpop.f32.mrf.mxu0 }
 0x39f   :  { %v2765_v44 = vpop.f32.mrf.mxu3  ;;  %v2633_v56 = vadd.f32 %v2632_v3, %v2500_v36  ;;  %v2502_v26 = vpop.f32.mrf.mxu1  ;;  %v2370_v30 = vadd.f32 %v2369_v17, %v7131_v13 }
 0x3a1   :  { %v2766_v15 = vadd.f32 %v2765_v44, %v2633_v56  ;;  %v2503_v2 = vadd.f32 %v2502_v26, %v2370_v30 }
 0x3a3   :  { %v2867_v52 = vsel %vm2777_vm0, %v2766_v15, 0.0 }
 0x3a4   :  { %v2868_v27 = vadd.f32 %v2867_v52, %v2866_v10 }
 0x3a6   :  { %v2635_v41 = vpop.f32.mrf.mxu2  ;;  %v2371_v47 = vpop.f32.mrf.mxu0 }
 0x3a7   :  { %v2768_v35 = vpop.f32.mrf.mxu3  ;;  %v2636_v59 = vadd.f32 %v2635_v41, %v2503_v2  ;;  %v2504_v18 = vpop.f32.mrf.mxu1  ;;  %v2372_v58 = vadd.f32 %v2371_v47, %v5721_v49 }
 0x3a9   :  { %v2769_v60 = vadd.f32 %v2768_v35, %v2636_v59  ;;  %v2505_v12 = vadd.f32 %v2504_v18, %v2372_v58 }
 0x3ab   :  { %v2869_v36 = vsel %vm2777_vm0, %v2769_v60, 0.0 }
 0x3ac   :  { %v2870_v3 = vadd.f32 %v2869_v36, %v2868_v27 }
 0x3ae   :  { %v2637_v48 = vpop.f32.mrf.mxu2  ;;  %v2374_v8 = vpop.f32.mrf.mxu0 }
 0x3af   :  { %v2770_v13 = vpop.f32.mrf.mxu3  ;;  %v2638_v44 = vadd.f32 %v2637_v48, %v2505_v12  ;;  %v2507_v42 = vpop.f32.mrf.mxu1  ;;  %v2375_v17 = vadd.f32 %v2374_v8, %v5723_v51 }
 0x3b1   :  { %v2771_v56 = vadd.f32 %v2770_v13, %v2638_v44  ;;  %v2508_v10 = vadd.f32 %v2507_v42, %v2375_v17 }
 0x3b3   :  { %v2871_v26 = vsel %vm2777_vm0, %v2771_v56, 0.0 }
 0x3b4   :  { %v2872_v30 = vadd.f32 %v2871_v26, %v2870_v3 }
 0x3b6   :  { %v2640_v2 = vpop.f32.mrf.mxu2  ;;  %v2376_v49 = vpop.f32.mrf.mxu0 }
 0x3b7   :  { %v2773_v59 = vpop.f32.mrf.mxu3  ;;  %v2641_v52 = vadd.f32 %v2640_v2, %v2508_v10  ;;  %v2509_v41 = vpop.f32.mrf.mxu1 }
 0x3b9   :  { %v2774_v35 = vadd.f32 %v2773_v59, %v2641_v52 }
 0x3bb   :  { %v2873_v58 = vsel %vm2777_vm0, %v2774_v35, 0.0 }
 0x3bc   :  { %v2874_v27 = vadd.f32 %v2873_v58, %v2872_v30 }
 0x3be   :  { %v2875_v47 = vrot.slane %v2874_v27, 4  ;;  %v2642_v18 = vpop.f32.mrf.mxu2 }
 0x3bf   :  { %v2775_v36 = vpop.f32.mrf.mxu3 }
 0x3c0   :  { %v2876_v12 = vadd.f32 %v2875_v47, %v2874_v27 }
 0x3c2   :  { %v2877_v48 = vrot.slane %v2876_v12, 2 }
 0x3c4   :  { %v2878_v13 = vadd.f32 %v2877_v48, %v2876_v12 }
 0x3c6   :  { %v2879_v51 = vrot.slane %v2878_v13, 1 }
 0x3c8   :  { %v2880_v44 = vadd.f32 %v2879_v51, %v2878_v13 }
 0x3ca   :  { %v6345_v8 = vmul.f32 0.0025510204, %v2880_v44 }
 0x3cc   :  { %v6348_v3 = vsub.f32 %v2764_v61, %v6345_v8  ;;  %v6351_v42 = vsub.f32 %v2766_v15, %v6345_v8  ;;  %v6354_v17 = vsub.f32 %v2769_v60, %v6345_v8  ;;  %v6357_v26 = vsub.f32 %v2771_v56, %v6345_v8 }
 0x3cd   :  { %v6360_v30 = vsub.f32 %v2774_v35, %v6345_v8  ;;  %v6364_v10 = vsub.f32 %v5751_v54, %v6345_v8  ;;  %v6368_v61 = vsub.f32 %v5778_v45, %v6345_v8  ;;  %v6372_v15 = vsub.f32 %v5781_v37, %v6345_v8 }
 0x3ce   :  { %7132 = vst [vmem:[#allocation8_spill] sm:$0xff] %v6348_v3  ;;  %v6376_v60 = vsub.f32 %v5808_v1, %v6345_v8  ;;  %v6384_v54 = vsub.f32 %v5811_v55, %v6345_v8  ;;  %v6390_v37 = vsub.f32 %v5838_v4, %v6345_v8  ;;  %v6398_v41 = vsub.f32 %v5841_v20, %v6345_v8 }
 0x3cf   :  { %7133 = vst [vmem:[#allocation9_spill] sm:$0xff] %v6351_v42  ;;  %v2931_v56 = vmul.f32 %v6364_v10, %v6364_v10  ;;  %v2932_v2 = vmul.f32 %v6368_v61, %v6368_v61  ;;  %v2933_v45 = vmul.f32 %v6372_v15, %v6372_v15  ;;  %v6405_v4 = vsub.f32 %v5868_v16, %v6345_v8 }
 0x3d0   :  { %7134 = vst [vmem:[#allocation10_spill] sm:$0xff] %v6354_v17  ;;  %v2934_v1 = vmul.f32 %v6376_v60, %v6376_v60  ;;  %v2935_v55 = vmul.f32 %v6384_v54, %v6384_v54  ;;  %v2936_v27 = vmul.f32 %v6390_v37, %v6390_v37  ;;  %v6412_v20 = vsub.f32 %v5871_v11, %v6345_v8 }
 0x3d1   :  { %7135 = vst [vmem:[#allocation12_spill] sm:$0xff] %v6357_v26  ;;  %v2980_v59 = vsel %vm2777_vm0, %v2931_v56, 0.0  ;;  %v2981_v52 = vsel %vm2777_vm0, %v2932_v2, 0.0  ;;  %v2983_v35 = vsel %vm2777_vm0, %v2933_v45, 0.0  ;;  %v2937_v36 = vmul.f32 %v6398_v41, %v6398_v41 }
 0x3d2   :  { %7136 = vst [vmem:[#allocation13_spill] sm:$0xff] %v6360_v30  ;;  %v2982_v49 = vadd.f32 %v2981_v52, %v2980_v59  ;;  %v2985_v47 = vsel %vm2777_vm0, %v2934_v1, 0.0  ;;  %v2987_v12 = vsel %vm2777_vm0, %v2935_v55, 0.0  ;;  %v6419_v16 = vsub.f32 %v5898_v63, %v6345_v8 }
 0x3d3   :  { %v2938_v13 = vmul.f32 %v6405_v4, %v6405_v4  ;;  %v2989_v51 = vsel %vm2777_vm0, %v2936_v27, 0.0  ;;  %v6426_v11 = vsub.f32 %v5901_v7, %v6345_v8  ;;  %v2939_v56 = vmul.f32 %v6412_v20, %v6412_v20 }
 0x3d4   :  { %v2984_v58 = vadd.f32 %v2983_v35, %v2982_v49  ;;  %v2991_v2 = vsel %vm2777_vm0, %v2937_v36, 0.0  ;;  %v6433_v63 = vsub.f32 %v5928_v25, %v6345_v8  ;;  %v2940_v1 = vmul.f32 %v6419_v16, %v6419_v16 }
 0x3d5   :  { %v2993_v59 = vsel %vm2777_vm0, %v2938_v13, 0.0  ;;  %v6440_v7 = vsub.f32 %v5931_v14, %v6345_v8  ;;  %v2941_v49 = vmul.f32 %v6426_v11, %v6426_v11  ;;  %v2995_v55 = vsel %vm2777_vm0, %v2939_v56, 0.0 }
 0x3d6   :  { %v2986_v18 = vadd.f32 %v2985_v47, %v2984_v58  ;;  %v6447_v25 = vsub.f32 %v5958_v57, %v6345_v8  ;;  %v2942_v58 = vmul.f32 %v6433_v63, %v6433_v63  ;;  %v2997_v27 = vsel %vm2777_vm0, %v2940_v1, 0.0 }
 0x3d7   :  { %v6454_v14 = vsub.f32 %v5961_v28, %v6345_v8  ;;  %v2999_v36 = vsel %vm2777_vm0, %v2941_v49, 0.0  ;;  %v6461_v57 = vsub.f32 %v5988_v21, %v6345_v8  ;;  %v6468_v28 = vsub.f32 %v5991_v29, %v6345_v8 }
 0x3d8   :  { %v2988_v48 = vadd.f32 %v2987_v12, %v2986_v18  ;;  %v2943_v18 = vmul.f32 %v6440_v7, %v6440_v7  ;;  %v3001_v13 = vsel %vm2777_vm0, %v2942_v58, 0.0  ;;  %v6475_v21 = vsub.f32 %v6018_v50, %v6345_v8 }
 0x3d9   :  { %v6482_v29 = vsub.f32 %v6021_v31, %v6345_v8  ;;  %v6489_v50 = vsub.f32 %v6048_v22, %v6345_v8  ;;  %v6496_v31 = vsub.f32 %v6051_v32, %v6345_v8  ;;  %v6503_v22 = vsub.f32 %v6078_v53, %v6345_v8 }
 0x3da   :  { %v2990_v44 = vadd.f32 %v2989_v51, %v2988_v48  ;;  %v2944_v48 = vmul.f32 %v6447_v25, %v6447_v25  ;;  %v3003_v56 = vsel %vm2777_vm0, %v2943_v18, 0.0  ;;  %v6510_v32 = vsub.f32 %v6081_v34, %v6345_v8 }
 0x3db   :  { %v6517_v53 = vsub.f32 %v6108_v23, %v6345_v8  ;;  %v6524_v34 = vsub.f32 %v6111_v38, %v6345_v8  ;;  %v6531_v23 = vsub.f32 %v6138_v62, %v6345_v8  ;;  %v6538_v38 = vsub.f32 %v6141_v39, %v6345_v8 }
 0x3dc   :  { %v2992_v45 = vadd.f32 %v2991_v2, %v2990_v44  ;;  %v2945_v44 = vmul.f32 %v6454_v14, %v6454_v14  ;;  %v3005_v1 = vsel %vm2777_vm0, %v2944_v48, 0.0  ;;  %v6545_v62 = vsub.f32 %v6168_v33, %v6345_v8 }
 0x3dd   :  { %v6552_v39 = vsub.f32 %v6171_v40, %v6345_v8  ;;  %v6559_v33 = vsub.f32 %v6198_v6, %v6345_v8  ;;  %v6566_v40 = vsub.f32 %v6207_v0, %v6345_v8  ;;  %v6573_v6 = vsub.f32 %v6210_v46, %v6345_v8 }
 0x3de   :  { %v2994_v52 = vadd.f32 %v2993_v59, %v2992_v45  ;;  %v2946_v45 = vmul.f32 %v6461_v57, %v6461_v57  ;;  %v3007_v49 = vsel %vm2777_vm0, %v2945_v44, 0.0  ;;  %v6580_v0 = vsub.f32 %v6213_v43, %v6345_v8 }
 0x3df   :  { %v6587_v46 = vsub.f32 %v6216_v19, %v6345_v8  ;;  %v6594_v43 = vsub.f32 %v6221_v24, %v6345_v8  ;;  %v6601_v19 = vsub.f32 %v6234_v5, %v6345_v8  ;;  %v6615_v5 = vsub.f32 %v6256_v9, %v6345_v8 }
 0x3e0   :  { %v2996_v35 = vadd.f32 %v2995_v55, %v2994_v52  ;;  %v2947_v52 = vmul.f32 %v6468_v28, %v6468_v28  ;;  %v3009_v58 = vsel %vm2777_vm0, %v2946_v45, 0.0 }
 0x3e2   :  { %v2998_v47 = vadd.f32 %v2997_v27, %v2996_v35  ;;  %v2948_v35 = vmul.f32 %v6475_v21, %v6475_v21  ;;  %v3011_v18 = vsel %vm2777_vm0, %v2947_v52, 0.0 }
 0x3e4   :  { %v3000_v12 = vadd.f32 %v2999_v36, %v2998_v47  ;;  %v2949_v47 = vmul.f32 %v6482_v29, %v6482_v29  ;;  %v3013_v48 = vsel %vm2777_vm0, %v2948_v35, 0.0 }
 0x3e6   :  { %v3002_v51 = vadd.f32 %v3001_v13, %v3000_v12  ;;  %v2950_v12 = vmul.f32 %v6489_v50, %v6489_v50  ;;  %v3015_v44 = vsel %vm2777_vm0, %v2949_v47, 0.0 }
 0x3e8   :  { %v3004_v2 = vadd.f32 %v3003_v56, %v3002_v51  ;;  %v2951_v51 = vmul.f32 %v6496_v31, %v6496_v31  ;;  %v3017_v45 = vsel %vm2777_vm0, %v2950_v12, 0.0 }
 0x3ea   :  { %v3006_v59 = vadd.f32 %v3005_v1, %v3004_v2  ;;  %v2952_v2 = vmul.f32 %v6503_v22, %v6503_v22  ;;  %v3019_v52 = vsel %vm2777_vm0, %v2951_v51, 0.0 }
 0x3ec   :  { %v3008_v55 = vadd.f32 %v3007_v49, %v3006_v59  ;;  %v2953_v59 = vmul.f32 %v6510_v32, %v6510_v32  ;;  %v3021_v35 = vsel %vm2777_vm0, %v2952_v2, 0.0 }
 0x3ee   :  { %v3010_v27 = vadd.f32 %v3009_v58, %v3008_v55  ;;  %v2954_v55 = vmul.f32 %v6517_v53, %v6517_v53  ;;  %v3023_v47 = vsel %vm2777_vm0, %v2953_v59, 0.0 }
 0x3f0   :  { %v3012_v36 = vadd.f32 %v3011_v18, %v3010_v27  ;;  %v2955_v27 = vmul.f32 %v6524_v34, %v6524_v34  ;;  %v3025_v12 = vsel %vm2777_vm0, %v2954_v55, 0.0 }
 0x3f2   :  { %v3014_v13 = vadd.f32 %v3013_v48, %v3012_v36  ;;  %v2956_v36 = vmul.f32 %v6531_v23, %v6531_v23  ;;  %v3027_v51 = vsel %vm2777_vm0, %v2955_v27, 0.0 }
 0x3f4   :  { %v3016_v56 = vadd.f32 %v3015_v44, %v3014_v13  ;;  %v2957_v13 = vmul.f32 %v6538_v38, %v6538_v38  ;;  %v3029_v2 = vsel %vm2777_vm0, %v2956_v36, 0.0 }
 0x3f6   :  { %v3018_v1 = vadd.f32 %v3017_v45, %v3016_v56  ;;  %v2958_v56 = vmul.f32 %v6545_v62, %v6545_v62  ;;  %v3031_v59 = vsel %vm2777_vm0, %v2957_v13, 0.0 }
 0x3f8   :  { %v3020_v49 = vadd.f32 %v3019_v52, %v3018_v1  ;;  %v2959_v1 = vmul.f32 %v6552_v39, %v6552_v39  ;;  %v3033_v55 = vsel %vm2777_vm0, %v2958_v56, 0.0 }
 0x3fa   :  { %v3022_v58 = vadd.f32 %v3021_v35, %v3020_v49  ;;  %v2960_v49 = vmul.f32 %v6559_v33, %v6559_v33  ;;  %v3035_v27 = vsel %vm2777_vm0, %v2959_v1, 0.0  ;;  %v2965_v1 = vmul.f32 %v6594_v43, %v6594_v43 }
 0x3fc   :  { %v3024_v18 = vadd.f32 %v3023_v47, %v3022_v58  ;;  %v2961_v58 = vmul.f32 %v6566_v40, %v6566_v40  ;;  %v3037_v36 = vsel %vm2777_vm0, %v2960_v49, 0.0  ;;  %v2966_v49 = vmul.f32 %v6601_v19, %v6601_v19 }
 0x3fe   :  { %v3026_v48 = vadd.f32 %v3025_v12, %v3024_v18  ;;  %v2962_v18 = vmul.f32 %v6573_v6, %v6573_v6  ;;  %v3039_v13 = vsel %vm2777_vm0, %v2961_v58, 0.0  ;;  %v7138_v58 = vld [vmem:[#allocation2_spill] sm:$0xff] }
 0x400   :  { %v3028_v44 = vadd.f32 %v3027_v51, %v3026_v48  ;;  %v2963_v48 = vmul.f32 %v6580_v0, %v6580_v0  ;;  %v3041_v56 = vsel %vm2777_vm0, %v2962_v18, 0.0  ;;  %v3047_v18 = vsel %vm2777_vm0, %v2965_v1, 0.0 }
 0x402   :  { %v3030_v45 = vadd.f32 %v3029_v2, %v3028_v44  ;;  %v2964_v44 = vmul.f32 %v6587_v46, %v6587_v46 }
 0x404   :  { %v3032_v52 = vadd.f32 %v3031_v59, %v3030_v45  ;;  %v7137_v45 = vld [vmem:[#allocation11_spill] sm:$0xff]  ;;  %v3043_v59 = vsel %vm2777_vm0, %v2963_v48, 0.0  ;;  %v2968_v48 = vmul.f32 %v6615_v5, %v6615_v5 }
 0x405   :  { %v6608_v24 = vsub.f32 %v7137_v45, %v6345_v8 }
 0x406   :  { %v3034_v35 = vadd.f32 %v3033_v55, %v3032_v52  ;;  %v3045_v55 = vsel %vm2777_vm0, %v2964_v44, 0.0  ;;  %v7140_v44 = vld [vmem:[#allocation4_spill] sm:$0xff] }
 0x408   :  { %v3036_v47 = vadd.f32 %v3035_v27, %v3034_v35  ;;  %v6622_v27 = vsub.f32 %v7138_v58, %v6345_v8  ;;  %v7142_v58 = vld [vmem:[#allocation6_spill] sm:$0xff] }
 0x40a   :  { %v3038_v12 = vadd.f32 %v3037_v36, %v3036_v47  ;;  %v2967_v47 = vmul.f32 %v6608_v24, %v6608_v24 }
 0x40c   :  { %v3040_v51 = vadd.f32 %v3039_v13, %v3038_v12  ;;  %v7139_v12 = vld [vmem:[#allocation3_spill] sm:$0xff]  ;;  %v3049_v13 = vsel %vm2777_vm0, %v2966_v49, 0.0  ;;  %v3051_v45 = vsel %vm2777_vm0, %v2967_v47, 0.0  ;;  %v3053_v49 = vsel %vm2777_vm0, %v2968_v48, 0.0 }
 0x40d   :  { %v6629_v9 = vsub.f32 %v7139_v12, %v6345_v8 }
 0x40e   :  { %v3042_v2 = vadd.f32 %v3041_v56, %v3040_v51  ;;  %v6636_v56 = vsub.f32 %v7140_v44, %v6345_v8 }
 0x410   :  { %v3044_v52 = vadd.f32 %v3043_v59, %v3042_v2  ;;  %v2969_v2 = vmul.f32 %v6622_v27, %v6622_v27  ;;  %v7141_v59 = vld [vmem:[#allocation5_spill] sm:$0xff] }
 0x412   :  { %v3046_v35 = vadd.f32 %v3045_v55, %v3044_v52  ;;  %v6643_v52 = vsub.f32 %v7141_v59, %v6345_v8  ;;  %v2970_v55 = vmul.f32 %v6629_v9, %v6629_v9  ;;  %v3055_v47 = vsel %vm2777_vm0, %v2969_v2, 0.0 }
 0x414   :  { %v3048_v36 = vadd.f32 %v3047_v18, %v3046_v35  ;;  %v6650_v18 = vsub.f32 %v7142_v58, %v6345_v8  ;;  %v2972_v44 = vmul.f32 %v6643_v52, %v6643_v52  ;;  %v3057_v48 = vsel %vm2777_vm0, %v2970_v55, 0.0 }
 0x415   :  { %v2976_v55 = vmul.f32 %v6351_v42, %v6351_v42 }
 0x416   :  { %v3050_v51 = vadd.f32 %v3049_v13, %v3048_v36  ;;  %v2971_v36 = vmul.f32 %v6636_v56, %v6636_v56  ;;  %v7143_v13 = vld [vmem:[#allocation7_spill] sm:$0xff] }
 0x418   :  { %v3052_v1 = vadd.f32 %v3051_v45, %v3050_v51  ;;  %v6657_v51 = vsub.f32 %v7143_v13, %v6345_v8  ;;  %v3059_v59 = vsel %vm2777_vm0, %v2971_v36, 0.0  ;;  %v2975_v8 = vmul.f32 %v6348_v3, %v6348_v3 }
 0x419   :  { %v2977_v36 = vmul.f32 %v6354_v17, %v6354_v17 }
 0x41a   :  { %v3054_v35 = vadd.f32 %v3053_v49, %v3052_v1  ;;  %7144 = vst [vmem:[#allocation11_spill] sm:$0xff] %v6657_v51  ;;  %v2973_v1 = vmul.f32 %v6650_v18, %v6650_v18  ;;  %v2974_v2 = vmul.f32 %v6657_v51, %v6657_v51 }
 0x41c   :  { %v3056_v12 = vadd.f32 %v3055_v47, %v3054_v35  ;;  %v3061_v35 = vsel %vm2777_vm0, %v2972_v44, 0.0  ;;  %v3063_v47 = vsel %vm2777_vm0, %v2973_v1, 0.0  ;;  %v2978_v44 = vmul.f32 %v6357_v26, %v6357_v26 }
 0x41d   :  { %v2979_v1 = vmul.f32 %v6360_v30, %v6360_v30 }
 0x41e   :  { %v3058_v45 = vadd.f32 %v3057_v48, %v3056_v12  ;;  %v3065_v12 = vsel %vm2777_vm0, %v2974_v2, 0.0  ;;  %v3073_v2 = vsel %vm2777_vm0, %v2978_v44, 0.0 }
 0x420   :  { %v3060_v49 = vadd.f32 %v3059_v59, %v3058_v45  ;;  %v3067_v45 = vsel %vm2777_vm0, %v2975_v8, 0.0 }
 0x422   :  { %v3062_v58 = vadd.f32 %v3061_v35, %v3060_v49  ;;  %v3069_v49 = vsel %vm2777_vm0, %v2976_v55, 0.0 }
 0x424   :  { %v3064_v13 = vadd.f32 %v3063_v47, %v3062_v58  ;;  %v3071_v58 = vsel %vm2777_vm0, %v2977_v36, 0.0 }
 0x426   :  { %v3066_v48 = vadd.f32 %v3065_v12, %v3064_v13  ;;  %v3075_v12 = vsel %vm2777_vm0, %v2979_v1, 0.0 }
 0x428   :  { %v3068_v59 = vadd.f32 %v3067_v45, %v3066_v48 }
 0x42a   :  { %v3070_v35 = vadd.f32 %v3069_v49, %v3068_v59 }
 0x42c   :  { %v3072_v47 = vadd.f32 %v3071_v58, %v3070_v35 }
 0x42e   :  { %v3074_v13 = vadd.f32 %v3073_v2, %v3072_v47 }
 0x430   :  { %v3076_v17 = vadd.f32 %v3075_v12, %v3074_v13 }
 0x432   :  { %v3077_v8 = vrot.slane %v3076_v17, 4 }
 0x434   :  { %v3078_v48 = vadd.f32 %v3077_v8, %v3076_v17 }
 0x436   :  { %v3079_v45 = vrot.slane %v3078_v48, 2 }
 0x438   :  { %v3080_v42 = vadd.f32 %v3079_v45, %v3078_v48 }
 0x43a   :  { %v3081_v26 = vrot.slane %v3080_v42, 1 }
 0x43c   :  { %v3082_v3 = vadd.f32 %v3081_v26, %v3080_v42 }
 0x43e   :  { %v3083_v55 = vmul.f32 0.0025510204, %v3082_v3  ;;  %v6692_v3 = vld [vmem:[%s7091_s2] ss:$0 sm:$0xff] }
 0x440   :  { %v3084_v59 = vadd.f32 1e-05, %v3083_v55 }
 0x442   :  { %4634 = vrsqrt.f32 %v3084_v59  ;;  %vm3091_vm2 = vweird.f32 %v3084_v59 }
 0x448   :  { %v4635_v49 = vpop.eup %4634 }
 0x449   :  { %v3086_v30 = vmul.f32 %v4635_v49, %v3084_v59  ;;  %vm3092_vm1 = vweird.f32 %v4635_v49 }
 0x44a   :  { %vm3093_vm3 = vmor %vm3091_vm2, %vm3092_vm1 }
 0x44b   :  { %v3087_v51 = vmul.f32 %v4635_v49, %v3086_v30 }
 0x44d   :  { %v3088_v36 = vmul.f32 0.5, %v3087_v51 }
 0x44f   :  { %v3089_v35 = vsub.f32 1.5, %v3088_v36 }
 0x451   :  { %v3090_v58 = vmul.f32 %v4635_v49, %v3089_v35 }
 0x453   :  { %v6685_v44 = vsel %vm3093_vm3, %v4635_v49, %v3090_v58 }
 0x454   :  { %v3095_v17 = vmul.f32 %v6685_v44, %v6364_v10  ;;  %v3096_v42 = vmul.f32 %v6685_v44, %v6368_v61  ;;  %v3097_v26 = vmul.f32 %v6685_v44, %v6372_v15  ;;  %v3098_v30 = vmul.f32 %v6685_v44, %v6376_v60  ;;  %v6710_v61 = vld [vmem:[%s7092_s3] ss:$0 sm:$0xff] }
 0x455   :  { %v3099_v51 = vmul.f32 %v6685_v44, %v6384_v54  ;;  %v3100_v10 = vmul.f32 %v6685_v44, %v6390_v37  ;;  %v3101_v1 = vmul.f32 %v6685_v44, %v6398_v41  ;;  %v3102_v15 = vmul.f32 %v6685_v44, %v6405_v4 }
 0x456   :  { %v3148_v47 = vmul.f32 %v6692_v3, %v3095_v17  ;;  %v3149_v60 = vmul.f32 %v6692_v3, %v3096_v42  ;;  %v3150_v54 = vmul.f32 %v6692_v3, %v3097_v26  ;;  %v3151_v2 = vmul.f32 %v6692_v3, %v3098_v30 }
 0x457   :  { %v3103_v37 = vmul.f32 %v6685_v44, %v6412_v20  ;;  %v3152_v41 = vmul.f32 %v6692_v3, %v3099_v51  ;;  %v3104_v13 = vmul.f32 %v6685_v44, %v6419_v16  ;;  %v3153_v12 = vmul.f32 %v6692_v3, %v3100_v10 }
 0x458   :  { %v3105_v8 = vmul.f32 %v6685_v44, %v6426_v11  ;;  %v3106_v4 = vmul.f32 %v6685_v44, %v6433_v63  ;;  %v3154_v48 = vmul.f32 %v6692_v3, %v3101_v1  ;;  %v3201_v45 = vadd.f32 %v6710_v61, %v3148_v47 }
 0x459   :  { %v3155_v55 = vmul.f32 %v6692_v3, %v3102_v15  ;;  %v3202_v20 = vadd.f32 %v6710_v61, %v3149_v60  ;;  %v3203_v59 = vadd.f32 %v6710_v61, %v3150_v54  ;;  %v3204_v16 = vadd.f32 %v6710_v61, %v3151_v2 }
 0x45a   :  { %v3107_v49 = vmul.f32 %v6685_v44, %v6440_v7  ;;  %v3108_v11 = vmul.f32 %v6685_v44, %v6447_v25  ;;  %v3156_v63 = vmul.f32 %v6692_v3, %v3103_v37  ;;  %v3205_v36 = vadd.f32 %v6710_v61, %v3152_v41 }
 0x45b   :  { %v3109_v35 = vmul.f32 %v6685_v44, %v6454_v14  ;;  %v3110_v58 = vmul.f32 %v6685_v44, %v6461_v57  ;;  %v3157_v17 = vmul.f32 %v6692_v3, %v3104_v13  ;;  %v3206_v42 = vadd.f32 %v6710_v61, %v3153_v12 }
 0x45c   :  { %v3158_v26 = vmul.f32 %v6692_v3, %v3105_v8  ;;  %v3159_v7 = vmul.f32 %v6692_v3, %v3106_v4  ;;  %v3207_v25 = vadd.f32 %v6710_v61, %v3154_v48  ;;  %v3250_v30 = vmax.f32 %v3201_v45, 0.0 }
 0x45d   :  { %v3208_v51 = vadd.f32 %v6710_v61, %v3155_v55  ;;  %v3251_v10 = vmax.f32 %v3202_v20, 0.0  ;;  %v3252_v1 = vmax.f32 %v3203_v59, 0.0  ;;  %v3253_v47 = vmax.f32 %v3204_v16, 0.0 }
 0x45e   :  { %v3111_v14 = vmul.f32 %v6685_v44, %v6468_v28  ;;  %v3160_v57 = vmul.f32 %v6692_v3, %v3107_v49  ;;  %v3209_v15 = vadd.f32 %v6710_v61, %v3156_v63  ;;  %v3254_v60 = vmax.f32 %v3205_v36, 0.0  ;;  %3299 = vst.msk [vmem:[%s7093_s4] sm:$0xff] %vm2777_vm0, %v3250_v30 }
 0x45f   :  { %v3112_v54 = vmul.f32 %v6685_v44, %v6475_v21  ;;  %v3161_v2 = vmul.f32 %v6692_v3, %v3108_v11  ;;  %v3210_v37 = vadd.f32 %v6710_v61, %v3157_v17  ;;  %v3255_v41 = vmax.f32 %v3206_v42, 0.0  ;;  %3300 = vst.msk [vmem:[%s7093_s4 + $0x8] sm:$0xff] %vm2777_vm0, %v3251_v10 }
 0x460   :  { %v3113_v28 = vmul.f32 %v6685_v44, %v6482_v29  ;;  %v3162_v13 = vmul.f32 %v6692_v3, %v3109_v35  ;;  %v3211_v12 = vadd.f32 %v6710_v61, %v3158_v26  ;;  %v3256_v8 = vmax.f32 %v3207_v25, 0.0  ;;  %3301 = vst.msk [vmem:[%s7093_s4 + $0x10] sm:$0xff] %vm2777_vm0, %v3252_v1 }
 0x461   :  { %v3114_v21 = vmul.f32 %v6685_v44, %v6489_v50  ;;  %v3163_v4 = vmul.f32 %v6692_v3, %v3110_v58  ;;  %v3212_v48 = vadd.f32 %v6710_v61, %v3159_v7  ;;  %v3257_v45 = vmax.f32 %v3208_v51, 0.0  ;;  %3302 = vst.msk [vmem:[%s7093_s4 + $0x18] sm:$0xff] %vm2777_vm0, %v3253_v47 }
 0x462   :  { %v3115_v29 = vmul.f32 %v6685_v44, %v6496_v31  ;;  %v3164_v55 = vmul.f32 %v6692_v3, %v3111_v14  ;;  %v3213_v20 = vadd.f32 %v6710_v61, %v3160_v57  ;;  %v3258_v59 = vmax.f32 %v3209_v15, 0.0  ;;  %3303 = vst.msk [vmem:[%s7093_s4 + $0x20] sm:$0xff] %vm2777_vm0, %v3254_v60 }
 0x463   :  { %v3116_v50 = vmul.f32 %v6685_v44, %v6503_v22  ;;  %v3165_v16 = vmul.f32 %v6692_v3, %v3112_v54  ;;  %v3214_v49 = vadd.f32 %v6710_v61, %v3161_v2  ;;  %v3259_v11 = vmax.f32 %v3210_v37, 0.0  ;;  %3304 = vst.msk [vmem:[%s7093_s4 + $0x28] sm:$0xff] %vm2777_vm0, %v3255_v41 }
 0x464   :  { %v3117_v31 = vmul.f32 %v6685_v44, %v6510_v32  ;;  %v3166_v63 = vmul.f32 %v6692_v3, %v3113_v28  ;;  %v3215_v36 = vadd.f32 %v6710_v61, %v3162_v13  ;;  %v3260_v35 = vmax.f32 %v3211_v12, 0.0  ;;  %3305 = vst.msk [vmem:[%s7093_s4 + $0x30] sm:$0xff] %vm2777_vm0, %v3256_v8 }
 0x465   :  { %v3118_v22 = vmul.f32 %v6685_v44, %v6517_v53  ;;  %v3167_v58 = vmul.f32 %v6692_v3, %v3114_v21  ;;  %v3216_v17 = vadd.f32 %v6710_v61, %v3163_v4  ;;  %v3261_v42 = vmax.f32 %v3212_v48, 0.0  ;;  %3306 = vst.msk [vmem:[%s7093_s4 + $0x38] sm:$0xff] %vm2777_vm0, %v3257_v45 }
 0x466   :  { %v3119_v32 = vmul.f32 %v6685_v44, %v6524_v34  ;;  %v3168_v26 = vmul.f32 %v6692_v3, %v3115_v29  ;;  %v3217_v7 = vadd.f32 %v6710_v61, %v3164_v55  ;;  %v3262_v25 = vmax.f32 %v3213_v20, 0.0  ;;  %3307 = vst.msk [vmem:[%s7093_s4 + $0x40] sm:$0xff] %vm2777_vm0, %v3258_v59 }
 0x467   :  { %v3120_v53 = vmul.f32 %v6685_v44, %v6531_v23  ;;  %v3169_v30 = vmul.f32 %v6692_v3, %v3116_v50  ;;  %v3218_v51 = vadd.f32 %v6710_v61, %v3165_v16  ;;  %v3263_v10 = vmax.f32 %v3214_v49, 0.0  ;;  %3308 = vst.msk [vmem:[%s7093_s4 + $0x48] sm:$0xff] %vm2777_vm0, %v3259_v11 }
 0x468   :  { %v3121_v34 = vmul.f32 %v6685_v44, %v6538_v38  ;;  %v3170_v1 = vmul.f32 %v6692_v3, %v3117_v31  ;;  %v3219_v47 = vadd.f32 %v6710_v61, %v3166_v63  ;;  %v3264_v14 = vmax.f32 %v3215_v36, 0.0  ;;  %3309 = vst.msk [vmem:[%s7093_s4 + $0x50] sm:$0xff] %vm2777_vm0, %v3260_v35 }
 0x469   :  { %v3122_v23 = vmul.f32 %v6685_v44, %v6545_v62  ;;  %v3171_v57 = vmul.f32 %v6692_v3, %v3118_v22  ;;  %v3220_v15 = vadd.f32 %v6710_v61, %v3167_v58  ;;  %v3265_v60 = vmax.f32 %v3216_v17, 0.0  ;;  %3310 = vst.msk [vmem:[%s7093_s4 + $0x58] sm:$0xff] %vm2777_vm0, %v3261_v42 }
 0x46a   :  { %v3123_v38 = vmul.f32 %v6685_v44, %v6552_v39  ;;  %v3172_v54 = vmul.f32 %v6692_v3, %v3119_v32  ;;  %v3221_v2 = vadd.f32 %v6710_v61, %v3168_v26  ;;  %v3266_v37 = vmax.f32 %v3217_v7, 0.0  ;;  %3311 = vst.msk [vmem:[%s7093_s4 + $0x60] sm:$0xff] %vm2777_vm0, %v3262_v25 }
 0x46b   :  { %v3124_v62 = vmul.f32 %v6685_v44, %v6559_v33  ;;  %v3173_v41 = vmul.f32 %v6692_v3, %v3120_v53  ;;  %v3222_v28 = vadd.f32 %v6710_v61, %v3169_v30  ;;  %v3267_v13 = vmax.f32 %v3218_v51, 0.0  ;;  %3312 = vst.msk [vmem:[%s7093_s4 + $0x68] sm:$0xff] %vm2777_vm0, %v3263_v10 }
 0x46c   :  { %v3125_v39 = vmul.f32 %v6685_v44, %v6566_v40  ;;  %v3174_v12 = vmul.f32 %v6692_v3, %v3121_v34  ;;  %v3223_v8 = vadd.f32 %v6710_v61, %v3170_v1  ;;  %v3268_v21 = vmax.f32 %v3219_v47, 0.0  ;;  %3313 = vst.msk [vmem:[%s7093_s4 + $0x70] sm:$0xff] %vm2777_vm0, %v3264_v14 }
 0x46d   :  { %v3126_v33 = vmul.f32 %v6685_v44, %v6573_v6  ;;  %v3175_v4 = vmul.f32 %v6692_v3, %v3122_v23  ;;  %v3224_v48 = vadd.f32 %v6710_v61, %v3171_v57  ;;  %v3269_v45 = vmax.f32 %v3220_v15, 0.0  ;;  %3314 = vst.msk [vmem:[%s7093_s4 + $0x78] sm:$0xff] %vm2777_vm0, %v3265_v60 }
 0x46e   :  { %v3127_v40 = vmul.f32 %v6685_v44, %v6580_v0  ;;  %v3176_v29 = vmul.f32 %v6692_v3, %v3123_v38  ;;  %v3225_v55 = vadd.f32 %v6710_v61, %v3172_v54  ;;  %v3270_v20 = vmax.f32 %v3221_v2, 0.0  ;;  %3315 = vst.msk [vmem:[%s7093_s4 + $0x80] sm:$0xff] %vm2777_vm0, %v3266_v37 }
 0x46f   :  { %v3128_v6 = vmul.f32 %v6685_v44, %v6587_v46  ;;  %v3177_v59 = vmul.f32 %v6692_v3, %v3124_v62  ;;  %v3226_v50 = vadd.f32 %v6710_v61, %v3173_v41  ;;  %v3271_v16 = vmax.f32 %v3222_v28, 0.0  ;;  %3316 = vst.msk [vmem:[%s7093_s4 + $0x88] sm:$0xff] %vm2777_vm0, %v3267_v13 }
 0x470   :  { %v3129_v0 = vmul.f32 %v6685_v44, %v6594_v43  ;;  %v3178_v49 = vmul.f32 %v6692_v3, %v3125_v39  ;;  %v3227_v11 = vadd.f32 %v6710_v61, %v3174_v12  ;;  %v3272_v31 = vmax.f32 %v3223_v8, 0.0  ;;  %3317 = vst.msk [vmem:[%s7093_s4 + $0x90] sm:$0xff] %vm2777_vm0, %v3268_v21  ;;  %v7147_v12 = vld [vmem:[#allocation9_spill] sm:$0xff] }
 0x471   :  { %v3130_v46 = vmul.f32 %v6685_v44, %v6601_v19  ;;  %v3179_v63 = vmul.f32 %v6692_v3, %v3126_v33  ;;  %v3228_v36 = vadd.f32 %v6710_v61, %v3175_v4  ;;  %v3273_v35 = vmax.f32 %v3224_v48, 0.0  ;;  %3318 = vst.msk [vmem:[%s7093_s4 + $0x98] sm:$0xff] %vm2777_vm0, %v3269_v45  ;;  %v7148_v48 = vld [vmem:[#allocation10_spill] sm:$0xff] }
 0x472   :  { %v3131_v43 = vmul.f32 %v6685_v44, %v6608_v24  ;;  %v3180_v22 = vmul.f32 %v6692_v3, %v3127_v40  ;;  %v3229_v58 = vadd.f32 %v6710_v61, %v3176_v29  ;;  %v3274_v17 = vmax.f32 %v3225_v55, 0.0  ;;  %3319 = vst.msk [vmem:[%s7093_s4 + $0xa0] sm:$0xff] %vm2777_vm0, %v3270_v20  ;;  %v7149_v20 = vld [vmem:[#allocation12_spill] sm:$0xff] }
 0x473   :  { %v3132_v19 = vmul.f32 %v6685_v44, %v6615_v5  ;;  %v3181_v42 = vmul.f32 %v6692_v3, %v3128_v6  ;;  %v3230_v32 = vadd.f32 %v6710_v61, %v3177_v59  ;;  %v3275_v26 = vmax.f32 %v3226_v50, 0.0  ;;  %3320 = vst.msk [vmem:[%s7093_s4 + $0xa8] sm:$0xff] %vm2777_vm0, %v3271_v16 }
 0x474   :  { %v3133_v24 = vmul.f32 %v6685_v44, %v6622_v27  ;;  %v3182_v7 = vmul.f32 %v6692_v3, %v3129_v0  ;;  %v3231_v25 = vadd.f32 %v6710_v61, %v3178_v49  ;;  %v3276_v53 = vmax.f32 %v3227_v11, 0.0  ;;  %3321 = vst.msk [vmem:[%s7093_s4 + $0xb0] sm:$0xff] %vm2777_vm0, %v3272_v31  ;;  %v7150_v0 = vld [vmem:[#allocation13_spill] sm:$0xff] }
 0x475   :  { %v3134_v5 = vmul.f32 %v6685_v44, %v6629_v9  ;;  %v3183_v30 = vmul.f32 %v6692_v3, %v3130_v46  ;;  %v3232_v51 = vadd.f32 %v6710_v61, %v3179_v63  ;;  %v3277_v10 = vmax.f32 %v3228_v36, 0.0  ;;  %3322 = vst.msk [vmem:[%s7093_s4 + $0xb8] sm:$0xff] %vm2777_vm0, %v3273_v35 }
 0x476   :  { %v3135_v27 = vmul.f32 %v6685_v44, %v6636_v56  ;;  %v3184_v34 = vmul.f32 %v6692_v3, %v3131_v43  ;;  %v3233_v1 = vadd.f32 %v6710_v61, %v3180_v22  ;;  %v3278_v47 = vmax.f32 %v3229_v58, 0.0  ;;  %3323 = vst.msk [vmem:[%s7093_s4 + $0xc0] sm:$0xff] %vm2777_vm0, %v3274_v17 }
 0x477   :  { %v3136_v9 = vmul.f32 %v6685_v44, %v6643_v52  ;;  %v3185_v14 = vmul.f32 %v6692_v3, %v3132_v19  ;;  %v3234_v23 = vadd.f32 %v6710_v61, %v3181_v42  ;;  %v3279_v57 = vmax.f32 %v3230_v32, 0.0  ;;  %3324 = vst.msk [vmem:[%s7093_s4 + $0xc8] sm:$0xff] %vm2777_vm0, %v3275_v26  ;;  %v7145_v52 = vld [vmem:[#allocation11_spill] sm:$0xff] }
 0x478   :  { %v3137_v56 = vmul.f32 %v6685_v44, %v6650_v18  ;;  %v3186_v15 = vmul.f32 %v6692_v3, %v3133_v24  ;;  %v3235_v60 = vadd.f32 %v6710_v61, %v3182_v7  ;;  %v3280_v38 = vmax.f32 %v3231_v25, 0.0  ;;  %3325 = vst.msk [vmem:[%s7093_s4 + $0xd0] sm:$0xff] %vm2777_vm0, %v3276_v53  ;;  %v7146_v18 = vld [vmem:[#allocation8_spill] sm:$0xff] }
 0x479   :  { %v3138_v54 = vmul.f32 %v6685_v44, %v7145_v52  ;;  %v3187_v2 = vmul.f32 %v6692_v3, %v3134_v5  ;;  %v3236_v37 = vadd.f32 %v6710_v61, %v3183_v30  ;;  %v3281_v62 = vmax.f32 %v3232_v51, 0.0  ;;  %3326 = vst.msk [vmem:[%s7093_s4 + $0xd8] sm:$0xff] %vm2777_vm0, %v3277_v10 }
 0x47a   :  { %v3139_v41 = vmul.f32 %v6685_v44, %v7146_v18  ;;  %v3188_v28 = vmul.f32 %v6692_v3, %v3135_v27  ;;  %v3237_v13 = vadd.f32 %v6710_v61, %v3184_v34  ;;  %v3282_v39 = vmax.f32 %v3233_v1, 0.0  ;;  %3327 = vst.msk [vmem:[%s7093_s4 + $0xe0] sm:$0xff] %vm2777_vm0, %v3278_v47 }
 0x47b   :  { %v3140_v8 = vmul.f32 %v6685_v44, %v7147_v12  ;;  %v3189_v21 = vmul.f32 %v6692_v3, %v3136_v9  ;;  %v3238_v33 = vadd.f32 %v6710_v61, %v3185_v14  ;;  %v3283_v4 = vmax.f32 %v3234_v23, 0.0  ;;  %3328 = vst.msk [vmem:[%s7093_s4 + $0xe8] sm:$0xff] %vm2777_vm0, %v3279_v57 }
 0x47c   :  { %v3141_v45 = vmul.f32 %v6685_v44, %v7148_v48  ;;  %v3190_v40 = vmul.f32 %v6692_v3, %v3137_v56  ;;  %v3239_v29 = vadd.f32 %v6710_v61, %v3186_v15  ;;  %v3284_v55 = vmax.f32 %v3235_v60, 0.0  ;;  %3329 = vst.msk [vmem:[%s7093_s4 + $0xf0] sm:$0xff] %vm2777_vm0, %v3280_v38 }
 0x47d   :  { %v3142_v6 = vmul.f32 %v6685_v44, %v7149_v20  ;;  %v3191_v59 = vmul.f32 %v6692_v3, %v3138_v54  ;;  %v3240_v50 = vadd.f32 %v6710_v61, %v3187_v2  ;;  %v3285_v16 = vmax.f32 %v3236_v37, 0.0  ;;  %3330 = vst.msk [vmem:[%s7093_s4 + $0xf8] sm:$0xff] %vm2777_vm0, %v3281_v62 }
 0x47e   :  { %v3143_v49 = vmul.f32 %v6685_v44, %v7150_v0  ;;  %v3192_v11 = vmul.f32 %v6692_v3, %v3139_v41  ;;  %v3241_v31 = vadd.f32 %v6710_v61, %v3188_v28  ;;  %v3286_v46 = vmax.f32 %v3237_v13, 0.0  ;;  %3331 = vst.msk [vmem:[%s7093_s4 + $0x100] sm:$0xff] %vm2777_vm0, %v3282_v39 }
 0x47f   :  { %v3193_v63 = vmul.f32 %v6692_v3, %v3140_v8  ;;  %v3242_v36 = vadd.f32 %v6710_v61, %v3189_v21  ;;  %v3287_v35 = vmax.f32 %v3238_v33, 0.0  ;;  %3332 = vst.msk [vmem:[%s7093_s4 + $0x108] sm:$0xff] %vm2777_vm0, %v3283_v4  ;;  %v3194_v44 = vmul.f32 %v6692_v3, %v3141_v45 }
 0x480   :  { %v3243_v43 = vadd.f32 %v6710_v61, %v3190_v40  ;;  %v3288_v22 = vmax.f32 %v3239_v29, 0.0  ;;  %3333 = vst.msk [vmem:[%s7093_s4 + $0x110] sm:$0xff] %vm2777_vm0, %v3284_v55  ;;  %v3195_v58 = vmul.f32 %v6692_v3, %v3142_v6  ;;  %v3244_v17 = vadd.f32 %v6710_v61, %v3191_v59 }
 0x481   :  { %v3289_v19 = vmax.f32 %v3240_v50, 0.0  ;;  %3334 = vst.msk [vmem:[%s7093_s4 + $0x118] sm:$0xff] %vm2777_vm0, %v3285_v16  ;;  %v3196_v42 = vmul.f32 %v6692_v3, %v3143_v49  ;;  %v3245_v32 = vadd.f32 %v6710_v61, %v3192_v11  ;;  %v3290_v26 = vmax.f32 %v3241_v31, 0.0 }
 0x482   :  { %3335 = vst.msk [vmem:[%s7093_s4 + $0x120] sm:$0xff] %vm2777_vm0, %v3286_v46  ;;  %v3246_v24 = vadd.f32 %v6710_v61, %v3193_v63  ;;  %v3291_v7 = vmax.f32 %v3242_v36, 0.0  ;;  %v3247_v25 = vadd.f32 %v6710_v61, %v3194_v44  ;;  %v3292_v53 = vmax.f32 %v3243_v43, 0.0 }
 0x483   :  { %3336 = vst.msk [vmem:[%s7093_s4 + $0x128] sm:$0xff] %vm2777_vm0, %v3287_v35  ;;  %v3248_v3 = vadd.f32 %v6710_v61, %v3195_v58  ;;  %v3293_v5 = vmax.f32 %v3244_v17, 0.0  ;;  %v3249_v30 = vadd.f32 %v6710_v61, %v3196_v42  ;;  %v3294_v51 = vmax.f32 %v3245_v32, 0.0 }
 0x484   :  { %3337 = vst.msk [vmem:[%s7093_s4 + $0x130] sm:$0xff] %vm2777_vm0, %v3288_v22  ;;  %v3295_v10 = vmax.f32 %v3246_v24, 0.0  ;;  %v3296_v27 = vmax.f32 %v3247_v25, 0.0 }
 0x485   :  { %3338 = vst.msk [vmem:[%s7093_s4 + $0x138] sm:$0xff] %vm2777_vm0, %v3289_v19  ;;  %v3297_v34 = vmax.f32 %v3248_v3, 0.0  ;;  %v3298_v61 = vmax.f32 %v3249_v30, 0.0 }
 0x486   :  { %3339 = vst.msk [vmem:[%s7093_s4 + $0x140] sm:$0xff] %vm2777_vm0, %v3290_v26 }
 0x487   :  { %3340 = vst.msk [vmem:[%s7093_s4 + $0x148] sm:$0xff] %vm2777_vm0, %v3291_v7 }
 0x488   :  { %3341 = vst.msk [vmem:[%s7093_s4 + $0x150] sm:$0xff] %vm2777_vm0, %v3292_v53 }
 0x489   :  { %3342 = vst.msk [vmem:[%s7093_s4 + $0x158] sm:$0xff] %vm2777_vm0, %v3293_v5 }
 0x48a   :  { %3343 = vst.msk [vmem:[%s7093_s4 + $0x160] sm:$0xff] %vm2777_vm0, %v3294_v51 }
 0x48b   :  { %3344 = vst.msk [vmem:[%s7093_s4 + $0x168] sm:$0xff] %vm2777_vm0, %v3295_v10 }
 0x48c   :  { %3345 = vst.msk [vmem:[%s7093_s4 + $0x170] sm:$0xff] %vm2777_vm0, %v3296_v27 }
 0x48d   :  { %3346 = vst.msk [vmem:[%s7093_s4 + $0x178] sm:$0xff] %vm2777_vm0, %v3297_v34 }
 0x48e   :  { %3347 = vst.msk [vmem:[%s7093_s4 + $0x180] sm:$0xff] %vm2777_vm0, %v3298_v61 }

// kernel: cnn_generator_forward.7
= control target key start
LH: loop header
LB: loop body
LE: loop exit
PB: predicated region body
PF: predicated region fallthrough
CT: control target
= control target key end

     0   :  { %vm3093_vm0 = vcmask 1040384   ;;  %vm3095_vm1 = vcmask 1042434   ;;  %vm3097_vm2 = vcmask 1041408   ;;  %vm3099_vm3 = vcmask 1044484   ;;  %s7588_s0 = inlined_call_operand.vmem [shape: bf16[1568,512], index: 0, kind: input, shape index: {}]   ;;  %s7589_s1 = inlined_call_operand.vmem [shape: bf16[8,512], index: 1, kind: input, shape index: {}]   ;;  %s7590_s2 = inlined_call_operand.vmem [shape: f32[1,1568], index: 2, kind: output, shape index: {}]  }
   0x1   :  { %v3239_v0 = vld [vmem:[%s7588_s0 + $0xe0] sm:$0xf]  ;;  %v4723_v1 = vld [vmem:[%s7588_s0 + $0xec] sm:$0xf0]  ;;  %v4721_v2 = vld [vmem:[%s7588_s0 + $0xe4] sm:$0xf] }
   0x2   :  { %v3240_v3 = vor.u32 %v4723_v1, %v3239_v0  ;;  %v3241_v4 = vld [vmem:[%s7588_s0 + $0xf0] sm:$0xf0]  ;;  %v3247_v5 = vld [vmem:[%s7588_s0 + $0xe8] sm:$0xf]  ;;  %v4724_v6 = vld [vmem:[%s7588_s0 + $0xf4] sm:$0xf0] }
   0x3   :  { %v3244_v7 = vor.u32 %v4721_v2, %v3241_v4  ;;  %v3248_v8 = vor.u32 %v4724_v6, %v3247_v5  ;;  %v4722_v9 = vld [vmem:[%s7588_s0 + $0xec] sm:$0xf]  ;;  %v3249_v10 = vld [vmem:[%s7588_s0 + $0xf8] sm:$0xf0]  ;;  %v3223_v12 = vld [vmem:[%s7588_s0 + $0xc0] sm:$0xf] }
   0x4   :  { %2380 = vmatpush.bf16.xpose.msra.mxu0 %v3240_v3  ;;  %v3252_v11 = vor.u32 %v4722_v9, %v3249_v10  ;;  %v4719_v13 = vld [vmem:[%s7588_s0 + $0xcc] sm:$0xf0]  ;;  %v4717_v14 = vld [vmem:[%s7588_s0 + $0xc4] sm:$0xf]  ;;  %v3225_v15 = vld [vmem:[%s7588_s0 + $0xd0] sm:$0xf0] }
   0x5   :  { %2393 = vmatpush.bf16.xpose.msra.mxu1 %v3244_v7  ;;  %2406 = vmatpush.bf16.xpose.msra.mxu2 %v3248_v8  ;;  %v3231_v16 = vld [vmem:[%s7588_s0 + $0xc8] sm:$0xf]  ;;  %v4720_v17 = vld [vmem:[%s7588_s0 + $0xd4] sm:$0xf0]  ;;  %v4718_v18 = vld [vmem:[%s7588_s0 + $0xcc] sm:$0xf]  ;;  %v3224_v20 = vor.u32 %v4719_v13, %v3223_v12  ;;  %v3228_v21 = vor.u32 %v4717_v14, %v3225_v15 }
   0x6   :  { %2419 = vmatpush.bf16.xpose.msra.mxu3 %v3252_v11  ;;  %v3233_v19 = vld [vmem:[%s7588_s0 + $0xd8] sm:$0xf0]  ;;  %v3232_v22 = vor.u32 %v4720_v17, %v3231_v16  ;;  %v3207_v24 = vld [vmem:[%s7588_s0 + $0xa0] sm:$0xf]  ;;  %v4715_v25 = vld [vmem:[%s7588_s0 + $0xac] sm:$0xf0] }
   0x7   :  { %v3236_v23 = vor.u32 %v4718_v18, %v3233_v19  ;;  %v4713_v26 = vld [vmem:[%s7588_s0 + $0xa4] sm:$0xf]  ;;  %v3209_v27 = vld [vmem:[%s7588_s0 + $0xb0] sm:$0xf0]  ;;  %v3215_v28 = vld [vmem:[%s7588_s0 + $0xa8] sm:$0xf]  ;;  %v3208_v32 = vor.u32 %v4715_v25, %v3207_v24 }
   0x8   :  { %v4716_v29 = vld [vmem:[%s7588_s0 + $0xb4] sm:$0xf0]  ;;  %v4714_v30 = vld [vmem:[%s7588_s0 + $0xac] sm:$0xf]  ;;  %v3217_v31 = vld [vmem:[%s7588_s0 + $0xb8] sm:$0xf0]  ;;  %v3212_v33 = vor.u32 %v4713_v26, %v3209_v27 }
   0x9   :  { %v3216_v34 = vor.u32 %v4716_v29, %v3215_v28  ;;  %v3220_v35 = vor.u32 %v4714_v30, %v3217_v31  ;;  %v3191_v36 = vld [vmem:[%s7588_s0 + $0x80] sm:$0xf]  ;;  %v4711_v37 = vld [vmem:[%s7588_s0 + $0x8c] sm:$0xf0]  ;;  %v4709_v38 = vld [vmem:[%s7588_s0 + $0x84] sm:$0xf] }
   0xa   :  { %v3193_v39 = vld [vmem:[%s7588_s0 + $0x90] sm:$0xf0]  ;;  %v3199_v40 = vld [vmem:[%s7588_s0 + $0x88] sm:$0xf]  ;;  %v4712_v41 = vld [vmem:[%s7588_s0 + $0x94] sm:$0xf0]  ;;  %v3192_v44 = vor.u32 %v4711_v37, %v3191_v36 }
   0xb   :  { %v4710_v42 = vld [vmem:[%s7588_s0 + $0x8c] sm:$0xf]  ;;  %v3201_v43 = vld [vmem:[%s7588_s0 + $0x98] sm:$0xf0]  ;;  %v3196_v45 = vor.u32 %v4709_v38, %v3193_v39  ;;  %v3200_v46 = vor.u32 %v4712_v41, %v3199_v40  ;;  %v3175_v48 = vld [vmem:[%s7588_s0 + $0x60] sm:$0xf] }
   0xc   :  { %2381 = vmatpush.bf16.xpose.msra.mxu0 %v3224_v20  ;;  %v3204_v47 = vor.u32 %v4710_v42, %v3201_v43  ;;  %v4707_v49 = vld [vmem:[%s7588_s0 + $0x6c] sm:$0xf0]  ;;  %v4705_v50 = vld [vmem:[%s7588_s0 + $0x64] sm:$0xf]  ;;  %v3177_v51 = vld [vmem:[%s7588_s0 + $0x70] sm:$0xf0] }
   0xd   :  { %2394 = vmatpush.bf16.xpose.msra.mxu1 %v3228_v21  ;;  %2407 = vmatpush.bf16.xpose.msra.mxu2 %v3232_v22  ;;  %v3183_v52 = vld [vmem:[%s7588_s0 + $0x68] sm:$0xf]  ;;  %v4708_v53 = vld [vmem:[%s7588_s0 + $0x74] sm:$0xf0]  ;;  %v4706_v54 = vld [vmem:[%s7588_s0 + $0x6c] sm:$0xf]  ;;  %v3176_v56 = vor.u32 %v4707_v49, %v3175_v48  ;;  %v3180_v57 = vor.u32 %v4705_v50, %v3177_v51 }
   0xe   :  { %2420 = vmatpush.bf16.xpose.msra.mxu3 %v3236_v23  ;;  %v3185_v55 = vld [vmem:[%s7588_s0 + $0x78] sm:$0xf0]  ;;  %v3184_v58 = vor.u32 %v4708_v53, %v3183_v52  ;;  %v3159_v60 = vld [vmem:[%s7588_s0 + $0x40] sm:$0xf]  ;;  %v4703_v61 = vld [vmem:[%s7588_s0 + $0x4c] sm:$0xf0] }
   0xf   :  { %v3188_v59 = vor.u32 %v4706_v54, %v3185_v55  ;;  %v4701_v62 = vld [vmem:[%s7588_s0 + $0x44] sm:$0xf]  ;;  %v3161_v63 = vld [vmem:[%s7588_s0 + $0x50] sm:$0xf0]  ;;  %v3167_v0 = vld [vmem:[%s7588_s0 + $0x48] sm:$0xf]  ;;  %v3160_v4 = vor.u32 %v4703_v61, %v3159_v60 }
  0x10   :  { %v4704_v1 = vld [vmem:[%s7588_s0 + $0x54] sm:$0xf0]  ;;  %v4702_v2 = vld [vmem:[%s7588_s0 + $0x4c] sm:$0xf]  ;;  %v3169_v3 = vld [vmem:[%s7588_s0 + $0x58] sm:$0xf0]  ;;  %v3164_v5 = vor.u32 %v4701_v62, %v3161_v63 }
  0x11   :  { %v3168_v6 = vor.u32 %v4704_v1, %v3167_v0  ;;  %v3172_v7 = vor.u32 %v4702_v2, %v3169_v3  ;;  %v3143_v8 = vld [vmem:[%s7588_s0 + $0x20] sm:$0xf]  ;;  %v4699_v9 = vld [vmem:[%s7588_s0 + $0x2c] sm:$0xf0]  ;;  %v4697_v10 = vld [vmem:[%s7588_s0 + $0x24] sm:$0xf] }
  0x12   :  { %v3145_v11 = vld [vmem:[%s7588_s0 + $0x30] sm:$0xf0]  ;;  %v3151_v12 = vld [vmem:[%s7588_s0 + $0x28] sm:$0xf]  ;;  %v4700_v13 = vld [vmem:[%s7588_s0 + $0x34] sm:$0xf0]  ;;  %v3144_v16 = vor.u32 %v4699_v9, %v3143_v8 }
  0x13   :  { %v4698_v14 = vld [vmem:[%s7588_s0 + $0x2c] sm:$0xf]  ;;  %v3153_v15 = vld [vmem:[%s7588_s0 + $0x38] sm:$0xf0]  ;;  %v3148_v17 = vor.u32 %v4697_v10, %v3145_v11  ;;  %v3152_v18 = vor.u32 %v4700_v13, %v3151_v12  ;;  %v3127_v20 = vld [vmem:[%s7588_s0] sm:$0xf] }
  0x14   :  { %2382 = vmatpush.bf16.xpose.msra.mxu0 %v3208_v32  ;;  %v3156_v19 = vor.u32 %v4698_v14, %v3153_v15  ;;  %v4695_v21 = vld [vmem:[%s7588_s0 + $0xc] sm:$0xf0]  ;;  %v4693_v22 = vld [vmem:[%s7588_s0 + $0x4] sm:$0xf]  ;;  %v3129_v23 = vld [vmem:[%s7588_s0 + $0x10] sm:$0xf0] }
  0x15   :  { %2395 = vmatpush.bf16.xpose.msra.mxu1 %v3212_v33  ;;  %2408 = vmatpush.bf16.xpose.msra.mxu2 %v3216_v34  ;;  %v3135_v24 = vld [vmem:[%s7588_s0 + $0x8] sm:$0xf]  ;;  %v4696_v25 = vld [vmem:[%s7588_s0 + $0x14] sm:$0xf0]  ;;  %v4694_v26 = vld [vmem:[%s7588_s0 + $0xc] sm:$0xf]  ;;  %v3128_v31 = vor.u32 %v4695_v21, %v3127_v20 }
  0x16   :  { %2421 = vmatpush.bf16.xpose.msra.mxu3 %v3220_v35  ;;  %v3137_v27 = vld [vmem:[%s7588_s0 + $0x18] sm:$0xf0]  ;;  %v3367_v28 = vld [vmem:[%s7588_s0 + $0x1e0] sm:$0xf]  ;;  %v4755_v29 = vld [vmem:[%s7588_s0 + $0x1ec] sm:$0xf0]  ;;  %v3132_v35 = vor.u32 %v4693_v22, %v3129_v23  ;;  %v3136_v36 = vor.u32 %v4696_v25, %v3135_v24 }
  0x17   :  { %v4753_v30 = vld [vmem:[%s7588_s0 + $0x1e4] sm:$0xf]  ;;  %v3369_v32 = vld [vmem:[%s7588_s0 + $0x1f0] sm:$0xf0]  ;;  %v3375_v33 = vld [vmem:[%s7588_s0 + $0x1e8] sm:$0xf]  ;;  %v3140_v39 = vor.u32 %v4694_v26, %v3137_v27  ;;  %v3368_v40 = vor.u32 %v4755_v29, %v3367_v28 }
  0x18   :  { %v4756_v34 = vld [vmem:[%s7588_s0 + $0x1f4] sm:$0xf0]  ;;  %v4754_v37 = vld [vmem:[%s7588_s0 + $0x1ec] sm:$0xf]  ;;  %v3377_v38 = vld [vmem:[%s7588_s0 + $0x1f8] sm:$0xf0]  ;;  %v3372_v41 = vor.u32 %v4753_v30, %v3369_v32 }
  0x19   :  { %v3376_v42 = vor.u32 %v4756_v34, %v3375_v33  ;;  %v3380_v43 = vor.u32 %v4754_v37, %v3377_v38  ;;  %v3359_v48 = vld [vmem:[%s7588_s0 + $0x1c8] sm:$0xf]  ;;  %v4752_v49 = vld [vmem:[%s7588_s0 + $0x1d4] sm:$0xf0]  ;;  %v4750_v50 = vld [vmem:[%s7588_s0 + $0x1cc] sm:$0xf] }
  0x1a   :  { %v3361_v51 = vld [vmem:[%s7588_s0 + $0x1d8] sm:$0xf0]  ;;  %v3360_v54 = vor.u32 %v4752_v49, %v3359_v48  ;;  %v3343_v60 = vld [vmem:[%s7588_s0 + $0x1a8] sm:$0xf]  ;;  %v4748_v61 = vld [vmem:[%s7588_s0 + $0x1b4] sm:$0xf0] }
  0x1b   :  { %v3364_v55 = vor.u32 %v4750_v50, %v3361_v51  ;;  %v13_v62 = vld [vmem:[%s7589_s1 + $0x8] sm:$0xff]  ;;  %v3345_v0 = vld [vmem:[%s7588_s0 + $0x1b8] sm:$0xf0]  ;;  %v3319_v8 = vld [vmem:[%s7588_s0 + $0x180] sm:$0xf]  ;;  %vm3101_vm4 = vcmask 1046534  }
  0x1c   :  { %2383 = vmatpush.bf16.xpose.msra.mxu0 %v3192_v44  ;;  %v3351_v44 = vld [vmem:[%s7588_s0 + $0x1c0] sm:$0xf]  ;;  %v4746_v63 = vld [vmem:[%s7588_s0 + $0x1ac] sm:$0xf]  ;;  %v410_v1 = vunpack.c.l.b16 %v13_v62  ;;  %v4743_v9 = vld [vmem:[%s7588_s0 + $0x18c] sm:$0xf0] }
  0x1d   :  { %2396 = vmatpush.bf16.xpose.msra.mxu1 %v3196_v45  ;;  %2409 = vmatpush.bf16.xpose.msra.mxu2 %v3200_v46  ;;  %v4751_v45 = vld [vmem:[%s7588_s0 + $0x1cc] sm:$0xf0]  ;;  %v4749_v46 = vld [vmem:[%s7588_s0 + $0x1c4] sm:$0xf]  ;;  %v3321_v13 = vld [vmem:[%s7588_s0 + $0x190] sm:$0xf0]  ;;  %v3320_v20 = vor.u32 %v4743_v9, %v3319_v8 }
  0x1e   :  { %2422 = vmatpush.bf16.xpose.msra.mxu3 %v3204_v47  ;;  %v3353_v47 = vld [vmem:[%s7588_s0 + $0x1d0] sm:$0xf0]  ;;  %v3352_v52 = vor.u32 %v4751_v45, %v3351_v44  ;;  %v4741_v10 = vld [vmem:[%s7588_s0 + $0x184] sm:$0xf]  ;;  %v3327_v14 = vld [vmem:[%s7588_s0 + $0x188] sm:$0xf] }
  0x1f   :  { %v3356_v53 = vor.u32 %v4749_v46, %v3353_v47  ;;  %v12_v12 = vld [vmem:[%s7589_s1] sm:$0xff]  ;;  %v4744_v15 = vld [vmem:[%s7588_s0 + $0x194] sm:$0xf0]  ;;  %v3324_v23 = vor.u32 %v4741_v10, %v3321_v13  ;;  %v4739_v27 = vld [vmem:[%s7588_s0 + $0x16c] sm:$0xf0]  ;;  %vm3103_vm5 = vcmask 1045508  }
  0x20   :  { %v3328_v24 = vor.u32 %v4744_v15, %v3327_v14  ;;  %v3303_v26 = vld [vmem:[%s7588_s0 + $0x160] sm:$0xf]  ;;  %v4737_v28 = vld [vmem:[%s7588_s0 + $0x164] sm:$0xf]  ;;  %v3305_v29 = vld [vmem:[%s7588_s0 + $0x170] sm:$0xf0] }
  0x21   :  { %v3311_v30 = vld [vmem:[%s7588_s0 + $0x168] sm:$0xf]  ;;  %v4738_v32 = vld [vmem:[%s7588_s0 + $0x16c] sm:$0xf]  ;;  %v3313_v33 = vld [vmem:[%s7588_s0 + $0x178] sm:$0xf0]  ;;  %v3304_v34 = vor.u32 %v4739_v27, %v3303_v26 }
  0x22   :  { %v3316_v37 = vor.u32 %v4738_v32, %v3313_v33  ;;  %v3287_v38 = vld [vmem:[%s7588_s0 + $0x140] sm:$0xf]  ;;  %v4734_v44 = vld [vmem:[%s7588_s0 + $0x14c] sm:$0xf]  ;;  %v3297_v45 = vld [vmem:[%s7588_s0 + $0x158] sm:$0xf0] }
  0x23   :  { %v3300_v49 = vor.u32 %v4734_v44, %v3297_v45  ;;  %v3271_v50 = vld [vmem:[%s7588_s0 + $0x120] sm:$0xf]  ;;  %v4731_v51 = vld [vmem:[%s7588_s0 + $0x12c] sm:$0xf0]  ;;  %v4785_v9 = vld [vmem:[%s7588_s0 + $0x2e4] sm:$0xf] }
  0x24   :  { %2384 = vmatpush.bf16.xpose.msra.mxu0 %v3176_v56  ;;  %v3335_v56 = vld [vmem:[%s7588_s0 + $0x1a0] sm:$0xf]  ;;  %v4787_v8 = vld [vmem:[%s7588_s0 + $0x2ec] sm:$0xf0]  ;;  %v3503_v13 = vld [vmem:[%s7588_s0 + $0x2e8] sm:$0xf] }
  0x25   :  { %2397 = vmatpush.bf16.xpose.msra.mxu1 %v3180_v57  ;;  %2410 = vmatpush.bf16.xpose.msra.mxu2 %v3184_v58  ;;  %v4747_v57 = vld [vmem:[%s7588_s0 + $0x1ac] sm:$0xf0]  ;;  %v4745_v58 = vld [vmem:[%s7588_s0 + $0x1a4] sm:$0xf]  ;;  %v4788_v14 = vld [vmem:[%s7588_s0 + $0x2f4] sm:$0xf0] }
  0x26   :  { %2423 = vmatpush.bf16.xpose.msra.mxu3 %v3188_v59  ;;  %v3337_v59 = vld [vmem:[%s7588_s0 + $0x1b0] sm:$0xf0]  ;;  %v3336_v2 = vor.u32 %v4747_v57, %v3335_v56  ;;  %v4730_v56 = vld [vmem:[%s7588_s0 + $0x12c] sm:$0xf]  ;;  %v3281_v57 = vld [vmem:[%s7588_s0 + $0x138] sm:$0xf0] }
  0x27   :  { %v3340_v3 = vor.u32 %v4745_v58, %v3337_v59  ;;  %v3272_v58 = vor.u32 %v4731_v51, %v3271_v50  ;;  %v3479_v26 = vld [vmem:[%s7588_s0 + $0x2c0] sm:$0xf]  ;;  %v4783_v27 = vld [vmem:[%s7588_s0 + $0x2cc] sm:$0xf0]  ;;  %v4782_v32 = vld [vmem:[%s7588_s0 + $0x2cc] sm:$0xf] }
  0x28   :  { %v3489_v33 = vld [vmem:[%s7588_s0 + $0x2d8] sm:$0xf0]  ;;  %v4778_v44 = vld [vmem:[%s7588_s0 + $0x2ac] sm:$0xf]  ;;  %v3447_v50 = vld [vmem:[%s7588_s0 + $0x280] sm:$0xf] }
  0x29   :  { %v3473_v45 = vld [vmem:[%s7588_s0 + $0x2b8] sm:$0xf0]  ;;  %v4775_v51 = vld [vmem:[%s7588_s0 + $0x28c] sm:$0xf0]  ;;  %vm3105_vm6 = vcmask 1043456   ;;  %vm3109_vm7 = vcmask 1043459  }
  0x2a   :  { %vm3111_vm8 = vcmask 1042432  }
  0x2c   :  { %2385 = vmatpush.bf16.xpose.msra.mxu0 %v3160_v4  ;;  %v3344_v4 = vor.u32 %v4748_v61, %v3343_v60  ;;  %v3284_v61 = vor.u32 %v4730_v56, %v3281_v57  ;;  %v4774_v56 = vld [vmem:[%s7588_s0 + $0x28c] sm:$0xf]  ;;  %v3457_v57 = vld [vmem:[%s7588_s0 + $0x298] sm:$0xf0] }
  0x2d   :  { %2398 = vmatpush.bf16.xpose.msra.mxu1 %v3164_v5  ;;  %2411 = vmatpush.bf16.xpose.msra.mxu2 %v3168_v6  ;;  %v5393_v5 = vpack.c.b16 %v410_v1, %v410_v1  ;;  %v3348_v6 = vor.u32 %v4746_v63, %v3345_v0  ;;  %v4727_v63 = vld [vmem:[%s7588_s0 + $0x10c] sm:$0xf0]  ;;  %v4725_v0 = vld [vmem:[%s7588_s0 + $0x104] sm:$0xf]  ;;  %v3257_v1 = vld [vmem:[%s7588_s0 + $0x110] sm:$0xf0] }
  0x2e   :  { %2424 = vmatpush.bf16.xpose.msra.mxu3 %v3172_v7  ;;  %v411_v7 = vunpack.c.h.b16 %v13_v62  ;;  %v3255_v62 = vld [vmem:[%s7588_s0 + $0x100] sm:$0xf]  ;;  %v3260_v15 = vor.u32 %v4725_v0, %v3257_v1  ;;  %v4769_v0 = vld [vmem:[%s7588_s0 + $0x264] sm:$0xf]  ;;  %v3433_v1 = vld [vmem:[%s7588_s0 + $0x270] sm:$0xf0] }
  0x2f   :  { %v3256_v10 = vor.u32 %v4727_v63, %v3255_v62  ;;  %v3431_v62 = vld [vmem:[%s7588_s0 + $0x260] sm:$0xf]  ;;  %v4771_v63 = vld [vmem:[%s7588_s0 + $0x26c] sm:$0xf0] }
  0x30   :  { %v5405_v11 = vpack.c.b16 %v411_v7, %v411_v7  ;;  %v3495_v7 = vld [vmem:[%s7588_s0 + $0x2e0] sm:$0xf] }
  0x34   :  { %2386 = vmatpush.bf16.xpose.msra.mxu0 %v3144_v16  ;;  %v408_v16 = vunpack.c.l.b16 %v12_v12 }
  0x35   :  { %2399 = vmatpush.bf16.xpose.msra.mxu1 %v3148_v17  ;;  %2412 = vmatpush.bf16.xpose.msra.mxu2 %v3152_v18  ;;  %v409_v17 = vunpack.c.h.b16 %v12_v12  ;;  %v4742_v18 = vld [vmem:[%s7588_s0 + $0x18c] sm:$0xf]  ;;  %v3497_v12 = vld [vmem:[%s7588_s0 + $0x2f0] sm:$0xf0] }
  0x36   :  { %2425 = vmatpush.bf16.xpose.msra.mxu3 %v3156_v19  ;;  %v3329_v19 = vld [vmem:[%s7588_s0 + $0x198] sm:$0xf0]  ;;  %v5426_v21 = vpack.c.b16 %v408_v16, %v408_v16 }
  0x37   :  { %v5428_v22 = vpack.c.b16 %v409_v17, %v409_v17  ;;  %v3332_v25 = vor.u32 %v4742_v18, %v3329_v19  ;;  %v4786_v17 = vld [vmem:[%s7588_s0 + $0x2ec] sm:$0xf]  ;;  %v3505_v18 = vld [vmem:[%s7588_s0 + $0x2f8] sm:$0xf0] }
  0x3c   :  { %2387 = vmatpush.bf16.xpose.msra.mxu0 %v3128_v31  ;;  %v4740_v31 = vld [vmem:[%s7588_s0 + $0x174] sm:$0xf0] }
  0x3d   :  { %2400 = vmatpush.bf16.xpose.msra.mxu1 %v3132_v35  ;;  %2413 = vmatpush.bf16.xpose.msra.mxu2 %v3136_v36  ;;  %v3308_v35 = vor.u32 %v4737_v28, %v3305_v29  ;;  %v3312_v36 = vor.u32 %v4740_v31, %v3311_v30  ;;  %v4781_v28 = vld [vmem:[%s7588_s0 + $0x2c4] sm:$0xf]  ;;  %v3481_v29 = vld [vmem:[%s7588_s0 + $0x2d0] sm:$0xf0]  ;;  %v3487_v30 = vld [vmem:[%s7588_s0 + $0x2c8] sm:$0xf] }
  0x3e   :  { %2426 = vmatpush.bf16.xpose.msra.mxu3 %v3140_v39  ;;  %v4735_v39 = vld [vmem:[%s7588_s0 + $0x14c] sm:$0xf0]  ;;  %v4784_v31 = vld [vmem:[%s7588_s0 + $0x2d4] sm:$0xf0] }
  0x3f   :  { %v3288_v46 = vor.u32 %v4735_v39, %v3287_v38  ;;  %v3463_v38 = vld [vmem:[%s7588_s0 + $0x2a0] sm:$0xf]  ;;  %v4779_v39 = vld [vmem:[%s7588_s0 + $0x2ac] sm:$0xf0] }
  0x43   :  { %2388 = vmatmul.bf16.vlgmr.msra.gmra.mxu0 %v5426_v21 }
  0x44   :  { %2432 = vmatpush.bf16.xpose.msrb.mxu0 %v3368_v40  ;;  %2414 = vmatmul.bf16.vlgmr.msra.gmra.mxu2 %v5393_v5  ;;  %v4733_v40 = vld [vmem:[%s7588_s0 + $0x144] sm:$0xf] }
  0x45   :  { %2445 = vmatpush.bf16.xpose.msrb.mxu1 %v3372_v41  ;;  %2458 = vmatpush.bf16.xpose.msrb.mxu2 %v3376_v42  ;;  %v3289_v41 = vld [vmem:[%s7588_s0 + $0x150] sm:$0xf0]  ;;  %v3295_v42 = vld [vmem:[%s7588_s0 + $0x148] sm:$0xf] }
  0x46   :  { %2471 = vmatpush.bf16.xpose.msrb.mxu3 %v3380_v43  ;;  %2401 = vmatmul.bf16.vlgmr.msra.gmra.mxu1 %v5428_v22  ;;  %v4736_v43 = vld [vmem:[%s7588_s0 + $0x154] sm:$0xf0]  ;;  %v3292_v47 = vor.u32 %v4733_v40, %v3289_v41  ;;  %v4777_v40 = vld [vmem:[%s7588_s0 + $0x2a4] sm:$0xf]  ;;  %v3465_v41 = vld [vmem:[%s7588_s0 + $0x2b0] sm:$0xf0] }
  0x47   :  { %2427 = vmatmul.bf16.vlgmr.msra.gmra.mxu3 %v5405_v11  ;;  %v3296_v48 = vor.u32 %v4736_v43, %v3295_v42  ;;  %v3471_v42 = vld [vmem:[%s7588_s0 + $0x2a8] sm:$0xf]  ;;  %v4780_v43 = vld [vmem:[%s7588_s0 + $0x2b4] sm:$0xf0] }
  0x4c   :  { %2433 = vmatpush.bf16.xpose.msrb.mxu0 %v3352_v52  ;;  %v4729_v52 = vld [vmem:[%s7588_s0 + $0x124] sm:$0xf] }
  0x4d   :  { %2446 = vmatpush.bf16.xpose.msrb.mxu1 %v3356_v53  ;;  %2459 = vmatpush.bf16.xpose.msrb.mxu2 %v3360_v54  ;;  %v3273_v53 = vld [vmem:[%s7588_s0 + $0x130] sm:$0xf0]  ;;  %v3279_v54 = vld [vmem:[%s7588_s0 + $0x128] sm:$0xf] }
  0x4e   :  { %2472 = vmatpush.bf16.xpose.msrb.mxu3 %v3364_v55  ;;  %v4732_v55 = vld [vmem:[%s7588_s0 + $0x134] sm:$0xf0]  ;;  %v3276_v59 = vor.u32 %v4729_v52, %v3273_v53  ;;  %v4773_v52 = vld [vmem:[%s7588_s0 + $0x284] sm:$0xf]  ;;  %v3449_v53 = vld [vmem:[%s7588_s0 + $0x290] sm:$0xf0] }
  0x4f   :  { %v3280_v60 = vor.u32 %v4732_v55, %v3279_v54  ;;  %v3455_v54 = vld [vmem:[%s7588_s0 + $0x288] sm:$0xf]  ;;  %v4776_v55 = vld [vmem:[%s7588_s0 + $0x294] sm:$0xf0] }
  0x54   :  { %2434 = vmatpush.bf16.xpose.msrb.mxu0 %v3336_v2  ;;  %v3263_v2 = vld [vmem:[%s7588_s0 + $0x108] sm:$0xf] }
  0x55   :  { %2447 = vmatpush.bf16.xpose.msrb.mxu1 %v3340_v3  ;;  %2460 = vmatpush.bf16.xpose.msrb.mxu2 %v3344_v4  ;;  %v4728_v3 = vld [vmem:[%s7588_s0 + $0x114] sm:$0xf0]  ;;  %v4726_v4 = vld [vmem:[%s7588_s0 + $0x10c] sm:$0xf] }
  0x56   :  { %2473 = vmatpush.bf16.xpose.msrb.mxu3 %v3348_v6  ;;  %v3265_v6 = vld [vmem:[%s7588_s0 + $0x118] sm:$0xf0]  ;;  %v3264_v16 = vor.u32 %v4728_v3, %v3263_v2  ;;  %v3439_v2 = vld [vmem:[%s7588_s0 + $0x268] sm:$0xf]  ;;  %v4772_v3 = vld [vmem:[%s7588_s0 + $0x274] sm:$0xf0] }
  0x57   :  { %v3268_v19 = vor.u32 %v4726_v4, %v3265_v6  ;;  %v4770_v4 = vld [vmem:[%s7588_s0 + $0x26c] sm:$0xf]  ;;  %v3441_v6 = vld [vmem:[%s7588_s0 + $0x278] sm:$0xf0] }
  0x5c   :  { %2435 = vmatpush.bf16.xpose.msrb.mxu0 %v3320_v20  ;;  %v3496_v20 = vor.u32 %v4787_v8, %v3495_v7  ;;  %v3432_v7 = vor.u32 %v4771_v63, %v3431_v62  ;;  %v3436_v8 = vor.u32 %v4769_v0, %v3433_v1  ;;  %v3607_v62 = vld [vmem:[%s7588_s0 + $0x3c0] sm:$0xf]  ;;  %v4815_v63 = vld [vmem:[%s7588_s0 + $0x3cc] sm:$0xf0]  ;;  %v4813_v0 = vld [vmem:[%s7588_s0 + $0x3c4] sm:$0xf] }
  0x5d   :  { %2448 = vmatpush.bf16.xpose.msrb.mxu1 %v3324_v23  ;;  %2461 = vmatpush.bf16.xpose.msrb.mxu2 %v3328_v24  ;;  %v3500_v23 = vor.u32 %v4785_v9, %v3497_v12  ;;  %v3504_v24 = vor.u32 %v4788_v14, %v3503_v13  ;;  %v3440_v9 = vor.u32 %v4772_v3, %v3439_v2  ;;  %v3415_v12 = vld [vmem:[%s7588_s0 + $0x240] sm:$0xf]  ;;  %v4767_v13 = vld [vmem:[%s7588_s0 + $0x24c] sm:$0xf0]  ;;  %v4765_v14 = vld [vmem:[%s7588_s0 + $0x244] sm:$0xf] }
  0x5e   :  { %2474 = vmatpush.bf16.xpose.msrb.mxu3 %v3332_v25  ;;  %v3508_v25 = vor.u32 %v4786_v17, %v3505_v18  ;;  %v4768_v17 = vld [vmem:[%s7588_s0 + $0x254] sm:$0xf0]  ;;  %v4766_v18 = vld [vmem:[%s7588_s0 + $0x24c] sm:$0xf]  ;;  %v3609_v1 = vld [vmem:[%s7588_s0 + $0x3d0] sm:$0xf0] }
  0x5f   :  { %v3615_v2 = vld [vmem:[%s7588_s0 + $0x3c8] sm:$0xf]  ;;  %v4816_v3 = vld [vmem:[%s7588_s0 + $0x3d4] sm:$0xf0] }
  0x64   :  { %2436 = vmatpush.bf16.xpose.msrb.mxu0 %v3304_v34  ;;  %v3480_v34 = vor.u32 %v4783_v27, %v3479_v26  ;;  %v3399_v26 = vld [vmem:[%s7588_s0 + $0x220] sm:$0xf]  ;;  %v4763_v27 = vld [vmem:[%s7588_s0 + $0x22c] sm:$0xf0] }
  0x65   :  { %2449 = vmatpush.bf16.xpose.msrb.mxu1 %v3308_v35  ;;  %2462 = vmatpush.bf16.xpose.msrb.mxu2 %v3312_v36  ;;  %v3484_v35 = vor.u32 %v4781_v28, %v3481_v29  ;;  %v3488_v36 = vor.u32 %v4784_v31, %v3487_v30  ;;  %v4761_v28 = vld [vmem:[%s7588_s0 + $0x224] sm:$0xf]  ;;  %v3401_v29 = vld [vmem:[%s7588_s0 + $0x230] sm:$0xf0]  ;;  %v3407_v30 = vld [vmem:[%s7588_s0 + $0x228] sm:$0xf] }
  0x66   :  { %2475 = vmatpush.bf16.xpose.msrb.mxu3 %v3316_v37  ;;  %v3492_v37 = vor.u32 %v4782_v32, %v3489_v33  ;;  %v4764_v31 = vld [vmem:[%s7588_s0 + $0x234] sm:$0xf0]  ;;  %v4762_v32 = vld [vmem:[%s7588_s0 + $0x22c] sm:$0xf]  ;;  %v3409_v33 = vld [vmem:[%s7588_s0 + $0x238] sm:$0xf0] }
  0x6c   :  { %2437 = vmatpush.bf16.xpose.msrb.mxu0 %v3288_v46  ;;  %v3464_v46 = vor.u32 %v4779_v39, %v3463_v38  ;;  %v3383_v38 = vld [vmem:[%s7588_s0 + $0x200] sm:$0xf]  ;;  %v4759_v39 = vld [vmem:[%s7588_s0 + $0x20c] sm:$0xf0] }
  0x6d   :  { %2450 = vmatpush.bf16.xpose.msrb.mxu1 %v3292_v47  ;;  %2463 = vmatpush.bf16.xpose.msrb.mxu2 %v3296_v48  ;;  %v3468_v47 = vor.u32 %v4777_v40, %v3465_v41  ;;  %v3472_v48 = vor.u32 %v4780_v43, %v3471_v42  ;;  %v4757_v40 = vld [vmem:[%s7588_s0 + $0x204] sm:$0xf]  ;;  %v3385_v41 = vld [vmem:[%s7588_s0 + $0x210] sm:$0xf0]  ;;  %v3391_v42 = vld [vmem:[%s7588_s0 + $0x208] sm:$0xf] }
  0x6e   :  { %2476 = vmatpush.bf16.xpose.msrb.mxu3 %v3300_v49  ;;  %v3476_v49 = vor.u32 %v4778_v44, %v3473_v45  ;;  %v4760_v43 = vld [vmem:[%s7588_s0 + $0x214] sm:$0xf0]  ;;  %v4758_v44 = vld [vmem:[%s7588_s0 + $0x20c] sm:$0xf]  ;;  %v3393_v45 = vld [vmem:[%s7588_s0 + $0x218] sm:$0xf0] }
  0x74   :  { %2438 = vmatpush.bf16.xpose.msrb.mxu0 %v3272_v58  ;;  %v3448_v58 = vor.u32 %v4775_v51, %v3447_v50  ;;  %v3625_v50 = vld [vmem:[%s7588_s0 + $0x3f0] sm:$0xf0]  ;;  %v3631_v51 = vld [vmem:[%s7588_s0 + $0x3e8] sm:$0xf] }
  0x75   :  { %2451 = vmatpush.bf16.xpose.msrb.mxu1 %v3276_v59  ;;  %2464 = vmatpush.bf16.xpose.msrb.mxu2 %v3280_v60  ;;  %v3452_v59 = vor.u32 %v4773_v52, %v3449_v53  ;;  %v3456_v60 = vor.u32 %v4776_v55, %v3455_v54  ;;  %v4820_v52 = vld [vmem:[%s7588_s0 + $0x3f4] sm:$0xf0]  ;;  %v3388_v53 = vor.u32 %v4757_v40, %v3385_v41  ;;  %v4818_v55 = vld [vmem:[%s7588_s0 + $0x3ec] sm:$0xf]  ;;  %v4801_v40 = vld [vmem:[%s7588_s0 + $0x364] sm:$0xf] }
  0x76   :  { %2477 = vmatpush.bf16.xpose.msrb.mxu3 %v3284_v61  ;;  %v3460_v61 = vor.u32 %v4774_v56, %v3457_v57  ;;  %v3392_v54 = vor.u32 %v4760_v43, %v3391_v42  ;;  %v3633_v56 = vld [vmem:[%s7588_s0 + $0x3f8] sm:$0xf0]  ;;  %v3396_v57 = vor.u32 %v4758_v44, %v3393_v45  ;;  %v3561_v41 = vld [vmem:[%s7588_s0 + $0x370] sm:$0xf0]  ;;  %v3567_v42 = vld [vmem:[%s7588_s0 + $0x368] sm:$0xf] }
  0x77   :  { %v4804_v43 = vld [vmem:[%s7588_s0 + $0x374] sm:$0xf0]  ;;  %v4802_v44 = vld [vmem:[%s7588_s0 + $0x36c] sm:$0xf]  ;;  %v3569_v45 = vld [vmem:[%s7588_s0 + $0x378] sm:$0xf0] }
  0x7c   :  { %2439 = vmatpush.bf16.xpose.msrb.mxu0 %v3256_v10  ;;  %v3444_v10 = vor.u32 %v4770_v4, %v3441_v6  ;;  %v4814_v4 = vld [vmem:[%s7588_s0 + $0x3cc] sm:$0xf]  ;;  %v3617_v6 = vld [vmem:[%s7588_s0 + $0x3d8] sm:$0xf0] }
  0x7d   :  { %2452 = vmatpush.bf16.xpose.msrb.mxu1 %v3260_v15  ;;  %2465 = vmatpush.bf16.xpose.msrb.mxu2 %v3264_v16  ;;  %v3417_v15 = vld [vmem:[%s7588_s0 + $0x250] sm:$0xf0]  ;;  %v3423_v16 = vld [vmem:[%s7588_s0 + $0x248] sm:$0xf] }
  0x7e   :  { %2478 = vmatpush.bf16.xpose.msrb.mxu3 %v3268_v19  ;;  %v3425_v19 = vld [vmem:[%s7588_s0 + $0x258] sm:$0xf0] }
  0x83   :  { %2440 = vmatmul.bf16.vlgmr.msrb.gmra.mxu0 %v5426_v21 }
  0x84   :  { %2484 = vmatpush.bf16.xpose.msra.mxu0 %v3496_v20  ;;  %2466 = vmatmul.bf16.vlgmr.msrb.gmra.mxu2 %v5393_v5  ;;  %v3416_v20 = vor.u32 %v4767_v13, %v3415_v12  ;;  %v3591_v12 = vld [vmem:[%s7588_s0 + $0x3a0] sm:$0xf]  ;;  %v4811_v13 = vld [vmem:[%s7588_s0 + $0x3ac] sm:$0xf0] }
  0x85   :  { %2497 = vmatpush.bf16.xpose.msra.mxu1 %v3500_v23  ;;  %2510 = vmatpush.bf16.xpose.msra.mxu2 %v3504_v24  ;;  %v3420_v23 = vor.u32 %v4765_v14, %v3417_v15  ;;  %v3424_v24 = vor.u32 %v4768_v17, %v3423_v16  ;;  %v4809_v14 = vld [vmem:[%s7588_s0 + $0x3a4] sm:$0xf]  ;;  %v3593_v15 = vld [vmem:[%s7588_s0 + $0x3b0] sm:$0xf0]  ;;  %v3599_v16 = vld [vmem:[%s7588_s0 + $0x3a8] sm:$0xf] }
  0x86   :  { %2523 = vmatpush.bf16.xpose.msra.mxu3 %v3508_v25  ;;  %2453 = vmatmul.bf16.vlgmr.msrb.gmra.mxu1 %v5428_v22  ;;  %v3428_v25 = vor.u32 %v4766_v18, %v3425_v19  ;;  %v4812_v17 = vld [vmem:[%s7588_s0 + $0x3b4] sm:$0xf0]  ;;  %v4810_v18 = vld [vmem:[%s7588_s0 + $0x3ac] sm:$0xf]  ;;  %v3601_v19 = vld [vmem:[%s7588_s0 + $0x3b8] sm:$0xf0] }
  0x87   :  { %2479 = vmatmul.bf16.vlgmr.msrb.gmra.mxu3 %v5405_v11 }
  0x8c   :  { %2485 = vmatpush.bf16.xpose.msra.mxu0 %v3480_v34  ;;  %v3400_v34 = vor.u32 %v4763_v27, %v3399_v26  ;;  %v3575_v26 = vld [vmem:[%s7588_s0 + $0x380] sm:$0xf]  ;;  %v4807_v27 = vld [vmem:[%s7588_s0 + $0x38c] sm:$0xf0] }
  0x8d   :  { %2498 = vmatpush.bf16.xpose.msra.mxu1 %v3484_v35  ;;  %2511 = vmatpush.bf16.xpose.msra.mxu2 %v3488_v36  ;;  %v3404_v35 = vor.u32 %v4761_v28, %v3401_v29  ;;  %v3408_v36 = vor.u32 %v4764_v31, %v3407_v30  ;;  %v4805_v28 = vld [vmem:[%s7588_s0 + $0x384] sm:$0xf]  ;;  %v3577_v29 = vld [vmem:[%s7588_s0 + $0x390] sm:$0xf0]  ;;  %v3583_v30 = vld [vmem:[%s7588_s0 + $0x388] sm:$0xf] }
  0x8e   :  { %2524 = vmatpush.bf16.xpose.msra.mxu3 %v3492_v37  ;;  %v3412_v37 = vor.u32 %v4762_v32, %v3409_v33  ;;  %v4808_v31 = vld [vmem:[%s7588_s0 + $0x394] sm:$0xf0]  ;;  %v4806_v32 = vld [vmem:[%s7588_s0 + $0x38c] sm:$0xf]  ;;  %v3585_v33 = vld [vmem:[%s7588_s0 + $0x398] sm:$0xf0] }
  0x94   :  { %2486 = vmatpush.bf16.xpose.msra.mxu0 %v3464_v46  ;;  %v3623_v46 = vld [vmem:[%s7588_s0 + $0x3e0] sm:$0xf] }
  0x95   :  { %2499 = vmatpush.bf16.xpose.msra.mxu1 %v3468_v47  ;;  %2512 = vmatpush.bf16.xpose.msra.mxu2 %v3472_v48  ;;  %v4819_v47 = vld [vmem:[%s7588_s0 + $0x3ec] sm:$0xf0]  ;;  %v4817_v48 = vld [vmem:[%s7588_s0 + $0x3e4] sm:$0xf] }
  0x96   :  { %2525 = vmatpush.bf16.xpose.msra.mxu3 %v3476_v49  ;;  %v3384_v49 = vor.u32 %v4759_v39, %v3383_v38  ;;  %v3559_v38 = vld [vmem:[%s7588_s0 + $0x360] sm:$0xf]  ;;  %v4803_v39 = vld [vmem:[%s7588_s0 + $0x36c] sm:$0xf0] }
  0x9c   :  { %2487 = vmatpush.bf16.xpose.msra.mxu0 %v3448_v58  ;;  %v3624_v58 = vor.u32 %v4819_v47, %v3623_v46  ;;  %v3560_v46 = vor.u32 %v4803_v39, %v3559_v38  ;;  %v3564_v47 = vor.u32 %v4801_v40, %v3561_v41  ;;  %v3759_v38 = vld [vmem:[%s7588_s0 + $0x4e8] sm:$0xf]  ;;  %v4852_v39 = vld [vmem:[%s7588_s0 + $0x4f4] sm:$0xf0] }
  0x9d   :  { %2500 = vmatpush.bf16.xpose.msra.mxu1 %v3452_v59  ;;  %2513 = vmatpush.bf16.xpose.msra.mxu2 %v3456_v60  ;;  %v3628_v59 = vor.u32 %v4817_v48, %v3625_v50  ;;  %v3632_v60 = vor.u32 %v4820_v52, %v3631_v51  ;;  %v3568_v48 = vor.u32 %v4804_v43, %v3567_v42  ;;  %v4850_v42 = vld [vmem:[%s7588_s0 + $0x4ec] sm:$0xf]  ;;  %v3761_v43 = vld [vmem:[%s7588_s0 + $0x4f8] sm:$0xf0] }
  0x9e   :  { %2526 = vmatpush.bf16.xpose.msra.mxu3 %v3460_v61  ;;  %v3636_v61 = vor.u32 %v4818_v55, %v3633_v56  ;;  %v4799_v55 = vld [vmem:[%s7588_s0 + $0x34c] sm:$0xf0]  ;;  %v4797_v56 = vld [vmem:[%s7588_s0 + $0x344] sm:$0xf] }
  0xa4   :  { %2488 = vmatpush.bf16.xpose.msra.mxu0 %v3432_v7  ;;  %v3608_v7 = vor.u32 %v4815_v63, %v3607_v62  ;;  %v3553_v62 = vld [vmem:[%s7588_s0 + $0x358] sm:$0xf0] }
  0xa5   :  { %2501 = vmatpush.bf16.xpose.msra.mxu1 %v3436_v8  ;;  %2514 = vmatpush.bf16.xpose.msra.mxu2 %v3440_v9  ;;  %v3612_v8 = vor.u32 %v4813_v0, %v3609_v1  ;;  %v3616_v9 = vor.u32 %v4816_v3, %v3615_v2 }
  0xa6   :  { %2527 = vmatpush.bf16.xpose.msra.mxu3 %v3444_v10  ;;  %v3620_v10 = vor.u32 %v4814_v4, %v3617_v6 }
  0xac   :  { %2489 = vmatpush.bf16.xpose.msra.mxu0 %v3416_v20  ;;  %v3592_v20 = vor.u32 %v4811_v13, %v3591_v12  ;;  %v4793_v12 = vld [vmem:[%s7588_s0 + $0x324] sm:$0xf]  ;;  %v3529_v13 = vld [vmem:[%s7588_s0 + $0x330] sm:$0xf0] }
  0xad   :  { %2502 = vmatpush.bf16.xpose.msra.mxu1 %v3420_v23  ;;  %2515 = vmatpush.bf16.xpose.msra.mxu2 %v3424_v24  ;;  %v3596_v23 = vor.u32 %v4809_v14, %v3593_v15  ;;  %v3600_v24 = vor.u32 %v4812_v17, %v3599_v16  ;;  %v3535_v14 = vld [vmem:[%s7588_s0 + $0x328] sm:$0xf]  ;;  %v4796_v15 = vld [vmem:[%s7588_s0 + $0x334] sm:$0xf0]  ;;  %v4794_v16 = vld [vmem:[%s7588_s0 + $0x32c] sm:$0xf] }
  0xae   :  { %2528 = vmatpush.bf16.xpose.msra.mxu3 %v3428_v25  ;;  %v3604_v25 = vor.u32 %v4810_v18, %v3601_v19  ;;  %v3537_v17 = vld [vmem:[%s7588_s0 + $0x338] sm:$0xf0] }
  0xb4   :  { %2490 = vmatpush.bf16.xpose.msra.mxu0 %v3400_v34  ;;  %v3576_v34 = vor.u32 %v4807_v27, %v3575_v26  ;;  %v4791_v26 = vld [vmem:[%s7588_s0 + $0x30c] sm:$0xf0]  ;;  %v4789_v27 = vld [vmem:[%s7588_s0 + $0x304] sm:$0xf] }
  0xb5   :  { %2503 = vmatpush.bf16.xpose.msra.mxu1 %v3404_v35  ;;  %2516 = vmatpush.bf16.xpose.msra.mxu2 %v3408_v36  ;;  %v3580_v35 = vor.u32 %v4805_v28, %v3577_v29  ;;  %v3584_v36 = vor.u32 %v4808_v31, %v3583_v30  ;;  %v3513_v28 = vld [vmem:[%s7588_s0 + $0x310] sm:$0xf0]  ;;  %v3519_v29 = vld [vmem:[%s7588_s0 + $0x308] sm:$0xf]  ;;  %v4792_v30 = vld [vmem:[%s7588_s0 + $0x314] sm:$0xf0] }
  0xb6   :  { %2529 = vmatpush.bf16.xpose.msra.mxu3 %v3412_v37  ;;  %v3588_v37 = vor.u32 %v4806_v32, %v3585_v33  ;;  %v4790_v31 = vld [vmem:[%s7588_s0 + $0x30c] sm:$0xf]  ;;  %v3521_v32 = vld [vmem:[%s7588_s0 + $0x318] sm:$0xf0]  ;;  %v3751_v33 = vld [vmem:[%s7588_s0 + $0x4e0] sm:$0xf]  ;;  %v3516_v40 = vor.u32 %v4789_v27, %v3513_v28  ;;  %v3520_v41 = vor.u32 %v4792_v30, %v3519_v29 }
  0xbc   :  { %2491 = vmatpush.bf16.xpose.msra.mxu0 %v3384_v49  ;;  %v3572_v49 = vor.u32 %v4802_v44, %v3569_v45  ;;  %v3524_v44 = vor.u32 %v4790_v31, %v3521_v32 }
  0xbd   :  { %2504 = vmatpush.bf16.xpose.msra.mxu1 %v3388_v53  ;;  %2517 = vmatpush.bf16.xpose.msra.mxu2 %v3392_v54  ;;  %v3543_v54 = vld [vmem:[%s7588_s0 + $0x340] sm:$0xf] }
  0xbe   :  { %2530 = vmatpush.bf16.xpose.msra.mxu3 %v3396_v57  ;;  %v3545_v57 = vld [vmem:[%s7588_s0 + $0x350] sm:$0xf0]  ;;  %v3544_v63 = vor.u32 %v4799_v55, %v3543_v54  ;;  %v4848_v54 = vld [vmem:[%s7588_s0 + $0x4d4] sm:$0xf0]  ;;  %v4846_v55 = vld [vmem:[%s7588_s0 + $0x4cc] sm:$0xf] }
  0xbf   :  { %v3548_v1 = vor.u32 %v4797_v56, %v3545_v57  ;;  %v3745_v56 = vld [vmem:[%s7588_s0 + $0x4d8] sm:$0xf0] }
  0xc0   :  { %v2389_v50 = vpop.f32.mrf.mxu0 }
  0xc3   :  { %2492 = vmatmul.bf16.vlgmr.msra.gmra.mxu0 %v5426_v21  ;;  %v2402_v51 = vpop.f32.mrf.mxu1 }
  0xc4   :  { %2536 = vmatpush.bf16.xpose.msrb.mxu0 %v3624_v58  ;;  %2518 = vmatmul.bf16.vlgmr.msra.gmra.mxu2 %v5393_v5  ;;  %v2403_v52 = vadd.f32 %v2402_v51, %v2389_v50  ;;  %v3551_v58 = vld [vmem:[%s7588_s0 + $0x348] sm:$0xf]  ;;  %v4847_v50 = vld [vmem:[%s7588_s0 + $0x4cc] sm:$0xf0]  ;;  %v4845_v51 = vld [vmem:[%s7588_s0 + $0x4c4] sm:$0xf] }
  0xc5   :  { %2549 = vmatpush.bf16.xpose.msrb.mxu1 %v3628_v59  ;;  %2562 = vmatpush.bf16.xpose.msrb.mxu2 %v3632_v60  ;;  %v4800_v59 = vld [vmem:[%s7588_s0 + $0x354] sm:$0xf0] }
  0xc6   :  { %2575 = vmatpush.bf16.xpose.msrb.mxu3 %v3636_v61  ;;  %2505 = vmatmul.bf16.vlgmr.msra.gmra.mxu1 %v5428_v22  ;;  %v4798_v61 = vld [vmem:[%s7588_s0 + $0x34c] sm:$0xf]  ;;  %v3552_v2 = vor.u32 %v4800_v59, %v3551_v58 }
  0xc7   :  { %2531 = vmatmul.bf16.vlgmr.msra.gmra.mxu3 %v5405_v11  ;;  %v2415_v53 = vpop.f32.mrf.mxu2  ;;  %v3556_v4 = vor.u32 %v4798_v61, %v3553_v62  ;;  %v3719_v61 = vld [vmem:[%s7588_s0 + $0x4a0] sm:$0xf]  ;;  %v4843_v62 = vld [vmem:[%s7588_s0 + $0x4ac] sm:$0xf0] }
  0xc8   :  { %v2416_v60 = vadd.f32 %v2415_v53, %v2403_v52  ;;  %v2391_v6 = vpop.f32.mrf.mxu0  ;;  %v3737_v52 = vld [vmem:[%s7588_s0 + $0x4d0] sm:$0xf0]  ;;  %v3743_v53 = vld [vmem:[%s7588_s0 + $0x4c8] sm:$0xf] }
  0xc9   :  { %v3740_v58 = vor.u32 %v4845_v51, %v3737_v52  ;;  %v3744_v59 = vor.u32 %v4848_v54, %v3743_v53  ;;  %v3729_v6 = vld [vmem:[%s7588_s0 + $0x4b8] sm:$0xf0]  ;;  %v4829_v52 = vld [vmem:[%s7588_s0 + $0x444] sm:$0xf]  ;;  %v3673_v54 = vld [vmem:[%s7588_s0 + $0x450] sm:$0xf0] }
  0xca   :  { %v2428_v0 = vpop.f32.mrf.mxu3 }
  0xcb   :  { %v5872_v3 = vadd.f32 %v2428_v0, %v2416_v60  ;;  %v3748_v60 = vor.u32 %v4846_v55, %v3745_v56  ;;  %v3721_v0 = vld [vmem:[%s7588_s0 + $0x4b0] sm:$0xf0]  ;;  %v3679_v55 = vld [vmem:[%s7588_s0 + $0x448] sm:$0xf]  ;;  %v4832_v56 = vld [vmem:[%s7588_s0 + $0x454] sm:$0xf0] }
  0xcc   :  { %2537 = vmatpush.bf16.xpose.msrb.mxu0 %v3608_v7  ;;  %v2404_v7 = vpop.f32.mrf.mxu1 }
  0xcd   :  { %2550 = vmatpush.bf16.xpose.msrb.mxu1 %v3612_v8  ;;  %2563 = vmatpush.bf16.xpose.msrb.mxu2 %v3616_v9  ;;  %v3527_v9 = vld [vmem:[%s7588_s0 + $0x320] sm:$0xf]  ;;  %v3720_v7 = vor.u32 %v4843_v62, %v3719_v61  ;;  %v3676_v61 = vor.u32 %v4829_v52, %v3673_v54  ;;  %v3680_v62 = vor.u32 %v4832_v56, %v3679_v55  ;;  %v4873_v54 = vld [vmem:[%s7588_s0 + $0x5a4] sm:$0xf]  ;;  %v3849_v55 = vld [vmem:[%s7588_s0 + $0x5b0] sm:$0xf0] }
  0xce   :  { %2576 = vmatpush.bf16.xpose.msrb.mxu3 %v3620_v10  ;;  %v4795_v10 = vld [vmem:[%s7588_s0 + $0x32c] sm:$0xf0]  ;;  %v3847_v52 = vld [vmem:[%s7588_s0 + $0x5a0] sm:$0xf]  ;;  %v3855_v56 = vld [vmem:[%s7588_s0 + $0x5a8] sm:$0xf] }
  0xcf   :  { %v2417_v8 = vpop.f32.mrf.mxu2  ;;  %v3528_v18 = vor.u32 %v4795_v10, %v3527_v9 }
  0xd2   :  { %v2430_v19 = vpop.f32.mrf.mxu3 }
  0xd3   :  { %v3711_v19 = vld [vmem:[%s7588_s0 + $0x488] sm:$0xf] }
  0xd4   :  { %2538 = vmatpush.bf16.xpose.msrb.mxu0 %v3592_v20  ;;  %v3532_v20 = vor.u32 %v4793_v12, %v3529_v13 }
  0xd5   :  { %2551 = vmatpush.bf16.xpose.msrb.mxu1 %v3596_v23  ;;  %2564 = vmatpush.bf16.xpose.msrb.mxu2 %v3600_v24  ;;  %v3536_v23 = vor.u32 %v4796_v15, %v3535_v14  ;;  %v3540_v24 = vor.u32 %v4794_v16, %v3537_v17  ;;  %v3703_v15 = vld [vmem:[%s7588_s0 + $0x480] sm:$0xf]  ;;  %v4839_v16 = vld [vmem:[%s7588_s0 + $0x48c] sm:$0xf0]  ;;  %v4837_v17 = vld [vmem:[%s7588_s0 + $0x484] sm:$0xf] }
  0xd6   :  { %2577 = vmatpush.bf16.xpose.msrb.mxu3 %v3604_v25  ;;  %v3511_v25 = vld [vmem:[%s7588_s0 + $0x300] sm:$0xf] }
  0xdc   :  { %2539 = vmatpush.bf16.xpose.msrb.mxu0 %v3576_v34  ;;  %v4851_v34 = vld [vmem:[%s7588_s0 + $0x4ec] sm:$0xf0] }
  0xdd   :  { %2552 = vmatpush.bf16.xpose.msrb.mxu1 %v3580_v35  ;;  %2565 = vmatpush.bf16.xpose.msrb.mxu2 %v3584_v36  ;;  %v4849_v35 = vld [vmem:[%s7588_s0 + $0x4e4] sm:$0xf]  ;;  %v3512_v36 = vor.u32 %v4791_v26, %v3511_v25  ;;  %v3752_v45 = vor.u32 %v4851_v34, %v3751_v33  ;;  %v3704_v25 = vor.u32 %v4839_v16, %v3703_v15  ;;  %v3639_v15 = vld [vmem:[%s7588_s0 + $0x400] sm:$0xf]  ;;  %v4823_v16 = vld [vmem:[%s7588_s0 + $0x40c] sm:$0xf0] }
  0xde   :  { %2578 = vmatpush.bf16.xpose.msrb.mxu3 %v3588_v37  ;;  %v3753_v37 = vld [vmem:[%s7588_s0 + $0x4f0] sm:$0xf0] }
  0xe4   :  { %2540 = vmatpush.bf16.xpose.msrb.mxu0 %v3560_v46  ;;  %v3756_v46 = vor.u32 %v4849_v35, %v3753_v37  ;;  %v3687_v35 = vld [vmem:[%s7588_s0 + $0x460] sm:$0xf]  ;;  %v4833_v37 = vld [vmem:[%s7588_s0 + $0x464] sm:$0xf] }
  0xe5   :  { %2553 = vmatpush.bf16.xpose.msrb.mxu1 %v3564_v47  ;;  %2566 = vmatpush.bf16.xpose.msrb.mxu2 %v3568_v48  ;;  %v3760_v47 = vor.u32 %v4852_v39, %v3759_v38  ;;  %v3764_v48 = vor.u32 %v4850_v42, %v3761_v43  ;;  %v3689_v38 = vld [vmem:[%s7588_s0 + $0x470] sm:$0xf0]  ;;  %v3695_v39 = vld [vmem:[%s7588_s0 + $0x468] sm:$0xf]  ;;  %v3697_v42 = vld [vmem:[%s7588_s0 + $0x478] sm:$0xf0] }
  0xe6   :  { %2579 = vmatpush.bf16.xpose.msrb.mxu3 %v3572_v49  ;;  %v3735_v49 = vld [vmem:[%s7588_s0 + $0x4c0] sm:$0xf] }
  0xe7   :  { %v3736_v57 = vor.u32 %v4847_v50, %v3735_v49  ;;  %v3671_v50 = vld [vmem:[%s7588_s0 + $0x440] sm:$0xf] }
  0xec   :  { %2541 = vmatpush.bf16.xpose.msrb.mxu0 %v3544_v63  ;;  %v4841_v63 = vld [vmem:[%s7588_s0 + $0x4a4] sm:$0xf] }
  0xed   :  { %2554 = vmatpush.bf16.xpose.msrb.mxu1 %v3548_v1  ;;  %2567 = vmatpush.bf16.xpose.msrb.mxu2 %v3552_v2  ;;  %v3727_v1 = vld [vmem:[%s7588_s0 + $0x4a8] sm:$0xf]  ;;  %v4844_v2 = vld [vmem:[%s7588_s0 + $0x4b4] sm:$0xf0]  ;;  %v3724_v8 = vor.u32 %v4841_v63, %v3721_v0  ;;  %v3655_v0 = vld [vmem:[%s7588_s0 + $0x420] sm:$0xf] }
  0xee   :  { %2580 = vmatpush.bf16.xpose.msrb.mxu3 %v3556_v4  ;;  %v4842_v4 = vld [vmem:[%s7588_s0 + $0x4ac] sm:$0xf]  ;;  %v3728_v9 = vor.u32 %v4844_v2, %v3727_v1  ;;  %v4827_v1 = vld [vmem:[%s7588_s0 + $0x42c] sm:$0xf0]  ;;  %v4825_v2 = vld [vmem:[%s7588_s0 + $0x424] sm:$0xf] }
  0xef   :  { %v3732_v10 = vor.u32 %v4842_v4, %v3729_v6  ;;  %v3657_v4 = vld [vmem:[%s7588_s0 + $0x430] sm:$0xf0]  ;;  %v3663_v6 = vld [vmem:[%s7588_s0 + $0x428] sm:$0xf] }
  0xf4   :  { %2542 = vmatpush.bf16.xpose.msrb.mxu0 %v3528_v18  ;;  %v3705_v18 = vld [vmem:[%s7588_s0 + $0x490] sm:$0xf0] }
  0xf5   :  { %2555 = vmatpush.bf16.xpose.msrb.mxu1 %v3532_v20  ;;  %2568 = vmatpush.bf16.xpose.msrb.mxu2 %v3536_v23  ;;  %v4840_v20 = vld [vmem:[%s7588_s0 + $0x494] sm:$0xf0]  ;;  %v4838_v23 = vld [vmem:[%s7588_s0 + $0x48c] sm:$0xf]  ;;  %v3708_v27 = vor.u32 %v4837_v17, %v3705_v18  ;;  %v4821_v17 = vld [vmem:[%s7588_s0 + $0x404] sm:$0xf] }
  0xf6   :  { %2581 = vmatpush.bf16.xpose.msrb.mxu3 %v3540_v24  ;;  %v3713_v24 = vld [vmem:[%s7588_s0 + $0x498] sm:$0xf0]  ;;  %v3712_v28 = vor.u32 %v4840_v20, %v3711_v19  ;;  %v3641_v18 = vld [vmem:[%s7588_s0 + $0x410] sm:$0xf0]  ;;  %v3647_v19 = vld [vmem:[%s7588_s0 + $0x408] sm:$0xf] }
  0xf7   :  { %v3716_v30 = vor.u32 %v4838_v23, %v3713_v24  ;;  %v4824_v20 = vld [vmem:[%s7588_s0 + $0x414] sm:$0xf0]  ;;  %v4822_v23 = vld [vmem:[%s7588_s0 + $0x40c] sm:$0xf]  ;;  %v3649_v24 = vld [vmem:[%s7588_s0 + $0x418] sm:$0xf0] }
  0xfc   :  { %2543 = vmatpush.bf16.xpose.msrb.mxu0 %v3512_v36  ;;  %v4835_v36 = vld [vmem:[%s7588_s0 + $0x46c] sm:$0xf0] }
  0xfd   :  { %2556 = vmatpush.bf16.xpose.msrb.mxu1 %v3516_v40  ;;  %2569 = vmatpush.bf16.xpose.msrb.mxu2 %v3520_v41  ;;  %v4836_v40 = vld [vmem:[%s7588_s0 + $0x474] sm:$0xf0]  ;;  %v4834_v41 = vld [vmem:[%s7588_s0 + $0x46c] sm:$0xf]  ;;  %v3688_v43 = vor.u32 %v4835_v36, %v3687_v35  ;;  %v3889_v35 = vld [vmem:[%s7588_s0 + $0x5f8] sm:$0xf0]  ;;  %v3652_v36 = vor.u32 %v4822_v23, %v3649_v24 }
  0xfe   :  { %2582 = vmatpush.bf16.xpose.msrb.mxu3 %v3524_v44  ;;  %v3692_v44 = vor.u32 %v4833_v37, %v3689_v38  ;;  %v4868_v23 = vld [vmem:[%s7588_s0 + $0x574] sm:$0xf0]  ;;  %v4866_v24 = vld [vmem:[%s7588_s0 + $0x56c] sm:$0xf] }
 0x100   :  { %v2441_v12 = vpop.f32.mrf.mxu0 }
 0x103   :  { %2544 = vmatmul.bf16.vlgmr.msrb.gmra.mxu0 %v5426_v21  ;;  %v2454_v13 = vpop.f32.mrf.mxu1 }
 0x104   :  { %2588 = vmatpush.bf16.xpose.msra.mxu0 %v3752_v45  ;;  %2570 = vmatmul.bf16.vlgmr.msrb.gmra.mxu2 %v5393_v5  ;;  %v2455_v14 = vadd.f32 %v2454_v13, %v2441_v12  ;;  %v3696_v45 = vor.u32 %v4836_v40, %v3695_v39  ;;  %v3660_v12 = vor.u32 %v4825_v2, %v3657_v4  ;;  %v4871_v2 = vld [vmem:[%s7588_s0 + $0x58c] sm:$0xf0]  ;;  %v4869_v4 = vld [vmem:[%s7588_s0 + $0x584] sm:$0xf] }
 0x105   :  { %2601 = vmatpush.bf16.xpose.msra.mxu1 %v3756_v46  ;;  %2614 = vmatpush.bf16.xpose.msra.mxu2 %v3760_v47  ;;  %v3700_v47 = vor.u32 %v4834_v41, %v3697_v42  ;;  %v3863_v41 = vld [vmem:[%s7588_s0 + $0x5c0] sm:$0xf]  ;;  %v4879_v42 = vld [vmem:[%s7588_s0 + $0x5cc] sm:$0xf0] }
 0x106   :  { %2627 = vmatpush.bf16.xpose.msra.mxu3 %v3764_v48  ;;  %2557 = vmatmul.bf16.vlgmr.msrb.gmra.mxu1 %v5428_v22 }
 0x107   :  { %2583 = vmatmul.bf16.vlgmr.msrb.gmra.mxu3 %v5405_v11  ;;  %v2467_v26 = vpop.f32.mrf.mxu2 }
 0x108   :  { %v2468_v29 = vadd.f32 %v2467_v26, %v2455_v14  ;;  %v2443_v32 = vpop.f32.mrf.mxu0  ;;  %v4883_v26 = vld [vmem:[%s7588_s0 + $0x5ec] sm:$0xf0] }
 0x109   :  { %v3644_v32 = vor.u32 %v4821_v17, %v3641_v18  ;;  %v4867_v17 = vld [vmem:[%s7588_s0 + $0x56c] sm:$0xf0]  ;;  %v4865_v18 = vld [vmem:[%s7588_s0 + $0x564] sm:$0xf] }
 0x10a   :  { %v2480_v31 = vpop.f32.mrf.mxu3 }
 0x10b   :  { %v2456_v33 = vpop.f32.mrf.mxu1  ;;  %v2481_v34 = vadd.f32 %v2480_v31, %v2468_v29  ;;  %v3881_v29 = vld [vmem:[%s7588_s0 + $0x5f0] sm:$0xf0]  ;;  %v4884_v31 = vld [vmem:[%s7588_s0 + $0x5f4] sm:$0xf0] }
 0x10c   :  { %2589 = vmatpush.bf16.xpose.msra.mxu0 %v3736_v57  ;;  %v3648_v33 = vor.u32 %v4824_v20, %v3647_v19  ;;  %v3817_v19 = vld [vmem:[%s7588_s0 + $0x570] sm:$0xf0]  ;;  %v3823_v20 = vld [vmem:[%s7588_s0 + $0x568] sm:$0xf] }
 0x10d   :  { %2602 = vmatpush.bf16.xpose.msra.mxu1 %v3740_v58  ;;  %2615 = vmatpush.bf16.xpose.msra.mxu2 %v3744_v59  ;;  %5085 = vtanh.f32 %v2481_v34  ;;  %v4830_v58 = vld [vmem:[%s7588_s0 + $0x44c] sm:$0xf]  ;;  %v3681_v59 = vld [vmem:[%s7588_s0 + $0x458] sm:$0xf0] }
 0x10e   :  { %2628 = vmatpush.bf16.xpose.msra.mxu3 %v3748_v60  ;;  %5087 = vtanh.f32 %v5872_v3  ;;  %v4831_v3 = vld [vmem:[%s7588_s0 + $0x44c] sm:$0xf0]  ;;  %v3684_v63 = vor.u32 %v4830_v58, %v3681_v59  ;;  %v4882_v34 = vld [vmem:[%s7588_s0 + $0x5ec] sm:$0xf]  ;;  %v4876_v58 = vld [vmem:[%s7588_s0 + $0x5b4] sm:$0xf0] }
 0x10f   :  { %v2469_v46 = vpop.f32.mrf.mxu2  ;;  %v3672_v60 = vor.u32 %v4831_v3, %v3671_v50  ;;  %v3892_v40 = vor.u32 %v4882_v34, %v3889_v35  ;;  %v4874_v59 = vld [vmem:[%s7588_s0 + $0x5ac] sm:$0xf]  ;;  %v3799_v34 = vld [vmem:[%s7588_s0 + $0x540] sm:$0xf]  ;;  %v4863_v35 = vld [vmem:[%s7588_s0 + $0x54c] sm:$0xf0] }
 0x110   :  { %v4880_v46 = vld [vmem:[%s7588_s0 + $0x5d4] sm:$0xf0] }
 0x112   :  { %v2482_v48 = vpop.f32.mrf.mxu3 }
 0x113   :  { %v5086_v49 = vpop.eup %5085  ;;  %v3873_v48 = vld [vmem:[%s7588_s0 + $0x5d8] sm:$0xf0] }
 0x114   :  { %2590 = vmatpush.bf16.xpose.msra.mxu0 %v3720_v7  ;;  %v3082_v51 = vrot.slane %v5086_v49, 7  ;;  %v5088_v53 = vpop.eup %5087  ;;  %v4828_v7 = vld [vmem:[%s7588_s0 + $0x434] sm:$0xf0]  ;;  %v3864_v49 = vor.u32 %v4879_v42, %v3863_v41  ;;  %v4862_v41 = vld [vmem:[%s7588_s0 + $0x54c] sm:$0xf] }
 0x115   :  { %2603 = vmatpush.bf16.xpose.msra.mxu1 %v3724_v8  ;;  %2616 = vmatpush.bf16.xpose.msra.mxu2 %v3728_v9  ;;  %v4826_v8 = vld [vmem:[%s7588_s0 + $0x42c] sm:$0xf]  ;;  %v3665_v9 = vld [vmem:[%s7588_s0 + $0x438] sm:$0xf0]  ;;  %v3664_v13 = vor.u32 %v4828_v7, %v3663_v6  ;;  %v3833_v6 = vld [vmem:[%s7588_s0 + $0x590] sm:$0xf0] }
 0x116   :  { %2629 = vmatpush.bf16.xpose.msra.mxu3 %v3732_v10  ;;  %v6066_v57 = vsel %vm3093_vm0, %v5088_v53, %v3082_v51  ;;  %v3656_v10 = vor.u32 %v4827_v1, %v3655_v0  ;;  %v3668_v14 = vor.u32 %v4826_v8, %v3665_v9  ;;  %v4875_v53 = vld [vmem:[%s7588_s0 + $0x5ac] sm:$0xf0]  ;;  %v3831_v1 = vld [vmem:[%s7588_s0 + $0x580] sm:$0xf]  ;;  %v3839_v7 = vld [vmem:[%s7588_s0 + $0x588] sm:$0xf] }
 0x117   :  { %v4872_v8 = vld [vmem:[%s7588_s0 + $0x594] sm:$0xf0]  ;;  %v4870_v9 = vld [vmem:[%s7588_s0 + $0x58c] sm:$0xf]  ;;  %v3809_v42 = vld [vmem:[%s7588_s0 + $0x558] sm:$0xf0] }
 0x11c   :  { %2591 = vmatpush.bf16.xpose.msra.mxu0 %v3704_v25  ;;  %v3879_v25 = vld [vmem:[%s7588_s0 + $0x5e0] sm:$0xf] }
 0x11d   :  { %2604 = vmatpush.bf16.xpose.msra.mxu1 %v3708_v27  ;;  %2617 = vmatpush.bf16.xpose.msra.mxu2 %v3712_v28  ;;  %v4881_v27 = vld [vmem:[%s7588_s0 + $0x5e4] sm:$0xf]  ;;  %v3640_v28 = vor.u32 %v4823_v16, %v3639_v15  ;;  %v3880_v37 = vor.u32 %v4883_v26, %v3879_v25  ;;  %v3815_v16 = vld [vmem:[%s7588_s0 + $0x560] sm:$0xf]  ;;  %v3825_v25 = vld [vmem:[%s7588_s0 + $0x578] sm:$0xf0] }
 0x11e   :  { %2630 = vmatpush.bf16.xpose.msra.mxu3 %v3716_v30  ;;  %v3887_v30 = vld [vmem:[%s7588_s0 + $0x5e8] sm:$0xf]  ;;  %v3884_v38 = vor.u32 %v4881_v27, %v3881_v29  ;;  %v3816_v26 = vor.u32 %v4867_v17, %v3815_v16  ;;  %v3820_v29 = vor.u32 %v4865_v18, %v3817_v19  ;;  %v4009_v16 = vld [vmem:[%s7588_s0 + $0x6f0] sm:$0xf0]  ;;  %v4916_v18 = vld [vmem:[%s7588_s0 + $0x6f4] sm:$0xf0] }
 0x11f   :  { %v3888_v39 = vor.u32 %v4884_v31, %v3887_v30  ;;  %v3824_v30 = vor.u32 %v4868_v23, %v3823_v20  ;;  %v4015_v17 = vld [vmem:[%s7588_s0 + $0x6e8] sm:$0xf]  ;;  %v4914_v23 = vld [vmem:[%s7588_s0 + $0x6ec] sm:$0xf] }
 0x124   :  { %2592 = vmatpush.bf16.xpose.msra.mxu0 %v3688_v43  ;;  %v4877_v43 = vld [vmem:[%s7588_s0 + $0x5c4] sm:$0xf] }
 0x125   :  { %2605 = vmatpush.bf16.xpose.msra.mxu1 %v3692_v44  ;;  %2618 = vmatpush.bf16.xpose.msra.mxu2 %v3696_v45  ;;  %v3865_v44 = vld [vmem:[%s7588_s0 + $0x5d0] sm:$0xf0]  ;;  %v3871_v45 = vld [vmem:[%s7588_s0 + $0x5c8] sm:$0xf] }
 0x126   :  { %2631 = vmatpush.bf16.xpose.msra.mxu3 %v3700_v47  ;;  %v4878_v47 = vld [vmem:[%s7588_s0 + $0x5cc] sm:$0xf]  ;;  %v3868_v50 = vor.u32 %v4877_v43, %v3865_v44  ;;  %v3872_v51 = vor.u32 %v4880_v46, %v3871_v45  ;;  %v3800_v43 = vor.u32 %v4863_v35, %v3799_v34  ;;  %v3999_v34 = vld [vmem:[%s7588_s0 + $0x6c8] sm:$0xf]  ;;  %v4912_v35 = vld [vmem:[%s7588_s0 + $0x6d4] sm:$0xf0] }
 0x127   :  { %v3876_v3 = vor.u32 %v4878_v47, %v3873_v48 }
 0x12c   :  { %2593 = vmatpush.bf16.xpose.msra.mxu0 %v3672_v60  ;;  %v3857_v60 = vld [vmem:[%s7588_s0 + $0x5b8] sm:$0xf0] }
 0x12d   :  { %2606 = vmatpush.bf16.xpose.msra.mxu1 %v3676_v61  ;;  %2619 = vmatpush.bf16.xpose.msra.mxu2 %v3680_v62  ;;  %v3848_v61 = vor.u32 %v4875_v53, %v3847_v52  ;;  %v3852_v62 = vor.u32 %v4873_v54, %v3849_v55  ;;  %v3860_v0 = vor.u32 %v4874_v59, %v3857_v60  ;;  %v4859_v52 = vld [vmem:[%s7588_s0 + $0x52c] sm:$0xf0]  ;;  %v4857_v53 = vld [vmem:[%s7588_s0 + $0x524] sm:$0xf]  ;;  %v3785_v54 = vld [vmem:[%s7588_s0 + $0x530] sm:$0xf0] }
 0x12e   :  { %2632 = vmatpush.bf16.xpose.msra.mxu3 %v3684_v63  ;;  %v3856_v63 = vor.u32 %v4876_v58, %v3855_v56  ;;  %v3791_v55 = vld [vmem:[%s7588_s0 + $0x528] sm:$0xf]  ;;  %v4860_v56 = vld [vmem:[%s7588_s0 + $0x534] sm:$0xf0]  ;;  %v4858_v58 = vld [vmem:[%s7588_s0 + $0x52c] sm:$0xf] }
 0x12f   :  { %v3793_v59 = vld [vmem:[%s7588_s0 + $0x538] sm:$0xf0] }
 0x134   :  { %2594 = vmatpush.bf16.xpose.msra.mxu0 %v3656_v10  ;;  %v3841_v10 = vld [vmem:[%s7588_s0 + $0x598] sm:$0xf0] }
 0x135   :  { %2607 = vmatpush.bf16.xpose.msra.mxu1 %v3660_v12  ;;  %2620 = vmatpush.bf16.xpose.msra.mxu2 %v3664_v13  ;;  %v3832_v12 = vor.u32 %v4871_v2, %v3831_v1  ;;  %v3836_v13 = vor.u32 %v4869_v4, %v3833_v6  ;;  %v3844_v15 = vor.u32 %v4870_v9, %v3841_v10  ;;  %v3767_v1 = vld [vmem:[%s7588_s0 + $0x500] sm:$0xf]  ;;  %v4855_v2 = vld [vmem:[%s7588_s0 + $0x50c] sm:$0xf0]  ;;  %v4853_v4 = vld [vmem:[%s7588_s0 + $0x504] sm:$0xf] }
 0x136   :  { %2633 = vmatpush.bf16.xpose.msra.mxu3 %v3668_v14  ;;  %v3840_v14 = vor.u32 %v4872_v8, %v3839_v7  ;;  %v3769_v6 = vld [vmem:[%s7588_s0 + $0x510] sm:$0xf0]  ;;  %v3775_v7 = vld [vmem:[%s7588_s0 + $0x508] sm:$0xf]  ;;  %v4856_v8 = vld [vmem:[%s7588_s0 + $0x514] sm:$0xf0] }
 0x137   :  { %v4854_v9 = vld [vmem:[%s7588_s0 + $0x50c] sm:$0xf]  ;;  %v3777_v10 = vld [vmem:[%s7588_s0 + $0x518] sm:$0xf0]  ;;  %v3772_v19 = vor.u32 %v4853_v4, %v3769_v6  ;;  %v3776_v20 = vor.u32 %v4856_v8, %v3775_v7 }
 0x13c   :  { %2595 = vmatpush.bf16.xpose.msra.mxu0 %v3640_v28 }
 0x13d   :  { %2608 = vmatpush.bf16.xpose.msra.mxu1 %v3644_v32  ;;  %2621 = vmatpush.bf16.xpose.msra.mxu2 %v3648_v33  ;;  %v3828_v32 = vor.u32 %v4866_v24, %v3825_v25  ;;  %v4017_v24 = vld [vmem:[%s7588_s0 + $0x6f8] sm:$0xf0]  ;;  %v3780_v25 = vor.u32 %v4854_v9, %v3777_v10 }
 0x13e   :  { %2634 = vmatpush.bf16.xpose.msra.mxu3 %v3652_v36  ;;  %v4861_v36 = vld [vmem:[%s7588_s0 + $0x544] sm:$0xf] }
 0x140   :  { %v2493_v27 = vpop.f32.mrf.mxu0 }
 0x143   :  { %2596 = vmatmul.bf16.vlgmr.msra.gmra.mxu0 %v5426_v21  ;;  %v2506_v28 = vpop.f32.mrf.mxu1 }
 0x144   :  { %2640 = vmatpush.bf16.xpose.msrb.mxu0 %v3880_v37  ;;  %2622 = vmatmul.bf16.vlgmr.msra.gmra.mxu2 %v5393_v5  ;;  %v2507_v31 = vadd.f32 %v2506_v28, %v2493_v27  ;;  %v4016_v28 = vor.u32 %v4916_v18, %v4015_v17  ;;  %v4897_v17 = vld [vmem:[%s7588_s0 + $0x664] sm:$0xf]  ;;  %v3951_v18 = vld [vmem:[%s7588_s0 + $0x668] sm:$0xf] }
 0x145   :  { %2653 = vmatpush.bf16.xpose.msrb.mxu1 %v3884_v38  ;;  %2666 = vmatpush.bf16.xpose.msrb.mxu2 %v3888_v39  ;;  %v3801_v38 = vld [vmem:[%s7588_s0 + $0x550] sm:$0xf0]  ;;  %v3807_v39 = vld [vmem:[%s7588_s0 + $0x548] sm:$0xf] }
 0x146   :  { %2679 = vmatpush.bf16.xpose.msrb.mxu3 %v3892_v40  ;;  %2609 = vmatmul.bf16.vlgmr.msra.gmra.mxu1 %v5428_v22  ;;  %v4864_v40 = vld [vmem:[%s7588_s0 + $0x554] sm:$0xf0]  ;;  %v3804_v46 = vor.u32 %v4861_v36, %v3801_v38  ;;  %v4910_v36 = vld [vmem:[%s7588_s0 + $0x6cc] sm:$0xf] }
 0x147   :  { %2635 = vmatmul.bf16.vlgmr.msra.gmra.mxu3 %v5405_v11  ;;  %v2519_v33 = vpop.f32.mrf.mxu2  ;;  %v3808_v47 = vor.u32 %v4864_v40, %v3807_v39  ;;  %v4000_v40 = vor.u32 %v4912_v35, %v3999_v34  ;;  %v4895_v35 = vld [vmem:[%s7588_s0 + $0x64c] sm:$0xf0] }
 0x148   :  { %v2520_v37 = vadd.f32 %v2519_v33, %v2507_v31  ;;  %v2495_v45 = vpop.f32.mrf.mxu0  ;;  %v4911_v31 = vld [vmem:[%s7588_s0 + $0x6cc] sm:$0xf0]  ;;  %v3993_v33 = vld [vmem:[%s7588_s0 + $0x6d0] sm:$0xf0] }
 0x149   :  { %v3977_v45 = vld [vmem:[%s7588_s0 + $0x6b0] sm:$0xf0] }
 0x14a   :  { %v2532_v44 = vpop.f32.mrf.mxu3 }
 0x14b   :  { %v6270_v48 = vadd.f32 %v2532_v44, %v2520_v37  ;;  %v4001_v37 = vld [vmem:[%s7588_s0 + $0x6d8] sm:$0xf0]  ;;  %v4905_v44 = vld [vmem:[%s7588_s0 + $0x6a4] sm:$0xf] }
 0x14c   :  { %2641 = vmatpush.bf16.xpose.msrb.mxu0 %v3864_v49  ;;  %v2508_v49 = vpop.f32.mrf.mxu1 }
 0x14d   :  { %2654 = vmatpush.bf16.xpose.msrb.mxu1 %v3868_v50  ;;  %2667 = vmatpush.bf16.xpose.msrb.mxu2 %v3872_v51  ;;  %v3812_v50 = vor.u32 %v4862_v41, %v3809_v42  ;;  %v4004_v41 = vor.u32 %v4910_v36, %v4001_v37  ;;  %v3975_v42 = vld [vmem:[%s7588_s0 + $0x6a0] sm:$0xf]  ;;  %v4906_v49 = vld [vmem:[%s7588_s0 + $0x6ac] sm:$0xf]  ;;  %5089 = vtanh.f32 %v6270_v48  ;;  %v3945_v48 = vld [vmem:[%s7588_s0 + $0x670] sm:$0xf0] }
 0x14e   :  { %2680 = vmatpush.bf16.xpose.msrb.mxu3 %v3876_v3  ;;  %v3783_v3 = vld [vmem:[%s7588_s0 + $0x520] sm:$0xf]  ;;  %v4893_v36 = vld [vmem:[%s7588_s0 + $0x644] sm:$0xf]  ;;  %v3929_v37 = vld [vmem:[%s7588_s0 + $0x650] sm:$0xf0] }
 0x14f   :  { %v2521_v51 = vpop.f32.mrf.mxu2  ;;  %v3784_v60 = vor.u32 %v4859_v52, %v3783_v3  ;;  %v3980_v3 = vor.u32 %v4905_v44, %v3977_v45  ;;  %v3932_v45 = vor.u32 %v4893_v36, %v3929_v37  ;;  %v4103_v36 = vld [vmem:[%s7588_s0 + $0x7a0] sm:$0xf]  ;;  %v4939_v37 = vld [vmem:[%s7588_s0 + $0x7ac] sm:$0xf0] }
 0x154   :  { %2642 = vmatpush.bf16.xpose.msrb.mxu0 %v3848_v61  ;;  %v2534_v61 = vpop.f32.mrf.mxu3 }
 0x155   :  { %2655 = vmatpush.bf16.xpose.msrb.mxu1 %v3852_v62  ;;  %2668 = vmatpush.bf16.xpose.msrb.mxu2 %v3856_v63  ;;  %v3788_v62 = vor.u32 %v4857_v53, %v3785_v54  ;;  %v3792_v63 = vor.u32 %v4860_v56, %v3791_v55  ;;  %v3961_v61 = vld [vmem:[%s7588_s0 + $0x690] sm:$0xf0] }
 0x156   :  { %2681 = vmatpush.bf16.xpose.msrb.mxu3 %v3860_v0  ;;  %v3796_v0 = vor.u32 %v4858_v58, %v3793_v59  ;;  %v3959_v58 = vld [vmem:[%s7588_s0 + $0x680] sm:$0xf]  ;;  %v4903_v59 = vld [vmem:[%s7588_s0 + $0x68c] sm:$0xf0] }
 0x15c   :  { %2643 = vmatpush.bf16.xpose.msrb.mxu0 %v3832_v12  ;;  %v4007_v12 = vld [vmem:[%s7588_s0 + $0x6e0] sm:$0xf] }
 0x15d   :  { %2656 = vmatpush.bf16.xpose.msrb.mxu1 %v3836_v13  ;;  %2669 = vmatpush.bf16.xpose.msrb.mxu2 %v3840_v14  ;;  %v4915_v13 = vld [vmem:[%s7588_s0 + $0x6ec] sm:$0xf0]  ;;  %v4913_v14 = vld [vmem:[%s7588_s0 + $0x6e4] sm:$0xf] }
 0x15e   :  { %2682 = vmatpush.bf16.xpose.msrb.mxu3 %v3844_v15  ;;  %v3768_v15 = vor.u32 %v4855_v2, %v3767_v1  ;;  %v4012_v27 = vor.u32 %v4913_v14, %v4009_v16  ;;  %v3969_v1 = vld [vmem:[%s7588_s0 + $0x698] sm:$0xf0]  ;;  %v3960_v2 = vor.u32 %v4903_v59, %v3959_v58  ;;  %v4899_v16 = vld [vmem:[%s7588_s0 + $0x66c] sm:$0xf0] }
 0x164   :  { %2644 = vmatpush.bf16.xpose.msrb.mxu0 %v3816_v26  ;;  %v4008_v26 = vor.u32 %v4915_v13, %v4007_v12 }
 0x165   :  { %2657 = vmatpush.bf16.xpose.msrb.mxu1 %v3820_v29  ;;  %2670 = vmatpush.bf16.xpose.msrb.mxu2 %v3824_v30  ;;  %v4020_v29 = vor.u32 %v4914_v23, %v4017_v24  ;;  %v3991_v30 = vld [vmem:[%s7588_s0 + $0x6c0] sm:$0xf]  ;;  %v3953_v23 = vld [vmem:[%s7588_s0 + $0x678] sm:$0xf0] }
 0x166   :  { %2683 = vmatpush.bf16.xpose.msrb.mxu3 %v3828_v32  ;;  %v4909_v32 = vld [vmem:[%s7588_s0 + $0x6c4] sm:$0xf]  ;;  %v3992_v38 = vor.u32 %v4911_v31, %v3991_v30 }
 0x167   :  { %v3996_v39 = vor.u32 %v4909_v32, %v3993_v33  ;;  %v3927_v33 = vld [vmem:[%s7588_s0 + $0x640] sm:$0xf] }
 0x168   :  { %v3928_v44 = vor.u32 %v4895_v35, %v3927_v33 }
 0x16c   :  { %2645 = vmatpush.bf16.xpose.msrb.mxu0 %v3800_v43  ;;  %v4907_v43 = vld [vmem:[%s7588_s0 + $0x6ac] sm:$0xf0] }
 0x16d   :  { %2658 = vmatpush.bf16.xpose.msrb.mxu1 %v3804_v46  ;;  %2671 = vmatpush.bf16.xpose.msrb.mxu2 %v3808_v47  ;;  %v3983_v46 = vld [vmem:[%s7588_s0 + $0x6a8] sm:$0xf]  ;;  %v4908_v47 = vld [vmem:[%s7588_s0 + $0x6b4] sm:$0xf0]  ;;  %v3976_v51 = vor.u32 %v4907_v43, %v3975_v42  ;;  %v3937_v42 = vld [vmem:[%s7588_s0 + $0x658] sm:$0xf0] }
 0x16e   :  { %2684 = vmatpush.bf16.xpose.msrb.mxu3 %v3812_v50  ;;  %v3985_v50 = vld [vmem:[%s7588_s0 + $0x6b8] sm:$0xf0]  ;;  %v3984_v52 = vor.u32 %v4908_v47, %v3983_v46 }
 0x16f   :  { %v3988_v53 = vor.u32 %v4906_v49, %v3985_v50  ;;  %v3911_v49 = vld [vmem:[%s7588_s0 + $0x620] sm:$0xf]  ;;  %v4891_v50 = vld [vmem:[%s7588_s0 + $0x62c] sm:$0xf0] }
 0x174   :  { %2646 = vmatpush.bf16.xpose.msrb.mxu0 %v3784_v60  ;;  %v4901_v60 = vld [vmem:[%s7588_s0 + $0x684] sm:$0xf] }
 0x175   :  { %2659 = vmatpush.bf16.xpose.msrb.mxu1 %v3788_v62  ;;  %2672 = vmatpush.bf16.xpose.msrb.mxu2 %v3792_v63  ;;  %v3967_v62 = vld [vmem:[%s7588_s0 + $0x688] sm:$0xf]  ;;  %v4904_v63 = vld [vmem:[%s7588_s0 + $0x694] sm:$0xf0]  ;;  %v3964_v6 = vor.u32 %v4901_v60, %v3961_v61  ;;  %v3895_v60 = vld [vmem:[%s7588_s0 + $0x600] sm:$0xf] }
 0x176   :  { %2685 = vmatpush.bf16.xpose.msrb.mxu3 %v3796_v0  ;;  %v4902_v0 = vld [vmem:[%s7588_s0 + $0x68c] sm:$0xf]  ;;  %v3968_v7 = vor.u32 %v4904_v63, %v3967_v62  ;;  %v4887_v61 = vld [vmem:[%s7588_s0 + $0x60c] sm:$0xf0]  ;;  %v4885_v62 = vld [vmem:[%s7588_s0 + $0x604] sm:$0xf] }
 0x177   :  { %v3972_v9 = vor.u32 %v4902_v0, %v3969_v1  ;;  %v3897_v63 = vld [vmem:[%s7588_s0 + $0x610] sm:$0xf0]  ;;  %v3903_v0 = vld [vmem:[%s7588_s0 + $0x608] sm:$0xf]  ;;  %v4888_v1 = vld [vmem:[%s7588_s0 + $0x614] sm:$0xf0] }
 0x17c   :  { %2647 = vmatpush.bf16.xpose.msrb.mxu0 %v3768_v15  ;;  %v3943_v15 = vld [vmem:[%s7588_s0 + $0x660] sm:$0xf] }
 0x17d   :  { %2660 = vmatpush.bf16.xpose.msrb.mxu1 %v3772_v19  ;;  %2673 = vmatpush.bf16.xpose.msrb.mxu2 %v3776_v20  ;;  %v4900_v19 = vld [vmem:[%s7588_s0 + $0x674] sm:$0xf0]  ;;  %v4898_v20 = vld [vmem:[%s7588_s0 + $0x66c] sm:$0xf]  ;;  %v3944_v24 = vor.u32 %v4899_v16, %v3943_v15  ;;  %v3904_v15 = vor.u32 %v4888_v1, %v3903_v0  ;;  %v4073_v0 = vld [vmem:[%s7588_s0 + $0x770] sm:$0xf0] }
 0x17e   :  { %2686 = vmatpush.bf16.xpose.msrb.mxu3 %v3780_v25  ;;  %v5090_v25 = vpop.eup %5089  ;;  %v4946_v16 = vld [vmem:[%s7588_s0 + $0x7ec] sm:$0xf]  ;;  %v4079_v1 = vld [vmem:[%s7588_s0 + $0x768] sm:$0xf] }
 0x17f   :  { %v3083_v32 = vrot.slane %v5090_v25, 6  ;;  %v4943_v25 = vld [vmem:[%s7588_s0 + $0x7cc] sm:$0xf0] }
 0x180   :  { %v2545_v54 = vpop.f32.mrf.mxu0 }
 0x183   :  { %2648 = vmatmul.bf16.vlgmr.msrb.gmra.mxu0 %v5426_v21  ;;  %v2558_v55 = vpop.f32.mrf.mxu1 }
 0x184   :  { %2692 = vmatpush.bf16.xpose.msra.mxu0 %v4008_v26  ;;  %2674 = vmatmul.bf16.vlgmr.msrb.gmra.mxu2 %v5393_v5  ;;  %v2559_v56 = vadd.f32 %v2558_v55, %v2545_v54  ;;  %v3948_v26 = vor.u32 %v4897_v17, %v3945_v48  ;;  %v3921_v54 = vld [vmem:[%s7588_s0 + $0x638] sm:$0xf0]  ;;  %v3912_v55 = vor.u32 %v4891_v50, %v3911_v49  ;;  %v4087_v50 = vld [vmem:[%s7588_s0 + $0x780] sm:$0xf] }
 0x185   :  { %2705 = vmatpush.bf16.xpose.msra.mxu1 %v4012_v27  ;;  %2718 = vmatpush.bf16.xpose.msra.mxu2 %v4016_v28  ;;  %v3952_v27 = vor.u32 %v4900_v19, %v3951_v18  ;;  %v4145_v17 = vld [vmem:[%s7588_s0 + $0x7f8] sm:$0xf0] }
 0x186   :  { %2731 = vmatpush.bf16.xpose.msra.mxu3 %v4020_v29  ;;  %2661 = vmatmul.bf16.vlgmr.msrb.gmra.mxu1 %v5428_v22  ;;  %v3956_v29 = vor.u32 %v4898_v20, %v3953_v23  ;;  %v4148_v23 = vor.u32 %v4946_v16, %v4145_v17  ;;  %v4055_v16 = vld [vmem:[%s7588_s0 + $0x740] sm:$0xf]  ;;  %v4927_v17 = vld [vmem:[%s7588_s0 + $0x74c] sm:$0xf0] }
 0x187   :  { %2687 = vmatmul.bf16.vlgmr.msrb.gmra.mxu3 %v5405_v11  ;;  %v2571_v4 = vpop.f32.mrf.mxu2 }
 0x188   :  { %v2572_v8 = vadd.f32 %v2571_v4, %v2559_v56  ;;  %v2547_v12 = vpop.f32.mrf.mxu0  ;;  %v3905_v4 = vld [vmem:[%s7588_s0 + $0x618] sm:$0xf0] }
 0x189   :  { %v4143_v12 = vld [vmem:[%s7588_s0 + $0x7e8] sm:$0xf] }
 0x18a   :  { %v2584_v10 = vpop.f32.mrf.mxu3 }
 0x18b   :  { %v2560_v13 = vpop.f32.mrf.mxu1  ;;  %v2585_v14 = vadd.f32 %v2584_v10, %v2572_v8  ;;  %v4945_v8 = vld [vmem:[%s7588_s0 + $0x7e4] sm:$0xf]  ;;  %v4137_v10 = vld [vmem:[%s7588_s0 + $0x7f0] sm:$0xf0] }
 0x18c   :  { %2693 = vmatpush.bf16.xpose.msra.mxu0 %v3992_v38  ;;  %v3935_v38 = vld [vmem:[%s7588_s0 + $0x648] sm:$0xf]  ;;  %v4948_v13 = vld [vmem:[%s7588_s0 + $0x7f4] sm:$0xf0]  ;;  %v4140_v19 = vor.u32 %v4945_v8, %v4137_v10 }
 0x18d   :  { %2706 = vmatpush.bf16.xpose.msra.mxu1 %v3996_v39  ;;  %2719 = vmatpush.bf16.xpose.msra.mxu2 %v4000_v40  ;;  %5091 = vtanh.f32 %v2585_v14  ;;  %v4896_v39 = vld [vmem:[%s7588_s0 + $0x654] sm:$0xf0]  ;;  %v3900_v14 = vor.u32 %v4885_v62, %v3897_v63  ;;  %v4144_v20 = vor.u32 %v4948_v13, %v4143_v12  ;;  %v4931_v62 = vld [vmem:[%s7588_s0 + $0x76c] sm:$0xf0]  ;;  %v4929_v63 = vld [vmem:[%s7588_s0 + $0x764] sm:$0xf] }
 0x18e   :  { %2732 = vmatpush.bf16.xpose.msra.mxu3 %v4004_v41  ;;  %v4894_v41 = vld [vmem:[%s7588_s0 + $0x64c] sm:$0xf]  ;;  %v3936_v46 = vor.u32 %v4896_v39, %v3935_v38  ;;  %v4937_v38 = vld [vmem:[%s7588_s0 + $0x7a4] sm:$0xf]  ;;  %v4105_v39 = vld [vmem:[%s7588_s0 + $0x7b0] sm:$0xf0]  ;;  %v4076_v10 = vor.u32 %v4929_v63, %v4073_v0 }
 0x18f   :  { %v2573_v28 = vpop.f32.mrf.mxu2  ;;  %v3940_v47 = vor.u32 %v4894_v41, %v3937_v42  ;;  %v4940_v41 = vld [vmem:[%s7588_s0 + $0x7b4] sm:$0xf0]  ;;  %v4938_v42 = vld [vmem:[%s7588_s0 + $0x7ac] sm:$0xf] }
 0x190   :  { %v4127_v28 = vld [vmem:[%s7588_s0 + $0x7c8] sm:$0xf]  ;;  %v4980_v63 = vld [vmem:[%s7588_s0 + $0x8f4] sm:$0xf0] }
 0x192   :  { %v2586_v30 = vpop.f32.mrf.mxu3 }
 0x193   :  { %v5092_v31 = vpop.eup %5091  ;;  %v4942_v30 = vld [vmem:[%s7588_s0 + $0x7cc] sm:$0xf] }
 0x194   :  { %2694 = vmatpush.bf16.xpose.msra.mxu0 %v3976_v51  ;;  %v3084_v34 = vrot.slane %v5092_v31, 5  ;;  %v3913_v51 = vld [vmem:[%s7588_s0 + $0x630] sm:$0xf0]  ;;  %v4129_v31 = vld [vmem:[%s7588_s0 + $0x7d8] sm:$0xf0] }
 0x195   :  { %2707 = vmatpush.bf16.xpose.msra.mxu1 %v3980_v3  ;;  %2720 = vmatpush.bf16.xpose.msra.mxu2 %v3984_v52  ;;  %v3919_v3 = vld [vmem:[%s7588_s0 + $0x628] sm:$0xf]  ;;  %v4892_v52 = vld [vmem:[%s7588_s0 + $0x634] sm:$0xf0]  ;;  %v4132_v35 = vor.u32 %v4942_v30, %v4129_v31 }
 0x196   :  { %2733 = vmatpush.bf16.xpose.msra.mxu3 %v3988_v53  ;;  %v3096_v40 = vsel %vm3095_vm1, %v3083_v32, %v3084_v34  ;;  %v4890_v53 = vld [vmem:[%s7588_s0 + $0x62c] sm:$0xf]  ;;  %v3920_v58 = vor.u32 %v4892_v52, %v3919_v3  ;;  %v4089_v3 = vld [vmem:[%s7588_s0 + $0x790] sm:$0xf0]  ;;  %v4095_v52 = vld [vmem:[%s7588_s0 + $0x788] sm:$0xf] }
 0x197   :  { %v6471_v43 = vsel %vm3097_vm2, %v6066_v57, %v3096_v40  ;;  %v4889_v57 = vld [vmem:[%s7588_s0 + $0x624] sm:$0xf]  ;;  %v3924_v59 = vor.u32 %v4890_v53, %v3921_v54  ;;  %v4111_v40 = vld [vmem:[%s7588_s0 + $0x7a8] sm:$0xf]  ;;  %v4936_v53 = vld [vmem:[%s7588_s0 + $0x794] sm:$0xf0] }
 0x198   :  { %v3916_v56 = vor.u32 %v4889_v57, %v3913_v51  ;;  %v4935_v57 = vld [vmem:[%s7588_s0 + $0x78c] sm:$0xf0]  ;;  %v4933_v51 = vld [vmem:[%s7588_s0 + $0x784] sm:$0xf]  ;;  %v4934_v54 = vld [vmem:[%s7588_s0 + $0x78c] sm:$0xf] }
 0x19c   :  { %2695 = vmatpush.bf16.xpose.msra.mxu0 %v3960_v2  ;;  %v4886_v2 = vld [vmem:[%s7588_s0 + $0x60c] sm:$0xf] }
 0x19d   :  { %2708 = vmatpush.bf16.xpose.msra.mxu1 %v3964_v6  ;;  %2721 = vmatpush.bf16.xpose.msra.mxu2 %v3968_v7  ;;  %v4135_v6 = vld [vmem:[%s7588_s0 + $0x7e0] sm:$0xf]  ;;  %v4947_v7 = vld [vmem:[%s7588_s0 + $0x7ec] sm:$0xf0]  ;;  %v3908_v48 = vor.u32 %v4886_v2, %v3905_v4  ;;  %v4932_v2 = vld [vmem:[%s7588_s0 + $0x774] sm:$0xf0] }
 0x19e   :  { %2734 = vmatpush.bf16.xpose.msra.mxu3 %v3972_v9  ;;  %v3896_v9 = vor.u32 %v4887_v61, %v3895_v60  ;;  %v4136_v18 = vor.u32 %v4947_v7, %v4135_v6  ;;  %v4071_v61 = vld [vmem:[%s7588_s0 + $0x760] sm:$0xf]  ;;  %v4930_v4 = vld [vmem:[%s7588_s0 + $0x76c] sm:$0xf]  ;;  %v4081_v6 = vld [vmem:[%s7588_s0 + $0x778] sm:$0xf0]  ;;  %v4080_v12 = vor.u32 %v4932_v2, %v4079_v1 }
 0x19f   :  { %v4072_v7 = vor.u32 %v4931_v62, %v4071_v61  ;;  %v4265_v61 = vld [vmem:[%s7588_s0 + $0x8f0] sm:$0xf0]  ;;  %v4271_v62 = vld [vmem:[%s7588_s0 + $0x8e8] sm:$0xf]  ;;  %v4978_v2 = vld [vmem:[%s7588_s0 + $0x8ec] sm:$0xf] }
 0x1a4   :  { %2696 = vmatpush.bf16.xpose.msra.mxu0 %v3944_v24  ;;  %v4119_v24 = vld [vmem:[%s7588_s0 + $0x7c0] sm:$0xf] }
 0x1a5   :  { %2709 = vmatpush.bf16.xpose.msra.mxu1 %v3948_v26  ;;  %2722 = vmatpush.bf16.xpose.msra.mxu2 %v3952_v27  ;;  %v4941_v26 = vld [vmem:[%s7588_s0 + $0x7c4] sm:$0xf]  ;;  %v4121_v27 = vld [vmem:[%s7588_s0 + $0x7d0] sm:$0xf0]  ;;  %v4120_v32 = vor.u32 %v4943_v25, %v4119_v24  ;;  %v4926_v24 = vld [vmem:[%s7588_s0 + $0x74c] sm:$0xf] }
 0x1a6   :  { %2735 = vmatpush.bf16.xpose.msra.mxu3 %v3956_v29  ;;  %v4944_v29 = vld [vmem:[%s7588_s0 + $0x7d4] sm:$0xf0]  ;;  %v4124_v33 = vor.u32 %v4941_v26, %v4121_v27  ;;  %v4065_v25 = vld [vmem:[%s7588_s0 + $0x758] sm:$0xf0]  ;;  %v4056_v26 = vor.u32 %v4927_v17, %v4055_v16  ;;  %v4255_v16 = vld [vmem:[%s7588_s0 + $0x8c8] sm:$0xf] }
 0x1a7   :  { %v4128_v34 = vor.u32 %v4944_v29, %v4127_v28  ;;  %v4976_v17 = vld [vmem:[%s7588_s0 + $0x8d4] sm:$0xf0] }
 0x1ac   :  { %2697 = vmatpush.bf16.xpose.msra.mxu0 %v3928_v44  ;;  %v4113_v44 = vld [vmem:[%s7588_s0 + $0x7b8] sm:$0xf0] }
 0x1ad   :  { %2710 = vmatpush.bf16.xpose.msra.mxu1 %v3932_v45  ;;  %2723 = vmatpush.bf16.xpose.msra.mxu2 %v3936_v46  ;;  %v4104_v45 = vor.u32 %v4939_v37, %v4103_v36  ;;  %v4108_v46 = vor.u32 %v4937_v38, %v4105_v39  ;;  %v4116_v49 = vor.u32 %v4938_v42, %v4113_v44  ;;  %v4923_v36 = vld [vmem:[%s7588_s0 + $0x72c] sm:$0xf0]  ;;  %v4921_v37 = vld [vmem:[%s7588_s0 + $0x724] sm:$0xf]  ;;  %v4041_v38 = vld [vmem:[%s7588_s0 + $0x730] sm:$0xf0] }
 0x1ae   :  { %2736 = vmatpush.bf16.xpose.msra.mxu3 %v3940_v47  ;;  %v4112_v47 = vor.u32 %v4940_v41, %v4111_v40  ;;  %v4047_v39 = vld [vmem:[%s7588_s0 + $0x728] sm:$0xf]  ;;  %v4924_v40 = vld [vmem:[%s7588_s0 + $0x734] sm:$0xf0]  ;;  %v4922_v41 = vld [vmem:[%s7588_s0 + $0x72c] sm:$0xf] }
 0x1af   :  { %v4049_v42 = vld [vmem:[%s7588_s0 + $0x738] sm:$0xf0] }
 0x1b4   :  { %2698 = vmatpush.bf16.xpose.msra.mxu0 %v3912_v55  ;;  %v4097_v55 = vld [vmem:[%s7588_s0 + $0x798] sm:$0xf0] }
 0x1b5   :  { %2711 = vmatpush.bf16.xpose.msra.mxu1 %v3916_v56  ;;  %2724 = vmatpush.bf16.xpose.msra.mxu2 %v3920_v58  ;;  %v4088_v56 = vor.u32 %v4935_v57, %v4087_v50  ;;  %v4092_v58 = vor.u32 %v4933_v51, %v4089_v3  ;;  %v4100_v60 = vor.u32 %v4934_v54, %v4097_v55  ;;  %v4023_v50 = vld [vmem:[%s7588_s0 + $0x700] sm:$0xf]  ;;  %v4919_v57 = vld [vmem:[%s7588_s0 + $0x70c] sm:$0xf0]  ;;  %v4917_v51 = vld [vmem:[%s7588_s0 + $0x704] sm:$0xf] }
 0x1b6   :  { %2737 = vmatpush.bf16.xpose.msra.mxu3 %v3924_v59  ;;  %v4096_v59 = vor.u32 %v4936_v53, %v4095_v52  ;;  %v4025_v3 = vld [vmem:[%s7588_s0 + $0x710] sm:$0xf0]  ;;  %v4031_v52 = vld [vmem:[%s7588_s0 + $0x708] sm:$0xf]  ;;  %v4920_v53 = vld [vmem:[%s7588_s0 + $0x714] sm:$0xf0] }
 0x1b7   :  { %v4918_v54 = vld [vmem:[%s7588_s0 + $0x70c] sm:$0xf]  ;;  %v4033_v55 = vld [vmem:[%s7588_s0 + $0x718] sm:$0xf0]  ;;  %v4028_v0 = vor.u32 %v4917_v51, %v4025_v3  ;;  %v4032_v1 = vor.u32 %v4920_v53, %v4031_v52 }
 0x1bc   :  { %2699 = vmatpush.bf16.xpose.msra.mxu0 %v3896_v9 }
 0x1bd   :  { %2712 = vmatpush.bf16.xpose.msra.mxu1 %v3900_v14  ;;  %2725 = vmatpush.bf16.xpose.msra.mxu2 %v3904_v15  ;;  %v4084_v14 = vor.u32 %v4930_v4, %v4081_v6  ;;  %v4273_v4 = vld [vmem:[%s7588_s0 + $0x8f8] sm:$0xf0]  ;;  %v4036_v6 = vor.u32 %v4918_v54, %v4033_v55 }
 0x1be   :  { %2738 = vmatpush.bf16.xpose.msra.mxu3 %v3908_v48  ;;  %v4925_v48 = vld [vmem:[%s7588_s0 + $0x744] sm:$0xf] }
 0x1c0   :  { %v2597_v8 = vpop.f32.mrf.mxu0 }
 0x1c3   :  { %2700 = vmatmul.bf16.vlgmr.msra.gmra.mxu0 %v5426_v21  ;;  %v2610_v9 = vpop.f32.mrf.mxu1 }
 0x1c4   :  { %2744 = vmatpush.bf16.xpose.msrb.mxu0 %v4136_v18  ;;  %2726 = vmatmul.bf16.vlgmr.msra.gmra.mxu2 %v5393_v5  ;;  %v2611_v13 = vadd.f32 %v2610_v9, %v2597_v8  ;;  %v4272_v9 = vor.u32 %v4980_v63, %v4271_v62  ;;  %v4961_v62 = vld [vmem:[%s7588_s0 + $0x864] sm:$0xf]  ;;  %v4207_v63 = vld [vmem:[%s7588_s0 + $0x868] sm:$0xf] }
 0x1c5   :  { %2757 = vmatpush.bf16.xpose.msrb.mxu1 %v4140_v19  ;;  %2770 = vmatpush.bf16.xpose.msrb.mxu2 %v4144_v20  ;;  %v4057_v19 = vld [vmem:[%s7588_s0 + $0x750] sm:$0xf0]  ;;  %v4063_v20 = vld [vmem:[%s7588_s0 + $0x748] sm:$0xf] }
 0x1c6   :  { %2783 = vmatpush.bf16.xpose.msrb.mxu3 %v4148_v23  ;;  %2713 = vmatmul.bf16.vlgmr.msra.gmra.mxu1 %v5428_v22  ;;  %v4928_v23 = vld [vmem:[%s7588_s0 + $0x754] sm:$0xf0]  ;;  %v4060_v29 = vor.u32 %v4925_v48, %v4057_v19  ;;  %v4974_v48 = vld [vmem:[%s7588_s0 + $0x8cc] sm:$0xf] }
 0x1c7   :  { %2739 = vmatmul.bf16.vlgmr.msra.gmra.mxu3 %v5405_v11  ;;  %v2623_v15 = vpop.f32.mrf.mxu2  ;;  %v4064_v30 = vor.u32 %v4928_v23, %v4063_v20  ;;  %v4256_v23 = vor.u32 %v4976_v17, %v4255_v16  ;;  %v4959_v17 = vld [vmem:[%s7588_s0 + $0x84c] sm:$0xf0] }
 0x1c8   :  { %v2624_v18 = vadd.f32 %v2623_v15, %v2611_v13  ;;  %v2599_v28 = vpop.f32.mrf.mxu0  ;;  %v4975_v13 = vld [vmem:[%s7588_s0 + $0x8cc] sm:$0xf0]  ;;  %v4249_v15 = vld [vmem:[%s7588_s0 + $0x8d0] sm:$0xf0] }
 0x1c9   :  { %v4233_v28 = vld [vmem:[%s7588_s0 + $0x8b0] sm:$0xf0] }
 0x1ca   :  { %v2636_v27 = vpop.f32.mrf.mxu3 }
 0x1cb   :  { %v6669_v31 = vadd.f32 %v2636_v27, %v2624_v18  ;;  %v4257_v18 = vld [vmem:[%s7588_s0 + $0x8d8] sm:$0xf0]  ;;  %v4969_v27 = vld [vmem:[%s7588_s0 + $0x8a4] sm:$0xf] }
 0x1cc   :  { %2745 = vmatpush.bf16.xpose.msrb.mxu0 %v4120_v32  ;;  %v2612_v32 = vpop.f32.mrf.mxu1 }
 0x1cd   :  { %2758 = vmatpush.bf16.xpose.msrb.mxu1 %v4124_v33  ;;  %2771 = vmatpush.bf16.xpose.msrb.mxu2 %v4128_v34  ;;  %v4068_v33 = vor.u32 %v4926_v24, %v4065_v25  ;;  %v4260_v24 = vor.u32 %v4974_v48, %v4257_v18  ;;  %v4231_v25 = vld [vmem:[%s7588_s0 + $0x8a0] sm:$0xf]  ;;  %v4970_v32 = vld [vmem:[%s7588_s0 + $0x8ac] sm:$0xf]  ;;  %5093 = vtanh.f32 %v6669_v31  ;;  %v4201_v31 = vld [vmem:[%s7588_s0 + $0x870] sm:$0xf0] }
 0x1ce   :  { %2784 = vmatpush.bf16.xpose.msrb.mxu3 %v4132_v35  ;;  %v4039_v35 = vld [vmem:[%s7588_s0 + $0x720] sm:$0xf]  ;;  %v4957_v48 = vld [vmem:[%s7588_s0 + $0x844] sm:$0xf]  ;;  %v4185_v18 = vld [vmem:[%s7588_s0 + $0x850] sm:$0xf0] }
 0x1cf   :  { %v2625_v34 = vpop.f32.mrf.mxu2  ;;  %v4040_v44 = vor.u32 %v4923_v36, %v4039_v35  ;;  %v4236_v35 = vor.u32 %v4969_v27, %v4233_v28  ;;  %v4188_v27 = vor.u32 %v4957_v48, %v4185_v18  ;;  %v4359_v48 = vld [vmem:[%s7588_s0 + $0x9a0] sm:$0xf]  ;;  %v5003_v18 = vld [vmem:[%s7588_s0 + $0x9ac] sm:$0xf0] }
 0x1d4   :  { %2746 = vmatpush.bf16.xpose.msrb.mxu0 %v4104_v45  ;;  %v2638_v45 = vpop.f32.mrf.mxu3 }
 0x1d5   :  { %2759 = vmatpush.bf16.xpose.msrb.mxu1 %v4108_v46  ;;  %2772 = vmatpush.bf16.xpose.msrb.mxu2 %v4112_v47  ;;  %v4044_v46 = vor.u32 %v4921_v37, %v4041_v38  ;;  %v4048_v47 = vor.u32 %v4924_v40, %v4047_v39  ;;  %v4217_v45 = vld [vmem:[%s7588_s0 + $0x890] sm:$0xf0] }
 0x1d6   :  { %2785 = vmatpush.bf16.xpose.msrb.mxu3 %v4116_v49  ;;  %v4052_v49 = vor.u32 %v4922_v41, %v4049_v42  ;;  %v4215_v41 = vld [vmem:[%s7588_s0 + $0x880] sm:$0xf]  ;;  %v4967_v42 = vld [vmem:[%s7588_s0 + $0x88c] sm:$0xf0] }
 0x1dc   :  { %2747 = vmatpush.bf16.xpose.msrb.mxu0 %v4088_v56  ;;  %v4263_v56 = vld [vmem:[%s7588_s0 + $0x8e0] sm:$0xf] }
 0x1dd   :  { %2760 = vmatpush.bf16.xpose.msrb.mxu1 %v4092_v58  ;;  %2773 = vmatpush.bf16.xpose.msrb.mxu2 %v4096_v59  ;;  %v4979_v58 = vld [vmem:[%s7588_s0 + $0x8ec] sm:$0xf0]  ;;  %v4977_v59 = vld [vmem:[%s7588_s0 + $0x8e4] sm:$0xf] }
 0x1de   :  { %2786 = vmatpush.bf16.xpose.msrb.mxu3 %v4100_v60  ;;  %v4024_v60 = vor.u32 %v4919_v57, %v4023_v50  ;;  %v4268_v8 = vor.u32 %v4977_v59, %v4265_v61  ;;  %v4225_v50 = vld [vmem:[%s7588_s0 + $0x898] sm:$0xf0]  ;;  %v4216_v57 = vor.u32 %v4967_v42, %v4215_v41  ;;  %v4963_v61 = vld [vmem:[%s7588_s0 + $0x86c] sm:$0xf0] }
 0x1e4   :  { %2748 = vmatpush.bf16.xpose.msrb.mxu0 %v4072_v7  ;;  %v4264_v7 = vor.u32 %v4979_v58, %v4263_v56 }
 0x1e5   :  { %2761 = vmatpush.bf16.xpose.msrb.mxu1 %v4076_v10  ;;  %2774 = vmatpush.bf16.xpose.msrb.mxu2 %v4080_v12  ;;  %v4276_v10 = vor.u32 %v4978_v2, %v4273_v4  ;;  %v4247_v12 = vld [vmem:[%s7588_s0 + $0x8c0] sm:$0xf]  ;;  %v4209_v2 = vld [vmem:[%s7588_s0 + $0x878] sm:$0xf0] }
 0x1e6   :  { %2787 = vmatpush.bf16.xpose.msrb.mxu3 %v4084_v14  ;;  %v4973_v14 = vld [vmem:[%s7588_s0 + $0x8c4] sm:$0xf]  ;;  %v4248_v19 = vor.u32 %v4975_v13, %v4247_v12 }
 0x1e7   :  { %v4252_v20 = vor.u32 %v4973_v14, %v4249_v15  ;;  %v4183_v14 = vld [vmem:[%s7588_s0 + $0x840] sm:$0xf] }
 0x1ec   :  { %2749 = vmatpush.bf16.xpose.msrb.mxu0 %v4056_v26  ;;  %v4971_v26 = vld [vmem:[%s7588_s0 + $0x8ac] sm:$0xf0] }
 0x1ed   :  { %2762 = vmatpush.bf16.xpose.msrb.mxu1 %v4060_v29  ;;  %2775 = vmatpush.bf16.xpose.msrb.mxu2 %v4064_v30  ;;  %v4239_v29 = vld [vmem:[%s7588_s0 + $0x8a8] sm:$0xf]  ;;  %v4972_v30 = vld [vmem:[%s7588_s0 + $0x8b4] sm:$0xf0]  ;;  %v4232_v34 = vor.u32 %v4971_v26, %v4231_v25  ;;  %v4193_v25 = vld [vmem:[%s7588_s0 + $0x858] sm:$0xf0]  ;;  %v4184_v26 = vor.u32 %v4959_v17, %v4183_v14 }
 0x1ee   :  { %2788 = vmatpush.bf16.xpose.msrb.mxu3 %v4068_v33  ;;  %v4241_v33 = vld [vmem:[%s7588_s0 + $0x8b8] sm:$0xf0]  ;;  %v4240_v36 = vor.u32 %v4972_v30, %v4239_v29  ;;  %v4167_v30 = vld [vmem:[%s7588_s0 + $0x820] sm:$0xf] }
 0x1ef   :  { %v4244_v37 = vor.u32 %v4970_v32, %v4241_v33  ;;  %v4955_v32 = vld [vmem:[%s7588_s0 + $0x82c] sm:$0xf0]  ;;  %v4953_v33 = vld [vmem:[%s7588_s0 + $0x824] sm:$0xf] }
 0x1f4   :  { %2750 = vmatpush.bf16.xpose.msrb.mxu0 %v4040_v44  ;;  %v4965_v44 = vld [vmem:[%s7588_s0 + $0x884] sm:$0xf] }
 0x1f5   :  { %2763 = vmatpush.bf16.xpose.msrb.mxu1 %v4044_v46  ;;  %2776 = vmatpush.bf16.xpose.msrb.mxu2 %v4048_v47  ;;  %v4223_v46 = vld [vmem:[%s7588_s0 + $0x888] sm:$0xf]  ;;  %v4968_v47 = vld [vmem:[%s7588_s0 + $0x894] sm:$0xf0]  ;;  %v4220_v3 = vor.u32 %v4965_v44, %v4217_v45  ;;  %v4151_v44 = vld [vmem:[%s7588_s0 + $0x800] sm:$0xf] }
 0x1f6   :  { %2789 = vmatpush.bf16.xpose.msrb.mxu3 %v4052_v49  ;;  %v4966_v49 = vld [vmem:[%s7588_s0 + $0x88c] sm:$0xf]  ;;  %v4224_v52 = vor.u32 %v4968_v47, %v4223_v46  ;;  %v4951_v45 = vld [vmem:[%s7588_s0 + $0x80c] sm:$0xf0]  ;;  %v4949_v46 = vld [vmem:[%s7588_s0 + $0x804] sm:$0xf] }
 0x1f7   :  { %v4228_v54 = vor.u32 %v4966_v49, %v4225_v50  ;;  %v4153_v47 = vld [vmem:[%s7588_s0 + $0x810] sm:$0xf0]  ;;  %v4159_v49 = vld [vmem:[%s7588_s0 + $0x808] sm:$0xf]  ;;  %v4952_v50 = vld [vmem:[%s7588_s0 + $0x814] sm:$0xf0] }
 0x1fc   :  { %2751 = vmatpush.bf16.xpose.msrb.mxu0 %v4024_v60  ;;  %v4199_v60 = vld [vmem:[%s7588_s0 + $0x860] sm:$0xf] }
 0x1fd   :  { %2764 = vmatpush.bf16.xpose.msrb.mxu1 %v4028_v0  ;;  %2777 = vmatpush.bf16.xpose.msrb.mxu2 %v4032_v1  ;;  %v4964_v0 = vld [vmem:[%s7588_s0 + $0x874] sm:$0xf0]  ;;  %v4962_v1 = vld [vmem:[%s7588_s0 + $0x86c] sm:$0xf]  ;;  %v4200_v4 = vor.u32 %v4963_v61, %v4199_v60  ;;  %v4160_v60 = vor.u32 %v4952_v50, %v4159_v49  ;;  %v4993_v49 = vld [vmem:[%s7588_s0 + $0x964] sm:$0xf] }
 0x1fe   :  { %2790 = vmatpush.bf16.xpose.msrb.mxu3 %v4036_v6  ;;  %v4204_v6 = vor.u32 %v4961_v62, %v4201_v31  ;;  %v5010_v61 = vld [vmem:[%s7588_s0 + $0x9ec] sm:$0xf]  ;;  %v4401_v62 = vld [vmem:[%s7588_s0 + $0x9f8] sm:$0xf0]  ;;  %v4329_v50 = vld [vmem:[%s7588_s0 + $0x970] sm:$0xf0] }
 0x200   :  { %v2649_v38 = vpop.f32.mrf.mxu0 }
 0x203   :  { %2752 = vmatmul.bf16.vlgmr.msrb.gmra.mxu0 %v5426_v21  ;;  %v2662_v39 = vpop.f32.mrf.mxu1 }
 0x204   :  { %2796 = vmatpush.bf16.xpose.msra.mxu0 %v4264_v7  ;;  %2778 = vmatmul.bf16.vlgmr.msrb.gmra.mxu2 %v5393_v5  ;;  %v2663_v40 = vadd.f32 %v2662_v39, %v2649_v38  ;;  %v4208_v7 = vor.u32 %v4964_v0, %v4207_v63  ;;  %v4177_v38 = vld [vmem:[%s7588_s0 + $0x838] sm:$0xf0]  ;;  %v4168_v39 = vor.u32 %v4955_v32, %v4167_v30 }
 0x205   :  { %2809 = vmatpush.bf16.xpose.msra.mxu1 %v4268_v8  ;;  %2822 = vmatpush.bf16.xpose.msra.mxu2 %v4272_v9  ;;  %v5094_v9 = vpop.eup %5093 }
 0x206   :  { %2835 = vmatpush.bf16.xpose.msra.mxu3 %v4276_v10  ;;  %2765 = vmatmul.bf16.vlgmr.msrb.gmra.mxu1 %v5428_v22  ;;  %v4212_v10 = vor.u32 %v4962_v1, %v4209_v2  ;;  %v3085_v15 = vrot.slane %v5094_v9, 4  ;;  %v4404_v2 = vor.u32 %v5010_v61, %v4401_v62  ;;  %v4383_v9 = vld [vmem:[%s7588_s0 + $0x9c8] sm:$0xf]  ;;  %v4311_v61 = vld [vmem:[%s7588_s0 + $0x940] sm:$0xf] }
 0x207   :  { %2791 = vmatmul.bf16.vlgmr.msrb.gmra.mxu3 %v5405_v11  ;;  %v2675_v51 = vpop.f32.mrf.mxu2  ;;  %v4991_v62 = vld [vmem:[%s7588_s0 + $0x94c] sm:$0xf0] }
 0x208   :  { %v2676_v53 = vadd.f32 %v2675_v51, %v2663_v40  ;;  %v2651_v56 = vpop.f32.mrf.mxu0  ;;  %v4161_v51 = vld [vmem:[%s7588_s0 + $0x818] sm:$0xf0] }
 0x209   :  { %v4399_v56 = vld [vmem:[%s7588_s0 + $0x9e8] sm:$0xf] }
 0x20a   :  { %v2688_v55 = vpop.f32.mrf.mxu3 }
 0x20b   :  { %v2664_v58 = vpop.f32.mrf.mxu1  ;;  %v2689_v59 = vadd.f32 %v2688_v55, %v2676_v53  ;;  %v5009_v53 = vld [vmem:[%s7588_s0 + $0x9e4] sm:$0xf]  ;;  %v4393_v55 = vld [vmem:[%s7588_s0 + $0x9f0] sm:$0xf0] }
 0x20c   :  { %2797 = vmatpush.bf16.xpose.msra.mxu0 %v4248_v19  ;;  %v4191_v19 = vld [vmem:[%s7588_s0 + $0x848] sm:$0xf]  ;;  %v5012_v58 = vld [vmem:[%s7588_s0 + $0x9f4] sm:$0xf0]  ;;  %v4396_v0 = vor.u32 %v5009_v53, %v4393_v55 }
 0x20d   :  { %2810 = vmatpush.bf16.xpose.msra.mxu1 %v4252_v20  ;;  %2823 = vmatpush.bf16.xpose.msra.mxu2 %v4256_v23  ;;  %5095 = vtanh.f32 %v2689_v59  ;;  %v4960_v20 = vld [vmem:[%s7588_s0 + $0x854] sm:$0xf0]  ;;  %v4156_v59 = vor.u32 %v4949_v46, %v4153_v47  ;;  %v4400_v1 = vor.u32 %v5012_v58, %v4399_v56  ;;  %v4327_v46 = vld [vmem:[%s7588_s0 + $0x960] sm:$0xf]  ;;  %v4995_v47 = vld [vmem:[%s7588_s0 + $0x96c] sm:$0xf0]  ;;  %v4332_v56 = vor.u32 %v4993_v49, %v4329_v50 }
 0x20e   :  { %2836 = vmatpush.bf16.xpose.msra.mxu3 %v4260_v24  ;;  %v4958_v24 = vld [vmem:[%s7588_s0 + $0x84c] sm:$0xf]  ;;  %v4192_v28 = vor.u32 %v4960_v20, %v4191_v19  ;;  %v5001_v19 = vld [vmem:[%s7588_s0 + $0x9a4] sm:$0xf]  ;;  %v4361_v20 = vld [vmem:[%s7588_s0 + $0x9b0] sm:$0xf0]  ;;  %v4328_v53 = vor.u32 %v4995_v47, %v4327_v46 }
 0x20f   :  { %v2677_v8 = vpop.f32.mrf.mxu2  ;;  %v4196_v29 = vor.u32 %v4958_v24, %v4193_v25  ;;  %v4367_v24 = vld [vmem:[%s7588_s0 + $0x9a8] sm:$0xf]  ;;  %v5004_v25 = vld [vmem:[%s7588_s0 + $0x9b4] sm:$0xf0]  ;;  %v5042_v50 = vld [vmem:[%s7588_s0 + $0xaec] sm:$0xf] }
 0x210   :  { %v4377_v8 = vld [vmem:[%s7588_s0 + $0x9d0] sm:$0xf0]  ;;  %v4368_v30 = vor.u32 %v5004_v25, %v4367_v24  ;;  %v4305_v24 = vld [vmem:[%s7588_s0 + $0x938] sm:$0xf0]  ;;  %v5044_v46 = vld [vmem:[%s7588_s0 + $0xaf4] sm:$0xf0] }
 0x212   :  { %v2690_v12 = vpop.f32.mrf.mxu3 }
 0x213   :  { %v5096_v13 = vpop.eup %5095  ;;  %v5006_v12 = vld [vmem:[%s7588_s0 + $0x9cc] sm:$0xf] }
 0x214   :  { %2798 = vmatpush.bf16.xpose.msra.mxu0 %v4232_v34  ;;  %v3086_v16 = vrot.slane %v5096_v13, 3  ;;  %v4169_v34 = vld [vmem:[%s7588_s0 + $0x830] sm:$0xf0]  ;;  %v4385_v13 = vld [vmem:[%s7588_s0 + $0x9d8] sm:$0xf0] }
 0x215   :  { %2811 = vmatpush.bf16.xpose.msra.mxu1 %v4236_v35  ;;  %2824 = vmatpush.bf16.xpose.msra.mxu2 %v4240_v36  ;;  %v4175_v35 = vld [vmem:[%s7588_s0 + $0x828] sm:$0xf]  ;;  %v4956_v36 = vld [vmem:[%s7588_s0 + $0x834] sm:$0xf0]  ;;  %v4172_v40 = vor.u32 %v4953_v33, %v4169_v34  ;;  %v4388_v17 = vor.u32 %v5006_v12, %v4385_v13  ;;  %v4343_v33 = vld [vmem:[%s7588_s0 + $0x980] sm:$0xf] }
 0x216   :  { %2837 = vmatpush.bf16.xpose.msra.mxu3 %v4244_v37  ;;  %v6862_v23 = vsel %vm3099_vm3, %v3085_v15, %v3086_v16  ;;  %v4954_v37 = vld [vmem:[%s7588_s0 + $0x82c] sm:$0xf]  ;;  %v4176_v41 = vor.u32 %v4956_v36, %v4175_v35  ;;  %v4999_v34 = vld [vmem:[%s7588_s0 + $0x98c] sm:$0xf0]  ;;  %v4997_v35 = vld [vmem:[%s7588_s0 + $0x984] sm:$0xf] }
 0x217   :  { %v4180_v42 = vor.u32 %v4954_v37, %v4177_v38  ;;  %v4345_v36 = vld [vmem:[%s7588_s0 + $0x990] sm:$0xf0]  ;;  %v4351_v37 = vld [vmem:[%s7588_s0 + $0x988] sm:$0xf]  ;;  %v5000_v38 = vld [vmem:[%s7588_s0 + $0x994] sm:$0xf0] }
 0x21c   :  { %2799 = vmatpush.bf16.xpose.msra.mxu0 %v4216_v57  ;;  %v4950_v57 = vld [vmem:[%s7588_s0 + $0x80c] sm:$0xf] }
 0x21d   :  { %2812 = vmatpush.bf16.xpose.msra.mxu1 %v4220_v3  ;;  %2825 = vmatpush.bf16.xpose.msra.mxu2 %v4224_v52  ;;  %v4391_v3 = vld [vmem:[%s7588_s0 + $0x9e0] sm:$0xf]  ;;  %v5011_v52 = vld [vmem:[%s7588_s0 + $0x9ec] sm:$0xf0]  ;;  %v4164_v31 = vor.u32 %v4950_v57, %v4161_v51  ;;  %v4335_v57 = vld [vmem:[%s7588_s0 + $0x968] sm:$0xf] }
 0x21e   :  { %2838 = vmatpush.bf16.xpose.msra.mxu3 %v4228_v54  ;;  %v4152_v54 = vor.u32 %v4951_v45, %v4151_v44  ;;  %v4392_v63 = vor.u32 %v5011_v52, %v4391_v3  ;;  %v4352_v44 = vor.u32 %v5000_v38, %v4351_v37  ;;  %v4996_v51 = vld [vmem:[%s7588_s0 + $0x974] sm:$0xf0]  ;;  %v4994_v3 = vld [vmem:[%s7588_s0 + $0x96c] sm:$0xf]  ;;  %v4337_v52 = vld [vmem:[%s7588_s0 + $0x978] sm:$0xf0] }
 0x21f   :  { %v4336_v58 = vor.u32 %v4996_v51, %v4335_v57  ;;  %v4982_v37 = vld [vmem:[%s7588_s0 + $0x90c] sm:$0xf]  ;;  %v4289_v38 = vld [vmem:[%s7588_s0 + $0x918] sm:$0xf0] }
 0x220   :  { %v4529_v57 = vld [vmem:[%s7588_s0 + $0xaf8] sm:$0xf0]  ;;  %v4292_v51 = vor.u32 %v4982_v37, %v4289_v38 }
 0x224   :  { %2800 = vmatpush.bf16.xpose.msra.mxu0 %v4200_v4  ;;  %v4375_v4 = vld [vmem:[%s7588_s0 + $0x9c0] sm:$0xf] }
 0x225   :  { %2813 = vmatpush.bf16.xpose.msra.mxu1 %v4204_v6  ;;  %2826 = vmatpush.bf16.xpose.msra.mxu2 %v4208_v7  ;;  %v5007_v6 = vld [vmem:[%s7588_s0 + $0x9cc] sm:$0xf0]  ;;  %v5005_v7 = vld [vmem:[%s7588_s0 + $0x9c4] sm:$0xf] }
 0x226   :  { %2839 = vmatpush.bf16.xpose.msra.mxu3 %v4212_v10  ;;  %v5008_v10 = vld [vmem:[%s7588_s0 + $0x9d4] sm:$0xf0]  ;;  %v4376_v14 = vor.u32 %v5007_v6, %v4375_v4  ;;  %v4380_v15 = vor.u32 %v5005_v7, %v4377_v8  ;;  %v4321_v4 = vld [vmem:[%s7588_s0 + $0x958] sm:$0xf0]  ;;  %v4312_v6 = vor.u32 %v4991_v62, %v4311_v61  ;;  %v5037_v61 = vld [vmem:[%s7588_s0 + $0xac4] sm:$0xf] }
 0x227   :  { %v4384_v16 = vor.u32 %v5008_v10, %v4383_v9  ;;  %v4505_v62 = vld [vmem:[%s7588_s0 + $0xad0] sm:$0xf0] }
 0x22c   :  { %2801 = vmatpush.bf16.xpose.msra.mxu0 %v4184_v26  ;;  %v5002_v26 = vld [vmem:[%s7588_s0 + $0x9ac] sm:$0xf] }
 0x22d   :  { %2814 = vmatpush.bf16.xpose.msra.mxu1 %v4188_v27  ;;  %2827 = vmatpush.bf16.xpose.msra.mxu2 %v4192_v28  ;;  %v4369_v27 = vld [vmem:[%s7588_s0 + $0x9b8] sm:$0xf0]  ;;  %v4360_v28 = vor.u32 %v5003_v18, %v4359_v48  ;;  %v4297_v48 = vld [vmem:[%s7588_s0 + $0x930] sm:$0xf0]  ;;  %v4303_v18 = vld [vmem:[%s7588_s0 + $0x928] sm:$0xf] }
 0x22e   :  { %2840 = vmatpush.bf16.xpose.msra.mxu3 %v4196_v29  ;;  %v4364_v29 = vor.u32 %v5001_v19, %v4361_v20  ;;  %v4372_v32 = vor.u32 %v5002_v26, %v4369_v27  ;;  %v4988_v19 = vld [vmem:[%s7588_s0 + $0x934] sm:$0xf0]  ;;  %v4986_v20 = vld [vmem:[%s7588_s0 + $0x92c] sm:$0xf] }
 0x234   :  { %2802 = vmatpush.bf16.xpose.msra.mxu0 %v4168_v39  ;;  %v4998_v39 = vld [vmem:[%s7588_s0 + $0x98c] sm:$0xf] }
 0x235   :  { %2815 = vmatpush.bf16.xpose.msra.mxu1 %v4172_v40  ;;  %2828 = vmatpush.bf16.xpose.msra.mxu2 %v4176_v41  ;;  %v4353_v40 = vld [vmem:[%s7588_s0 + $0x998] sm:$0xf0]  ;;  %v4344_v41 = vor.u32 %v4999_v34, %v4343_v33  ;;  %v4981_v33 = vld [vmem:[%s7588_s0 + $0x904] sm:$0xf]  ;;  %v4281_v34 = vld [vmem:[%s7588_s0 + $0x910] sm:$0xf0] }
 0x236   :  { %2841 = vmatpush.bf16.xpose.msra.mxu3 %v4180_v42  ;;  %v4348_v42 = vor.u32 %v4997_v35, %v4345_v36  ;;  %v4356_v45 = vor.u32 %v4998_v39, %v4353_v40  ;;  %v4287_v35 = vld [vmem:[%s7588_s0 + $0x908] sm:$0xf]  ;;  %v4984_v36 = vld [vmem:[%s7588_s0 + $0x914] sm:$0xf0]  ;;  %v4519_v39 = vld [vmem:[%s7588_s0 + $0xae0] sm:$0xf]  ;;  %v4284_v47 = vor.u32 %v4981_v33, %v4281_v34 }
 0x237   :  { %v5043_v40 = vld [vmem:[%s7588_s0 + $0xaec] sm:$0xf0]  ;;  %v4288_v49 = vor.u32 %v4984_v36, %v4287_v35  ;;  %v5030_v34 = vld [vmem:[%s7588_s0 + $0xa8c] sm:$0xf]  ;;  %v4481_v35 = vld [vmem:[%s7588_s0 + $0xa98] sm:$0xf0] }
 0x23c   :  { %2803 = vmatpush.bf16.xpose.msra.mxu0 %v4152_v54 }
 0x23d   :  { %2816 = vmatpush.bf16.xpose.msra.mxu1 %v4156_v59  ;;  %2829 = vmatpush.bf16.xpose.msra.mxu2 %v4160_v60  ;;  %v4340_v59 = vor.u32 %v4994_v3, %v4337_v52  ;;  %v4520_v3 = vor.u32 %v5043_v40, %v4519_v39 }
 0x23e   :  { %2842 = vmatpush.bf16.xpose.msra.mxu3 %v4164_v31  ;;  %v4989_v31 = vld [vmem:[%s7588_s0 + $0x944] sm:$0xf] }
 0x240   :  { %v7042_v54 = vpop.f32.mrf.mxu0 }
 0x243   :  { %2804 = vmatmul.bf16.vlgmr.msra.gmra.mxu0 %v5426_v21  ;;  %v7044_v55 = vpop.f32.mrf.mxu1 }
 0x244   :  { %2848 = vmatpush.bf16.xpose.msrb.mxu0 %v4392_v63  ;;  %2830 = vmatmul.bf16.vlgmr.msra.gmra.mxu2 %v5393_v5  ;;  %v4313_v63 = vld [vmem:[%s7588_s0 + $0x950] sm:$0xf0] }
 0x245   :  { %2861 = vmatpush.bf16.xpose.msrb.mxu1 %v4396_v0  ;;  %2874 = vmatpush.bf16.xpose.msrb.mxu2 %v4400_v1  ;;  %v4319_v0 = vld [vmem:[%s7588_s0 + $0x948] sm:$0xf]  ;;  %v4992_v1 = vld [vmem:[%s7588_s0 + $0x954] sm:$0xf0]  ;;  %v4316_v9 = vor.u32 %v4989_v31, %v4313_v63 }
 0x246   :  { %2887 = vmatpush.bf16.xpose.msrb.mxu3 %v4404_v2  ;;  %2817 = vmatmul.bf16.vlgmr.msra.gmra.mxu1 %v5428_v22  ;;  %v4990_v2 = vld [vmem:[%s7588_s0 + $0x94c] sm:$0xf]  ;;  %v4320_v10 = vor.u32 %v4992_v1, %v4319_v0  ;;  %v4511_v31 = vld [vmem:[%s7588_s0 + $0xac8] sm:$0xf]  ;;  %v5040_v63 = vld [vmem:[%s7588_s0 + $0xad4] sm:$0xf0] }
 0x247   :  { %2843 = vmatmul.bf16.vlgmr.msra.gmra.mxu3 %v5405_v11  ;;  %v7046_v60 = vpop.f32.mrf.mxu2  ;;  %v4324_v13 = vor.u32 %v4990_v2, %v4321_v4  ;;  %v5038_v0 = vld [vmem:[%s7588_s0 + $0xacc] sm:$0xf]  ;;  %v4513_v1 = vld [vmem:[%s7588_s0 + $0xad8] sm:$0xf0]  ;;  %v4508_v4 = vor.u32 %v5037_v61, %v4505_v62 }
 0x248   :  { %v2703_v8 = vpop.f32.mrf.mxu0 }
 0x249   :  { %v4516_v8 = vor.u32 %v5038_v0, %v4513_v1  ;;  %v4439_v1 = vld [vmem:[%s7588_s0 + $0xa40] sm:$0xf] }
 0x24a   :  { %v7072_v7 = vpop.f32.mrf.mxu3 }
 0x24b   :  { %v2716_v12 = vpop.f32.mrf.mxu1 }
 0x24c   :  { %2849 = vmatpush.bf16.xpose.msrb.mxu0 %v4376_v14  ;;  %v5033_v12 = vld [vmem:[%s7588_s0 + $0xaa4] sm:$0xf] }
 0x24d   :  { %2862 = vmatpush.bf16.xpose.msrb.mxu1 %v4380_v15  ;;  %2875 = vmatpush.bf16.xpose.msrb.mxu2 %v4384_v16  ;;  %v4295_v15 = vld [vmem:[%s7588_s0 + $0x920] sm:$0xf]  ;;  %v4987_v16 = vld [vmem:[%s7588_s0 + $0x92c] sm:$0xf0] }
 0x24e   :  { %2888 = vmatpush.bf16.xpose.msrb.mxu3 %v4388_v17  ;;  %v4985_v17 = vld [vmem:[%s7588_s0 + $0x924] sm:$0xf]  ;;  %v4296_v25 = vor.u32 %v4987_v16, %v4295_v15  ;;  %v5036_v15 = vld [vmem:[%s7588_s0 + $0xab4] sm:$0xf0]  ;;  %v2715_v16 = vadd.f32 %v7044_v55, %v7042_v54  ;;  %v4471_v54 = vld [vmem:[%s7588_s0 + $0xa80] sm:$0xf] }
 0x24f   :  { %v2729_v14 = vpop.f32.mrf.mxu2  ;;  %v4300_v27 = vor.u32 %v4985_v17, %v4297_v48  ;;  %v5034_v17 = vld [vmem:[%s7588_s0 + $0xaac] sm:$0xf]  ;;  %v4497_v48 = vld [vmem:[%s7588_s0 + $0xab8] sm:$0xf0]  ;;  %v5031_v55 = vld [vmem:[%s7588_s0 + $0xa8c] sm:$0xf0] }
 0x250   :  { %v4495_v14 = vld [vmem:[%s7588_s0 + $0xaa8] sm:$0xf]  ;;  %v4472_v36 = vor.u32 %v5031_v55, %v4471_v54  ;;  %v4433_v54 = vld [vmem:[%s7588_s0 + $0xa38] sm:$0xf0] }
 0x252   :  { %v2742_v26 = vpop.f32.mrf.mxu3 }
 0x253   :  { %v2728_v26 = vadd.f32 %v7046_v60, %v2715_v16  ;;  %v4473_v60 = vld [vmem:[%s7588_s0 + $0xa90] sm:$0xf0] }
 0x254   :  { %2850 = vmatpush.bf16.xpose.msrb.mxu0 %v4360_v28  ;;  %v4304_v28 = vor.u32 %v4988_v19, %v4303_v18 }
 0x255   :  { %2863 = vmatpush.bf16.xpose.msrb.mxu1 %v4364_v29  ;;  %2876 = vmatpush.bf16.xpose.msrb.mxu2 %v4368_v30  ;;  %v4308_v29 = vor.u32 %v4986_v20, %v4305_v24  ;;  %v4279_v30 = vld [vmem:[%s7588_s0 + $0x900] sm:$0xf]  ;;  %v4496_v20 = vor.u32 %v5036_v15, %v4495_v14  ;;  %v4500_v24 = vor.u32 %v5034_v17, %v4497_v48  ;;  %v4449_v14 = vld [vmem:[%s7588_s0 + $0xa58] sm:$0xf0] }
 0x256   :  { %2889 = vmatpush.bf16.xpose.msrb.mxu3 %v4372_v32  ;;  %v4983_v32 = vld [vmem:[%s7588_s0 + $0x90c] sm:$0xf0]  ;;  %v2741_v33 = vadd.f32 %v7072_v7, %v2728_v26  ;;  %v5020_v26 = vld [vmem:[%s7588_s0 + $0xa34] sm:$0xf0] }
 0x258   :  { %5097 = vtanh.f32 %v2741_v33  ;;  %v5013_v33 = vld [vmem:[%s7588_s0 + $0xa04] sm:$0xf] }
 0x25c   :  { %2851 = vmatpush.bf16.xpose.msrb.mxu0 %v4344_v41  ;;  %v5041_v41 = vld [vmem:[%s7588_s0 + $0xae4] sm:$0xf] }
 0x25d   :  { %2864 = vmatpush.bf16.xpose.msrb.mxu1 %v4348_v42  ;;  %2877 = vmatpush.bf16.xpose.msrb.mxu2 %v4352_v44  ;;  %v4280_v42 = vor.u32 %v4983_v32, %v4279_v30  ;;  %v4521_v44 = vld [vmem:[%s7588_s0 + $0xaf0] sm:$0xf0]  ;;  %v4479_v30 = vld [vmem:[%s7588_s0 + $0xa88] sm:$0xf]  ;;  %v5032_v32 = vld [vmem:[%s7588_s0 + $0xa94] sm:$0xf0] }
 0x25e   :  { %2890 = vmatpush.bf16.xpose.msrb.mxu3 %v4356_v45  ;;  %v4527_v45 = vld [vmem:[%s7588_s0 + $0xae8] sm:$0xf]  ;;  %v4524_v52 = vor.u32 %v5041_v41, %v4521_v44  ;;  %v4480_v39 = vor.u32 %v5032_v32, %v4479_v30  ;;  %v4484_v41 = vor.u32 %v5030_v34, %v4481_v35  ;;  %v4407_v30 = vld [vmem:[%s7588_s0 + $0xa00] sm:$0xf]  ;;  %v5015_v32 = vld [vmem:[%s7588_s0 + $0xa0c] sm:$0xf0] }
 0x25f   :  { %v4409_v34 = vld [vmem:[%s7588_s0 + $0xa10] sm:$0xf0]  ;;  %v4415_v35 = vld [vmem:[%s7588_s0 + $0xa08] sm:$0xf] }
 0x264   :  { %2852 = vmatpush.bf16.xpose.msrb.mxu0 %v4328_v53  ;;  %v4528_v53 = vor.u32 %v5044_v46, %v4527_v45  ;;  %v4455_v46 = vld [vmem:[%s7588_s0 + $0xa60] sm:$0xf] }
 0x265   :  { %2865 = vmatpush.bf16.xpose.msrb.mxu1 %v4332_v56  ;;  %2878 = vmatpush.bf16.xpose.msrb.mxu2 %v4336_v58  ;;  %v4532_v56 = vor.u32 %v5042_v50, %v4529_v57  ;;  %v4503_v58 = vld [vmem:[%s7588_s0 + $0xac0] sm:$0xf]  ;;  %v4457_v50 = vld [vmem:[%s7588_s0 + $0xa70] sm:$0xf0]  ;;  %v4463_v57 = vld [vmem:[%s7588_s0 + $0xa68] sm:$0xf] }
 0x266   :  { %2891 = vmatpush.bf16.xpose.msrb.mxu3 %v4340_v59  ;;  %v5039_v59 = vld [vmem:[%s7588_s0 + $0xacc] sm:$0xf0] }
 0x267   :  { %v4504_v2 = vor.u32 %v5039_v59, %v4503_v58 }
 0x26c   :  { %2853 = vmatpush.bf16.xpose.msrb.mxu0 %v4312_v6  ;;  %v4512_v6 = vor.u32 %v5040_v63, %v4511_v31 }
 0x26d   :  { %2866 = vmatpush.bf16.xpose.msrb.mxu1 %v4316_v9  ;;  %2879 = vmatpush.bf16.xpose.msrb.mxu2 %v4320_v10  ;;  %v4487_v9 = vld [vmem:[%s7588_s0 + $0xaa0] sm:$0xf]  ;;  %v5035_v10 = vld [vmem:[%s7588_s0 + $0xaac] sm:$0xf0] }
 0x26e   :  { %2892 = vmatpush.bf16.xpose.msrb.mxu3 %v4324_v13  ;;  %v4489_v13 = vld [vmem:[%s7588_s0 + $0xab0] sm:$0xf0]  ;;  %v4488_v18 = vor.u32 %v5035_v10, %v4487_v9  ;;  %v4447_v9 = vld [vmem:[%s7588_s0 + $0xa48] sm:$0xf]  ;;  %v5024_v10 = vld [vmem:[%s7588_s0 + $0xa54] sm:$0xf0] }
 0x26f   :  { %v4492_v19 = vor.u32 %v5033_v12, %v4489_v13  ;;  %v5022_v13 = vld [vmem:[%s7588_s0 + $0xa4c] sm:$0xf] }
 0x274   :  { %2854 = vmatpush.bf16.xpose.msrb.mxu0 %v4296_v25 }
 0x275   :  { %2867 = vmatpush.bf16.xpose.msrb.mxu1 %v4300_v27  ;;  %2880 = vmatpush.bf16.xpose.msrb.mxu2 %v4304_v28  ;;  %v5029_v28 = vld [vmem:[%s7588_s0 + $0xa84] sm:$0xf] }
 0x276   :  { %2893 = vmatpush.bf16.xpose.msrb.mxu3 %v4308_v29  ;;  %v4476_v38 = vor.u32 %v5029_v28, %v4473_v60 }
 0x27c   :  { %2855 = vmatpush.bf16.xpose.msrb.mxu0 %v4280_v42 }
 0x27d   :  { %2868 = vmatpush.bf16.xpose.msrb.mxu1 %v4284_v47  ;;  %2881 = vmatpush.bf16.xpose.msrb.mxu2 %v4288_v49  ;;  %v5027_v47 = vld [vmem:[%s7588_s0 + $0xa6c] sm:$0xf0]  ;;  %v5025_v49 = vld [vmem:[%s7588_s0 + $0xa64] sm:$0xf] }
 0x27e   :  { %2894 = vmatpush.bf16.xpose.msrb.mxu3 %v4292_v51  ;;  %v5028_v51 = vld [vmem:[%s7588_s0 + $0xa74] sm:$0xf0]  ;;  %v4460_v58 = vor.u32 %v5025_v49, %v4457_v50  ;;  %v5074_v49 = vld [vmem:[%s7588_s0 + $0xbec] sm:$0xf]  ;;  %v4657_v50 = vld [vmem:[%s7588_s0 + $0xbf8] sm:$0xf0] }
 0x27f   :  { %v4464_v59 = vor.u32 %v5028_v51, %v4463_v57 }
 0x280   :  { %v2753_v25 = vpop.f32.mrf.mxu0 }
 0x283   :  { %2856 = vmatmul.bf16.vlgmr.msrb.gmra.mxu0 %v5426_v21  ;;  %v2766_v27 = vpop.f32.mrf.mxu1 }
 0x284   :  { %2900 = vmatpush.bf16.xpose.msra.mxu0 %v4520_v3  ;;  %2882 = vmatmul.bf16.vlgmr.msrb.gmra.mxu2 %v5393_v5  ;;  %v2767_v29 = vadd.f32 %v2766_v27, %v2753_v25  ;;  %v5026_v3 = vld [vmem:[%s7588_s0 + $0xa6c] sm:$0xf]  ;;  %v4431_v25 = vld [vmem:[%s7588_s0 + $0xa28] sm:$0xf] }
 0x285   :  { %2913 = vmatpush.bf16.xpose.msra.mxu1 %v4524_v52  ;;  %2926 = vmatpush.bf16.xpose.msra.mxu2 %v4528_v53  ;;  %v4465_v52 = vld [vmem:[%s7588_s0 + $0xa78] sm:$0xf0]  ;;  %v4456_v53 = vor.u32 %v5027_v47, %v4455_v46  ;;  %v5018_v27 = vld [vmem:[%s7588_s0 + $0xa2c] sm:$0xf]  ;;  %v4412_v46 = vor.u32 %v5013_v33, %v4409_v34  ;;  %v5057_v33 = vld [vmem:[%s7588_s0 + $0xb64] sm:$0xf] }
 0x286   :  { %2939 = vmatpush.bf16.xpose.msra.mxu3 %v4532_v56  ;;  %2869 = vmatmul.bf16.vlgmr.msrb.gmra.mxu1 %v5428_v22  ;;  %v5098_v56 = vpop.eup %5097  ;;  %v4468_v62 = vor.u32 %v5026_v3, %v4465_v52  ;;  %v4436_v60 = vor.u32 %v5018_v27, %v4433_v54  ;;  %v5062_v27 = vld [vmem:[%s7588_s0 + $0xb8c] sm:$0xf]  ;;  %v4609_v54 = vld [vmem:[%s7588_s0 + $0xb98] sm:$0xf0]  ;;  %v4585_v34 = vld [vmem:[%s7588_s0 + $0xb70] sm:$0xf0] }
 0x287   :  { %2895 = vmatmul.bf16.vlgmr.msrb.gmra.mxu3 %v5405_v11  ;;  %v2779_v37 = vpop.f32.mrf.mxu2  ;;  %v3087_v0 = vrot.slane %v5098_v56, 2  ;;  %v4631_v56 = vld [vmem:[%s7588_s0 + $0xbc0] sm:$0xf] }
 0x288   :  { %v2780_v40 = vadd.f32 %v2779_v37, %v2767_v29  ;;  %v2755_v44 = vpop.f32.mrf.mxu0  ;;  %v4432_v29 = vor.u32 %v5020_v26, %v4431_v25  ;;  %v5014_v37 = vld [vmem:[%s7588_s0 + $0xa0c] sm:$0xf]  ;;  %v4607_v25 = vld [vmem:[%s7588_s0 + $0xb88] sm:$0xf]  ;;  %v5064_v26 = vld [vmem:[%s7588_s0 + $0xb94] sm:$0xf0] }
 0x289   :  { %v4649_v44 = vld [vmem:[%s7588_s0 + $0xbf0] sm:$0xf0] }
 0x28a   :  { %v2792_v42 = vpop.f32.mrf.mxu3 }
 0x28b   :  { %v2768_v45 = vpop.f32.mrf.mxu1  ;;  %v2793_v7 = vadd.f32 %v2792_v42, %v2780_v40  ;;  %v5075_v40 = vld [vmem:[%s7588_s0 + $0xbec] sm:$0xf0]  ;;  %v4408_v42 = vor.u32 %v5015_v32, %v4407_v30  ;;  %v4583_v30 = vld [vmem:[%s7588_s0 + $0xb60] sm:$0xf] }
 0x28c   :  { %2901 = vmatpush.bf16.xpose.msra.mxu0 %v4504_v2  ;;  %v4655_v45 = vld [vmem:[%s7588_s0 + $0xbe8] sm:$0xf]  ;;  %v5059_v32 = vld [vmem:[%s7588_s0 + $0xb6c] sm:$0xf0] }
 0x28d   :  { %2914 = vmatpush.bf16.xpose.msra.mxu1 %v4508_v4  ;;  %2927 = vmatpush.bf16.xpose.msra.mxu2 %v4512_v6  ;;  %5099 = vtanh.f32 %v2793_v7  ;;  %v5023_v4 = vld [vmem:[%s7588_s0 + $0xa4c] sm:$0xf0]  ;;  %v5021_v6 = vld [vmem:[%s7588_s0 + $0xa44] sm:$0xf]  ;;  %v5076_v7 = vld [vmem:[%s7588_s0 + $0xbf4] sm:$0xf0] }
 0x28e   :  { %2940 = vmatpush.bf16.xpose.msra.mxu3 %v4516_v8  ;;  %v4441_v8 = vld [vmem:[%s7588_s0 + $0xa50] sm:$0xf0]  ;;  %v4440_v16 = vor.u32 %v5023_v4, %v4439_v1  ;;  %v4656_v52 = vor.u32 %v5076_v7, %v4655_v45 }
 0x28f   :  { %v2781_v61 = vpop.f32.mrf.mxu2  ;;  %v4444_v48 = vor.u32 %v5021_v6, %v4441_v8  ;;  %v4615_v8 = vld [vmem:[%s7588_s0 + $0xba0] sm:$0xf] }
 0x290   :  { %v4633_v61 = vld [vmem:[%s7588_s0 + $0xbd0] sm:$0xf0] }
 0x292   :  { %v2794_v31 = vpop.f32.mrf.mxu3 }
 0x293   :  { %v5100_v63 = vpop.eup %5099  ;;  %v5072_v31 = vld [vmem:[%s7588_s0 + $0xbd4] sm:$0xf0] }
 0x294   :  { %2902 = vmatpush.bf16.xpose.msra.mxu0 %v4488_v18  ;;  %v3088_v2 = vrot.slane %v5100_v63, 1  ;;  %v4448_v18 = vor.u32 %v5024_v10, %v4447_v9  ;;  %v5070_v63 = vld [vmem:[%s7588_s0 + $0xbcc] sm:$0xf]  ;;  %v5067_v9 = vld [vmem:[%s7588_s0 + $0xbac] sm:$0xf0] }
 0x295   :  { %2915 = vmatpush.bf16.xpose.msra.mxu1 %v4492_v19  ;;  %2928 = vmatpush.bf16.xpose.msra.mxu2 %v4496_v20  ;;  %v4452_v19 = vor.u32 %v5022_v13, %v4449_v14  ;;  %v4423_v20 = vld [vmem:[%s7588_s0 + $0xa20] sm:$0xf]  ;;  %v5065_v10 = vld [vmem:[%s7588_s0 + $0xba4] sm:$0xf]  ;;  %v4623_v13 = vld [vmem:[%s7588_s0 + $0xba8] sm:$0xf] }
 0x296   :  { %2941 = vmatpush.bf16.xpose.msra.mxu3 %v4500_v24  ;;  %v3102_v12 = vsel %vm3101_vm4, %v3087_v0, %v3088_v2  ;;  %v4425_v24 = vld [vmem:[%s7588_s0 + $0xa30] sm:$0xf0]  ;;  %v4641_v0 = vld [vmem:[%s7588_s0 + $0xbd8] sm:$0xf0]  ;;  %v5068_v14 = vld [vmem:[%s7588_s0 + $0xbb4] sm:$0xf0] }
 0x297   :  { %v3104_v15 = vsel %vm3103_vm5, %v6862_v23, %v3102_v12  ;;  %v5019_v23 = vld [vmem:[%s7588_s0 + $0xa2c] sm:$0xf0]  ;;  %v4644_v6 = vor.u32 %v5070_v63, %v4641_v0  ;;  %v4617_v12 = vld [vmem:[%s7588_s0 + $0xbb0] sm:$0xf0] }
 0x298   :  { %v3106_v17 = vsel %vm3105_vm6, %v6471_v43, %v3104_v15  ;;  %v5017_v43 = vld [vmem:[%s7588_s0 + $0xa24] sm:$0xf]  ;;  %v4424_v55 = vor.u32 %v5019_v23, %v4423_v20  ;;  %v5066_v15 = vld [vmem:[%s7588_s0 + $0xbac] sm:$0xf]  ;;  %v4599_v20 = vld [vmem:[%s7588_s0 + $0xb80] sm:$0xf] }
 0x299   :  { %3115 = vst [vmem:[%s7590_s2] sm:$0xff] %v3106_v17  ;;  %v4428_v28 = vor.u32 %v5017_v43, %v4425_v24  ;;  %v4616_v17 = vor.u32 %v5067_v9, %v4615_v8  ;;  %v5063_v23 = vld [vmem:[%s7588_s0 + $0xb8c] sm:$0xf0]  ;;  %v5061_v43 = vld [vmem:[%s7588_s0 + $0xb84] sm:$0xf]  ;;  %v4601_v24 = vld [vmem:[%s7588_s0 + $0xb90] sm:$0xf0] }
 0x29c   :  { %2903 = vmatpush.bf16.xpose.msra.mxu0 %v4472_v36  ;;  %v5016_v36 = vld [vmem:[%s7588_s0 + $0xa14] sm:$0xf0] }
 0x29d   :  { %2916 = vmatpush.bf16.xpose.msra.mxu1 %v4476_v38  ;;  %2929 = vmatpush.bf16.xpose.msra.mxu2 %v4480_v39  ;;  %v4417_v38 = vld [vmem:[%s7588_s0 + $0xa18] sm:$0xf0]  ;;  %v4647_v39 = vld [vmem:[%s7588_s0 + $0xbe0] sm:$0xf]  ;;  %v4416_v47 = vor.u32 %v5016_v36, %v4415_v35  ;;  %v4591_v35 = vld [vmem:[%s7588_s0 + $0xb68] sm:$0xf] }
 0x29e   :  { %2942 = vmatpush.bf16.xpose.msra.mxu3 %v4484_v41  ;;  %v5073_v41 = vld [vmem:[%s7588_s0 + $0xbe4] sm:$0xf]  ;;  %v4420_v57 = vor.u32 %v5014_v37, %v4417_v38  ;;  %v4648_v51 = vor.u32 %v5075_v40, %v4647_v39  ;;  %v5060_v36 = vld [vmem:[%s7588_s0 + $0xb74] sm:$0xf0]  ;;  %v5058_v39 = vld [vmem:[%s7588_s0 + $0xb6c] sm:$0xf] }
 0x29f   :  { %v4652_v3 = vor.u32 %v5073_v41, %v4649_v44  ;;  %v4593_v40 = vld [vmem:[%s7588_s0 + $0xb78] sm:$0xf0]  ;;  %v4588_v44 = vor.u32 %v5057_v33, %v4585_v34  ;;  %v4592_v45 = vor.u32 %v5060_v36, %v4591_v35  ;;  %v5082_v35 = vld [vmem:[%s7588_s0 + $0xc2c] sm:$0xf] }
 0x2a0   :  { %v4596_v7 = vor.u32 %v5058_v39, %v4593_v40  ;;  %v4689_v36 = vld [vmem:[%s7588_s0 + $0xc38] sm:$0xf0] }
 0x2a4   :  { %2904 = vmatpush.bf16.xpose.msra.mxu0 %v4456_v53  ;;  %v4660_v53 = vor.u32 %v5074_v49, %v4657_v50  ;;  %v5053_v49 = vld [vmem:[%s7588_s0 + $0xb44] sm:$0xf] }
 0x2a5   :  { %2917 = vmatpush.bf16.xpose.msra.mxu1 %v4460_v58  ;;  %2930 = vmatpush.bf16.xpose.msra.mxu2 %v4464_v59  ;;  %v5071_v58 = vld [vmem:[%s7588_s0 + $0xbcc] sm:$0xf0]  ;;  %v5069_v59 = vld [vmem:[%s7588_s0 + $0xbc4] sm:$0xf] }
 0x2a6   :  { %2943 = vmatpush.bf16.xpose.msra.mxu3 %v4468_v62  ;;  %v4639_v62 = vld [vmem:[%s7588_s0 + $0xbc8] sm:$0xf]  ;;  %v4632_v1 = vor.u32 %v5071_v58, %v4631_v56  ;;  %v4636_v2 = vor.u32 %v5069_v59, %v4633_v61  ;;  %v5054_v59 = vld [vmem:[%s7588_s0 + $0xb4c] sm:$0xf]  ;;  %v4577_v61 = vld [vmem:[%s7588_s0 + $0xb58] sm:$0xf0] }
 0x2a7   :  { %v4640_v4 = vor.u32 %v5072_v31, %v4639_v62 }
 0x2ac   :  { %2905 = vmatpush.bf16.xpose.msra.mxu0 %v4440_v16  ;;  %v4625_v16 = vld [vmem:[%s7588_s0 + $0xbb8] sm:$0xf0] }
 0x2ad   :  { %2918 = vmatpush.bf16.xpose.msra.mxu1 %v4444_v48  ;;  %2931 = vmatpush.bf16.xpose.msra.mxu2 %v4448_v18  ;;  %v4620_v48 = vor.u32 %v5065_v10, %v4617_v12  ;;  %v4624_v18 = vor.u32 %v5068_v14, %v4623_v13  ;;  %v4553_v10 = vld [vmem:[%s7588_s0 + $0xb30] sm:$0xf0]  ;;  %v4559_v12 = vld [vmem:[%s7588_s0 + $0xb28] sm:$0xf]  ;;  %v5052_v13 = vld [vmem:[%s7588_s0 + $0xb34] sm:$0xf0] }
 0x2ae   :  { %2944 = vmatpush.bf16.xpose.msra.mxu3 %v4452_v19  ;;  %v4628_v19 = vor.u32 %v5066_v15, %v4625_v16  ;;  %v5050_v14 = vld [vmem:[%s7588_s0 + $0xb2c] sm:$0xf]  ;;  %v4561_v15 = vld [vmem:[%s7588_s0 + $0xb38] sm:$0xf0] }
 0x2b4   :  { %2906 = vmatpush.bf16.xpose.msra.mxu0 %v4424_v55  ;;  %v4600_v55 = vor.u32 %v5063_v23, %v4599_v20  ;;  %v5047_v20 = vld [vmem:[%s7588_s0 + $0xb0c] sm:$0xf0]  ;;  %v5045_v23 = vld [vmem:[%s7588_s0 + $0xb04] sm:$0xf] }
 0x2b5   :  { %2919 = vmatpush.bf16.xpose.msra.mxu1 %v4428_v28  ;;  %2932 = vmatpush.bf16.xpose.msra.mxu2 %v4432_v29  ;;  %v4604_v28 = vor.u32 %v5061_v43, %v4601_v24  ;;  %v4608_v29 = vor.u32 %v5064_v26, %v4607_v25  ;;  %v4537_v43 = vld [vmem:[%s7588_s0 + $0xb10] sm:$0xf0]  ;;  %v4543_v24 = vld [vmem:[%s7588_s0 + $0xb08] sm:$0xf]  ;;  %v5048_v25 = vld [vmem:[%s7588_s0 + $0xb14] sm:$0xf0] }
 0x2b6   :  { %2945 = vmatpush.bf16.xpose.msra.mxu3 %v4436_v60  ;;  %v4612_v60 = vor.u32 %v5062_v27, %v4609_v54  ;;  %v5046_v26 = vld [vmem:[%s7588_s0 + $0xb0c] sm:$0xf]  ;;  %v4545_v27 = vld [vmem:[%s7588_s0 + $0xb18] sm:$0xf0]  ;;  %v4687_v54 = vld [vmem:[%s7588_s0 + $0xc28] sm:$0xf]  ;;  %v4540_v33 = vor.u32 %v5045_v23, %v4537_v43  ;;  %v4544_v34 = vor.u32 %v5048_v25, %v4543_v24 }
 0x2bc   :  { %2907 = vmatpush.bf16.xpose.msra.mxu0 %v4408_v42  ;;  %v4584_v42 = vor.u32 %v5059_v32, %v4583_v30  ;;  %v5081_v30 = vld [vmem:[%s7588_s0 + $0xc24] sm:$0xf]  ;;  %v4681_v32 = vld [vmem:[%s7588_s0 + $0xc30] sm:$0xf0] }
 0x2bd   :  { %2920 = vmatpush.bf16.xpose.msra.mxu1 %v4412_v46  ;;  %2933 = vmatpush.bf16.xpose.msra.mxu2 %v4416_v47  ;;  %v4567_v46 = vld [vmem:[%s7588_s0 + $0xb40] sm:$0xf]  ;;  %v5055_v47 = vld [vmem:[%s7588_s0 + $0xb4c] sm:$0xf0]  ;;  %v4684_v40 = vor.u32 %v5081_v30, %v4681_v32 }
 0x2be   :  { %2946 = vmatpush.bf16.xpose.msra.mxu3 %v4420_v57  ;;  %v4568_v62 = vor.u32 %v5055_v47, %v4567_v46  ;;  %v5077_v46 = vld [vmem:[%s7588_s0 + $0xc04] sm:$0xf]  ;;  %v4665_v47 = vld [vmem:[%s7588_s0 + $0xc10] sm:$0xf0] }
 0x2c0   :  { %v2805_v37 = vpop.f32.mrf.mxu0 }
 0x2c3   :  { %2908 = vmatmul.bf16.vlgmr.msra.gmra.mxu0 %v5426_v21  ;;  %v2818_v38 = vpop.f32.mrf.mxu1 }
 0x2c4   :  { %2952 = vmatpush.bf16.xpose.msrb.mxu0 %v4648_v51  ;;  %2934 = vmatmul.bf16.vlgmr.msra.gmra.mxu2 %v5393_v5  ;;  %v2819_v41 = vadd.f32 %v2818_v38, %v2805_v37  ;;  %v4569_v51 = vld [vmem:[%s7588_s0 + $0xb50] sm:$0xf0]  ;;  %v4548_v37 = vor.u32 %v5046_v26, %v4545_v27 }
 0x2c5   :  { %2965 = vmatpush.bf16.xpose.msrb.mxu1 %v4652_v3  ;;  %2978 = vmatpush.bf16.xpose.msrb.mxu2 %v4656_v52  ;;  %v4575_v3 = vld [vmem:[%s7588_s0 + $0xb48] sm:$0xf]  ;;  %v5056_v52 = vld [vmem:[%s7588_s0 + $0xb54] sm:$0xf0]  ;;  %v4572_v63 = vor.u32 %v5053_v49, %v4569_v51  ;;  %v5078_v49 = vld [vmem:[%s7588_s0 + $0xc0c] sm:$0xf] }
 0x2c6   :  { %2991 = vmatpush.bf16.xpose.msrb.mxu3 %v4660_v53  ;;  %2921 = vmatmul.bf16.vlgmr.msra.gmra.mxu1 %v5428_v22  ;;  %v4576_v0 = vor.u32 %v5056_v52, %v4575_v3  ;;  %v4668_v3 = vor.u32 %v5077_v46, %v4665_v47 }
 0x2c7   :  { %2947 = vmatmul.bf16.vlgmr.msra.gmra.mxu3 %v5405_v11  ;;  %v2831_v50 = vpop.f32.mrf.mxu2 }
 0x2c8   :  { %v2832_v53 = vadd.f32 %v2831_v50, %v2819_v41  ;;  %v2807_v56 = vpop.f32.mrf.mxu0  ;;  %v4692_v41 = vor.u32 %v5082_v35, %v4689_v36  ;;  %v4673_v50 = vld [vmem:[%s7588_s0 + $0xc18] sm:$0xf0] }
 0x2c9   :  { %v4676_v52 = vor.u32 %v5078_v49, %v4673_v50 }
 0x2ca   :  { %v2844_v57 = vpop.f32.mrf.mxu3 }
 0x2cb   :  { %v2820_v58 = vpop.f32.mrf.mxu1  ;;  %v7476_v31 = vadd.f32 %v2844_v57, %v2832_v53 }
 0x2cc   :  { %2953 = vmatpush.bf16.xpose.msrb.mxu0 %v4632_v1  ;;  %v4580_v1 = vor.u32 %v5054_v59, %v4577_v61 }
 0x2cd   :  { %2966 = vmatpush.bf16.xpose.msrb.mxu1 %v4636_v2  ;;  %2979 = vmatpush.bf16.xpose.msrb.mxu2 %v4640_v4  ;;  %v4551_v2 = vld [vmem:[%s7588_s0 + $0xb20] sm:$0xf]  ;;  %v5051_v4 = vld [vmem:[%s7588_s0 + $0xb2c] sm:$0xf0] }
 0x2ce   :  { %2992 = vmatpush.bf16.xpose.msrb.mxu3 %v4644_v6  ;;  %v5049_v6 = vld [vmem:[%s7588_s0 + $0xb24] sm:$0xf]  ;;  %v4552_v16 = vor.u32 %v5051_v4, %v4551_v2 }
 0x2cf   :  { %v2833_v8 = vpop.f32.mrf.mxu2 }
 0x2d2   :  { %v2846_v9 = vpop.f32.mrf.mxu3 }
 0x2d4   :  { %2954 = vmatpush.bf16.xpose.msrb.mxu0 %v4616_v17  ;;  %v4556_v17 = vor.u32 %v5049_v6, %v4553_v10 }
 0x2d5   :  { %2967 = vmatpush.bf16.xpose.msrb.mxu1 %v4620_v48  ;;  %2980 = vmatpush.bf16.xpose.msrb.mxu2 %v4624_v18  ;;  %v4560_v48 = vor.u32 %v5052_v13, %v4559_v12  ;;  %v4564_v18 = vor.u32 %v5050_v14, %v4561_v15 }
 0x2d6   :  { %2993 = vmatpush.bf16.xpose.msrb.mxu3 %v4628_v19  ;;  %v4535_v19 = vld [vmem:[%s7588_s0 + $0xb00] sm:$0xf] }
 0x2dc   :  { %2955 = vmatpush.bf16.xpose.msrb.mxu0 %v4600_v55  ;;  %v5084_v55 = vld [vmem:[%s7588_s0 + $0xc34] sm:$0xf0] }
 0x2dd   :  { %2968 = vmatpush.bf16.xpose.msrb.mxu1 %v4604_v28  ;;  %2981 = vmatpush.bf16.xpose.msrb.mxu2 %v4608_v29  ;;  %v4679_v28 = vld [vmem:[%s7588_s0 + $0xc20] sm:$0xf]  ;;  %v4536_v29 = vor.u32 %v5047_v20, %v4535_v19  ;;  %v4688_v38 = vor.u32 %v5084_v55, %v4687_v54 }
 0x2de   :  { %2994 = vmatpush.bf16.xpose.msrb.mxu3 %v4612_v60  ;;  %v5083_v60 = vld [vmem:[%s7588_s0 + $0xc2c] sm:$0xf0] }
 0x2df   :  { %v4680_v39 = vor.u32 %v5083_v60, %v4679_v28 }
 0x2e4   :  { %2956 = vmatpush.bf16.xpose.msrb.mxu0 %v4584_v42  ;;  %v4671_v42 = vld [vmem:[%s7588_s0 + $0xc08] sm:$0xf] }
 0x2e5   :  { %2969 = vmatpush.bf16.xpose.msrb.mxu1 %v4588_v44  ;;  %2982 = vmatpush.bf16.xpose.msrb.mxu2 %v4592_v45  ;;  %v5080_v44 = vld [vmem:[%s7588_s0 + $0xc14] sm:$0xf0]  ;;  %v4663_v45 = vld [vmem:[%s7588_s0 + $0xc00] sm:$0xf] }
 0x2e6   :  { %2995 = vmatpush.bf16.xpose.msrb.mxu3 %v4596_v7  ;;  %v5079_v7 = vld [vmem:[%s7588_s0 + $0xc0c] sm:$0xf0]  ;;  %v4672_v57 = vor.u32 %v5080_v44, %v4671_v42 }
 0x2e7   :  { %v4664_v51 = vor.u32 %v5079_v7, %v4663_v45 }
 0x2ec   :  { %2957 = vmatpush.bf16.xpose.msrb.mxu0 %v4568_v62 }
 0x2ed   :  { %2970 = vmatpush.bf16.xpose.msrb.mxu1 %v4572_v63  ;;  %2983 = vmatpush.bf16.xpose.msrb.mxu2 %v4576_v0 }
 0x2ee   :  { %2996 = vmatpush.bf16.xpose.msrb.mxu3 %v4580_v1 }
 0x2f4   :  { %2958 = vmatpush.bf16.xpose.msrb.mxu0 %v4552_v16 }
 0x2f5   :  { %2971 = vmatpush.bf16.xpose.msrb.mxu1 %v4556_v17  ;;  %2984 = vmatpush.bf16.xpose.msrb.mxu2 %v4560_v48 }
 0x2f6   :  { %2997 = vmatpush.bf16.xpose.msrb.mxu3 %v4564_v18 }
 0x2fc   :  { %2959 = vmatpush.bf16.xpose.msrb.mxu0 %v4536_v29 }
 0x2fd   :  { %2972 = vmatpush.bf16.xpose.msrb.mxu1 %v4540_v33  ;;  %2985 = vmatpush.bf16.xpose.msrb.mxu2 %v4544_v34 }
 0x2fe   :  { %2998 = vmatpush.bf16.xpose.msrb.mxu3 %v4548_v37 }
 0x300   :  { %v2857_v53 = vpop.f32.mrf.mxu0 }
 0x303   :  { %2960 = vmatmul.bf16.vlgmr.msrb.gmra.mxu0 %v5426_v21  ;;  %v2870_v56 = vpop.f32.mrf.mxu1 }
 0x304   :  { %3010 = vmatpush.bf16.xpose.msra.mxu0 %v4680_v39  ;;  %2973 = vmatmul.bf16.vlgmr.msrb.gmra.mxu1 %v5428_v22  ;;  %v2871_v58 = vadd.f32 %v2870_v56, %v2857_v53 }
 0x305   :  { %3036 = vmatpush.bf16.xpose.msra.mxu2 %v4688_v38  ;;  %3023 = vmatpush.bf16.xpose.msra.mxu1 %v4684_v40 }
 0x306   :  { %3049 = vmatpush.bf16.xpose.msra.mxu3 %v4692_v41  ;;  %2986 = vmatmul.bf16.vlgmr.msrb.gmra.mxu2 %v5393_v5  ;;  %v3116_v41 = vlaneseq }
 0x307   :  { %2999 = vmatmul.bf16.vlgmr.msrb.gmra.mxu3 %v5405_v11  ;;  %v2883_v59 = vpop.f32.mrf.mxu2 }
 0x308   :  { %v2884_v61 = vadd.f32 %v2883_v59, %v2871_v58  ;;  %v2859_v63 = vpop.f32.mrf.mxu0  ;;  %vm3118_vm9 = vcmp.lt.s32.totalorder %v3116_v41, 544 }
 0x30a   :  { %v2896_v62 = vpop.f32.mrf.mxu3 }
 0x30b   :  { %v2872_v0 = vpop.f32.mrf.mxu1  ;;  %v2897_v1 = vadd.f32 %v2896_v62, %v2884_v61 }
 0x30c   :  { %3011 = vmatpush.bf16.xpose.msra.mxu0 %v4664_v51 }
 0x30d   :  { %3037 = vmatpush.bf16.xpose.msra.mxu2 %v4672_v57  ;;  %3024 = vmatpush.bf16.xpose.msra.mxu1 %v4668_v3  ;;  %5101 = vtanh.f32 %v2897_v1 }
 0x30e   :  { %3050 = vmatpush.bf16.xpose.msra.mxu3 %v4676_v52  ;;  %5103 = vtanh.f32 %v7476_v31 }
 0x30f   :  { %v2885_v2 = vpop.f32.mrf.mxu2 }
 0x312   :  { %v2898_v4 = vpop.f32.mrf.mxu3 }
 0x313   :  { %3012 = vmatmul.bf16.vlgmr.msra.gmra.mxu0 %v5426_v21  ;;  %v5102_v6 = vpop.eup %5101 }
 0x314   :  { %3025 = vmatmul.bf16.vlgmr.msra.gmra.mxu1 %v5428_v22  ;;  %v3089_v8 = vrot.slane %v5102_v6, 7  ;;  %v5104_v21 = vpop.eup %5103 }
 0x316   :  { %3038 = vmatmul.bf16.vlgmr.msra.gmra.mxu2 %v5393_v5  ;;  %v3107_v9 = vsel %vm3093_vm0, %v5104_v21, %v3089_v8 }
 0x317   :  { %3051 = vmatmul.bf16.vlgmr.msra.gmra.mxu3 %v5405_v11 }
 0x340   :  { %v2909_v22 = vpop.f32.mrf.mxu0 }
 0x343   :  { %v2922_v10 = vpop.f32.mrf.mxu1 }
 0x344   :  { %v2923_v5 = vadd.f32 %v2922_v10, %v2909_v22 }
 0x347   :  { %v2935_v12 = vpop.f32.mrf.mxu2 }
 0x348   :  { %v2936_v13 = vadd.f32 %v2935_v12, %v2923_v5  ;;  %v2911_v15 = vpop.f32.mrf.mxu0 }
 0x34a   :  { %v2948_v14 = vpop.f32.mrf.mxu3 }
 0x34b   :  { %v2924_v11 = vpop.f32.mrf.mxu1  ;;  %v2949_v16 = vadd.f32 %v2948_v14, %v2936_v13 }
 0x34d   :  { %5105 = vtanh.f32 %v2949_v16 }
 0x34f   :  { %v2937_v17 = vpop.f32.mrf.mxu2 }
 0x352   :  { %v2950_v48 = vpop.f32.mrf.mxu3 }
 0x353   :  { %v5106_v31 = vpop.eup %5105 }
 0x354   :  { %v3090_v18 = vrot.slane %v5106_v31, 6 }
 0x356   :  { %v3108_v19 = vsel %vm3097_vm2, %v3107_v9, %v3090_v18 }
 0x380   :  { %v2961_v20 = vpop.f32.mrf.mxu0 }
 0x381   :  { %v2974_v23 = vpop.f32.mrf.mxu1 }
 0x382   :  { %v2975_v27 = vadd.f32 %v2974_v23, %v2961_v20 }
 0x388   :  { %v2963_v25 = vpop.f32.mrf.mxu0 }
 0x389   :  { %v2987_v43 = vpop.f32.mrf.mxu2  ;;  %v2976_v26 = vpop.f32.mrf.mxu1 }
 0x38a   :  { %v3000_v24 = vpop.f32.mrf.mxu3  ;;  %v2988_v60 = vadd.f32 %v2987_v43, %v2975_v27 }
 0x38c   :  { %v3001_v32 = vadd.f32 %v3000_v24, %v2988_v60 }
 0x38e   :  { %5107 = vtanh.f32 %v3001_v32 }
 0x390   :  { %v3013_v28 = vpop.f32.mrf.mxu0 }
 0x391   :  { %v2989_v54 = vpop.f32.mrf.mxu2  ;;  %v3026_v29 = vpop.f32.mrf.mxu1 }
 0x392   :  { %v3002_v55 = vpop.f32.mrf.mxu3  ;;  %v3027_v30 = vadd.f32 %v3026_v29, %v3013_v28 }
 0x394   :  { %v5108_v40 = vpop.eup %5107 }
 0x395   :  { %v3091_v45 = vrot.slane %v5108_v40, 5 }
 0x398   :  { %v3015_v36 = vpop.f32.mrf.mxu0 }
 0x399   :  { %v3039_v33 = vpop.f32.mrf.mxu2  ;;  %v3028_v37 = vpop.f32.mrf.mxu1 }
 0x39a   :  { %v3040_v34 = vadd.f32 %v3039_v33, %v3027_v30  ;;  %v3052_v35 = vpop.f32.mrf.mxu3 }
 0x39c   :  { %v3053_v38 = vadd.f32 %v3052_v35, %v3040_v34 }
 0x39e   :  { %5109 = vtanh.f32 %v3053_v38 }
 0x3a1   :  { %v3041_v39 = vpop.f32.mrf.mxu2 }
 0x3a2   :  { %v3054_v42 = vpop.f32.mrf.mxu3 }
 0x3a4   :  { %v5110_v44 = vpop.eup %5109 }
 0x3a5   :  { %v3092_v7 = vrot.slane %v5110_v44, 4 }
 0x3a7   :  { %v3110_v46 = vsel %vm3109_vm7, %v3091_v45, %v3092_v7 }
 0x3a8   :  { %v3112_v47 = vsel %vm3111_vm8, %v3108_v19, %v3110_v46 }
 0x3a9   :  { %3120 = vst.msk [vmem:[%s7590_s2 + $0x8] sm:$0x1f] %vm3118_vm9, %v3112_v47 }

</bundles_post_ra>
